<compile_context>
chip_gen: v5e
topology: v5e:2x2
jax: 0.10.0
libtpu: 0.0.40
codegen_flags: <defaults>
</compile_context>

<pallas_src>
import functools

import jax
import jax.numpy as jnp
import numpy as np
from jax.experimental import pallas as pl
from jax.experimental.pallas import tpu as pltpu

LN_EPS = 1e-5          # torch.nn.LayerNorm default eps
NEG_INF = -1e30        # stand-in for float('-inf'); exp() underflows to exactly 0


# ----------------------------------------------------------------------------- helpers
def _gelu_tanh(x):
    # tanh approximation of GELU (used in kernel AND reference).
    c = 0.7978845608028654  # sqrt(2/pi)
    return 0.5 * x * (1.0 + jnp.tanh(c * (x + 0.044715 * x * x * x)))


def _relative_indices(ws):
    idx = np.array([[i, j] for i in range(ws) for j in range(ws)], dtype=np.int32)
    rel = idx[None, :, :] - idx[:, None, :] + (ws - 1)       # (T, T, 2)
    return rel


def _create_mask_np(ws, disp, upper_lower, left_right):
    m = np.zeros((ws * ws, ws * ws), dtype=np.float32)
    if upper_lower:
        m[-disp * ws:, :-disp * ws] = NEG_INF
        m[:-disp * ws, -disp * ws:] = NEG_INF
    if left_right:
        m = m.reshape(ws, ws, ws, ws)
        m[:, -disp:, :, :-disp] = NEG_INF
        m[:, :-disp, :, -disp:] = NEG_INF
        m = m.reshape(ws * ws, ws * ws)
    return m


def _window_partition(x, ws):
    B, H, W, D = x.shape
    x = x.reshape(B, H // ws, ws, W // ws, ws, D)
    x = x.transpose(0, 1, 3, 2, 4, 5)                        # B, nw_h, nw_w, ws, ws, D
    return x.reshape(B * (H // ws) * (W // ws), ws * ws, D)


def _window_merge(xw, B, H, W, D, ws):
    x = xw.reshape(B, H // ws, W // ws, ws, ws, D)
    x = x.transpose(0, 1, 3, 2, 4, 5)                        # B, nw_h, ws, nw_w, ws, D
    return x.reshape(B, H, W, D)


def _pick_row_tile(M):
    for cand in (1024, 512, 256, 128, 64, 32, 16, 8):
        if M % cand == 0:
            return cand
    return M


# ----------------------------------------------------------------------------- kernels
def _attn_block_kernel(x_ref, bias_ref, g_ref, beta_ref, wqkv_ref, wout_ref,
                       bo_ref, o_ref, *, heads, head_dim, scale):
    """Residual(PreNorm(WindowAttention)) for one batch element's windows."""
    nw, t, d = x_ref.shape
    inner = heads * head_dim

    x = x_ref[...].astype(jnp.float32)                       # (nw, t, d)

    # --- LayerNorm over channels (f32 statistics, biased variance) ---
    mu = jnp.mean(x, axis=-1, keepdims=True)
    xc = x - mu
    var = jnp.mean(xc * xc, axis=-1, keepdims=True)
    y = xc * jax.lax.rsqrt(var + LN_EPS) * g_ref[...] + beta_ref[...]

    # --- QKV projection (bf16 operands, f32 accumulation on the MXU) ---
    y2 = y.reshape(nw * t, d).astype(jnp.bfloat16)
    qkv = jnp.dot(y2, wqkv_ref[...], preferred_element_type=jnp.float32)
    qkv = qkv.reshape(nw, t, 3 * inner)

    bias = bias_ref[...]                                     # (nw, t, t) rel-pos + shift masks
    wout = wout_ref[...]                                     # (inner, d) bf16

    acc = jnp.zeros((nw * t, d), jnp.float32)
    for h in range(heads):
        q = qkv[:, :, h * head_dim:(h + 1) * head_dim].astype(jnp.bfloat16)
        k = qkv[:, :, inner + h * head_dim: inner + (h + 1) * head_dim].astype(jnp.bfloat16)
        v = qkv[:, :, 2 * inner + h * head_dim: 2 * inner + (h + 1) * head_dim].astype(jnp.bfloat16)

        dots = jnp.einsum('wid,wjd->wij', q, k,
                          preferred_element_type=jnp.float32) * scale + bias
        m = jnp.max(dots, axis=-1, keepdims=True)
        p = jnp.exp(dots - m)
        p = p / jnp.sum(p, axis=-1, keepdims=True)

        oh = jnp.einsum('wij,wjd->wid', p.astype(jnp.bfloat16), v,
                        preferred_element_type=jnp.float32)  # (nw, t, head_dim)
        # per-head slice of the output projection == concat-heads-then-project
        acc = acc + jnp.dot(oh.reshape(nw * t, head_dim).astype(jnp.bfloat16),
                            wout[h * head_dim:(h + 1) * head_dim, :],
                            preferred_element_type=jnp.float32)

    out = (acc + bo_ref[...]).reshape(nw, t, d) + x          # residual add
    o_ref[...] = out.astype(o_ref.dtype)


def _mlp_block_kernel(x_ref, g_ref, beta_ref, w1_ref, b1_ref, w2_ref, b2_ref, o_ref):
    """Residual(PreNorm(FeedForward)) on a (tm, D) tile of tokens."""
    x = x_ref[...].astype(jnp.float32)
    mu = jnp.mean(x, axis=-1, keepdims=True)
    xc = x - mu
    var = jnp.mean(xc * xc, axis=-1, keepdims=True)
    y = xc * jax.lax.rsqrt(var + LN_EPS) * g_ref[...] + beta_ref[...]

    h = jnp.dot(y.astype(jnp.bfloat16), w1_ref[...],
                preferred_element_type=jnp.float32) + b1_ref[...]
    h = _gelu_tanh(h)
    out = jnp.dot(h.astype(jnp.bfloat16), w2_ref[...],
                  preferred_element_type=jnp.float32) + b2_ref[...]
    o_ref[...] = (out + x).astype(o_ref.dtype)               # residual add


# ----------------------------------------------------------------------------- wrapper
def swin_block_forward(x, params, *, heads, head_dim, window_size, shifted,
                       relative_pos_embedding=True):
    B, H, W, D = x.shape
    ws = window_size
    assert H % ws == 0 and W % ws == 0
    nw_h, nw_w = H // ws, W // ws
    NW, T = nw_h * nw_w, ws * ws
    inner = heads * head_dim
    disp = ws // 2 if shifted else 0
    scale = float(head_dim) ** -0.5
    f32, bf16 = jnp.float32, jnp.bfloat16

    # ---- per-window additive attention bias: relative-pos bias + shift masks ----
    if relative_pos_embedding:
        rel = _relative_indices(ws)
        pos_bias = params["pos_embedding"][rel[..., 0], rel[..., 1]]     # (T, T)
    else:
        pos_bias = params["pos_embedding"]                               # (T, T)
    masks = np.zeros((NW, T, T), np.float32)
    if shifted:
        ul = _create_mask_np(ws, disp, True, False)
        lr = _create_mask_np(ws, disp, False, True)
        for w in range(NW):
            if w // nw_w == nw_h - 1:    # bottom row of windows
                masks[w] += ul
            if w % nw_w == nw_w - 1:     # rightmost column of windows
                masks[w] += lr
    attn_bias = pos_bias[None].astype(f32) + jnp.asarray(masks)          # (NW, T, T)

    # ---- attention block: Residual(PreNorm(WindowAttention)) ----
    xs = jnp.roll(x, (-disp, -disp), axis=(1, 2)) if shifted else x
    xw = _window_partition(xs, ws)                                       # (B*NW, T, D)

    wqkv_t = params["w_qkv"].T.astype(bf16)                              # (D, 3*inner)
    wout_t = params["w_out"].T.astype(bf16)                              # (inner, D)
    b_out = params["b_out"].reshape(1, D).astype(f32)
    g1 = params["ln1_g"].reshape(1, D).astype(f32)
    be1 = params["ln1_b"].reshape(1, D).astype(f32)

    attn_cost = pl.CostEstimate(
        flops=(2 * B * NW * T * D * 3 * inner
               + 2 * 2 * B * NW * heads * T * T * head_dim
               + 2 * B * NW * T * inner * D),
        transcendentals=B * NW * heads * T * T + B * NW * T,
        bytes_accessed=(2 * xw.size * 4 + attn_bias.size * 4
                        + (wqkv_t.size + wout_t.size) * 2),
    )

    attn_kernel = functools.partial(_attn_block_kernel,
                                    heads=heads, head_dim=head_dim, scale=scale)
    yw = pl.pallas_call(
        attn_kernel,
        out_shape=jax.ShapeDtypeStruct((B * NW, T, D), x.dtype),
        grid_spec=pltpu.PrefetchScalarGridSpec(
            num_scalar_prefetch=0,
            grid=(B,),
            in_specs=[
                pl.BlockSpec((NW, T, D), lambda b: (b, 0, 0)),           # windows of batch b
                pl.BlockSpec((NW, T, T), lambda b: (0, 0, 0)),           # per-window bias
                pl.BlockSpec((1, D), lambda b: (0, 0)),                  # ln1 gamma
                pl.BlockSpec((1, D), lambda b: (0, 0)),                  # ln1 beta
                pl.BlockSpec((D, 3 * inner), lambda b: (0, 0)),          # W_qkv^T (bf16)
                pl.BlockSpec((inner, D), lambda b: (0, 0)),              # W_out^T (bf16)
                pl.BlockSpec((1, D), lambda b: (0, 0)),                  # b_out
            ],
            out_specs=pl.BlockSpec((NW, T, D), lambda b: (b, 0, 0)),
        ),
        compiler_params=pltpu.CompilerParams(dimension_semantics=("parallel",)),
        cost_estimate=attn_cost,
    )(xw, attn_bias, g1, be1, wqkv_t, wout_t, b_out)

    y = _window_merge(yw, B, H, W, D, ws)
    x = jnp.roll(y, (disp, disp), axis=(1, 2)) if shifted else y         # residual already inside kernel

    # ---- MLP block: Residual(PreNorm(FeedForward)) ----
    M = B * H * W
    Dh = params["w1"].shape[0]
    x2 = x.reshape(M, D)
    tm = _pick_row_tile(M)                                               # large row tile

    g2 = params["ln2_g"].reshape(1, D).astype(f32)
    be2 = params["ln2_b"].reshape(1, D).astype(f32)
    w1_t = params["w1"].T.astype(bf16)                                   # (D, Dh)
    b1 = params["b1"].reshape(1, Dh).astype(f32)
    w2_t = params["w2"].T.astype(bf16)                                   # (Dh, D)
    b2 = params["b2"].reshape(1, D).astype(f32)

    mlp_cost = pl.CostEstimate(
        flops=2 * 2 * M * D * Dh,
        transcendentals=M * Dh + M,
        bytes_accessed=2 * M * D * 4 + (w1_t.size + w2_t.size) * 2,
    )

    out2 = pl.pallas_call(
        _mlp_block_kernel,
        out_shape=jax.ShapeDtypeStruct((M, D), x.dtype),
        grid_spec=pltpu.PrefetchScalarGridSpec(
            num_scalar_prefetch=0,
            grid=(M // tm,),
            in_specs=[
                pl.BlockSpec((tm, D), lambda i: (i, 0)),
                pl.BlockSpec((1, D), lambda i: (0, 0)),
                pl.BlockSpec((1, D), lambda i: (0, 0)),
                pl.BlockSpec((D, Dh), lambda i: (0, 0)),
                pl.BlockSpec((1, Dh), lambda i: (0, 0)),
                pl.BlockSpec((Dh, D), lambda i: (0, 0)),
                pl.BlockSpec((1, D), lambda i: (0, 0)),
            ],
            out_specs=pl.BlockSpec((tm, D), lambda i: (i, 0)),
        ),
        compiler_params=pltpu.CompilerParams(dimension_semantics=("parallel",)),
        cost_estimate=mlp_cost,
    )(x2, g2, be2, w1_t, b1, w2_t, b2)

    return out2.reshape(B, H, W, D)


# ----------------------------------------------------------------------------- reference
def swin_block_ref(x, params, *, heads, head_dim, window_size, shifted,
                   relative_pos_embedding=True):
    """Pure-JAX reference written in the PyTorch module's structure, mirroring the
    kernel's precision policy (bf16 GEMM operands, f32 accumulation, tanh-GELU)."""
    B, H, W, D = x.shape
    ws = window_size
    nw_h, nw_w = H // ws, W // ws
    T = ws * ws
    inner = heads * head_dim
    disp = ws // 2 if shifted else 0
    scale = float(head_dim) ** -0.5
    f32, bf16 = jnp.float32, jnp.bfloat16

    def ln(t, g, b):
        tf = t.astype(f32)
        mu = jnp.mean(tf, axis=-1, keepdims=True)
        var = jnp.mean((tf - mu) ** 2, axis=-1, keepdims=True)
        return (tf - mu) * jax.lax.rsqrt(var + LN_EPS) * g + b

    # --- Residual(PreNorm(WindowAttention)) ---
    y = ln(x, params["ln1_g"], params["ln1_b"])
    if shifted:
        y = jnp.roll(y, (-disp, -disp), axis=(1, 2))
    qkv = jnp.einsum("bhwd,ed->bhwe", y.astype(bf16), params["w_qkv"].astype(bf16),
                     preferred_element_type=f32)
    q, k, v = jnp.split(qkv, 3, axis=-1)

    def to_windows(t):
        t = t.reshape(B, nw_h, ws, nw_w, ws, heads, head_dim)
        t = t.transpose(0, 5, 1, 3, 2, 4, 6)
        return t.reshape(B, heads, nw_h * nw_w, T, head_dim)

    q, k, v = map(to_windows, (q, k, v))
    dots = jnp.einsum("bhwid,bhwjd->bhwij", q.astype(bf16), k.astype(bf16),
                      preferred_element_type=f32) * scale
    if relative_pos_embedding:
        rel = _relative_indices(ws)
        dots = dots + params["pos_embedding"][rel[..., 0], rel[..., 1]]
    else:
        dots = dots + params["pos_embedding"]
    if shifted:
        ul = jnp.asarray(_create_mask_np(ws, disp, True, False))
        lr = jnp.asarray(_create_mask_np(ws, disp, False, True))
        dots = dots.at[:, :, -nw_w:].add(ul)
        dots = dots.at[:, :, nw_w - 1::nw_w].add(lr)
    attn = jax.nn.softmax(dots, axis=-1)
    out = jnp.einsum("bhwij,bhwjd->bhwid", attn.astype(bf16), v.astype(bf16),
                     preferred_element_type=f32)
    out = out.reshape(B, heads, nw_h, nw_w, ws, ws, head_dim)
    out = out.transpose(0, 2, 4, 3, 5, 1, 6).reshape(B, H, W, inner)
    out = jnp.einsum("bhwe,de->bhwd", out.astype(bf16), params["w_out"].astype(bf16),
                     preferred_element_type=f32) + params["b_out"]
    if shifted:
        out = jnp.roll(out, (disp, disp), axis=(1, 2))
    x = x + out.astype(x.dtype)

    # --- Residual(PreNorm(FeedForward)) ---  (dropout = identity at inference)
    y = ln(x, params["ln2_g"], params["ln2_b"])
    h = jnp.einsum("bhwd,ed->bhwe", y.astype(bf16), params["w1"].astype(bf16),
                   preferred_element_type=f32) + params["b1"]
    h = _gelu_tanh(h)
    o = jnp.einsum("bhwe,de->bhwd", h.astype(bf16), params["w2"].astype(bf16),
                   preferred_element_type=f32) + params["b2"]
    return x + o.astype(x.dtype)


# ----------------------------------------------------------------------------- demo
if __name__ == "__main__":
    B, H, W = 2, 16, 16
    dim, heads, head_dim, mlp_dim, ws = 32, 2, 16, 64, 4
    inner = heads * head_dim
    shifted, rel_pos = True, True

    key = jax.random.PRNGKey(0)
    keys = jax.random.split(key, 12)
    f32 = jnp.float32

    x = jax.random.normal(keys[0], (B, H, W, dim), f32)

    params = {
        "ln1_g": 1.0 + 0.1 * jax.random.normal(keys[1], (dim,), f32),
        "ln1_b": 0.05 * jax.random.normal(keys[2], (dim,), f32),
        "w_qkv": jax.random.normal(keys[3], (3 * inner, dim), f32) * (dim ** -0.5),
        "w_out": jax.random.normal(keys[4], (dim, inner), f32) * (inner ** -0.5),
        "b_out": 0.02 * jax.random.normal(keys[5], (dim,), f32),
        "pos_embedding": jax.random.normal(keys[6], (2 * ws - 1, 2 * ws - 1), f32),
        "ln2_g": 1.0 + 0.1 * jax.random.normal(keys[7], (dim,), f32),
        "ln2_b": 0.05 * jax.random.normal(keys[8], (dim,), f32),
        "w1": jax.random.normal(keys[9], (mlp_dim, dim), f32) * (dim ** -0.5),
        "b1": 0.02 * jax.random.normal(keys[10], (mlp_dim,), f32),
        "w2": jax.random.normal(keys[11], (dim, mlp_dim), f32) * (mlp_dim ** -0.5),
        "b2": jnp.zeros((dim,), f32),
    }

    fwd = jax.jit(functools.partial(
        swin_block_forward, heads=heads, head_dim=head_dim, window_size=ws,
        shifted=shifted, relative_pos_embedding=rel_pos))

    out = jax.block_until_ready(fwd(x, params))
    ref = jax.block_until_ready(swin_block_ref(
        x, params, heads=heads, head_dim=head_dim, window_size=ws,
        shifted=shifted, relative_pos_embedding=rel_pos))

    assert out.shape == (B, H, W, dim)
    assert jnp.allclose(out, ref, atol=1e-2, rtol=1e-2), \
        f"max abs err = {float(jnp.max(jnp.abs(out - ref)))}"

    print("KERNEL_OK")
</pallas_src>

<mosaic_0001>
module attributes {stable_mosaic.version = 11 : i64} {
  func.func @_attn_block_kernel(%arg0: i32, %arg1: memref<16x16x32xf32, #tpu.memory_space<vmem>>, %arg2: memref<16x16x16xf32, #tpu.memory_space<vmem>>, %arg3: memref<1x32xf32, #tpu.memory_space<vmem>>, %arg4: memref<1x32xf32, #tpu.memory_space<vmem>>, %arg5: memref<32x96xbf16, #tpu.memory_space<vmem>>, %arg6: memref<32x32xbf16, #tpu.memory_space<vmem>>, %arg7: memref<1x32xf32, #tpu.memory_space<vmem>>, %arg8: memref<16x16x32xf32, #tpu.memory_space<vmem>>) attributes {dimension_semantics = [#tpu.dimension_semantics<parallel>], iteration_bounds = array<i64: 2>, scalar_prefetch = 0 : i64, scratch_operands = 0 : i64, tpu.core_type = #tpu.core_type<tc>, window_params = [{transform_indices = @transform_0, window_bounds = array<i64: 16, 16, 32>}, {pipeline_mode = #tpu.pipeline_mode<synchronous>, transform_indices = @transform_1, window_bounds = array<i64: 16, 16, 16>}, {pipeline_mode = #tpu.pipeline_mode<synchronous>, transform_indices = @transform_2, window_bounds = array<i64: 1, 32>}, {pipeline_mode = #tpu.pipeline_mode<synchronous>, transform_indices = @transform_3, window_bounds = array<i64: 1, 32>}, {pipeline_mode = #tpu.pipeline_mode<synchronous>, transform_indices = @transform_4, window_bounds = array<i64: 32, 96>}, {pipeline_mode = #tpu.pipeline_mode<synchronous>, transform_indices = @transform_5, window_bounds = array<i64: 32, 32>}, {pipeline_mode = #tpu.pipeline_mode<synchronous>, transform_indices = @transform_6, window_bounds = array<i64: 1, 32>}, {transform_indices = @transform_7, window_bounds = array<i64: 16, 16, 32>}]} {
    %c0 = arith.constant 0 : index
    %c0_0 = arith.constant 0 : index
    %c0_1 = arith.constant 0 : index
    %0 = vector.load %arg1[%c0, %c0_0, %c0_1] : memref<16x16x32xf32, #tpu.memory_space<vmem>>, vector<16x16x32xf32>
    %cst = arith.constant dense<0.000000e+00> : vector<16x16xf32>
    %1 = vector.multi_reduction <add>, %0, %cst [2] : vector<16x16x32xf32> to vector<16x16xf32>
    %2 = vector.shape_cast %1 : vector<16x16xf32> to vector<16x16x1xf32>
    %cst_2 = arith.constant 3.200000e+01 : f32
    %3 = vector.broadcast %cst_2 : f32 to vector<16x16x1xf32>
    %4 = arith.divf %2, %3 : vector<16x16x1xf32>
    %5 = vector.broadcast %4 : vector<16x16x1xf32> to vector<16x16x32xf32>
    %6 = arith.subf %0, %5 : vector<16x16x32xf32>
    %7 = arith.mulf %6, %6 : vector<16x16x32xf32>
    %cst_3 = arith.constant dense<0.000000e+00> : vector<16x16xf32>
    %8 = vector.multi_reduction <add>, %7, %cst_3 [2] : vector<16x16x32xf32> to vector<16x16xf32>
    %9 = vector.shape_cast %8 : vector<16x16xf32> to vector<16x16x1xf32>
    %cst_4 = arith.constant 3.200000e+01 : f32
    %10 = vector.broadcast %cst_4 : f32 to vector<16x16x1xf32>
    %11 = arith.divf %9, %10 : vector<16x16x1xf32>
    %cst_5 = arith.constant 9.99999974E-6 : f32
    %12 = vector.broadcast %cst_5 : f32 to vector<16x16x1xf32>
    %13 = arith.addf %11, %12 : vector<16x16x1xf32>
    %14 = math.rsqrt %13 : vector<16x16x1xf32>
    %15 = vector.broadcast %14 : vector<16x16x1xf32> to vector<16x16x32xf32>
    %16 = arith.mulf %6, %15 : vector<16x16x32xf32>
    %c0_6 = arith.constant 0 : index
    %c0_7 = arith.constant 0 : index
    %17 = vector.load %arg3[%c0_6, %c0_7] : memref<1x32xf32, #tpu.memory_space<vmem>>, vector<1x32xf32>
    %18 = vector.shape_cast %17 : vector<1x32xf32> to vector<1x1x32xf32>
    %19 = vector.broadcast %18 : vector<1x1x32xf32> to vector<16x16x32xf32>
    %20 = arith.mulf %16, %19 : vector<16x16x32xf32>
    %c0_8 = arith.constant 0 : index
    %c0_9 = arith.constant 0 : index
    %21 = vector.load %arg4[%c0_8, %c0_9] : memref<1x32xf32, #tpu.memory_space<vmem>>, vector<1x32xf32>
    %22 = vector.shape_cast %21 : vector<1x32xf32> to vector<1x1x32xf32>
    %23 = vector.broadcast %22 : vector<1x1x32xf32> to vector<16x16x32xf32>
    %24 = arith.addf %20, %23 : vector<16x16x32xf32>
    %25 = vector.shape_cast %24 : vector<16x16x32xf32> to vector<256x32xf32>
    %26 = arith.truncf %25 : vector<256x32xf32> to vector<256x32xbf16>
    %c0_10 = arith.constant 0 : index
    %c0_11 = arith.constant 0 : index
    %27 = vector.load %arg5[%c0_10, %c0_11] : memref<32x96xbf16, #tpu.memory_space<vmem>>, vector<32x96xbf16>
    %cst_12 = arith.constant dense<0.000000e+00> : vector<256x96xf32>
    %28 = tpu.matmul %26, %27, %cst_12 {dimension_numbers = #tpu.dot_dimension_numbers<[1], [0], [0], [1], [0, 0, 1, 1], [], []>} : vector<256x32xbf16>, vector<32x96xbf16>, vector<256x96xf32> -> vector<256x96xf32>
    %29 = vector.shape_cast %28 : vector<256x96xf32> to vector<16x16x96xf32>
    %c0_13 = arith.constant 0 : index
    %c0_14 = arith.constant 0 : index
    %c0_15 = arith.constant 0 : index
    %30 = vector.load %arg2[%c0_13, %c0_14, %c0_15] : memref<16x16x16xf32, #tpu.memory_space<vmem>>, vector<16x16x16xf32>
    %c0_16 = arith.constant 0 : index
    %c0_17 = arith.constant 0 : index
    %31 = vector.load %arg6[%c0_16, %c0_17] : memref<32x32xbf16, #tpu.memory_space<vmem>>, vector<32x32xbf16>
    %cst_18 = arith.constant 0.000000e+00 : f32
    %32 = vector.broadcast %cst_18 : f32 to vector<256x32xf32>
    %33 = vector.extract_strided_slice %29 {offsets = [0, 0, 0], sizes = [16, 16, 16], strides = [1, 1, 1]} : vector<16x16x96xf32> to vector<16x16x16xf32>
    %34 = arith.truncf %33 : vector<16x16x16xf32> to vector<16x16x16xbf16>
    %35 = vector.extract_strided_slice %29 {offsets = [0, 0, 32], sizes = [16, 16, 16], strides = [1, 1, 1]} : vector<16x16x96xf32> to vector<16x16x16xf32>
    %36 = arith.truncf %35 : vector<16x16x16xf32> to vector<16x16x16xbf16>
    %37 = vector.extract_strided_slice %29 {offsets = [0, 0, 64], sizes = [16, 16, 16], strides = [1, 1, 1]} : vector<16x16x96xf32> to vector<16x16x16xf32>
    %38 = arith.truncf %37 : vector<16x16x16xf32> to vector<16x16x16xbf16>
    "tpu.trace_start"() <{level = 10 : i32, message = "wid,wjd->wij"}> : () -> ()
    %cst_19 = arith.constant dense<0.000000e+00> : vector<16x16x16xf32>
    %39 = tpu.matmul %34, %36, %cst_19 {dimension_numbers = #tpu.dot_dimension_numbers<[2], [2], [1], [1], [0, 0, 0, 1, 1, 1], [0], [0]>} : vector<16x16x16xbf16>, vector<16x16x16xbf16>, vector<16x16x16xf32> -> vector<16x16x16xf32>
    "tpu.trace_stop"() : () -> ()
    %cst_20 = arith.constant 2.500000e-01 : f32
    %40 = vector.broadcast %cst_20 : f32 to vector<16x16x16xf32>
    %41 = arith.mulf %39, %40 : vector<16x16x16xf32>
    %42 = arith.addf %41, %30 : vector<16x16x16xf32>
    %cst_21 = arith.constant dense<0xFF800000> : vector<16x16xf32>
    %43 = vector.multi_reduction <maximumf>, %42, %cst_21 [2] : vector<16x16x16xf32> to vector<16x16xf32>
    %44 = vector.shape_cast %43 : vector<16x16xf32> to vector<16x16x1xf32>
    %45 = vector.broadcast %44 : vector<16x16x1xf32> to vector<16x16x16xf32>
    %46 = arith.subf %42, %45 : vector<16x16x16xf32>
    %47 = math.exp %46 : vector<16x16x16xf32>
    %cst_22 = arith.constant dense<0.000000e+00> : vector<16x16xf32>
    %48 = vector.multi_reduction <add>, %47, %cst_22 [2] : vector<16x16x16xf32> to vector<16x16xf32>
    %49 = vector.shape_cast %48 : vector<16x16xf32> to vector<16x16x1xf32>
    %50 = vector.broadcast %49 : vector<16x16x1xf32> to vector<16x16x16xf32>
    %51 = arith.divf %47, %50 : vector<16x16x16xf32>
    %52 = arith.truncf %51 : vector<16x16x16xf32> to vector<16x16x16xbf16>
    "tpu.trace_start"() <{level = 10 : i32, message = "wij,wjd->wid"}> : () -> ()
    %cst_23 = arith.constant dense<0.000000e+00> : vector<16x16x16xf32>
    %53 = tpu.matmul %52, %38, %cst_23 {dimension_numbers = #tpu.dot_dimension_numbers<[2], [1], [1], [2], [0, 0, 0, 1, 1, 2], [0], [0]>} : vector<16x16x16xbf16>, vector<16x16x16xbf16>, vector<16x16x16xf32> -> vector<16x16x16xf32>
    "tpu.trace_stop"() : () -> ()
    %54 = vector.shape_cast %53 : vector<16x16x16xf32> to vector<256x16xf32>
    %55 = arith.truncf %54 : vector<256x16xf32> to vector<256x16xbf16>
    %56 = vector.extract_strided_slice %31 {offsets = [0, 0], sizes = [16, 32], strides = [1, 1]} : vector<32x32xbf16> to vector<16x32xbf16>
    %cst_24 = arith.constant dense<0.000000e+00> : vector<256x32xf32>
    %57 = tpu.matmul %55, %56, %cst_24 {dimension_numbers = #tpu.dot_dimension_numbers<[1], [0], [0], [1], [0, 0, 1, 1], [], []>} : vector<256x16xbf16>, vector<16x32xbf16>, vector<256x32xf32> -> vector<256x32xf32>
    %58 = arith.addf %32, %57 : vector<256x32xf32>
    %59 = vector.extract_strided_slice %29 {offsets = [0, 0, 16], sizes = [16, 16, 16], strides = [1, 1, 1]} : vector<16x16x96xf32> to vector<16x16x16xf32>
    %60 = arith.truncf %59 : vector<16x16x16xf32> to vector<16x16x16xbf16>
    %61 = vector.extract_strided_slice %29 {offsets = [0, 0, 48], sizes = [16, 16, 16], strides = [1, 1, 1]} : vector<16x16x96xf32> to vector<16x16x16xf32>
    %62 = arith.truncf %61 : vector<16x16x16xf32> to vector<16x16x16xbf16>
    %63 = vector.extract_strided_slice %29 {offsets = [0, 0, 80], sizes = [16, 16, 16], strides = [1, 1, 1]} : vector<16x16x96xf32> to vector<16x16x16xf32>
    %64 = arith.truncf %63 : vector<16x16x16xf32> to vector<16x16x16xbf16>
    "tpu.trace_start"() <{level = 10 : i32, message = "wid,wjd->wij"}> : () -> ()
    %cst_25 = arith.constant dense<0.000000e+00> : vector<16x16x16xf32>
    %65 = tpu.matmul %60, %62, %cst_25 {dimension_numbers = #tpu.dot_dimension_numbers<[2], [2], [1], [1], [0, 0, 0, 1, 1, 1], [0], [0]>} : vector<16x16x16xbf16>, vector<16x16x16xbf16>, vector<16x16x16xf32> -> vector<16x16x16xf32>
    "tpu.trace_stop"() : () -> ()
    %cst_26 = arith.constant 2.500000e-01 : f32
    %66 = vector.broadcast %cst_26 : f32 to vector<16x16x16xf32>
    %67 = arith.mulf %65, %66 : vector<16x16x16xf32>
    %68 = arith.addf %67, %30 : vector<16x16x16xf32>
    %cst_27 = arith.constant dense<0xFF800000> : vector<16x16xf32>
    %69 = vector.multi_reduction <maximumf>, %68, %cst_27 [2] : vector<16x16x16xf32> to vector<16x16xf32>
    %70 = vector.shape_cast %69 : vector<16x16xf32> to vector<16x16x1xf32>
    %71 = vector.broadcast %70 : vector<16x16x1xf32> to vector<16x16x16xf32>
    %72 = arith.subf %68, %71 : vector<16x16x16xf32>
    %73 = math.exp %72 : vector<16x16x16xf32>
    %cst_28 = arith.constant dense<0.000000e+00> : vector<16x16xf32>
    %74 = vector.multi_reduction <add>, %73, %cst_28 [2] : vector<16x16x16xf32> to vector<16x16xf32>
    %75 = vector.shape_cast %74 : vector<16x16xf32> to vector<16x16x1xf32>
    %76 = vector.broadcast %75 : vector<16x16x1xf32> to vector<16x16x16xf32>
    %77 = arith.divf %73, %76 : vector<16x16x16xf32>
    %78 = arith.truncf %77 : vector<16x16x16xf32> to vector<16x16x16xbf16>
    "tpu.trace_start"() <{level = 10 : i32, message = "wij,wjd->wid"}> : () -> ()
    %cst_29 = arith.constant dense<0.000000e+00> : vector<16x16x16xf32>
    %79 = tpu.matmul %78, %64, %cst_29 {dimension_numbers = #tpu.dot_dimension_numbers<[2], [1], [1], [2], [0, 0, 0, 1, 1, 2], [0], [0]>} : vector<16x16x16xbf16>, vector<16x16x16xbf16>, vector<16x16x16xf32> -> vector<16x16x16xf32>
    "tpu.trace_stop"() : () -> ()
    %80 = vector.shape_cast %79 : vector<16x16x16xf32> to vector<256x16xf32>
    %81 = arith.truncf %80 : vector<256x16xf32> to vector<256x16xbf16>
    %82 = vector.extract_strided_slice %31 {offsets = [16, 0], sizes = [16, 32], strides = [1, 1]} : vector<32x32xbf16> to vector<16x32xbf16>
    %cst_30 = arith.constant dense<0.000000e+00> : vector<256x32xf32>
    %83 = tpu.matmul %81, %82, %cst_30 {dimension_numbers = #tpu.dot_dimension_numbers<[1], [0], [0], [1], [0, 0, 1, 1], [], []>} : vector<256x16xbf16>, vector<16x32xbf16>, vector<256x32xf32> -> vector<256x32xf32>
    %84 = arith.addf %58, %83 : vector<256x32xf32>
    %c0_31 = arith.constant 0 : index
    %c0_32 = arith.constant 0 : index
    %85 = vector.load %arg7[%c0_31, %c0_32] : memref<1x32xf32, #tpu.memory_space<vmem>>, vector<1x32xf32>
    %86 = vector.broadcast %85 : vector<1x32xf32> to vector<256x32xf32>
    %87 = arith.addf %84, %86 : vector<256x32xf32>
    %88 = vector.shape_cast %87 : vector<256x32xf32> to vector<16x16x32xf32>
    %89 = arith.addf %88, %0 : vector<16x16x32xf32>
    %c0_33 = arith.constant 0 : index
    %c0_34 = arith.constant 0 : index
    %c0_35 = arith.constant 0 : index
    %90 = vector.load %arg8[%c0_33, %c0_34, %c0_35] : memref<16x16x32xf32, #tpu.memory_space<vmem>>, vector<16x16x32xf32>
    tpu.vector_store %arg8[%c0_33, %c0_34, %c0_35], %89 {strides = array<i32>} : memref<16x16x32xf32, #tpu.memory_space<vmem>>, vector<16x16x32xf32>,
    return
  }
  func.func @transform_0(%arg0: i32) -> (i32, i32, i32) {
    %c0_i32 = arith.constant 0 : i32
    %c0_i32_0 = arith.constant 0 : i32
    %c0_i32_1 = arith.constant 0 : i32
    return %arg0, %c0_i32, %c0_i32_0 : i32, i32, i32
  }
  func.func @transform_1(%arg0: i32) -> (i32, i32, i32) {
    %c0_i32 = arith.constant 0 : i32
    %c0_i32_0 = arith.constant 0 : i32
    %c0_i32_1 = arith.constant 0 : i32
    %c0_i32_2 = arith.constant 0 : i32
    return %c0_i32, %c0_i32_0, %c0_i32_1 : i32, i32, i32
  }
  func.func @transform_2(%arg0: i32) -> (i32, i32) {
    %c0_i32 = arith.constant 0 : i32
    %c0_i32_0 = arith.constant 0 : i32
    %c0_i32_1 = arith.constant 0 : i32
    return %c0_i32, %c0_i32_0 : i32, i32
  }
  func.func @transform_3(%arg0: i32) -> (i32, i32) {
    %c0_i32 = arith.constant 0 : i32
    %c0_i32_0 = arith.constant 0 : i32
    %c0_i32_1 = arith.constant 0 : i32
    return %c0_i32, %c0_i32_0 : i32, i32
  }
  func.func @transform_4(%arg0: i32) -> (i32, i32) {
    %c0_i32 = arith.constant 0 : i32
    %c0_i32_0 = arith.constant 0 : i32
    %c0_i32_1 = arith.constant 0 : i32
    return %c0_i32, %c0_i32_0 : i32, i32
  }
  func.func @transform_5(%arg0: i32) -> (i32, i32) {
    %c0_i32 = arith.constant 0 : i32
    %c0_i32_0 = arith.constant 0 : i32
    %c0_i32_1 = arith.constant 0 : i32
    return %c0_i32, %c0_i32_0 : i32, i32
  }
  func.func @transform_6(%arg0: i32) -> (i32, i32) {
    %c0_i32 = arith.constant 0 : i32
    %c0_i32_0 = arith.constant 0 : i32
    %c0_i32_1 = arith.constant 0 : i32
    return %c0_i32, %c0_i32_0 : i32, i32
  }
  func.func @transform_7(%arg0: i32) -> (i32, i32, i32) {
    %c0_i32 = arith.constant 0 : i32
    %c0_i32_0 = arith.constant 0 : i32
    %c0_i32_1 = arith.constant 0 : i32
    return %arg0, %c0_i32, %c0_i32_0 : i32, i32, i32
  }
}

module attributes {stable_mosaic.version = 11 : i64} {
  func.func @_mlp_block_kernel(%arg0: i32, %arg1: memref<512x32xf32, #tpu.memory_space<vmem>>, %arg2: memref<1x32xf32, #tpu.memory_space<vmem>>, %arg3: memref<1x32xf32, #tpu.memory_space<vmem>>, %arg4: memref<32x64xbf16, #tpu.memory_space<vmem>>, %arg5: memref<1x64xf32, #tpu.memory_space<vmem>>, %arg6: memref<64x32xbf16, #tpu.memory_space<vmem>>, %arg7: memref<1x32xf32, #tpu.memory_space<vmem>>, %arg8: memref<512x32xf32, #tpu.memory_space<vmem>>) attributes {dimension_semantics = [#tpu.dimension_semantics<parallel>], iteration_bounds = array<i64: 1>, scalar_prefetch = 0 : i64, scratch_operands = 0 : i64, tpu.core_type = #tpu.core_type<tc>, window_params = [{transform_indices = @transform_0, window_bounds = array<i64: 512, 32>}, {pipeline_mode = #tpu.pipeline_mode<synchronous>, transform_indices = @transform_1, window_bounds = array<i64: 1, 32>}, {pipeline_mode = #tpu.pipeline_mode<synchronous>, transform_indices = @transform_2, window_bounds = array<i64: 1, 32>}, {pipeline_mode = #tpu.pipeline_mode<synchronous>, transform_indices = @transform_3, window_bounds = array<i64: 32, 64>}, {pipeline_mode = #tpu.pipeline_mode<synchronous>, transform_indices = @transform_4, window_bounds = array<i64: 1, 64>}, {pipeline_mode = #tpu.pipeline_mode<synchronous>, transform_indices = @transform_5, window_bounds = array<i64: 64, 32>}, {pipeline_mode = #tpu.pipeline_mode<synchronous>, transform_indices = @transform_6, window_bounds = array<i64: 1, 32>}, {transform_indices = @transform_7, window_bounds = array<i64: 512, 32>}]} {
    %c0 = arith.constant 0 : index
    %c0_0 = arith.constant 0 : index
    %0 = vector.load %arg1[%c0, %c0_0] : memref<512x32xf32, #tpu.memory_space<vmem>>, vector<512x32xf32>
    %cst = arith.constant dense<0.000000e+00> : vector<512xf32>
    %1 = vector.multi_reduction <add>, %0, %cst [1] : vector<512x32xf32> to vector<512xf32>
    %2 = vector.shape_cast %1 : vector<512xf32> to vector<512x1xf32>
    %cst_1 = arith.constant 3.200000e+01 : f32
    %3 = vector.broadcast %cst_1 : f32 to vector<512x1xf32>
    %4 = arith.divf %2, %3 : vector<512x1xf32>
    %5 = vector.broadcast %4 : vector<512x1xf32> to vector<512x32xf32>
    %6 = arith.subf %0, %5 : vector<512x32xf32>
    %7 = arith.mulf %6, %6 : vector<512x32xf32>
    %cst_2 = arith.constant dense<0.000000e+00> : vector<512xf32>
    %8 = vector.multi_reduction <add>, %7, %cst_2 [1] : vector<512x32xf32> to vector<512xf32>
    %9 = vector.shape_cast %8 : vector<512xf32> to vector<512x1xf32>
    %cst_3 = arith.constant 3.200000e+01 : f32
    %10 = vector.broadcast %cst_3 : f32 to vector<512x1xf32>
    %11 = arith.divf %9, %10 : vector<512x1xf32>
    %cst_4 = arith.constant 9.99999974E-6 : f32
    %12 = vector.broadcast %cst_4 : f32 to vector<512x1xf32>
    %13 = arith.addf %11, %12 : vector<512x1xf32>
    %14 = math.rsqrt %13 : vector<512x1xf32>
    %15 = vector.broadcast %14 : vector<512x1xf32> to vector<512x32xf32>
    %16 = arith.mulf %6, %15 : vector<512x32xf32>
    %c0_5 = arith.constant 0 : index
    %c0_6 = arith.constant 0 : index
    %17 = vector.load %arg2[%c0_5, %c0_6] : memref<1x32xf32, #tpu.memory_space<vmem>>, vector<1x32xf32>
    %18 = vector.broadcast %17 : vector<1x32xf32> to vector<512x32xf32>
    %19 = arith.mulf %16, %18 : vector<512x32xf32>
    %c0_7 = arith.constant 0 : index
    %c0_8 = arith.constant 0 : index
    %20 = vector.load %arg3[%c0_7, %c0_8] : memref<1x32xf32, #tpu.memory_space<vmem>>, vector<1x32xf32>
    %21 = vector.broadcast %20 : vector<1x32xf32> to vector<512x32xf32>
    %22 = arith.addf %19, %21 : vector<512x32xf32>
    %23 = arith.truncf %22 : vector<512x32xf32> to vector<512x32xbf16>
    %c0_9 = arith.constant 0 : index
    %c0_10 = arith.constant 0 : index
    %24 = vector.load %arg4[%c0_9, %c0_10] : memref<32x64xbf16, #tpu.memory_space<vmem>>, vector<32x64xbf16>
    %cst_11 = arith.constant dense<0.000000e+00> : vector<512x64xf32>
    %25 = tpu.matmul %23, %24, %cst_11 {dimension_numbers = #tpu.dot_dimension_numbers<[1], [0], [0], [1], [0, 0, 1, 1], [], []>} : vector<512x32xbf16>, vector<32x64xbf16>, vector<512x64xf32> -> vector<512x64xf32>
    %c0_12 = arith.constant 0 : index
    %c0_13 = arith.constant 0 : index
    %26 = vector.load %arg5[%c0_12, %c0_13] : memref<1x64xf32, #tpu.memory_space<vmem>>, vector<1x64xf32>
    %27 = vector.broadcast %26 : vector<1x64xf32> to vector<512x64xf32>
    %28 = arith.addf %25, %27 : vector<512x64xf32>
    %cst_14 = arith.constant 5.000000e-01 : f32
    %29 = vector.broadcast %cst_14 : f32 to vector<512x64xf32>
    %30 = arith.mulf %29, %28 : vector<512x64xf32>
    %cst_15 = arith.constant 4.471500e-02 : f32
    %31 = vector.broadcast %cst_15 : f32 to vector<512x64xf32>
    %32 = arith.mulf %31, %28 : vector<512x64xf32>
    %33 = arith.mulf %32, %28 : vector<512x64xf32>
    %34 = arith.mulf %33, %28 : vector<512x64xf32>
    %35 = arith.addf %28, %34 : vector<512x64xf32>
    %cst_16 = arith.constant 0.797884583 : f32
    %36 = vector.broadcast %cst_16 : f32 to vector<512x64xf32>
    %37 = arith.mulf %36, %35 : vector<512x64xf32>
    %38 = math.tanh %37 : vector<512x64xf32>
    %cst_17 = arith.constant 1.000000e+00 : f32
    %39 = vector.broadcast %cst_17 : f32 to vector<512x64xf32>
    %40 = arith.addf %39, %38 : vector<512x64xf32>
    %41 = arith.mulf %30, %40 : vector<512x64xf32>
    %42 = arith.truncf %41 : vector<512x64xf32> to vector<512x64xbf16>
    %c0_18 = arith.constant 0 : index
    %c0_19 = arith.constant 0 : index
    %43 = vector.load %arg6[%c0_18, %c0_19] : memref<64x32xbf16, #tpu.memory_space<vmem>>, vector<64x32xbf16>
    %cst_20 = arith.constant dense<0.000000e+00> : vector<512x32xf32>
    %44 = tpu.matmul %42, %43, %cst_20 {dimension_numbers = #tpu.dot_dimension_numbers<[1], [0], [0], [1], [0, 0, 1, 1], [], []>} : vector<512x64xbf16>, vector<64x32xbf16>, vector<512x32xf32> -> vector<512x32xf32>
    %c0_21 = arith.constant 0 : index
    %c0_22 = arith.constant 0 : index
    %45 = vector.load %arg7[%c0_21, %c0_22] : memref<1x32xf32, #tpu.memory_space<vmem>>, vector<1x32xf32>
    %46 = vector.broadcast %45 : vector<1x32xf32> to vector<512x32xf32>
    %47 = arith.addf %44, %46 : vector<512x32xf32>
    %48 = arith.addf %47, %0 : vector<512x32xf32>
    %c0_23 = arith.constant 0 : index
    %c0_24 = arith.constant 0 : index
    %49 = vector.load %arg8[%c0_23, %c0_24] : memref<512x32xf32, #tpu.memory_space<vmem>>, vector<512x32xf32>
    tpu.vector_store %arg8[%c0_23, %c0_24], %48 {strides = array<i32>} : memref<512x32xf32, #tpu.memory_space<vmem>>, vector<512x32xf32>,
    return
  }
  func.func @transform_0(%arg0: i32) -> (i32, i32) {
    %c0_i32 = arith.constant 0 : i32
    %c0_i32_0 = arith.constant 0 : i32
    return %arg0, %c0_i32 : i32, i32
  }
  func.func @transform_1(%arg0: i32) -> (i32, i32) {
    %c0_i32 = arith.constant 0 : i32
    %c0_i32_0 = arith.constant 0 : i32
    %c0_i32_1 = arith.constant 0 : i32
    return %c0_i32, %c0_i32_0 : i32, i32
  }
  func.func @transform_2(%arg0: i32) -> (i32, i32) {
    %c0_i32 = arith.constant 0 : i32
    %c0_i32_0 = arith.constant 0 : i32
    %c0_i32_1 = arith.constant 0 : i32
    return %c0_i32, %c0_i32_0 : i32, i32
  }
  func.func @transform_3(%arg0: i32) -> (i32, i32) {
    %c0_i32 = arith.constant 0 : i32
    %c0_i32_0 = arith.constant 0 : i32
    %c0_i32_1 = arith.constant 0 : i32
    return %c0_i32, %c0_i32_0 : i32, i32
  }
  func.func @transform_4(%arg0: i32) -> (i32, i32) {
    %c0_i32 = arith.constant 0 : i32
    %c0_i32_0 = arith.constant 0 : i32
    %c0_i32_1 = arith.constant 0 : i32
    return %c0_i32, %c0_i32_0 : i32, i32
  }
  func.func @transform_5(%arg0: i32) -> (i32, i32) {
    %c0_i32 = arith.constant 0 : i32
    %c0_i32_0 = arith.constant 0 : i32
    %c0_i32_1 = arith.constant 0 : i32
    return %c0_i32, %c0_i32_0 : i32, i32
  }
  func.func @transform_6(%arg0: i32) -> (i32, i32) {
    %c0_i32 = arith.constant 0 : i32
    %c0_i32_0 = arith.constant 0 : i32
    %c0_i32_1 = arith.constant 0 : i32
    return %c0_i32, %c0_i32_0 : i32, i32
  }
  func.func @transform_7(%arg0: i32) -> (i32, i32) {
    %c0_i32 = arith.constant 0 : i32
    %c0_i32_0 = arith.constant 0 : i32
    return %arg0, %c0_i32 : i32, i32
  }
}

</mosaic_0001>

<bundles_post_ra>
// kernel: swin_block_forward.3
= control target key start
LH: loop header
LB: loop body
LE: loop exit
PB: predicated region body
PF: predicated region fallthrough
CT: control target
= control target key end

     0   :  { %vm92_vm0 = vcmask 261120   ;;  %s6383_s0 = inlined_call_operand.vmem [shape: f32[512,32], index: 0, kind: input, shape index: {}]   ;;  %s6384_s1 = inlined_call_operand.vmem [shape: f32[1,32], index: 1, kind: input, shape index: {}]   ;;  %s6385_s2 = inlined_call_operand.vmem [shape: f32[1,32], index: 2, kind: input, shape index: {}]   ;;  %s6386_s3 = inlined_call_operand.vmem [shape: bf16[32,64], index: 3, kind: input, shape index: {}]   ;;  %s6387_s4 = inlined_call_operand.vmem [shape: f32[1,64], index: 4, kind: input, shape index: {}]   ;;  %s6388_s5 = inlined_call_operand.vmem [shape: bf16[64,32], index: 5, kind: input, shape index: {}]   ;;  %s6389_s6 = inlined_call_operand.vmem [shape: f32[1,32], index: 6, kind: input, shape index: {}]   ;;  %s6390_s7 = inlined_call_operand.hbm [shape: f32[512,32], index: 7, kind: output, shape index: {}]  }
   0x1   :  { %v30_v0 = vld [vmem:[%s6383_s0 + $0x10] sm:$0xff]  ;;  %v28_v1 = vld [vmem:[%s6383_s0] sm:$0xff]  ;;  %v31_v6 = vld [vmem:[%s6383_s0 + $0x18] sm:$0xff] }
   0x2   :  { %v99_v2 = vsel %vm92_vm0, %v30_v0, 0.0  ;;  %v93_v3 = vsel %vm92_vm0, %v28_v1, 0.0  ;;  %v32_v4 = vld [vmem:[%s6383_s0 + $0x20] sm:$0xff]  ;;  %v29_v7 = vld [vmem:[%s6383_s0 + $0x8] sm:$0xff] }
   0x3   :  { %100 = vadd.xlane.f32.xlu1 %v99_v2  ;;  %94 = vadd.xlane.f32.xlu0 %v93_v3  ;;  %v105_v5 = vsel %vm92_vm0, %v32_v4, 0.0 }
   0x4   :  { %106 = vadd.xlane.f32.xlu2 %v105_v5 }
   0x5   :  { %12 = vsyncpa [#allocation3], 0  ;;  %v33_v8 = vld [vmem:[%s6383_s0 + $0x28] sm:$0xff]  ;;  %v102_v9 = vsel %vm92_vm0, %v31_v6, 0.0  ;;  %v96_v10 = vsel %vm92_vm0, %v29_v7, 0.0  ;;  %v34_v12 = vld [vmem:[%s6383_s0 + $0x30] sm:$0xff] }
   0x6   :  { %v108_v11 = vsel %vm92_vm0, %v33_v8, 0.0  ;;  %v111_v13 = vsel %vm92_vm0, %v34_v12, 0.0  ;;  %v3488_v14 = vmov 32.0   ;;  %v3575_v34 = vld [vmem:[%s6383_s0 + $0x38] sm:$0xff]  ;;  %v3599_v47 = vld [vmem:[%s6383_s0 + $0x40] sm:$0xff]  ;;  %v3620_v57 = vld [vmem:[%s6383_s0 + $0x48] sm:$0xff] }
   0x7   :  { %3125 = vrcp.f32 %v3488_v14  ;;  %v114_v40 = vsel %vm92_vm0, %v3575_v34, 0.0  ;;  %v117_v51 = vsel %vm92_vm0, %v3599_v47, 0.0  ;;  %v3615_v56 = vld [vmem:[%s6383_s0 + $0x58] sm:$0xff]  ;;  %v120_v61 = vsel %vm92_vm0, %v3620_v57, 0.0  ;;  %v3634_v63 = vld [vmem:[%s6383_s0 + $0x60] sm:$0xff]  ;;  %s3489_s23 = smov [#allocation2]  }
   0x8   :  { %v126_v59 = vsel %vm92_vm0, %v3615_v56, 0.0  ;;  %s3003_s24 = sshll.u32 %s3489_s23, 4  ;;  %s3005_s27 = sshll.u32 %s6390_s7, 4  ;;  %s3004_s24 = int_to_ptr.vmem [resolvable:$true] %s3003_s24  ;;  %s3006_s27 = int_to_ptr.hbm [resolvable:$true] %s3005_s27 }
   0x9   :  { %s3490_s29 = smov 128  }
   0xb   :  { %103 = vadd.xlane.f32.xlu1 %v102_v9  ;;  %97 = vadd.xlane.f32.xlu0 %v96_v10  ;;  %v3106_v9 = vld [vmem:[%s6386_s3 + $0x8] sm:$0xff] }
   0xc   :  { %109 = vadd.xlane.f32.xlu2 %v108_v11  ;;  %1798 = vmatpush.bf16.msra.mxu0 %v3106_v9 }
   0xd   :  { %v3126_v15 = vpop.eup %3125  ;;  %3111 = vmatpush.bf16.msra.mxu3 %v3106_v9 }
   0xe   :  { %v286_v16 = vmul.f32 32.0, %v3126_v15  ;;  %vm290_vm1 = vweird.f32 %v3126_v15 }
  0x10   :  { %v287_v17 = vsub.f32 1.0, %v286_v16 }
  0x12   :  { %v288_v18 = vmul.f32 %v3126_v15, %v287_v17 }
  0x14   :  { %112 = vadd.xlane.f32.xlu2 %v111_v13  ;;  %v289_v19 = vadd.f32 %v3126_v15, %v288_v18 }
  0x16   :  { %v3560_v20 = vsel %vm290_vm1, %v3126_v15, %v289_v19 }
  0x76   :  { %v101_v21 = vpop.xlane.xlu1 %100  ;;  %v95_v22 = vpop.xlane.xlu0 %94 }
  0x77   :  { %v292_v23 = vmul.f32 %v3560_v20, %v95_v22  ;;  %v107_v24 = vpop.xlane.xlu2 %106  ;;  %v294_v33 = vmul.f32 %v3560_v20, %v101_v21 }
  0x78   :  { %v296_v32 = vmul.f32 %v3560_v20, %v107_v24 }
  0x79   :  { %v3563_v25 = vsub.f32 %v28_v1, %v292_v23  ;;  %v3589_v42 = vsub.f32 %v30_v0, %v294_v33  ;;  %v3639_v0 = vld [vmem:[%s6383_s0 + $0x50] sm:$0xff]  ;;  %v129_v1 = vsel %vm92_vm0, %v3634_v63, 0.0 }
  0x7a   :  { %v3581_v38 = vsub.f32 %v32_v4, %v296_v32  ;;  %v123_v3 = vsel %vm92_vm0, %v3639_v0, 0.0  ;;  %v3649_v4 = vld [vmem:[%s6383_s0 + $0x68] sm:$0xff] }
  0x7b   :  { %v420_v26 = vmul.f32 %v3563_v25, %v3563_v25  ;;  %v422_v48 = vmul.f32 %v3589_v42, %v3589_v42  ;;  %v132_v5 = vsel %vm92_vm0, %v3649_v4, 0.0 }
  0x7c   :  { %v424_v46 = vmul.f32 %v3581_v38, %v3581_v38 }
  0x7d   :  { %v484_v27 = vsel %vm92_vm0, %v420_v26, 0.0  ;;  %v490_v52 = vsel %vm92_vm0, %v422_v48, 0.0 }
  0x7e   :  { %v104_v28 = vpop.xlane.xlu1 %103  ;;  %485 = vadd.xlane.f32.xlu0 %v484_v27  ;;  %v98_v29 = vpop.xlane.xlu0 %97  ;;  %v496_v50 = vsel %vm92_vm0, %v424_v46, 0.0 }
  0x7f   :  { %v295_v30 = vmul.f32 %v3560_v20, %v104_v28  ;;  %v293_v31 = vmul.f32 %v3560_v20, %v98_v29  ;;  %v110_v37 = vpop.xlane.xlu2 %109 }
  0x80   :  { %v297_v45 = vmul.f32 %v3560_v20, %v110_v37 }
  0x81   :  { %v3577_v35 = vsub.f32 %v31_v6, %v295_v30  ;;  %v3579_v36 = vsub.f32 %v29_v7, %v293_v31  ;;  %v3656_v6 = vld [vmem:[%s6383_s0 + $0x70] sm:$0xff] }
  0x82   :  { %v3603_v49 = vsub.f32 %v33_v8, %v297_v45  ;;  %v135_v7 = vsel %vm92_vm0, %v3656_v6, 0.0 }
  0x83   :  { %v423_v39 = vmul.f32 %v3577_v35, %v3577_v35  ;;  %v421_v41 = vmul.f32 %v3579_v36, %v3579_v36 }
  0x84   :  { %v425_v55 = vmul.f32 %v3603_v49, %v3603_v49 }
  0x85   :  { %v493_v43 = vsel %vm92_vm0, %v423_v39, 0.0  ;;  %v487_v44 = vsel %vm92_vm0, %v421_v41, 0.0 }
  0x86   :  { %494 = vadd.xlane.f32.xlu2 %v493_v43  ;;  %115 = vadd.xlane.f32.xlu0 %v114_v40  ;;  %v499_v60 = vsel %vm92_vm0, %v425_v55, 0.0 }
  0x87   :  { %488 = vadd.xlane.f32.xlu1 %v487_v44  ;;  %v113_v53 = vpop.xlane.xlu2 %112 }
  0x88   :  { %v298_v54 = vmul.f32 %v3560_v20, %v113_v53 }
  0x8a   :  { %v3622_v58 = vsub.f32 %v34_v12, %v298_v54  ;;  %v3105_v12 = vld [vmem:[%s6386_s3] sm:$0xff] }
  0x8b   :  { %1799 = vmatpush.bf16.msra.mxu0 %v3105_v12  ;;  %3112 = vmatpush.bf16.msra.mxu3 %v3105_v12 }
  0x8c   :  { %v426_v62 = vmul.f32 %v3622_v58, %v3622_v58 }
  0x8e   :  { %497 = vadd.xlane.f32.xlu2 %v496_v50  ;;  %118 = vadd.xlane.f32.xlu0 %v117_v51  ;;  %v502_v2 = vsel %vm92_vm0, %v426_v62, 0.0 }
  0x8f   :  { %491 = vadd.xlane.f32.xlu1 %v490_v52 }
  0x96   :  { %127 = vadd.xlane.f32.xlu2 %v126_v59  ;;  %500 = vadd.xlane.f32.xlu0 %v499_v60 }
  0x97   :  { %121 = vadd.xlane.f32.xlu1 %v120_v61 }
  0x9e   :  { %130 = vadd.xlane.f32.xlu2 %v129_v1  ;;  %503 = vadd.xlane.f32.xlu0 %v502_v2 }
  0x9f   :  { %124 = vadd.xlane.f32.xlu1 %v123_v3 }
  0xa6   :  { %133 = vadd.xlane.f32.xlu0 %v132_v5 }
  0xae   :  { %136 = vadd.xlane.f32.xlu0 %v135_v7 }
  0xf1   :  { %v486_v8 = vpop.xlane.xlu0 %485 }
  0xf2   :  { %v676_v10 = vmul.f32 %v486_v8, %v3560_v20 }
  0xf4   :  { %v740_v11 = vadd.f32 1e-05, %v676_v10 }
  0xf6   :  { %3127 = vrsqrt.f32 %v740_v11  ;;  %vm810_vm3 = vweird.f32 %v740_v11 }
  0xf9   :  { %v495_v13 = vpop.xlane.xlu2 %494  ;;  %v116_v14 = vpop.xlane.xlu0 %115 }
  0xfa   :  { %v679_v15 = vmul.f32 %v495_v13, %v3560_v20  ;;  %v489_v16 = vpop.xlane.xlu1 %488  ;;  %v299_v17 = vmul.f32 %v3560_v20, %v116_v14  ;;  %v3730_v14 = vld [vmem:[%s6384_s1] ss:$0 sm:$0xff] }
  0xfb   :  { %v677_v18 = vmul.f32 %v489_v16, %v3560_v20 }
  0xfc   :  { %v3128_v19 = vpop.eup %3127  ;;  %v3670_v21 = vadd.f32 1e-05, %v679_v15  ;;  %v3673_v22 = vsub.f32 %v3575_v34, %v299_v17 }
  0xfd   :  { %v805_v23 = vmul.f32 %v3128_v19, %v740_v11  ;;  %v741_v24 = vadd.f32 1e-05, %v677_v18  ;;  %vm811_vm2 = vweird.f32 %v3128_v19  ;;  %v3721_v11 = vld [vmem:[%s6383_s0 + $0x78] sm:$0xff] }
  0xfe   :  { %3129 = vrsqrt.f32 %v3670_v21  ;;  %v427_v26 = vmul.f32 %v3673_v22, %v3673_v22  ;;  %vm3696_vm4 = vmor %vm810_vm3, %vm811_vm2  ;;  %v138_v18 = vsel %vm92_vm0, %v3721_v11, 0.0  ;;  %vm840_vm8 = vweird.f32 %v3670_v21 }
  0xff   :  { %v806_v27 = vmul.f32 %v3128_v19, %v805_v23  ;;  %3131 = vrsqrt.f32 %v741_v24  ;;  %vm820_vm6 = vweird.f32 %v741_v24 }
 0x100   :  { %v505_v28 = vsel %vm92_vm0, %v427_v26, 0.0 }
 0x101   :  { %v807_v29 = vmul.f32 0.5, %v806_v27  ;;  %v498_v30 = vpop.xlane.xlu2 %497  ;;  %506 = vadd.xlane.f32.xlu1 %v505_v28  ;;  %v119_v31 = vpop.xlane.xlu0 %118 }
 0x102   :  { %v492_v32 = vpop.xlane.xlu1 %491  ;;  %v300_v33 = vmul.f32 %v3560_v20, %v119_v31  ;;  %v680_v43 = vmul.f32 %v498_v30, %v3560_v20 }
 0x103   :  { %v808_v34 = vsub.f32 1.5, %v807_v29  ;;  %v678_v37 = vmul.f32 %v492_v32, %v3560_v20  ;;  %v3749_v32 = vld [vmem:[%s6385_s2] ss:$0 sm:$0xff] }
 0x104   :  { %v3681_v39 = vpop.eup %3129  ;;  %v3684_v40 = vsub.f32 %v3599_v47, %v300_v33  ;;  %v3694_v47 = vadd.f32 1e-05, %v680_v43 }
 0x105   :  { %v3132_v41 = vpop.eup %3131  ;;  %v3687_v44 = vadd.f32 1e-05, %v678_v37  ;;  %v809_v46 = vmul.f32 %v3128_v19, %v808_v34  ;;  %v835_v48 = vmul.f32 %v3681_v39, %v3670_v21  ;;  %vm841_vm9 = vweird.f32 %v3681_v39 }
 0x106   :  { %v815_v45 = vmul.f32 %v3132_v41, %v741_v24  ;;  %v428_v51 = vmul.f32 %v3684_v40, %v3684_v40  ;;  %vm821_vm5 = vweird.f32 %v3132_v41  ;;  %vm3778_vm12 = vmor %vm840_vm8, %vm841_vm9  ;;  %vm850_vm1 = vweird.f32 %v3694_v47 }
 0x107   :  { %3133 = vrsqrt.f32 %v3687_v44  ;;  %v813_v1 = vsel %vm3696_vm4, %v3128_v19, %v809_v46  ;;  %v836_v2 = vmul.f32 %v3681_v39, %v835_v48  ;;  %vm822_vm7 = vmor %vm820_vm6, %vm821_vm5  ;;  %vm830_vm11 = vweird.f32 %v3687_v44 }
 0x108   :  { %v816_v50 = vmul.f32 %v3132_v41, %v815_v45  ;;  %v508_v61 = vsel %vm92_vm0, %v428_v51, 0.0  ;;  %3135 = vrsqrt.f32 %v3694_v47  ;;  %v1444_v12 = vmul.f32 %v813_v1, %v3563_v25 }
 0x109   :  { %v128_v52 = vpop.xlane.xlu2 %127  ;;  %v501_v53 = vpop.xlane.xlu0 %500  ;;  %509 = vadd.xlane.f32.xlu1 %v508_v61 }
 0x10a   :  { %v817_v55 = vmul.f32 0.5, %v816_v50  ;;  %v303_v59 = vmul.f32 %v3560_v20, %v128_v52  ;;  %v122_v60 = vpop.xlane.xlu1 %121  ;;  %v681_v62 = vmul.f32 %v501_v53, %v3560_v20  ;;  %v1512_v31 = vmul.f32 %v3730_v14, %v1444_v12  ;;  %v3771_v50 = vld [vmem:[%s6383_s0 + $0x80] sm:$0xff] }
 0x10b   :  { %v301_v3 = vmul.f32 %v3560_v20, %v122_v60 }
 0x10c   :  { %v818_v5 = vsub.f32 1.5, %v817_v55  ;;  %v3708_v7 = vsub.f32 %v3615_v56, %v303_v59  ;;  %v3710_v8 = vadd.f32 1e-05, %v681_v62  ;;  %v141_v59 = vsel %vm92_vm0, %v3771_v50, 0.0 }
 0x10d   :  { %v3712_v9 = vpop.eup %3133  ;;  %v3716_v10 = vsub.f32 %v3620_v57, %v301_v3  ;;  %v837_v57 = vmul.f32 0.5, %v836_v2 }
 0x10e   :  { %v819_v13 = vmul.f32 %v3132_v41, %v818_v5  ;;  %v825_v56 = vmul.f32 %v3712_v9, %v3687_v44  ;;  %3137 = vrsqrt.f32 %v3710_v8  ;;  %v431_v15 = vmul.f32 %v3708_v7, %v3708_v7 }
 0x10f   :  { %v429_v25 = vmul.f32 %v3716_v10, %v3716_v10  ;;  %v838_v33 = vsub.f32 1.5, %v837_v57  ;;  %vm831_vm10 = vweird.f32 %v3712_v9  ;;  %vm860_vm14 = vweird.f32 %v3710_v8 }
 0x110   :  { %v823_v16 = vsel %vm822_vm7, %v3132_v41, %v819_v13  ;;  %v826_v17 = vmul.f32 %v3712_v9, %v825_v56  ;;  %v517_v24 = vsel %vm92_vm0, %v431_v15, 0.0  ;;  %vm832_vm13 = vmor %vm830_vm11, %vm831_vm10  ;;  %v3807_v56 = vld [vmem:[%s6383_s0 + $0x98] sm:$0xff]  ;;  %v3812_v15 = vld [vmem:[%s6383_s0 + $0x88] sm:$0xff] }
 0x111   :  { %v1445_v19 = vmul.f32 %v823_v16, %v3579_v36  ;;  %v131_v23 = vpop.xlane.xlu2 %130  ;;  %v3741_v26 = vpop.xlane.xlu0 %503  ;;  %518 = vadd.xlane.f32.xlu0 %v517_v24  ;;  %v511_v29 = vsel %vm92_vm0, %v429_v25, 0.0  ;;  %139 = vadd.xlane.f32.xlu1 %v138_v18  ;;  %v839_v52 = vmul.f32 %v3681_v39, %v838_v33 }
 0x112   :  { %v827_v27 = vmul.f32 0.5, %v826_v17  ;;  %v304_v28 = vmul.f32 %v3560_v20, %v131_v23  ;;  %v125_v30 = vpop.xlane.xlu1 %124  ;;  %v3751_v36 = vpop.eup %3135  ;;  %512 = vadd.xlane.f32.xlu2 %v511_v29  ;;  %v144_v17 = vsel %vm92_vm0, %v3812_v15, 0.0 }
 0x113   :  { %v302_v34 = vmul.f32 %v3560_v20, %v125_v30  ;;  %v1513_v37 = vmul.f32 %v3730_v14, %v1445_v19  ;;  %v843_v5 = vsel %vm3778_vm12, %v3681_v39, %v839_v52  ;;  %v3834_v30 = vld [vmem:[%s6383_s0 + $0xa0] sm:$0xff]  ;;  %vm851_vm2 = vweird.f32 %v3751_v36  ;;  %v3860_v52 = vld [vmem:[%s6383_s0 + $0xa8] sm:$0xff] }
 0x114   :  { %v3755_v41 = vpop.eup %3137  ;;  %v828_v43 = vsub.f32 1.5, %v827_v27  ;;  %v3760_v45 = vsub.f32 %v3634_v63, %v304_v28  ;;  %v1580_v63 = vadd.f32 %v3749_v32, %v1512_v31  ;;  %v1447_v39 = vmul.f32 %v843_v5, %v3577_v35  ;;  %v3842_v31 = vld [vmem:[%s6383_s0 + $0x90] sm:$0xff]  ;;  %vm852_vm4 = vmor %vm850_vm1, %vm851_vm2 }
 0x115   :  { %v855_v46 = vmul.f32 %v3755_v41, %v3710_v8  ;;  %v3766_v48 = vsub.f32 %v3639_v0, %v302_v34  ;;  %v1581_v51 = vadd.f32 %v3749_v32, %v1513_v37  ;;  %v845_v0 = vmul.f32 %v3751_v36, %v3694_v47 }
 0x116   :  { %v829_v21 = vmul.f32 %v3712_v9, %v828_v43  ;;  %v432_v54 = vmul.f32 %v3760_v45, %v3760_v45  ;;  %v1515_v35 = vmul.f32 %v3730_v14, %v1447_v39  ;;  %vm861_vm15 = vweird.f32 %v3755_v41 }
 0x117   :  { %v430_v55 = vmul.f32 %v3766_v48, %v3766_v48  ;;  %v1644_v44 = vpack.c.bf16 %v1581_v51, %v1580_v63  ;;  %v856_v61 = vmul.f32 %v3755_v41, %v855_v46  ;;  %v846_v12 = vmul.f32 %v3751_v36, %v845_v0  ;;  %vm862_vm3 = vmor %vm860_vm14, %vm861_vm15 }
 0x118   :  { %v833_v60 = vsel %vm832_vm13, %v3712_v9, %v829_v21  ;;  %v520_v62 = vsel %vm92_vm0, %v432_v54, 0.0  ;;  %v153_v47 = vsel %vm92_vm0, %v3834_v30, 0.0  ;;  %v147_v43 = vsel %vm92_vm0, %v3842_v31, 0.0 }
 0x119   :  { %v514_v1 = vsel %vm92_vm0, %v430_v55, 0.0  ;;  %v134_v2 = vpop.xlane.xlu0 %133  ;;  %3025 = vmatmul.msk.bf16.vlgmr.msra.gmra.mxu0 %vm92_vm0, %v1644_v44  ;;  %521 = vadd.xlane.f32.xlu0 %v520_v62  ;;  %v1446_v9 = vmul.f32 %v833_v60, %v3589_v42  ;;  %v857_v57 = vmul.f32 0.5, %v856_v61  ;;  %v847_v42 = vmul.f32 0.5, %v846_v12 }
 0x11a   :  { %v305_v3 = vmul.f32 %v3560_v20, %v134_v2  ;;  %515 = vadd.xlane.f32.xlu2 %v514_v1  ;;  %142 = vadd.xlane.f32.xlu1 %v141_v59  ;;  %v156_v0 = vsel %vm92_vm0, %v3860_v52, 0.0  ;;  %v682_v59 = vmul.f32 %v3741_v26, %v3560_v20 }
 0x11b   :  { %v1514_v18 = vmul.f32 %v3730_v14, %v1446_v9  ;;  %v858_v19 = vsub.f32 1.5, %v857_v57  ;;  %v848_v27 = vsub.f32 1.5, %v847_v42 }
 0x11c   :  { %v3802_v13 = vsub.f32 %v3649_v4, %v305_v3  ;;  %v150_v4 = vsel %vm92_vm0, %v3807_v56, 0.0  ;;  %v746_v60 = vadd.f32 1e-05, %v682_v59 }
 0x11d   :  { %v1582_v29 = vadd.f32 %v3749_v32, %v1514_v18  ;;  %v859_v8 = vmul.f32 %v3755_v41, %v858_v19  ;;  %v849_v34 = vmul.f32 %v3751_v36, %v848_v27 }
 0x11e   :  { %v433_v16 = vmul.f32 %v3802_v13, %v3802_v13  ;;  %3139 = vrsqrt.f32 %v746_v60  ;;  %vm870_vm5 = vweird.f32 %v746_v60 }
 0x11f   :  { %v863_v21 = vsel %vm862_vm3, %v3755_v41, %v859_v8  ;;  %v853_v63 = vsel %vm852_vm4, %v3751_v36, %v849_v34 }
 0x120   :  { %v523_v25 = vsel %vm92_vm0, %v433_v16, 0.0  ;;  %v1449_v51 = vmul.f32 %v863_v21, %v3603_v49  ;;  %v1448_v53 = vmul.f32 %v853_v63, %v3581_v38  ;;  %v3871_v49 = vld [vmem:[%s6383_s0 + $0xb0] sm:$0xff] }
 0x121   :  { %v137_v23 = vpop.xlane.xlu0 %136  ;;  %151 = vadd.xlane.f32.xlu0 %v150_v4  ;;  %v159_v38 = vsel %vm92_vm0, %v3871_v49, 0.0 }
 0x122   :  { %v306_v24 = vmul.f32 %v3560_v20, %v137_v23  ;;  %145 = vadd.xlane.f32.xlu2 %v144_v17  ;;  %524 = vadd.xlane.f32.xlu1 %v523_v25  ;;  %v1517_v41 = vmul.f32 %v3730_v14, %v1449_v51  ;;  %v1516_v54 = vmul.f32 %v3730_v14, %v1448_v53 }
 0x124   :  { %v3828_v28 = vsub.f32 %v3656_v6, %v306_v24  ;;  %v1583_v6 = vadd.f32 %v3749_v32, %v1515_v35  ;;  %v1585_v36 = vadd.f32 %v3749_v32, %v1517_v41  ;;  %v1584_v55 = vadd.f32 %v3749_v32, %v1516_v54  ;;  %v3140_v61 = vpop.eup %3139 }
 0x125   :  { %v865_v62 = vmul.f32 %v3140_v61, %v746_v60  ;;  %vm871_vm6 = vweird.f32 %v3140_v61 }
 0x126   :  { %v434_v33 = vmul.f32 %v3828_v28, %v3828_v28  ;;  %v1645_v37 = vpack.c.bf16 %v1583_v6, %v1582_v29  ;;  %v1646_v44 = vpack.c.bf16 %v1585_v36, %v1584_v55  ;;  %vm3881_vm7 = vmor %vm870_vm5, %vm871_vm6 }
 0x127   :  { %v866_v3 = vmul.f32 %v3140_v61, %v865_v62  ;;  %v3110_v62 = vld [vmem:[%s6388_s5 + $0x18] sm:$0xff] }
 0x128   :  { %v526_v46 = vsel %vm92_vm0, %v434_v33, 0.0  ;;  %2706 = vmatpush.bf16.msra.mxu1 %v3110_v62  ;;  %3113 = vmatpush.bf16.msra.mxu2 %v3110_v62 }
 0x129   :  { %3026 = vmatmul.msk.bf16.gmra.mxu0 %vm92_vm0, %v1645_v37  ;;  %154 = vadd.xlane.f32.xlu0 %v153_v47  ;;  %v867_v12 = vmul.f32 0.5, %v866_v3 }
 0x12a   :  { %148 = vadd.xlane.f32.xlu2 %v147_v43  ;;  %527 = vadd.xlane.f32.xlu1 %v526_v46 }
 0x12b   :  { %v868_v39 = vsub.f32 1.5, %v867_v12 }
 0x12d   :  { %v869_v17 = vmul.f32 %v3140_v61, %v868_v39 }
 0x12f   :  { %v873_v29 = vsel %vm3881_vm7, %v3140_v61, %v869_v17 }
 0x130   :  { %v1450_v46 = vmul.f32 %v873_v29, %v3622_v58  ;;  %v3108_v29 = vld [vmem:[%s6388_s5 + $0x8] sm:$0xff] }
 0x132   :  { %157 = vadd.xlane.f32.xlu1 %v156_v0 }
 0x139   :  { %3027 = vmatmul.msk.bf16.gmra.mxu0 %vm92_vm0, %v1646_v44  ;;  %v1518_v44 = vmul.f32 %v3730_v14, %v1450_v46 }
 0x13a   :  { %160 = vadd.xlane.f32.xlu1 %v159_v38 }
 0x174   :  { %v507_v1 = vpop.xlane.xlu1 %506 }
 0x175   :  { %v683_v2 = vmul.f32 %v507_v1, %v3560_v20 }
 0x177   :  { %v747_v5 = vadd.f32 1e-05, %v683_v2 }
 0x179   :  { %3141 = vrsqrt.f32 %v747_v5  ;;  %vm880_vm8 = vweird.f32 %v747_v5 }
 0x17c   :  { %v510_v9 = vpop.xlane.xlu1 %509 }
 0x17d   :  { %v684_v16 = vmul.f32 %v510_v9, %v3560_v20 }
 0x17f   :  { %v3142_v57 = vpop.eup %3141  ;;  %v748_v26 = vadd.f32 1e-05, %v684_v16 }
 0x180   :  { %v875_v42 = vmul.f32 %v3142_v57, %v747_v5  ;;  %vm881_vm9 = vweird.f32 %v3142_v57 }
 0x181   :  { %3143 = vrsqrt.f32 %v748_v26  ;;  %vm882_vm10 = vmor %vm880_vm8, %vm881_vm9  ;;  %vm890_vm11 = vweird.f32 %v748_v26 }
 0x182   :  { %v876_v4 = vmul.f32 %v3142_v57, %v875_v42 }
 0x184   :  { %v877_v18 = vmul.f32 0.5, %v876_v4  ;;  %v519_v19 = vpop.xlane.xlu0 %518  ;;  %v140_v35 = vpop.xlane.xlu1 %139 }
 0x185   :  { %v513_v24 = vpop.xlane.xlu2 %512  ;;  %v687_v27 = vmul.f32 %v519_v19, %v3560_v20  ;;  %v307_v6 = vmul.f32 %v3560_v20, %v140_v35 }
 0x186   :  { %v878_v23 = vsub.f32 1.5, %v877_v18  ;;  %v685_v8 = vmul.f32 %v513_v24, %v3560_v20 }
 0x187   :  { %v3890_v34 = vadd.f32 1e-05, %v687_v27  ;;  %v3892_v47 = vpop.eup %3143  ;;  %v3897_v43 = vsub.f32 %v3721_v11, %v307_v6 }
 0x188   :  { %v879_v33 = vmul.f32 %v3142_v57, %v878_v23  ;;  %v3894_v37 = vadd.f32 1e-05, %v685_v8  ;;  %v885_v63 = vmul.f32 %v3892_v47, %v748_v26  ;;  %vm891_vm12 = vweird.f32 %v3892_v47  ;;  %v3109_v26 = vld [vmem:[%s6388_s5 + $0x10] sm:$0xff] }
 0x189   :  { %3145 = vrsqrt.f32 %v3890_v34  ;;  %v435_v0 = vmul.f32 %v3897_v43, %v3897_v43  ;;  %vm3936_vm13 = vmor %vm890_vm11, %vm891_vm12  ;;  %2707 = vmatpush.bf16.msra.mxu1 %v3109_v26  ;;  %3114 = vmatpush.bf16.msra.mxu2 %v3109_v26  ;;  %vm920_vm2 = vweird.f32 %v3890_v34 }
 0x18a   :  { %v883_v21 = vsel %vm882_vm10, %v3142_v57, %v879_v33  ;;  %3147 = vrsqrt.f32 %v3894_v37  ;;  %v886_v53 = vmul.f32 %v3892_v47, %v885_v63  ;;  %v1586_v57 = vadd.f32 %v3749_v32, %v1518_v44  ;;  %v3954_v33 = vld [vmem:[%s6387_s4] ss:$0 sm:$0xff] }
 0x18b   :  { %v1451_v51 = vmul.f32 %v883_v21, %v3673_v22  ;;  %v529_v58 = vsel %vm92_vm0, %v435_v0, 0.0  ;;  %vm900_vm15 = vweird.f32 %v3894_v37 }
 0x18c   :  { %v522_v41 = vpop.xlane.xlu0 %521  ;;  %v887_v54 = vmul.f32 0.5, %v886_v53  ;;  %530 = vadd.xlane.f32.xlu2 %v529_v58 }
 0x18d   :  { %v1519_v11 = vmul.f32 %v3730_v14, %v1451_v51  ;;  %v516_v36 = vpop.xlane.xlu2 %515  ;;  %v143_v55 = vpop.xlane.xlu1 %142  ;;  %v688_v12 = vmul.f32 %v522_v41, %v3560_v20  ;;  %v3969_v41 = vld [vmem:[%s6383_s0 + $0xb8] sm:$0xff]  ;;  %2708 = vmatpush.bf16.msra.mxu1 %v3108_v29  ;;  %3115 = vmatpush.bf16.msra.mxu2 %v3108_v29 }
 0x18e   :  { %v686_v38 = vmul.f32 %v516_v36, %v3560_v20  ;;  %v308_v22 = vmul.f32 %v3560_v20, %v143_v55  ;;  %v888_v60 = vsub.f32 1.5, %v887_v54 }
 0x18f   :  { %v3912_v59 = vpop.eup %3145  ;;  %v1587_v61 = vadd.f32 %v3749_v32, %v1519_v11  ;;  %v3941_v25 = vadd.f32 1e-05, %v688_v12 }
 0x190   :  { %v3148_v1 = vpop.eup %3147  ;;  %v915_v2 = vmul.f32 %v3912_v59, %v3890_v34  ;;  %v3920_v3 = vadd.f32 1e-05, %v686_v38  ;;  %v3923_v5 = vsub.f32 %v3771_v50, %v308_v22  ;;  %v889_v39 = vmul.f32 %v3892_v47, %v888_v60 }
 0x191   :  { %v895_v9 = vmul.f32 %v3148_v1, %v3894_v37  ;;  %v1647_v42 = vpack.c.bf16 %v1587_v61, %v1586_v57  ;;  %vm901_vm14 = vweird.f32 %v3148_v1  ;;  %vm921_vm3 = vweird.f32 %v3912_v59 }
 0x192   :  { %3149 = vrsqrt.f32 %v3920_v3  ;;  %v436_v50 = vmul.f32 %v3923_v5, %v3923_v5  ;;  %v916_v17 = vmul.f32 %v3912_v59, %v915_v2  ;;  %v893_v21 = vsel %vm3936_vm13, %v3892_v47, %v889_v39  ;;  %vm902_vm1 = vmor %vm900_vm15, %vm901_vm14 }
 0x193   :  { %v896_v16 = vmul.f32 %v3148_v1, %v895_v9  ;;  %3028 = vmatmul.msk.bf16.gmra.mxu0 %vm92_vm0, %v1647_v42  ;;  %3151 = vrsqrt.f32 %v3941_v25  ;;  %v1452_v37 = vmul.f32 %v893_v21, %v3684_v40  ;;  %vm4039_vm5 = vmor %vm920_vm2, %vm921_vm3  ;;  %vm910_vm6 = vweird.f32 %v3920_v3 }
 0x194   :  { %v152_v18 = vpop.xlane.xlu0 %151  ;;  %v532_v24 = vsel %vm92_vm0, %v436_v50, 0.0  ;;  %v917_v53 = vmul.f32 0.5, %v916_v17  ;;  %vm930_vm8 = vweird.f32 %v3941_v25  ;;  %vm2605_vm14 = vcmask 523264  }
 0x195   :  { %v897_v19 = vmul.f32 0.5, %v896_v16  ;;  %v146_v23 = vpop.xlane.xlu2 %145  ;;  %v525_v35 = vpop.xlane.xlu1 %524  ;;  %v311_v27 = vmul.f32 %v3560_v20, %v152_v18  ;;  %533 = vadd.xlane.f32.xlu2 %v532_v24  ;;  %v1520_v42 = vmul.f32 %v3730_v14, %v1452_v37 }
 0x196   :  { %v309_v8 = vmul.f32 %v3560_v20, %v146_v23  ;;  %v689_v6 = vmul.f32 %v525_v35, %v3560_v20  ;;  %v1801_v46 = vpop.f32.mrf.mxu0  ;;  %v918_v60 = vsub.f32 1.5, %v917_v53 }
 0x197   :  { %v898_v63 = vsub.f32 1.5, %v897_v19  ;;  %v3976_v36 = vsub.f32 %v3807_v56, %v311_v27  ;;  %v3983_v58 = vadd.f32 %v3954_v33, %v1801_v46  ;;  %v162_v56 = vsel %vm92_vm0, %v3969_v41, 0.0  ;;  %v4014_v19 = vld [vmem:[%s6383_s0 + $0xc0] sm:$0xff] }
 0x198   :  { %v3959_v51 = vpop.eup %3149  ;;  %v3964_v0 = vsub.f32 %v3812_v15, %v309_v8  ;;  %v3973_v54 = vadd.f32 1e-05, %v689_v6  ;;  %v3107_v15 = vld [vmem:[%s6388_s5] sm:$0xff]  ;;  %v165_v46 = vsel %vm92_vm0, %v4014_v19, 0.0  ;;  %v919_v21 = vmul.f32 %v3912_v59, %v918_v60 }
 0x199   :  { %v899_v11 = vmul.f32 %v3148_v1, %v898_v63  ;;  %v905_v47 = vmul.f32 %v3959_v51, %v3920_v3  ;;  %2709 = vmatpush.bf16.msra.mxu1 %v3107_v15  ;;  %v3998_v57 = vpop.eup %3151  ;;  %v2025_v39 = vmul.f32 0.044715, %v3983_v58  ;;  %3116 = vmatpush.bf16.msra.mxu2 %v3107_v15  ;;  %vm911_vm4 = vweird.f32 %v3959_v51 }
 0x19a   :  { %v437_v55 = vmul.f32 %v3964_v0, %v3964_v0  ;;  %3153 = vrsqrt.f32 %v3973_v54  ;;  %v925_v8 = vmul.f32 %v3998_v57, %v3941_v25  ;;  %vm4048_vm7 = vmor %vm910_vm6, %vm911_vm4  ;;  %vm940_vm9 = vweird.f32 %v3973_v54 }
 0x19b   :  { %v903_v44 = vsel %vm902_vm1, %v3148_v1, %v899_v11  ;;  %v906_v38 = vmul.f32 %v3959_v51, %v905_v47  ;;  %v439_v1 = vmul.f32 %v3976_v36, %v3976_v36  ;;  %v2089_v53 = vmul.f32 %v2025_v39, %v3983_v58 }
 0x19c   :  { %v1453_v22 = vmul.f32 %v903_v44, %v3716_v10  ;;  %v155_v40 = vpop.xlane.xlu0 %154  ;;  %v535_v62 = vsel %vm92_vm0, %v437_v55, 0.0  ;;  %vm931_vm11 = vweird.f32 %v3998_v57 }
 0x19d   :  { %v907_v61 = vmul.f32 0.5, %v906_v38  ;;  %v149_v2 = vpop.xlane.xlu2 %148  ;;  %v3993_v12 = vpop.xlane.xlu1 %527  ;;  %v312_v9 = vmul.f32 %v3560_v20, %v155_v40  ;;  %536 = vadd.xlane.f32.xlu0 %v535_v62  ;;  %163 = vadd.xlane.f32.xlu2 %v162_v56  ;;  %v541_v4 = vsel %vm92_vm0, %v439_v1, 0.0  ;;  %v926_v38 = vmul.f32 %v3998_v57, %v925_v8  ;;  %vm4137_vm13 = vmor %vm930_vm8, %vm931_vm11 }
 0x19e   :  { %v310_v10 = vmul.f32 %v3560_v20, %v149_v2  ;;  %v1803_v16 = vpop.f32.mrf.mxu0  ;;  %v1521_v50 = vmul.f32 %v3730_v14, %v1453_v22  ;;  %542 = vadd.xlane.f32.xlu1 %v541_v4  ;;  %v923_v40 = vsel %vm4039_vm5, %v3912_v59, %v919_v21 }
 0x19f   :  { %v908_v26 = vsub.f32 1.5, %v907_v61  ;;  %v4006_v17 = vsub.f32 %v3834_v30, %v312_v9  ;;  %v4009_v18 = vadd.f32 %v3954_v33, %v1803_v16  ;;  %v2153_v61 = vmul.f32 %v2089_v53, %v3983_v58  ;;  %v4078_v9 = vld [vmem:[%s6383_s0 + $0xc8] sm:$0xff] }
 0x1a0   :  { %v4020_v23 = vsub.f32 %v3842_v31, %v310_v10  ;;  %v4022_v30 = vpop.eup %3153  ;;  %v1589_v27 = vadd.f32 %v3749_v32, %v1521_v50  ;;  %v1588_v31 = vadd.f32 %v3749_v32, %v1520_v42  ;;  %v1455_v16 = vmul.f32 %v923_v40, %v3708_v7 }
 0x1a1   :  { %v909_v24 = vmul.f32 %v3959_v51, %v908_v26  ;;  %v2026_v35 = vmul.f32 0.044715, %v4009_v18  ;;  %v440_v29 = vmul.f32 %v4006_v17, %v4006_v17  ;;  %v935_v6 = vmul.f32 %v4022_v30, %v3973_v54 }
 0x1a2   :  { %v1648_v15 = vpack.c.bf16 %v1589_v27, %v1588_v31  ;;  %v438_v34 = vmul.f32 %v4020_v23, %v4020_v23  ;;  %v2217_v10 = vadd.f32 %v2153_v61, %v3983_v58  ;;  %v927_v42 = vmul.f32 0.5, %v926_v38  ;;  %v4130_v38 = vld [vmem:[%s6383_s0 + $0xe0] sm:$0xff] }
 0x1a3   :  { %v2090_v11 = vmul.f32 %v2026_v35, %v4009_v18  ;;  %v913_v37 = vsel %vm4048_vm7, %v3959_v51, %v909_v24  ;;  %v936_v3 = vmul.f32 %v4022_v30, %v935_v6  ;;  %v544_v44 = vsel %vm92_vm0, %v440_v29, 0.0 }
 0x1a4   :  { %3029 = vmatmul.msk.bf16.gmra.mxu0 %vm92_vm0, %v1648_v15  ;;  %v538_v56 = vsel %vm92_vm0, %v438_v34, 0.0  ;;  %v1454_v2 = vmul.f32 %v913_v37, %v3766_v48  ;;  %v168_v26 = vsel %vm92_vm0, %v4078_v9, 0.0  ;;  %v2281_v4 = vmul.f32 0.7978846, %v2217_v10  ;;  %v4114_v15 = vld [vmem:[%s6383_s0 + $0xd0] sm:$0xff] }
 0x1a5   :  { %v158_v55 = vpop.xlane.xlu1 %157  ;;  %166 = vadd.xlane.f32.xlu2 %v165_v46  ;;  %539 = vadd.xlane.f32.xlu0 %v538_v56  ;;  %v2154_v62 = vmul.f32 %v2090_v11, %v4009_v18  ;;  %v937_v59 = vmul.f32 0.5, %v936_v3  ;;  %v928_v31 = vsub.f32 1.5, %v927_v42  ;;  %v1523_v63 = vmul.f32 %v3730_v14, %v1455_v16 }
 0x1a6   :  { %v313_v22 = vmul.f32 %v3560_v20, %v158_v55  ;;  %v1806_v60 = vpop.f32.mrf.mxu0  ;;  %545 = vadd.xlane.f32.xlu1 %v544_v44  ;;  %v1522_v7 = vmul.f32 %v3730_v14, %v1454_v2  ;;  %3155 = vtanh.f32 %v2281_v4  ;;  %vm941_vm10 = vweird.f32 %v4022_v30 }
 0x1a7   :  { %v4067_v51 = vadd.f32 %v3954_v33, %v1806_v60  ;;  %v2218_v50 = vadd.f32 %v2154_v62, %v4009_v18  ;;  %v938_v29 = vsub.f32 1.5, %v937_v59  ;;  %v929_v3 = vmul.f32 %v3998_v57, %v928_v31  ;;  %vm4120_vm12 = vmor %vm940_vm9, %vm941_vm10 }
 0x1a8   :  { %v4073_v1 = vsub.f32 %v3860_v52, %v313_v22  ;;  %v4088_v52 = vld [vmem:[%s6383_s0 + $0xd8] sm:$0xff]  ;;  %v1590_v47 = vadd.f32 %v3749_v32, %v1522_v7  ;;  %v171_v61 = vsel %vm92_vm0, %v4114_v15, 0.0  ;;  %v1961_v62 = vmul.f32 0.5, %v3983_v58 }
 0x1a9   :  { %v2027_v39 = vmul.f32 0.044715, %v4067_v51  ;;  %v2282_v27 = vmul.f32 0.7978846, %v2218_v50  ;;  %v174_v6 = vsel %vm92_vm0, %v4088_v52, 0.0  ;;  %v939_v34 = vmul.f32 %v4022_v30, %v938_v29 }
 0x1aa   :  { %v441_v48 = vmul.f32 %v4073_v1, %v4073_v1  ;;  %v1962_v2 = vmul.f32 0.5, %v4009_v18  ;;  %v177_v50 = vsel %vm92_vm0, %v4130_v38, 0.0  ;;  %v933_v58 = vsel %vm4137_vm13, %v3998_v57, %v929_v3 }
 0x1ab   :  { %v2091_v24 = vmul.f32 %v2027_v39, %v4067_v51  ;;  %3157 = vtanh.f32 %v2282_v27  ;;  %v943_v25 = vsel %vm4120_vm12, %v4022_v30, %v939_v34  ;;  %v4163_v27 = vld [vmem:[%s6383_s0 + $0xe8] sm:$0xff] }
 0x1ac   :  { %v547_v35 = vsel %vm92_vm0, %v441_v48, 0.0  ;;  %v3156_v22 = vpop.eup %3155  ;;  %v1457_v7 = vmul.f32 %v943_v25, %v3802_v13 }
 0x1ad   :  { %v161_v8 = vpop.xlane.xlu1 %160  ;;  %548 = vadd.xlane.f32.xlu2 %v547_v35  ;;  %169 = vadd.xlane.f32.xlu0 %v168_v26  ;;  %v2155_v54 = vmul.f32 %v2091_v24, %v4067_v51  ;;  %v2409_v16 = vadd.f32 1.0, %v3156_v22 }
 0x1ae   :  { %v314_v46 = vmul.f32 %v3560_v20, %v161_v8  ;;  %v1808_v21 = vpop.f32.mrf.mxu0  ;;  %175 = vadd.xlane.f32.xlu1 %v174_v6  ;;  %v1456_v6 = vmul.f32 %v933_v58, %v3760_v45  ;;  %v1525_v13 = vmul.f32 %v3730_v14, %v1457_v7  ;;  %v4176_v45 = vld [vmem:[%s6383_s0 + $0xf0] sm:$0xff]  ;;  %v690_v7 = vmul.f32 %v3993_v12, %v3560_v20 }
 0x1af   :  { %v4104_v53 = vadd.f32 %v3954_v33, %v1808_v21  ;;  %v2219_v56 = vadd.f32 %v2155_v54, %v4067_v51  ;;  %v2473_v24 = vmul.f32 %v2409_v16, %v1961_v62  ;;  %v1963_v62 = vmul.f32 0.5, %v4067_v51 }
 0x1b0   :  { %v4108_v11 = vsub.f32 %v3871_v49, %v314_v46  ;;  %v1591_v49 = vadd.f32 %v3749_v32, %v1523_v63  ;;  %v180_v46 = vsel %vm92_vm0, %v4163_v27, 0.0  ;;  %v1524_v54 = vmul.f32 %v3730_v14, %v1456_v6 }
 0x1b1   :  { %v2028_v37 = vmul.f32 0.044715, %v4104_v53  ;;  %v3158_v59 = vpop.eup %3157  ;;  %v2283_v42 = vmul.f32 0.7978846, %v2219_v56  ;;  %v1964_v22 = vmul.f32 0.5, %v4104_v53 }
 0x1b2   :  { %v442_v44 = vmul.f32 %v4108_v11, %v4108_v11  ;;  %v1649_v39 = vpack.c.bf16 %v1591_v49, %v1590_v47  ;;  %v2410_v48 = vadd.f32 1.0, %v3158_v59  ;;  %v1592_v56 = vadd.f32 %v3749_v32, %v1524_v54 }
 0x1b3   :  { %v2092_v40 = vmul.f32 %v2028_v37, %v4104_v53  ;;  %3159 = vtanh.f32 %v2283_v42  ;;  %v1593_v37 = vadd.f32 %v3749_v32, %v1525_v13 }
 0x1b4   :  { %v550_v10 = vsel %vm92_vm0, %v442_v44, 0.0  ;;  %3030 = vmatmul.msk.bf16.gmra.mxu0 %vm92_vm0, %v1649_v39  ;;  %v2474_v35 = vmul.f32 %v2410_v48, %v1962_v2 }
 0x1b5   :  { %v2156_v26 = vmul.f32 %v2092_v40, %v4104_v53  ;;  %551 = vadd.xlane.f32.xlu2 %v550_v10  ;;  %172 = vadd.xlane.f32.xlu0 %v171_v61  ;;  %v183_v61 = vsel %vm92_vm0, %v4176_v45, 0.0  ;;  %v1650_v2 = vpack.c.bf16 %v1593_v37, %v1592_v56 }
 0x1b6   :  { %v1811_v18 = vpop.f32.mrf.mxu0  ;;  %178 = vadd.xlane.f32.xlu1 %v177_v50  ;;  %v2537_v29 = vpack.c.bf16 %v2474_v35, %v2473_v24 }
 0x1b7   :  { %v1812_v4 = vadd.f32 %v3954_v33, %v1811_v18  ;;  %v2220_v30 = vadd.f32 %v2156_v26, %v4104_v53 }
 0x1b8   :  { %3073 = vmatmul.msk.bf16.vlgmr.msra.gmra.mxu1 %vm2605_vm14, %v2537_v29 }
 0x1b9   :  { %v2029_v57 = vmul.f32 0.044715, %v1812_v4  ;;  %v2284_v8 = vmul.f32 0.7978846, %v2220_v30  ;;  %v3160_v63 = vpop.eup %3159  ;;  %v1965_v18 = vmul.f32 0.5, %v1812_v4 }
 0x1ba   :  { %v2411_v44 = vadd.f32 1.0, %v3160_v63 }
 0x1bb   :  { %v2093_v31 = vmul.f32 %v2029_v57, %v1812_v4  ;;  %3161 = vtanh.f32 %v2284_v8  ;;  %v754_v57 = vadd.f32 1e-05, %v690_v7 }
 0x1bc   :  { %v2475_v10 = vmul.f32 %v2411_v44, %v1963_v62 }
 0x1bd   :  { %v2157_v21 = vmul.f32 %v2093_v31, %v1812_v4  ;;  %181 = vadd.xlane.f32.xlu2 %v180_v46  ;;  %vm950_vm15 = vweird.f32 %v754_v57 }
 0x1be   :  { %v1813_v47 = vpop.f32.mrf.mxu0 }
 0x1bf   :  { %v1814_v34 = vadd.f32 %v3954_v33, %v1813_v47  ;;  %v2221_v3 = vadd.f32 %v2157_v21, %v1812_v4 }
 0x1c1   :  { %v3162_v55 = vpop.eup %3161  ;;  %v2030_v49 = vmul.f32 0.044715, %v1814_v34  ;;  %v2285_v39 = vmul.f32 0.7978846, %v2221_v3  ;;  %v1966_v58 = vmul.f32 0.5, %v1814_v34 }
 0x1c2   :  { %v2412_v60 = vadd.f32 1.0, %v3162_v55 }
 0x1c3   :  { %v2094_v40 = vmul.f32 %v2030_v49, %v1814_v34  ;;  %3163 = vtanh.f32 %v2285_v39 }
 0x1c4   :  { %v2476_v59 = vmul.f32 %v2412_v60, %v1964_v22  ;;  %3031 = vmatmul.msk.bf16.gmra.mxu0 %vm92_vm0, %v1650_v2 }
 0x1c5   :  { %v2158_v16 = vmul.f32 %v2094_v40, %v1814_v34  ;;  %184 = vadd.xlane.f32.xlu2 %v183_v61 }
 0x1c6   :  { %v2538_v42 = vpack.c.bf16 %v2476_v59, %v2475_v10 }
 0x1c7   :  { %v2222_v25 = vadd.f32 %v2158_v16, %v1814_v34 }
 0x1c8   :  { %3074 = vmatmul.msk.bf16.gmra.mxu1 %vm2605_vm14, %v2538_v42 }
 0x1c9   :  { %v2286_v48 = vmul.f32 0.7978846, %v2222_v25  ;;  %v3164_v53 = vpop.eup %3163 }
 0x1ca   :  { %v2413_v26 = vadd.f32 1.0, %v3164_v53 }
 0x1cb   :  { %3165 = vtanh.f32 %v2286_v48 }
 0x1cc   :  { %v2477_v35 = vmul.f32 %v2413_v26, %v1965_v18  ;;  %3167 = vrsqrt.f32 %v754_v57 }
 0x1d1   :  { %v3166_v50 = vpop.eup %3165 }
 0x1d2   :  { %v2414_v51 = vadd.f32 1.0, %v3166_v50  ;;  %v3168_v29 = vpop.eup %3167 }
 0x1d3   :  { %v945_v8 = vmul.f32 %v3168_v29, %v754_v57  ;;  %vm951_vm1 = vweird.f32 %v3168_v29 }
 0x1d4   :  { %v2478_v24 = vmul.f32 %v2414_v51, %v1966_v58  ;;  %vm952_vm2 = vmor %vm950_vm15, %vm951_vm1 }
 0x1d5   :  { %v946_v6 = vmul.f32 %v3168_v29, %v945_v8 }
 0x1d6   :  { %v2539_v30 = vpack.c.bf16 %v2478_v24, %v2477_v35 }
 0x1d7   :  { %v947_v13 = vmul.f32 0.5, %v946_v6 }
 0x1d8   :  { %3075 = vmatmul.msk.bf16.gmra.mxu1 %vm2605_vm14, %v2539_v30 }
 0x1d9   :  { %v948_v4 = vsub.f32 1.5, %v947_v13 }
 0x1db   :  { %v949_v54 = vmul.f32 %v3168_v29, %v948_v4 }
 0x1dd   :  { %v953_v3 = vsel %vm952_vm2, %v3168_v29, %v949_v54 }
 0x1de   :  { %v1458_v22 = vmul.f32 %v953_v3, %v3828_v28 }
 0x1e0   :  { %v1526_v53 = vmul.f32 %v3730_v14, %v1458_v22 }
 0x1e2   :  { %v1594_v57 = vadd.f32 %v3749_v32, %v1526_v53 }
 0x1ff   :  { %v531_v31 = vpop.xlane.xlu2 %530 }
 0x200   :  { %v691_v46 = vmul.f32 %v531_v31, %v3560_v20 }
 0x202   :  { %v755_v21 = vadd.f32 1e-05, %v691_v46 }
 0x204   :  { %3169 = vrsqrt.f32 %v755_v21  ;;  %vm960_vm3 = vweird.f32 %v755_v21 }
 0x208   :  { %v534_v63 = vpop.xlane.xlu2 %533 }
 0x209   :  { %v692_v47 = vmul.f32 %v534_v63, %v3560_v20 }
 0x20a   :  { %v3170_v34 = vpop.eup %3169 }
 0x20b   :  { %v756_v12 = vadd.f32 1e-05, %v692_v47  ;;  %v955_v37 = vmul.f32 %v3170_v34, %v755_v21  ;;  %vm961_vm4 = vweird.f32 %v3170_v34 }
 0x20c   :  { %vm962_vm5 = vmor %vm960_vm3, %vm961_vm4 }
 0x20d   :  { %3171 = vrsqrt.f32 %v756_v12  ;;  %v956_v55 = vmul.f32 %v3170_v34, %v955_v37  ;;  %vm970_vm6 = vweird.f32 %v756_v12 }
 0x20f   :  { %v957_v49 = vmul.f32 0.5, %v956_v55 }
 0x210   :  { %v164_v44 = vpop.xlane.xlu2 %163  ;;  %v537_v56 = vpop.xlane.xlu0 %536 }
 0x211   :  { %v315_v60 = vmul.f32 %v3560_v20, %v164_v44  ;;  %v693_v40 = vmul.f32 %v537_v56, %v3560_v20  ;;  %v1816_v61 = vpop.f32.mrf.mxu0  ;;  %v958_v62 = vsub.f32 1.5, %v957_v49  ;;  %v543_v2 = vpop.xlane.xlu1 %542 }
 0x212   :  { %v695_v10 = vmul.f32 %v543_v2, %v3560_v20  ;;  %v4216_v8 = vadd.f32 %v3954_v33, %v1816_v61 }
 0x213   :  { %v4193_v59 = vpop.eup %3171  ;;  %v4196_v39 = vsub.f32 %v3969_v41, %v315_v60  ;;  %v4199_v16 = vadd.f32 1e-05, %v693_v40  ;;  %v959_v42 = vmul.f32 %v3170_v34, %v958_v62 }
 0x214   :  { %v965_v28 = vmul.f32 %v4193_v59, %v756_v12  ;;  %v4202_v25 = vadd.f32 1e-05, %v695_v10  ;;  %vm971_vm7 = vweird.f32 %v4193_v59  ;;  %v2031_v49 = vmul.f32 0.044715, %v4216_v8 }
 0x215   :  { %3173 = vrsqrt.f32 %v4199_v16  ;;  %v443_v48 = vmul.f32 %v4196_v39, %v4196_v39  ;;  %v963_v50 = vsel %vm962_vm5, %v3170_v34, %v959_v42  ;;  %vm4236_vm8 = vmor %vm970_vm6, %vm971_vm7  ;;  %vm980_vm10 = vweird.f32 %v4199_v16 }
 0x216   :  { %v966_v41 = vmul.f32 %v4193_v59, %v965_v28  ;;  %v1459_v26 = vmul.f32 %v963_v50, %v3897_v43  ;;  %3175 = vrsqrt.f32 %v4202_v25  ;;  %v4265_v50 = vld [vmem:[%s6383_s0 + $0xf8] sm:$0xff]  ;;  %vm1000_vm12 = vweird.f32 %v4202_v25 }
 0x217   :  { %v553_v58 = vsel %vm92_vm0, %v443_v48, 0.0  ;;  %v2095_v48 = vmul.f32 %v2031_v49, %v4216_v8 }
 0x218   :  { %v967_v51 = vmul.f32 0.5, %v966_v41  ;;  %554 = vadd.xlane.f32.xlu0 %v553_v58  ;;  %v167_v18 = vpop.xlane.xlu2 %166  ;;  %v540_v35 = vpop.xlane.xlu0 %539  ;;  %v1527_v7 = vmul.f32 %v3730_v14, %v1459_v26 }
 0x219   :  { %v316_v24 = vmul.f32 %v3560_v20, %v167_v18  ;;  %v1818_v30 = vpop.f32.mrf.mxu0  ;;  %v546_v43 = vpop.xlane.xlu1 %545  ;;  %v694_v6 = vmul.f32 %v540_v35, %v3560_v20 }
 0x21a   :  { %v968_v29 = vsub.f32 1.5, %v967_v51  ;;  %v696_v13 = vmul.f32 %v546_v43, %v3560_v20  ;;  %v1595_v14 = vadd.f32 %v3749_v32, %v1527_v7  ;;  %v4243_v55 = vadd.f32 %v3954_v33, %v1818_v30 }
 0x21b   :  { %v3174_v31 = vpop.eup %3173  ;;  %v4221_v46 = vsub.f32 %v4014_v19, %v316_v24  ;;  %v4226_v4 = vadd.f32 1e-05, %v694_v6 }
 0x21c   :  { %v975_v21 = vmul.f32 %v3174_v31, %v4199_v16  ;;  %v4228_v63 = vpop.eup %3175  ;;  %v969_v47 = vmul.f32 %v4193_v59, %v968_v29  ;;  %v4231_v54 = vadd.f32 1e-05, %v696_v13  ;;  %v1651_v34 = vpack.c.bf16 %v1595_v14, %v1594_v57 }
 0x21d   :  { %v444_v37 = vmul.f32 %v4221_v46, %v4221_v46  ;;  %v995_v32 = vmul.f32 %v4228_v63, %v4202_v25  ;;  %vm981_vm9 = vweird.f32 %v3174_v31  ;;  %v2032_v2 = vmul.f32 0.044715, %v4243_v55 }
 0x21e   :  { %v976_v3 = vmul.f32 %v3174_v31, %v975_v21  ;;  %3177 = vrsqrt.f32 %v4231_v54  ;;  %3032 = vmatmul.msk.bf16.gmra.mxu0 %vm92_vm0, %v1651_v34  ;;  %v973_v22 = vsel %vm4236_vm8, %v4193_v59, %v969_v47  ;;  %vm982_vm11 = vmor %vm980_vm10, %vm981_vm9  ;;  %v2159_v29 = vmul.f32 %v2095_v48, %v4216_v8 }
 0x21f   :  { %v996_v44 = vmul.f32 %v4228_v63, %v995_v32  ;;  %3179 = vrsqrt.f32 %v4226_v4  ;;  %v556_v60 = vsel %vm92_vm0, %v444_v37, 0.0  ;;  %v1460_v41 = vmul.f32 %v973_v22, %v3923_v5  ;;  %v4320_v22 = vld [vmem:[%s6385_s2] ss:$0 sm:$0xff] }
 0x220   :  { %v977_v12 = vmul.f32 0.5, %v976_v3  ;;  %v549_v56 = vpop.xlane.xlu2 %548  ;;  %v170_v61 = vpop.xlane.xlu0 %169  ;;  %557 = vadd.xlane.f32.xlu0 %v556_v60  ;;  %v2096_v30 = vmul.f32 %v2032_v2, %v4243_v55  ;;  %v186_v5 = vsel %vm92_vm0, %v4265_v50, 0.0  ;;  %vm1001_vm13 = vweird.f32 %v4228_v63  ;;  %v4311_v3 = vld [vmem:[%s6383_s0 + $0x100] sm:$0xff] }
 0x221   :  { %v697_v40 = vmul.f32 %v549_v56, %v3560_v20  ;;  %v176_v10 = vpop.xlane.xlu1 %175  ;;  %v317_v42 = vmul.f32 %v3560_v20, %v170_v61  ;;  %v1821_v28 = vpop.f32.mrf.mxu0  ;;  %v997_v26 = vmul.f32 0.5, %v996_v44  ;;  %vm4335_vm15 = vmor %vm1000_vm12, %vm1001_vm13  ;;  %vm990_vm1 = vweird.f32 %v4226_v4 }
 0x222   :  { %v978_v62 = vsub.f32 1.5, %v977_v12  ;;  %v319_v59 = vmul.f32 %v3560_v20, %v176_v10  ;;  %v2160_v49 = vmul.f32 %v2096_v30, %v4243_v55  ;;  %v4350_v25 = vadd.f32 %v3954_v33, %v1821_v28 }
 0x223   :  { %v4259_v53 = vadd.f32 1e-05, %v697_v40  ;;  %v4269_v51 = vsub.f32 %v4078_v9, %v317_v42  ;;  %v2223_v40 = vadd.f32 %v2159_v29, %v4216_v8  ;;  %vm1010_vm4 = vweird.f32 %v4231_v54 }
 0x224   :  { %v979_v58 = vmul.f32 %v3174_v31, %v978_v62  ;;  %v4271_v18 = vpop.eup %3177  ;;  %v4276_v16 = vsub.f32 %v4088_v52, %v319_v59  ;;  %v998_v52 = vsub.f32 1.5, %v997_v26  ;;  %v189_v59 = vsel %vm92_vm0, %v4311_v3, 0.0 }
 0x225   :  { %3181 = vrsqrt.f32 %v4259_v53  ;;  %v4278_v24 = vpop.eup %3179  ;;  %v1005_v7 = vmul.f32 %v4271_v18, %v4231_v54  ;;  %v2224_v30 = vadd.f32 %v2160_v49, %v4243_v55  ;;  %v4381_v49 = vld [vmem:[%s6389_s6] ss:$0 sm:$0xff]  ;;  %vm1020_vm5 = vweird.f32 %v4259_v53 }
 0x226   :  { %v983_v35 = vsel %vm982_vm11, %v3174_v31, %v979_v58  ;;  %v985_v57 = vmul.f32 %v4278_v24, %v4226_v4  ;;  %v447_v6 = vmul.f32 %v4276_v16, %v4276_v16  ;;  %v445_v31 = vmul.f32 %v4269_v51, %v4269_v51 }
 0x227   :  { %v1461_v9 = vmul.f32 %v983_v35, %v3964_v0  ;;  %v4298_v0 = vld [vmem:[%s6384_s1] ss:$0 sm:$0xff]  ;;  %v1006_v12 = vmul.f32 %v4271_v18, %v1005_v7  ;;  %v999_v61 = vmul.f32 %v4228_v63, %v998_v52  ;;  %vm991_vm2 = vweird.f32 %v4278_v24 }
 0x228   :  { %v4289_v43 = vpop.xlane.xlu2 %551  ;;  %v1528_v13 = vmul.f32 %v4298_v0, %v1460_v41  ;;  %v986_v14 = vmul.f32 %v4278_v24, %v985_v57  ;;  %v173_v21 = vpop.xlane.xlu0 %172  ;;  %187 = vadd.xlane.f32.xlu0 %v186_v5  ;;  %v565_v34 = vsel %vm92_vm0, %v447_v6, 0.0  ;;  %v559_v37 = vsel %vm92_vm0, %v445_v31, 0.0  ;;  %vm992_vm3 = vmor %vm990_vm1, %vm991_vm2 }
 0x229   :  { %v1529_v47 = vmul.f32 %v4298_v0, %v1461_v9  ;;  %v318_v19 = vmul.f32 %v3560_v20, %v173_v21  ;;  %v1823_v32 = vpop.f32.mrf.mxu0  ;;  %566 = vadd.xlane.f32.xlu2 %v565_v34  ;;  %560 = vadd.xlane.f32.xlu1 %v559_v37  ;;  %v1007_v4 = vmul.f32 0.5, %v1006_v12  ;;  %v2287_v5 = vmul.f32 0.7978846, %v2223_v40  ;;  %v179_v9 = vpop.xlane.xlu1 %178 }
 0x22a   :  { %v987_v56 = vmul.f32 0.5, %v986_v14  ;;  %v1596_v10 = vadd.f32 %v4320_v22, %v1528_v13  ;;  %v1003_v7 = vsel %vm4335_vm15, %v4228_v63, %v999_v61  ;;  %v4360_v57 = vadd.f32 %v3954_v33, %v1823_v32 }
 0x22b   :  { %v4314_v44 = vpop.eup %3181  ;;  %v1597_v60 = vadd.f32 %v4320_v22, %v1529_v47  ;;  %v4328_v2 = vsub.f32 %v4114_v15, %v318_v19  ;;  %v4346_v15 = vld [vmem:[%s6383_s0 + $0x110] sm:$0xff]  ;;  %v2288_v14 = vmul.f32 0.7978846, %v2224_v30  ;;  %v2033_v21 = vmul.f32 0.044715, %v4350_v25 }
 0x22c   :  { %v1015_v62 = vmul.f32 %v4314_v44, %v4259_v53  ;;  %v988_v48 = vsub.f32 1.5, %v987_v56  ;;  %v195_v29 = vsel %vm92_vm0, %v4346_v15, 0.0  ;;  %3183 = vtanh.f32 %v2287_v5 }
 0x22d   :  { %v1652_v26 = vpack.c.bf16 %v1597_v60, %v1596_v10  ;;  %v446_v58 = vmul.f32 %v4328_v2, %v4328_v2  ;;  %v320_v34 = vmul.f32 %v3560_v20, %v179_v9  ;;  %v1463_v37 = vmul.f32 %v1003_v7, %v3976_v36  ;;  %v4386_v36 = vld [vmem:[%s6383_s0 + $0x118] sm:$0xff] }
 0x22e   :  { %v1016_v41 = vmul.f32 %v4314_v44, %v1015_v62  ;;  %v989_v35 = vmul.f32 %v4278_v24, %v988_v48  ;;  %v1008_v19 = vsub.f32 1.5, %v1007_v4  ;;  %3185 = vtanh.f32 %v2288_v14 }
 0x22f   :  { %3033 = vmatmul.msk.bf16.gmra.mxu0 %vm92_vm0, %v1652_v26  ;;  %v562_v52 = vsel %vm92_vm0, %v446_v58, 0.0  ;;  %v1968_v56 = vmul.f32 0.5, %v4243_v55  ;;  %v2097_v40 = vmul.f32 %v2033_v21, %v4350_v25  ;;  %v4402_v61 = vsub.f32 %v4130_v38, %v320_v34 }
 0x230   :  { %v182_v28 = vpop.xlane.xlu2 %181  ;;  %v993_v6 = vsel %vm992_vm3, %v4278_v24, %v989_v35  ;;  %v1017_v31 = vmul.f32 0.5, %v1016_v41  ;;  %190 = vadd.xlane.f32.xlu0 %v189_v59  ;;  %v1967_v24 = vmul.f32 0.5, %v4216_v8  ;;  %v4397_v8 = vld [vmem:[%s6383_s0 + $0x108] sm:$0xff]  ;;  %v4406_v10 = vmul.f32 %v4271_v18, %v1008_v19 }
 0x231   :  { %v321_v13 = vmul.f32 %v3560_v20, %v182_v28  ;;  %v1462_v63 = vmul.f32 %v993_v6, %v4020_v23  ;;  %v1826_v47 = vpop.f32.mrf.mxu0  ;;  %196 = vadd.xlane.f32.xlu2 %v195_v29  ;;  %563 = vadd.xlane.f32.xlu1 %v562_v52  ;;  %v2034_v23 = vmul.f32 0.044715, %v4360_v57  ;;  %vm1021_vm6 = vweird.f32 %v4314_v44  ;;  %v3385_v52 = vld [vmem:[%s6383_s0] sm:$0xff] }
 0x232   :  { %v4389_v12 = vadd.f32 %v3954_v33, %v1826_v47  ;;  %v198_v42 = vsel %vm92_vm0, %v4386_v36, 0.0  ;;  %v1531_v48 = vmul.f32 %v4298_v0, %v1463_v37  ;;  %v3184_v59 = vpop.eup %3183  ;;  %v192_v4 = vsel %vm92_vm0, %v4397_v8, 0.0  ;;  %vm4424_vm7 = vmor %vm1020_vm5, %vm1021_vm6  ;;  %v4446_v37 = vld [vmem:[%s6383_s0 + $0x120] sm:$0xff] }
 0x233   :  { %v4373_v32 = vsub.f32 %v4163_v27, %v321_v13  ;;  %v1018_v27 = vsub.f32 1.5, %v1017_v31  ;;  %v1530_v62 = vmul.f32 %v4298_v0, %v1462_v63  ;;  %v2098_v41 = vmul.f32 %v2034_v23, %v4360_v57 }
 0x234   :  { %v3186_v35 = vpop.eup %3185  ;;  %v2035_v5 = vmul.f32 0.044715, %v4389_v12  ;;  %v2415_v9 = vadd.f32 1.0, %v3184_v59  ;;  %v448_v14 = vmul.f32 %v4402_v61, %v4402_v61  ;;  %vm1011_vm8 = vweird.f32 %v4271_v18 }
 0x235   :  { %v449_v60 = vmul.f32 %v4373_v32, %v4373_v32  ;;  %v2711_v55 = vpop.f32.mrf.mxu1  ;;  %v1019_v30 = vmul.f32 %v4314_v44, %v1018_v27  ;;  %v2416_v29 = vadd.f32 1.0, %v3186_v35  ;;  %v1598_v13 = vadd.f32 %v4320_v22, %v1530_v62  ;;  %vm4461_vm9 = vmor %vm1010_vm4, %vm1011_vm8 }
 0x236   :  { %v2712_v26 = vadd.f32 %v4381_v49, %v2711_v55  ;;  %v1599_v21 = vadd.f32 %v4320_v22, %v1531_v48  ;;  %v2479_v47 = vmul.f32 %v2415_v9, %v1967_v24  ;;  %v2161_v19 = vmul.f32 %v2097_v40, %v4350_v25 }
 0x237   :  { %v571_v58 = vsel %vm92_vm0, %v449_v60, 0.0  ;;  %v2480_v34 = vmul.f32 %v2416_v29, %v1968_v56  ;;  %v1023_v23 = vsel %vm4424_vm7, %v4314_v44, %v1019_v30  ;;  %v2099_v27 = vmul.f32 %v2035_v5, %v4389_v12  ;;  %v3386_v30 = vld [vmem:[%s6383_s0 + $0x8] sm:$0xff] }
 0x238   :  { %v185_v38 = vpop.xlane.xlu2 %184  ;;  %v2871_v6 = vadd.f32 %v3385_v52, %v2712_v26  ;;  %199 = vadd.xlane.f32.xlu0 %v198_v42  ;;  %v1653_v62 = vpack.c.bf16 %v1599_v21, %v1598_v13  ;;  %v2225_v55 = vadd.f32 %v2161_v19, %v4350_v25  ;;  %v201_v59 = vsel %vm92_vm0, %v4446_v37, 0.0  ;;  %v4499_v52 = vld [vmem:[%s6383_s0 + $0x128] sm:$0xff] }
 0x239   :  { %v322_v7 = vmul.f32 %v3560_v20, %v185_v38  ;;  %v1828_v31 = vpop.f32.mrf.mxu0  ;;  %572 = vadd.xlane.f32.xlu2 %v571_v58  ;;  %193 = vadd.xlane.f32.xlu1 %v192_v4  ;;  %v2540_v40 = vpack.c.bf16 %v2480_v34, %v2479_v47  ;;  %v1013_v4 = vsel %vm4461_vm9, %v4271_v18, %v4406_v10  ;;  %v4494_v10 = vld [vmem:[%s6383_s0 + $0x138] sm:$0xff]  ;;  %v204_v34 = vsel %vm92_vm0, %v4499_v52, 0.0 }
 0x23a   :  { %v4439_v63 = vadd.f32 %v3954_v33, %v1828_v31  ;;  %2935 = vst.msk [vmem:[#allocation2] sm:$0xff] %vm92_vm0, %v2871_v6  ;;  %v2289_v38 = vmul.f32 0.7978846, %v2225_v55  ;;  %v1465_v35 = vmul.f32 %v1023_v23, %v4073_v1  ;;  %v1464_v29 = vmul.f32 %v1013_v4, %v4006_v17 }
 0x23b   :  { %v4436_v53 = vsub.f32 %v4176_v45, %v322_v7  ;;  %v2162_v45 = vmul.f32 %v2098_v41, %v4360_v57  ;;  %v568_v41 = vsel %vm92_vm0, %v448_v14, 0.0  ;;  %3076 = vmatmul.msk.bf16.gmra.mxu1 %vm2605_vm14, %v2540_v40  ;;  %v2163_v7 = vmul.f32 %v2099_v27, %v4389_v12 }
 0x23c   :  { %v2036_v24 = vmul.f32 0.044715, %v4439_v63  ;;  %3187 = vtanh.f32 %v2289_v38  ;;  %v1533_v17 = vmul.f32 %v4298_v0, %v1465_v35  ;;  %v210_v47 = vsel %vm92_vm0, %v4494_v10, 0.0 }
 0x23d   :  { %v450_v56 = vmul.f32 %v4436_v53, %v4436_v53  ;;  %v2226_v44 = vadd.f32 %v2162_v45, %v4360_v57  ;;  %v2713_v48 = vpop.f32.mrf.mxu1  ;;  %v2227_v6 = vadd.f32 %v2163_v7, %v4389_v12  ;;  %v1532_v19 = vmul.f32 %v4298_v0, %v1464_v29 }
 0x23e   :  { %v2100_v42 = vmul.f32 %v2036_v24, %v4439_v63  ;;  %v2714_v54 = vadd.f32 %v4381_v49, %v2713_v48  ;;  %v1969_v27 = vmul.f32 0.5, %v4350_v25  ;;  %v1970_v60 = vmul.f32 0.5, %v4360_v57 }
 0x23f   :  { %3034 = vmatmul.msk.bf16.gmra.mxu0 %vm92_vm0, %v1653_v62  ;;  %v574_v26 = vsel %vm92_vm0, %v450_v56, 0.0  ;;  %v2290_v58 = vmul.f32 0.7978846, %v2226_v44  ;;  %v2291_v56 = vmul.f32 0.7978846, %v2227_v6  ;;  %v3387_v62 = vld [vmem:[%s6383_s0 + $0x10] sm:$0xff]  ;;  %v1600_v57 = vadd.f32 %v4320_v22, %v1532_v19 }
 0x240   :  { %v2872_v5 = vadd.f32 %v3386_v30, %v2714_v54  ;;  %202 = vadd.xlane.f32.xlu0 %v201_v59  ;;  %v2164_v28 = vmul.f32 %v2100_v42, %v4439_v63  ;;  %v1601_v42 = vadd.f32 %v4320_v22, %v1533_v17 }
 0x241   :  { %v1831_v9 = vpop.f32.mrf.mxu0  ;;  %575 = vadd.xlane.f32.xlu2 %v574_v26  ;;  %569 = vadd.xlane.f32.xlu1 %v568_v41  ;;  %3189 = vtanh.f32 %v2290_v58  ;;  %v4523_v26 = vld [vmem:[%s6383_s0 + $0x130] sm:$0xff] }
 0x242   :  { %2936 = vst.msk [vmem:[#allocation2 + $0x8] sm:$0xff] %vm92_vm0, %v2872_v5  ;;  %v2228_v1 = vadd.f32 %v2164_v28, %v4439_v63  ;;  %v4489_v18 = vadd.f32 %v3954_v33, %v1831_v9  ;;  %v3188_v14 = vpop.eup %3187  ;;  %v1654_v58 = vpack.c.bf16 %v1601_v42, %v1600_v57  ;;  %v207_v30 = vsel %vm92_vm0, %v4523_v26, 0.0  ;;  %v3388_v28 = vld [vmem:[%s6383_s0 + $0x18] sm:$0xff] }
 0x243   :  { %v2417_v24 = vadd.f32 1.0, %v3188_v14 }
 0x244   :  { %v2292_v13 = vmul.f32 0.7978846, %v2228_v1  ;;  %v2037_v23 = vmul.f32 0.044715, %v4489_v18  ;;  %v1973_v57 = vmul.f32 0.5, %v4489_v18 }
 0x245   :  { %v2716_v31 = vpop.f32.mrf.mxu1  ;;  %v2481_v59 = vmul.f32 %v2417_v24, %v1969_v27  ;;  %v3389_v24 = vld [vmem:[%s6383_s0 + $0x20] sm:$0xff] }
 0x246   :  { %v2717_v21 = vadd.f32 %v4381_v49, %v2716_v31  ;;  %3191 = vtanh.f32 %v2292_v13  ;;  %v2101_v41 = vmul.f32 %v2037_v23, %v4489_v18  ;;  %v1972_v13 = vmul.f32 0.5, %v4439_v63 }
 0x247   :  { %v3190_v45 = vpop.eup %3189  ;;  %3193 = vtanh.f32 %v2291_v56 }
 0x248   :  { %v2418_v40 = vadd.f32 1.0, %v3190_v45  ;;  %v2873_v55 = vadd.f32 %v3387_v62, %v2717_v21  ;;  %v2165_v9 = vmul.f32 %v2101_v41, %v4489_v18  ;;  %v3390_v62 = vld [vmem:[%s6383_s0 + $0x28] sm:$0xff] }
 0x249   :  { %v1833_v44 = vpop.f32.mrf.mxu0  ;;  %211 = vadd.xlane.f32.xlu2 %v210_v47  ;;  %205 = vadd.xlane.f32.xlu1 %v204_v34  ;;  %v1971_v34 = vmul.f32 0.5, %v4389_v12 }
 0x24a   :  { %v1834_v48 = vadd.f32 %v3954_v33, %v1833_v44  ;;  %v2482_v25 = vmul.f32 %v2418_v40, %v1970_v60  ;;  %2937 = vst.msk [vmem:[#allocation2 + $0x10] sm:$0xff] %vm92_vm0, %v2873_v55  ;;  %v2229_v31 = vadd.f32 %v2165_v9, %v4489_v18 }
 0x24c   :  { %v2038_v54 = vmul.f32 0.044715, %v1834_v48  ;;  %v2541_v38 = vpack.c.bf16 %v2482_v25, %v2481_v59  ;;  %v3192_v5 = vpop.eup %3191  ;;  %v2293_v23 = vmul.f32 0.7978846, %v2229_v31  ;;  %v1974_v59 = vmul.f32 0.5, %v1834_v48 }
 0x24d   :  { %v2718_v33 = vpop.f32.mrf.mxu1  ;;  %v3194_v1 = vpop.eup %3193  ;;  %v2420_v17 = vadd.f32 1.0, %v3192_v5 }
 0x24e   :  { %v2102_v4 = vmul.f32 %v2038_v54, %v1834_v48  ;;  %3077 = vmatmul.msk.bf16.gmra.mxu1 %vm2605_vm14, %v2541_v38  ;;  %v2719_v35 = vadd.f32 %v4381_v49, %v2718_v33  ;;  %v2419_v14 = vadd.f32 1.0, %v3194_v1 }
 0x24f   :  { %3035 = vmatmul.msk.bf16.gmra.mxu0 %vm92_vm0, %v1654_v58  ;;  %v2484_v19 = vmul.f32 %v2420_v17, %v1972_v13  ;;  %v698_v58 = vmul.f32 %v4289_v43, %v3560_v20 }
 0x250   :  { %v2166_v7 = vmul.f32 %v2102_v4, %v1834_v48  ;;  %v2874_v29 = vadd.f32 %v3388_v28, %v2719_v35  ;;  %v2483_v27 = vmul.f32 %v2419_v14, %v1971_v34 }
 0x251   :  { %208 = vadd.xlane.f32.xlu1 %v207_v30  ;;  %v762_v4 = vadd.f32 1e-05, %v698_v58 }
 0x252   :  { %v2230_v6 = vadd.f32 %v2166_v7, %v1834_v48  ;;  %2938 = vst.msk [vmem:[#allocation2 + $0x18] sm:$0xff] %vm92_vm0, %v2874_v29  ;;  %v2542_v60 = vpack.c.bf16 %v2484_v19, %v2483_v27 }
 0x253   :  { %vm1030_vm10 = vweird.f32 %v762_v4 }
 0x254   :  { %v2294_v47 = vmul.f32 0.7978846, %v2230_v6 }
 0x255   :  { %v2721_v21 = vpop.f32.mrf.mxu1 }
 0x256   :  { %v2722_v45 = vadd.f32 %v4381_v49, %v2721_v21  ;;  %3195 = vtanh.f32 %v2294_v47 }
 0x257   :  { %3197 = vtanh.f32 %v2293_v23 }
 0x258   :  { %v2875_v56 = vadd.f32 %v3389_v24, %v2722_v45  ;;  %3199 = vrsqrt.f32 %v762_v4  ;;  %v4559_v45 = vld [vmem:[%s6387_s4] ss:$0 sm:$0xff] }
 0x25a   :  { %2939 = vst.msk [vmem:[#allocation2 + $0x20] sm:$0xff] %vm92_vm0, %v2875_v56 }
 0x25c   :  { %v3196_v40 = vpop.eup %3195 }
 0x25d   :  { %v2723_v63 = vpop.f32.mrf.mxu1  ;;  %v3198_v44 = vpop.eup %3197  ;;  %v2422_v42 = vadd.f32 1.0, %v3196_v40 }
 0x25e   :  { %3078 = vmatmul.msk.bf16.gmra.mxu1 %vm2605_vm14, %v2542_v60  ;;  %v2724_v12 = vadd.f32 %v4381_v49, %v2723_v63  ;;  %v2421_v25 = vadd.f32 1.0, %v3198_v44  ;;  %v3200_v33 = vpop.eup %3199 }
 0x25f   :  { %v2486_v41 = vmul.f32 %v2422_v42, %v1974_v59  ;;  %v1025_v35 = vmul.f32 %v3200_v33, %v762_v4  ;;  %vm1031_vm11 = vweird.f32 %v3200_v33 }
 0x260   :  { %v2876_v55 = vadd.f32 %v3390_v62, %v2724_v12  ;;  %v2485_v54 = vmul.f32 %v2421_v25, %v1973_v57  ;;  %vm1032_vm12 = vmor %vm1030_vm10, %vm1031_vm11 }
 0x261   :  { %v1026_v30 = vmul.f32 %v3200_v33, %v1025_v35 }
 0x262   :  { %2940 = vst.msk [vmem:[#allocation2 + $0x28] sm:$0xff] %vm92_vm0, %v2876_v55  ;;  %v2543_v38 = vpack.c.bf16 %v2486_v41, %v2485_v54 }
 0x263   :  { %v1027_v48 = vmul.f32 0.5, %v1026_v30 }
 0x265   :  { %v1028_v18 = vsub.f32 1.5, %v1027_v48 }
 0x267   :  { %v1029_v1 = vmul.f32 %v3200_v33, %v1028_v18 }
 0x269   :  { %v1033_v13 = vsel %vm1032_vm12, %v3200_v33, %v1029_v1 }
 0x26a   :  { %v1466_v47 = vmul.f32 %v1033_v13, %v4108_v11 }
 0x26c   :  { %v1534_v59 = vmul.f32 %v4298_v0, %v1466_v47 }
 0x26e   :  { %3079 = vmatmul.msk.bf16.gmra.mxu1 %vm2605_vm14, %v2543_v38  ;;  %v1602_v30 = vadd.f32 %v4320_v22, %v1534_v59 }
 0x28b   :  { %v555_v5 = vpop.xlane.xlu0 %554 }
 0x28c   :  { %v699_v9 = vmul.f32 %v555_v5, %v3560_v20 }
 0x28e   :  { %v763_v7 = vadd.f32 1e-05, %v699_v9 }
 0x290   :  { %3201 = vrsqrt.f32 %v763_v7  ;;  %vm1040_vm13 = vweird.f32 %v763_v7 }
 0x293   :  { %v558_v28 = vpop.xlane.xlu0 %557 }
 0x294   :  { %v700_v6 = vmul.f32 %v558_v28, %v3560_v20 }
 0x296   :  { %v3202_v29 = vpop.eup %3201  ;;  %v764_v17 = vadd.f32 1e-05, %v700_v6 }
 0x297   :  { %v1035_v43 = vmul.f32 %v3202_v29, %v763_v7  ;;  %vm1041_vm15 = vweird.f32 %v3202_v29 }
 0x298   :  { %3203 = vrsqrt.f32 %v764_v17  ;;  %vm1042_vm1 = vmor %vm1040_vm13, %vm1041_vm15  ;;  %vm1050_vm2 = vweird.f32 %v764_v17 }
 0x299   :  { %v1036_v31 = vmul.f32 %v3202_v29, %v1035_v43 }
 0x29b   :  { %v1037_v14 = vmul.f32 0.5, %v1036_v31  ;;  %v1836_v21 = vpop.f32.mrf.mxu0  ;;  %v188_v19 = vpop.xlane.xlu0 %187 }
 0x29c   :  { %v4562_v23 = vadd.f32 %v4559_v45, %v1836_v21  ;;  %v567_v27 = vpop.xlane.xlu2 %566  ;;  %v561_v24 = vpop.xlane.xlu1 %560  ;;  %v323_v56 = vmul.f32 %v3560_v20, %v188_v19 }
 0x29d   :  { %v1038_v34 = vsub.f32 1.5, %v1037_v14  ;;  %v703_v63 = vmul.f32 %v567_v27, %v3560_v20  ;;  %v701_v11 = vmul.f32 %v561_v24, %v3560_v20 }
 0x29e   :  { %v2039_v12 = vmul.f32 0.044715, %v4562_v23  ;;  %v4568_v40 = vpop.eup %3203  ;;  %v4571_v62 = vsub.f32 %v4265_v50, %v323_v56 }
 0x29f   :  { %v1039_v60 = vmul.f32 %v3202_v29, %v1038_v34  ;;  %v1045_v44 = vmul.f32 %v4568_v40, %v764_v17  ;;  %v4574_v42 = vadd.f32 1e-05, %v703_v63  ;;  %v4578_v57 = vadd.f32 1e-05, %v701_v11 }
 0x2a0   :  { %v451_v41 = vmul.f32 %v4571_v62, %v4571_v62  ;;  %v2103_v50 = vmul.f32 %v2039_v12, %v4562_v23  ;;  %vm1051_vm3 = vweird.f32 %v4568_v40 }
 0x2a1   :  { %v1043_v55 = vsel %vm1042_vm1, %v3202_v29, %v1039_v60  ;;  %v1046_v54 = vmul.f32 %v4568_v40, %v1045_v44  ;;  %3205 = vrsqrt.f32 %v4574_v42  ;;  %vm4613_vm4 = vmor %vm1050_vm2, %vm1051_vm3  ;;  %vm1080_vm6 = vweird.f32 %v4574_v42 }
 0x2a2   :  { %v1467_v25 = vmul.f32 %v1043_v55, %v4196_v39  ;;  %3207 = vrsqrt.f32 %v4578_v57  ;;  %v577_v38 = vsel %vm92_vm0, %v451_v41, 0.0  ;;  %v2167_v1 = vmul.f32 %v2103_v50, %v4562_v23 }
 0x2a3   :  { %v1838_v58 = vpop.f32.mrf.mxu0  ;;  %v1047_v33 = vmul.f32 0.5, %v1046_v54  ;;  %578 = vadd.xlane.f32.xlu0 %v577_v38  ;;  %v191_v39 = vpop.xlane.xlu0 %190  ;;  %vm1060_vm7 = vweird.f32 %v4578_v57 }
 0x2a4   :  { %v1535_v4 = vmul.f32 %v4298_v0, %v1467_v25  ;;  %v4589_v35 = vadd.f32 %v4559_v45, %v1838_v58  ;;  %v197_v5 = vpop.xlane.xlu2 %196  ;;  %v564_v9 = vpop.xlane.xlu1 %563  ;;  %v324_v48 = vmul.f32 %v3560_v20, %v191_v39  ;;  %v2231_v24 = vadd.f32 %v2167_v1, %v4562_v23 }
 0x2a5   :  { %v1048_v18 = vsub.f32 1.5, %v1047_v33  ;;  %v326_v28 = vmul.f32 %v3560_v20, %v197_v5  ;;  %v702_v29 = vmul.f32 %v564_v9, %v3560_v20 }
 0x2a6   :  { %v1603_v7 = vadd.f32 %v4320_v22, %v1535_v4  ;;  %v4599_v6 = vsub.f32 %v4311_v3, %v324_v48  ;;  %v2040_v47 = vmul.f32 0.044715, %v4589_v35  ;;  %v2295_v58 = vmul.f32 0.7978846, %v2231_v24 }
 0x2a7   :  { %v4601_v31 = vpop.eup %3205  ;;  %v1049_v13 = vmul.f32 %v4568_v40, %v1048_v18  ;;  %v4605_v14 = vsub.f32 %v4346_v15, %v326_v28  ;;  %v4607_v21 = vadd.f32 1e-05, %v702_v29 }
 0x2a8   :  { %v1655_v43 = vpack.c.bf16 %v1603_v7, %v1602_v30  ;;  %v3208_v34 = vpop.eup %3207  ;;  %v1075_v3 = vmul.f32 %v4601_v31, %v4574_v42  ;;  %v452_v15 = vmul.f32 %v4599_v6, %v4599_v6  ;;  %v2104_v11 = vmul.f32 %v2040_v47, %v4589_v35  ;;  %v4644_v30 = vld [vmem:[%s6383_s0 + $0x148] sm:$0xff] }
 0x2a9   :  { %v1055_v27 = vmul.f32 %v3208_v34, %v4578_v57  ;;  %3209 = vrsqrt.f32 %v4607_v21  ;;  %v454_v56 = vmul.f32 %v4605_v14, %v4605_v14  ;;  %v1053_v60 = vsel %vm4613_vm4, %v4568_v40, %v1049_v13 }
 0x2aa   :  { %3036 = vmatmul.msk.bf16.gmra.mxu0 %vm92_vm0, %v1655_v43  ;;  %v1076_v17 = vmul.f32 %v4601_v31, %v1075_v3  ;;  %v580_v12 = vsel %vm92_vm0, %v452_v15, 0.0  ;;  %v1468_v4 = vmul.f32 %v1053_v60, %v4221_v46  ;;  %vm1061_vm5 = vweird.f32 %v3208_v34 }
 0x2ab   :  { %v1056_v63 = vmul.f32 %v3208_v34, %v1055_v27  ;;  %v200_v55 = vpop.xlane.xlu0 %199  ;;  %v586_v59 = vsel %vm92_vm0, %v454_v56, 0.0  ;;  %581 = vadd.xlane.f32.xlu0 %v580_v12  ;;  %v2168_v46 = vmul.f32 %v2104_v11, %v4589_v35  ;;  %v216_v28 = vsel %vm92_vm0, %v4644_v30, 0.0  ;;  %vm1062_vm8 = vmor %vm1060_vm7, %vm1061_vm5 }
 0x2ac   :  { %v1841_v44 = vpop.f32.mrf.mxu0  ;;  %v573_v25 = vpop.xlane.xlu2 %572  ;;  %v327_v54 = vmul.f32 %v3560_v20, %v200_v55  ;;  %587 = vadd.xlane.f32.xlu2 %v586_v59  ;;  %v1077_v33 = vmul.f32 0.5, %v1076_v17  ;;  %v1536_v43 = vmul.f32 %v4298_v0, %v1468_v4  ;;  %vm1081_vm9 = vweird.f32 %v4601_v31 }
 0x2ad   :  { %v194_v41 = vpop.xlane.xlu1 %193  ;;  %v1057_v50 = vmul.f32 0.5, %v1056_v63  ;;  %v705_v38 = vmul.f32 %v573_v25, %v3560_v20  ;;  %v2232_v15 = vadd.f32 %v2168_v46, %v4589_v35  ;;  %vm4705_vm11 = vmor %vm1080_vm6, %vm1081_vm9  ;;  %vm1070_vm12 = vweird.f32 %v4607_v21 }
 0x2ae   :  { %v325_v40 = vmul.f32 %v3560_v20, %v194_v41  ;;  %v4639_v39 = vsub.f32 %v4386_v36, %v327_v54  ;;  %v1604_v25 = vadd.f32 %v4320_v22, %v1536_v43  ;;  %v4686_v41 = vld [vmem:[%s6383_s0 + $0x140] sm:$0xff] }
 0x2af   :  { %v4646_v5 = vpop.eup %3209  ;;  %v1058_v9 = vsub.f32 1.5, %v1057_v50  ;;  %v4648_v48 = vadd.f32 1e-05, %v705_v38  ;;  %v2296_v12 = vmul.f32 0.7978846, %v2232_v15  ;;  %v4699_v38 = vld [vmem:[%s6383_s0 + $0x150] sm:$0xff] }
 0x2b0   :  { %v4651_v7 = vsub.f32 %v4397_v8, %v325_v40  ;;  %v1065_v36 = vmul.f32 %v4646_v5, %v4607_v21  ;;  %v1078_v8 = vsub.f32 1.5, %v1077_v33  ;;  %v455_v57 = vmul.f32 %v4639_v39, %v4639_v39 }
 0x2b1   :  { %v1059_v18 = vmul.f32 %v3208_v34, %v1058_v9  ;;  %3211 = vrsqrt.f32 %v4648_v48  ;;  %vm1071_vm10 = vweird.f32 %v4646_v5  ;;  %v213_v42 = vsel %vm92_vm0, %v4686_v41, 0.0 }
 0x2b2   :  { %v453_v29 = vmul.f32 %v4651_v7, %v4651_v7  ;;  %v1066_v1 = vmul.f32 %v4646_v5, %v1065_v36  ;;  %3213 = vtanh.f32 %v2295_v58  ;;  %v589_v60 = vsel %vm92_vm0, %v455_v57, 0.0  ;;  %vm4719_vm13 = vmor %vm1070_vm12, %vm1071_vm10 }
 0x2b3   :  { %v1063_v13 = vsel %vm1062_vm8, %v3208_v34, %v1059_v18  ;;  %v203_v19 = vpop.xlane.xlu0 %202  ;;  %v4677_v34 = vadd.f32 %v4559_v45, %v1841_v44  ;;  %590 = vadd.xlane.f32.xlu0 %v589_v60  ;;  %3215 = vtanh.f32 %v2296_v12  ;;  %v219_v18 = vsel %vm92_vm0, %v4699_v38, 0.0 }
 0x2b4   :  { %v583_v47 = vsel %vm92_vm0, %v453_v29, 0.0  ;;  %v1843_v3 = vpop.f32.mrf.mxu0  ;;  %v1469_v27 = vmul.f32 %v1063_v13, %v4269_v51  ;;  %v1067_v24 = vmul.f32 0.5, %v1066_v1  ;;  %v4671_v17 = vpop.xlane.xlu2 %575  ;;  %v328_v63 = vmul.f32 %v3560_v20, %v203_v19  ;;  %217 = vadd.xlane.f32.xlu2 %v216_v28 }
 0x2b5   :  { %584 = vadd.xlane.f32.xlu1 %v583_v47  ;;  %v570_v56 = vpop.xlane.xlu1 %569  ;;  %v1079_v51 = vmul.f32 %v4601_v31, %v1078_v8  ;;  %v4713_v4 = vadd.f32 %v4559_v45, %v1843_v3  ;;  %v2041_v43 = vmul.f32 0.044715, %v4677_v34  ;;  %vm1100_vm15 = vweird.f32 %v4648_v48 }
 0x2b6   :  { %v704_v11 = vmul.f32 %v570_v56, %v3560_v20  ;;  %v1068_v55 = vsub.f32 1.5, %v1067_v24  ;;  %v1537_v59 = vmul.f32 %v4298_v0, %v1469_v27  ;;  %v4694_v50 = vsub.f32 %v4446_v37, %v328_v63 }
 0x2b7   :  { %v4688_v54 = vpop.eup %3211  ;;  %v1083_v28 = vsel %vm4705_vm11, %v4601_v31, %v1079_v51  ;;  %v2042_v47 = vmul.f32 0.044715, %v4713_v4  ;;  %v2105_v40 = vmul.f32 %v2041_v43, %v4677_v34 }
 0x2b8   :  { %v4691_v44 = vadd.f32 1e-05, %v704_v11  ;;  %v1069_v58 = vmul.f32 %v4646_v5, %v1068_v55  ;;  %v1095_v37 = vmul.f32 %v4688_v54, %v4648_v48  ;;  %v1605_v33 = vadd.f32 %v4320_v22, %v1537_v59  ;;  %v3214_v9 = vpop.eup %3213  ;;  %v2726_v8 = vpop.f32.mrf.mxu1  ;;  %v3392_v11 = vld [vmem:[%s6383_s0 + $0x30] sm:$0xff] }
 0x2b9   :  { %v456_v1 = vmul.f32 %v4694_v50, %v4694_v50  ;;  %v2727_v13 = vadd.f32 %v4381_v49, %v2726_v8  ;;  %v3216_v3 = vpop.eup %3215  ;;  %v2423_v56 = vadd.f32 1.0, %v3214_v9  ;;  %v1471_v60 = vmul.f32 %v1083_v28, %v4276_v16  ;;  %v4758_v16 = vld [vmem:[%s6383_s0 + $0x158] sm:$0xff] }
 0x2ba   :  { %3217 = vrsqrt.f32 %v4691_v44  ;;  %v1656_v36 = vpack.c.bf16 %v1605_v33, %v1604_v25  ;;  %v1073_v21 = vsel %vm4719_vm13, %v4646_v5, %v1069_v58  ;;  %v1096_v29 = vmul.f32 %v4688_v54, %v1095_v37 }
 0x2bb   :  { %v1975_v5 = vmul.f32 0.5, %v4562_v23  ;;  %v592_v24 = vsel %vm92_vm0, %v456_v1, 0.0  ;;  %v1470_v63 = vmul.f32 %v1073_v21, %v4328_v2  ;;  %v2877_v12 = vadd.f32 %v3392_v11, %v2727_v13 }
 0x2bc   :  { %v1846_v57 = vpop.f32.mrf.mxu0  ;;  %3037 = vmatmul.msk.bf16.gmra.mxu0 %vm92_vm0, %v1656_v36  ;;  %v212_v31 = vpop.xlane.xlu2 %211  ;;  %220 = vadd.xlane.f32.xlu2 %v219_v18  ;;  %v2424_v23 = vadd.f32 1.0, %v3216_v3  ;;  %v1097_v51 = vmul.f32 0.5, %v1096_v29  ;;  %v1976_v25 = vmul.f32 0.5, %v4589_v35  ;;  %v1539_v36 = vmul.f32 %v4298_v0, %v1471_v60  ;;  %v3393_v3 = vld [vmem:[%s6383_s0 + $0x38] sm:$0xff] }
 0x2bd   :  { %214 = vadd.xlane.f32.xlu1 %v213_v42  ;;  %v206_v19 = vpop.xlane.xlu1 %205  ;;  %v331_v15 = vmul.f32 %v3560_v20, %v212_v31  ;;  %593 = vadd.xlane.f32.xlu0 %v592_v24  ;;  %2941 = vst.msk [vmem:[#allocation2 + $0x30] sm:$0xff] %vm92_vm0, %v2877_v12  ;;  %v2487_v58 = vmul.f32 %v2423_v56, %v1975_v5  ;;  %v222_v42 = vsel %vm92_vm0, %v4758_v16, 0.0  ;;  %vm1090_vm1 = vweird.f32 %v4691_v44 }
 0x2be   :  { %v329_v27 = vmul.f32 %v3560_v20, %v206_v19  ;;  %v2488_v37 = vmul.f32 %v2424_v23, %v1976_v25  ;;  %v1538_v46 = vmul.f32 %v4298_v0, %v1470_v63  ;;  %v1098_v18 = vsub.f32 1.5, %v1097_v51 }
 0x2bf   :  { %v4749_v55 = vsub.f32 %v4494_v10, %v331_v15  ;;  %v2106_v10 = vmul.f32 %v2042_v47, %v4713_v4  ;;  %vm1101_vm3 = vweird.f32 %v4688_v54  ;;  %v2169_v63 = vmul.f32 %v2105_v40, %v4677_v34  ;;  %v4818_v40 = vld [vmem:[%s6383_s0 + $0x160] sm:$0xff] }
 0x2c0   :  { %v4752_v59 = vsub.f32 %v4499_v52, %v329_v27  ;;  %v4760_v2 = vpop.eup %3217  ;;  %v4767_v52 = vadd.f32 %v4559_v45, %v1846_v57  ;;  %v2728_v21 = vpop.f32.mrf.mxu1  ;;  %v2544_v29 = vpack.c.bf16 %v2488_v37, %v2487_v58  ;;  %v1606_v24 = vadd.f32 %v4320_v22, %v1538_v46  ;;  %vm4824_vm5 = vmor %vm1100_vm15, %vm1101_vm3 }
 0x2c1   :  { %v1085_v35 = vmul.f32 %v4760_v2, %v4691_v44  ;;  %v459_v33 = vmul.f32 %v4749_v55, %v4749_v55  ;;  %v2729_v57 = vadd.f32 %v4381_v49, %v2728_v21  ;;  %vm1091_vm2 = vweird.f32 %v4760_v2 }
 0x2c2   :  { %v457_v9 = vmul.f32 %v4752_v59, %v4752_v59  ;;  %v2043_v43 = vmul.f32 0.044715, %v4767_v52  ;;  %3080 = vmatmul.msk.bf16.gmra.mxu1 %vm2605_vm14, %v2544_v29  ;;  %v2170_v11 = vmul.f32 %v2106_v10, %v4713_v4  ;;  %v1099_v12 = vmul.f32 %v4688_v54, %v1098_v18  ;;  %vm4807_vm4 = vmor %vm1090_vm1, %vm1091_vm2 }
 0x2c3   :  { %v1086_v28 = vmul.f32 %v4760_v2, %v1085_v35  ;;  %v601_v8 = vsel %vm92_vm0, %v459_v33, 0.0  ;;  %v2878_v15 = vadd.f32 %v3393_v3, %v2729_v57  ;;  %v1607_v25 = vadd.f32 %v4320_v22, %v1539_v36  ;;  %v3394_v57 = vld [vmem:[%s6383_s0 + $0x40] sm:$0xff] }
 0x2c4   :  { %v1848_v1 = vpop.f32.mrf.mxu0  ;;  %v595_v13 = vsel %vm92_vm0, %v457_v9, 0.0  ;;  %602 = vadd.xlane.f32.xlu2 %v601_v8  ;;  %v2107_v51 = vmul.f32 %v2043_v43, %v4767_v52  ;;  %v2233_v58 = vadd.f32 %v2169_v63, %v4677_v34  ;;  %v2234_v37 = vadd.f32 %v2170_v11, %v4713_v4 }
 0x2c5   :  { %v209_v47 = vpop.xlane.xlu1 %208  ;;  %v4785_v31 = vadd.f32 %v4559_v45, %v1848_v1  ;;  %v1087_v19 = vmul.f32 0.5, %v1086_v28  ;;  %596 = vadd.xlane.f32.xlu1 %v595_v13  ;;  %223 = vadd.xlane.f32.xlu0 %v222_v42  ;;  %2942 = vst.msk [vmem:[#allocation2 + $0x38] sm:$0xff] %vm92_vm0, %v2878_v15  ;;  %v1657_v33 = vpack.c.bf16 %v1607_v25, %v1606_v24  ;;  %v225_v46 = vsel %vm92_vm0, %v4818_v40, 0.0 }
 0x2c6   :  { %v330_v5 = vmul.f32 %v3560_v20, %v209_v47  ;;  %v2297_v18 = vmul.f32 0.7978846, %v2233_v58  ;;  %v1103_v28 = vsel %vm4824_vm5, %v4688_v54, %v1099_v12  ;;  %v2298_v29 = vmul.f32 0.7978846, %v2234_v37 }
 0x2c7   :  { %v2044_v27 = vmul.f32 0.044715, %v4785_v31  ;;  %v1088_v56 = vsub.f32 1.5, %v1087_v19  ;;  %v1473_v54 = vmul.f32 %v1103_v28, %v4373_v32  ;;  %v1977_v25 = vmul.f32 0.5, %v4677_v34 }
 0x2c8   :  { %v4798_v60 = vsub.f32 %v4523_v26, %v330_v5  ;;  %3219 = vtanh.f32 %v2297_v18  ;;  %v1978_v44 = vmul.f32 0.5, %v4713_v4 }
 0x2c9   :  { %v2108_v26 = vmul.f32 %v2044_v27, %v4785_v31  ;;  %v1089_v10 = vmul.f32 %v4760_v2, %v1088_v56  ;;  %3221 = vtanh.f32 %v2298_v29  ;;  %v1541_v63 = vmul.f32 %v4298_v0, %v1473_v54 }
 0x2ca   :  { %v458_v35 = vmul.f32 %v4798_v60, %v4798_v60 }
 0x2cb   :  { %v1093_v9 = vsel %vm4807_vm4, %v4760_v2, %v1089_v10  ;;  %v2731_v42 = vpop.f32.mrf.mxu1  ;;  %v2171_v2 = vmul.f32 %v2107_v51, %v4767_v52  ;;  %v2172_v8 = vmul.f32 %v2108_v26, %v4785_v31  ;;  %v1609_v4 = vadd.f32 %v4320_v22, %v1541_v63 }
 0x2cc   :  { %v598_v48 = vsel %vm92_vm0, %v458_v35, 0.0  ;;  %v1851_v36 = vpop.f32.mrf.mxu0  ;;  %v2732_v21 = vadd.f32 %v4381_v49, %v2731_v42  ;;  %3038 = vmatmul.msk.bf16.gmra.mxu0 %vm92_vm0, %v1657_v33  ;;  %v1472_v1 = vmul.f32 %v1093_v9, %v4402_v61  ;;  %v4859_v61 = vld [vmem:[%s6383_s0 + $0x168] sm:$0xff] }
 0x2cd   :  { %599 = vadd.xlane.f32.xlu1 %v598_v48  ;;  %226 = vadd.xlane.f32.xlu0 %v225_v46  ;;  %v4852_v13 = vadd.f32 %v4559_v45, %v1851_v36  ;;  %v2236_v47 = vadd.f32 %v2172_v8, %v4785_v31  ;;  %v2235_v19 = vadd.f32 %v2171_v2, %v4767_v52  ;;  %v228_v24 = vsel %vm92_vm0, %v4859_v61, 0.0  ;;  %v3395_v35 = vld [vmem:[%s6383_s0 + $0x48] sm:$0xff]  ;;  %v4881_v48 = vld [vmem:[%s6383_s0 + $0x170] sm:$0xff] }
 0x2ce   :  { %v2879_v43 = vadd.f32 %v3394_v57, %v2732_v21  ;;  %v1540_v5 = vmul.f32 %v4298_v0, %v1472_v1  ;;  %v3220_v15 = vpop.eup %3219  ;;  %v231_v21 = vsel %vm92_vm0, %v4881_v48, 0.0  ;;  %v3396_v1 = vld [vmem:[%s6383_s0 + $0x50] sm:$0xff] }
 0x2cf   :  { %v2300_v3 = vmul.f32 0.7978846, %v2236_v47  ;;  %v2045_v32 = vmul.f32 0.044715, %v4852_v13  ;;  %v3222_v11 = vpop.eup %3221  ;;  %v2425_v23 = vadd.f32 1.0, %v3220_v15 }
 0x2d0   :  { %2943 = vst.msk [vmem:[#allocation2 + $0x40] sm:$0xff] %vm92_vm0, %v2879_v43  ;;  %v2299_v26 = vmul.f32 0.7978846, %v2235_v19  ;;  %v2426_v10 = vadd.f32 1.0, %v3222_v11  ;;  %v1608_v0 = vadd.f32 %v4320_v22, %v1540_v5  ;;  %v1980_v19 = vmul.f32 0.5, %v4785_v31  ;;  %v3397_v11 = vld [vmem:[%s6383_s0 + $0x58] sm:$0xff] }
 0x2d1   :  { %3223 = vtanh.f32 %v2300_v3  ;;  %v2489_v33 = vmul.f32 %v2425_v23, %v1977_v25  ;;  %v2109_v42 = vmul.f32 %v2045_v32, %v4852_v13 }
 0x2d2   :  { %v2490_v9 = vmul.f32 %v2426_v10, %v1978_v44  ;;  %3225 = vtanh.f32 %v2299_v26  ;;  %v1658_v36 = vpack.c.bf16 %v1609_v4, %v1608_v0  ;;  %v3398_v44 = vld [vmem:[%s6383_s0 + $0x60] sm:$0xff]  ;;  %v3399_v4 = vld [vmem:[%s6383_s0 + $0x68] sm:$0xff] }
 0x2d3   :  { %v2733_v27 = vpop.f32.mrf.mxu1  ;;  %v2173_v22 = vmul.f32 %v2109_v42, %v4852_v13 }
 0x2d4   :  { %v1853_v56 = vpop.f32.mrf.mxu0  ;;  %v2734_v12 = vadd.f32 %v4381_v49, %v2733_v27  ;;  %v2545_v46 = vpack.c.bf16 %v2490_v9, %v2489_v33  ;;  %v1979_v27 = vmul.f32 0.5, %v4767_v52  ;;  %v1981_v33 = vmul.f32 0.5, %v4852_v13 }
 0x2d5   :  { %v1854_v51 = vadd.f32 %v4559_v45, %v1853_v56  ;;  %229 = vadd.xlane.f32.xlu1 %v228_v24  ;;  %v2237_v47 = vadd.f32 %v2173_v22, %v4852_v13 }
 0x2d6   :  { %v2880_v58 = vadd.f32 %v3395_v35, %v2734_v12  ;;  %3081 = vmatmul.msk.bf16.gmra.mxu1 %vm2605_vm14, %v2545_v46 }
 0x2d7   :  { %v2046_v37 = vmul.f32 0.044715, %v1854_v51  ;;  %v3224_v29 = vpop.eup %3223  ;;  %v2301_v56 = vmul.f32 0.7978846, %v2237_v47 }
 0x2d8   :  { %2944 = vst.msk [vmem:[#allocation2 + $0x48] sm:$0xff] %vm92_vm0, %v2880_v58  ;;  %v3226_v8 = vpop.eup %3225  ;;  %v2428_v54 = vadd.f32 1.0, %v3224_v29  ;;  %v1982_v58 = vmul.f32 0.5, %v1854_v51 }
 0x2d9   :  { %v2110_v34 = vmul.f32 %v2046_v37, %v1854_v51  ;;  %v2427_v5 = vadd.f32 1.0, %v3226_v8 }
 0x2da   :  { %v2492_v32 = vmul.f32 %v2428_v54, %v1980_v19 }
 0x2db   :  { %v2174_v18 = vmul.f32 %v2110_v34, %v1854_v51  ;;  %v2736_v28 = vpop.f32.mrf.mxu1  ;;  %v2491_v63 = vmul.f32 %v2427_v5, %v1979_v27 }
 0x2dc   :  { %v2737_v2 = vadd.f32 %v4381_v49, %v2736_v28  ;;  %3039 = vmatmul.msk.bf16.gmra.mxu0 %vm92_vm0, %v1658_v36 }
 0x2dd   :  { %232 = vadd.xlane.f32.xlu1 %v231_v21  ;;  %v2238_v43 = vadd.f32 %v2174_v18, %v1854_v51  ;;  %v2546_v23 = vpack.c.bf16 %v2492_v32, %v2491_v63  ;;  %v706_v51 = vmul.f32 %v4671_v17, %v3560_v20 }
 0x2de   :  { %v2881_v57 = vadd.f32 %v3396_v1, %v2737_v2 }
 0x2df   :  { %v2302_v3 = vmul.f32 0.7978846, %v2238_v43  ;;  %v770_v18 = vadd.f32 1e-05, %v706_v51 }
 0x2e0   :  { %2945 = vst.msk [vmem:[#allocation2 + $0x50] sm:$0xff] %vm92_vm0, %v2881_v57 }
 0x2e1   :  { %3227 = vtanh.f32 %v2302_v3  ;;  %vm1110_vm6 = vweird.f32 %v770_v18 }
 0x2e2   :  { %3229 = vtanh.f32 %v2301_v56 }
 0x2e3   :  { %v2738_v15 = vpop.f32.mrf.mxu1  ;;  %3231 = vrsqrt.f32 %v770_v18 }
 0x2e4   :  { %v2739_v24 = vadd.f32 %v4381_v49, %v2738_v15 }
 0x2e6   :  { %v2882_v12 = vadd.f32 %v3397_v11, %v2739_v24  ;;  %3082 = vmatmul.msk.bf16.gmra.mxu1 %vm2605_vm14, %v2546_v23 }
 0x2e7   :  { %v3228_v26 = vpop.eup %3227 }
 0x2e8   :  { %2946 = vst.msk [vmem:[#allocation2 + $0x58] sm:$0xff] %vm92_vm0, %v2882_v12  ;;  %v3230_v25 = vpop.eup %3229  ;;  %v2430_v35 = vadd.f32 1.0, %v3228_v26 }
 0x2e9   :  { %v2429_v37 = vadd.f32 1.0, %v3230_v25  ;;  %v3232_v13 = vpop.eup %3231 }
 0x2ea   :  { %v2494_v9 = vmul.f32 %v2430_v35, %v1982_v58  ;;  %v1105_v28 = vmul.f32 %v3232_v13, %v770_v18  ;;  %vm1111_vm7 = vweird.f32 %v3232_v13  ;;  %v4963_v18 = vld [vmem:[%s6384_s1] ss:$0 sm:$0xff] }
 0x2eb   :  { %v2741_v31 = vpop.f32.mrf.mxu1  ;;  %v2493_v34 = vmul.f32 %v2429_v37, %v1981_v33  ;;  %vm4924_vm8 = vmor %vm1110_vm6, %vm1111_vm7 }
 0x2ec   :  { %v2742_v52 = vadd.f32 %v4381_v49, %v2741_v31  ;;  %v1106_v29 = vmul.f32 %v3232_v13, %v1105_v28 }
 0x2ed   :  { %v2547_v36 = vpack.c.bf16 %v2494_v9, %v2493_v34 }
 0x2ee   :  { %v2883_v10 = vadd.f32 %v3398_v44, %v2742_v52  ;;  %v1107_v22 = vmul.f32 0.5, %v1106_v29 }
 0x2f0   :  { %2947 = vst.msk [vmem:[#allocation2 + $0x60] sm:$0xff] %vm92_vm0, %v2883_v10  ;;  %v1108_v1 = vsub.f32 1.5, %v1107_v22 }
 0x2f2   :  { %v1109_v3 = vmul.f32 %v3232_v13, %v1108_v1 }
 0x2f3   :  { %v2743_v0 = vpop.f32.mrf.mxu1 }
 0x2f4   :  { %v2744_v42 = vadd.f32 %v4381_v49, %v2743_v0  ;;  %v1113_v63 = vsel %vm4924_vm8, %v3232_v13, %v1109_v3 }
 0x2f5   :  { %v1474_v58 = vmul.f32 %v1113_v63, %v4436_v53 }
 0x2f6   :  { %v2884_v46 = vadd.f32 %v3399_v4, %v2744_v42  ;;  %3083 = vmatmul.msk.bf16.gmra.mxu1 %vm2605_vm14, %v2547_v36 }
 0x2f8   :  { %2948 = vst.msk [vmem:[#allocation2 + $0x68] sm:$0xff] %vm92_vm0, %v2884_v46 }
 0x316   :  { %v579_v21 = vpop.xlane.xlu0 %578 }
 0x317   :  { %v707_v49 = vmul.f32 %v579_v21, %v3560_v20 }
 0x319   :  { %v771_v2 = vadd.f32 1e-05, %v707_v49 }
 0x31b   :  { %3233 = vrsqrt.f32 %v771_v2  ;;  %vm1120_vm9 = vweird.f32 %v771_v2 }
 0x31e   :  { %v582_v8 = vpop.xlane.xlu0 %581 }
 0x31f   :  { %v588_v57 = vpop.xlane.xlu2 %587  ;;  %v708_v43 = vmul.f32 %v582_v8, %v3560_v20 }
 0x320   :  { %v710_v47 = vmul.f32 %v588_v57, %v3560_v20 }
 0x321   :  { %v3234_v54 = vpop.eup %3233  ;;  %v4919_v19 = vadd.f32 1e-05, %v708_v43  ;;  %v4975_v43 = vld [vmem:[%s6385_s2] ss:$0 sm:$0xff] }
 0x322   :  { %v1115_v17 = vmul.f32 %v3234_v54, %v771_v2  ;;  %v4921_v5 = vadd.f32 1e-05, %v710_v47  ;;  %vm1121_vm10 = vweird.f32 %v3234_v54 }
 0x323   :  { %3235 = vrsqrt.f32 %v4919_v19  ;;  %vm1122_vm11 = vmor %vm1120_vm9, %vm1121_vm10  ;;  %vm1130_vm12 = vweird.f32 %v4919_v19 }
 0x324   :  { %v1116_v15 = vmul.f32 %v3234_v54, %v1115_v17  ;;  %3237 = vrsqrt.f32 %v4921_v5  ;;  %vm1150_vm15 = vweird.f32 %v4921_v5 }
 0x326   :  { %v1117_v32 = vmul.f32 0.5, %v1116_v15  ;;  %v591_v31 = vpop.xlane.xlu0 %590 }
 0x327   :  { %v1856_v24 = vpop.f32.mrf.mxu0  ;;  %v218_v12 = vpop.xlane.xlu2 %217  ;;  %v711_v52 = vmul.f32 %v591_v31, %v3560_v20 }
 0x328   :  { %v585_v56 = vpop.xlane.xlu1 %584  ;;  %v1118_v11 = vsub.f32 1.5, %v1117_v32  ;;  %v333_v26 = vmul.f32 %v3560_v20, %v218_v12  ;;  %v4955_v53 = vadd.f32 %v4559_v45, %v1856_v24 }
 0x329   :  { %v709_v23 = vmul.f32 %v585_v56, %v3560_v20  ;;  %v4934_v25 = vpop.eup %3235  ;;  %v4946_v33 = vadd.f32 1e-05, %v711_v52 }
 0x32a   :  { %v1119_v44 = vmul.f32 %v3234_v54, %v1118_v11  ;;  %v4938_v35 = vpop.eup %3237  ;;  %v1125_v37 = vmul.f32 %v4934_v25, %v4919_v19  ;;  %v4944_v0 = vsub.f32 %v4644_v30, %v333_v26  ;;  %v2047_v8 = vmul.f32 0.044715, %v4955_v53 }
 0x32b   :  { %v4936_v10 = vadd.f32 1e-05, %v709_v23  ;;  %v1145_v42 = vmul.f32 %v4938_v35, %v4921_v5  ;;  %vm1131_vm13 = vweird.f32 %v4934_v25  ;;  %vm1151_vm1 = vweird.f32 %v4938_v35 }
 0x32c   :  { %v1123_v9 = vsel %vm1122_vm11, %v3234_v54, %v1119_v44  ;;  %v1126_v4 = vmul.f32 %v4934_v25, %v1125_v37  ;;  %v461_v46 = vmul.f32 %v4944_v0, %v4944_v0  ;;  %vm5003_vm2 = vmor %vm1130_vm12, %vm1131_vm13  ;;  %v2111_v44 = vmul.f32 %v2047_v8, %v4955_v53 }
 0x32d   :  { %3239 = vrsqrt.f32 %v4936_v10  ;;  %v1475_v34 = vmul.f32 %v1123_v9, %v4571_v62  ;;  %v1146_v30 = vmul.f32 %v4938_v35, %v1145_v42  ;;  %v1542_v62 = vmul.f32 %v4963_v18, %v1474_v58  ;;  %vm5010_vm3 = vmor %vm1150_vm15, %vm1151_vm1 }
 0x32e   :  { %3241 = vrsqrt.f32 %v4946_v33  ;;  %v1127_v36 = vmul.f32 0.5, %v1126_v4  ;;  %v607_v29 = vsel %vm92_vm0, %v461_v46, 0.0  ;;  %vm1160_vm4 = vweird.f32 %v4946_v33 }
 0x32f   :  { %v1543_v13 = vmul.f32 %v4963_v18, %v1475_v34  ;;  %v1147_v28 = vmul.f32 0.5, %v1146_v30  ;;  %v221_v21 = vpop.xlane.xlu2 %220  ;;  %v1858_v2 = vpop.f32.mrf.mxu0  ;;  %608 = vadd.xlane.f32.xlu0 %v607_v29  ;;  %v1610_v24 = vadd.f32 %v4975_v43, %v1542_v62  ;;  %v5040_v29 = vld [vmem:[%s6383_s0 + $0x178] sm:$0xff]  ;;  %vm1140_vm7 = vweird.f32 %v4936_v10 }
 0x330   :  { %v215_v51 = vpop.xlane.xlu1 %214  ;;  %v1128_v22 = vsub.f32 1.5, %v1127_v36  ;;  %v334_v1 = vmul.f32 %v3560_v20, %v221_v21  ;;  %v594_v57 = vpop.xlane.xlu0 %593  ;;  %v5019_v58 = vadd.f32 %v4559_v45, %v1858_v2 }
 0x331   :  { %v332_v49 = vmul.f32 %v3560_v20, %v215_v51  ;;  %v1611_v54 = vadd.f32 %v4975_v43, %v1543_v13  ;;  %v1148_v17 = vsub.f32 1.5, %v1147_v28  ;;  %v712_v15 = vmul.f32 %v594_v57, %v3560_v20 }
 0x332   :  { %v1129_v56 = vmul.f32 %v4934_v25, %v1128_v22 }
 0x333   :  { %v4978_v47 = vpop.eup %3239  ;;  %v4982_v3 = vsub.f32 %v4686_v41, %v332_v49  ;;  %v4996_v41 = vsub.f32 %v4699_v38, %v334_v1  ;;  %v4998_v11 = vadd.f32 1e-05, %v712_v15  ;;  %v1149_v12 = vmul.f32 %v4938_v35, %v1148_v17 }
 0x334   :  { %v4985_v27 = vpop.eup %3241  ;;  %v1135_v32 = vmul.f32 %v4978_v47, %v4936_v10  ;;  %v1659_v31 = vpack.c.bf16 %v1611_v54, %v1610_v24  ;;  %v1133_v9 = vsel %vm5003_vm2, %v4934_v25, %v1129_v56  ;;  %vm1141_vm6 = vweird.f32 %v4978_v47  ;;  %v5069_v54 = vld [vmem:[%s6383_s0 + $0x188] sm:$0xff] }
 0x335   :  { %v1155_v63 = vmul.f32 %v4985_v27, %v4946_v33  ;;  %v460_v26 = vmul.f32 %v4982_v3, %v4982_v3  ;;  %3243 = vrsqrt.f32 %v4998_v11  ;;  %vm1161_vm5 = vweird.f32 %v4985_v27  ;;  %vm1142_vm9 = vmor %vm1140_vm7, %vm1141_vm6 }
 0x336   :  { %v1136_v23 = vmul.f32 %v4978_v47, %v1135_v32  ;;  %3040 = vmatmul.msk.bf16.gmra.mxu0 %vm92_vm0, %v1659_v31  ;;  %v462_v4 = vmul.f32 %v4996_v41, %v4996_v41  ;;  %v1153_v30 = vsel %vm5010_vm3, %v4938_v35, %v1149_v12  ;;  %v1476_v35 = vmul.f32 %v1133_v9, %v4599_v6  ;;  %vm5049_vm8 = vmor %vm1160_vm4, %vm1161_vm5 }
 0x337   :  { %v1156_v38 = vmul.f32 %v4985_v27, %v1155_v63  ;;  %v604_v37 = vsel %vm92_vm0, %v460_v26, 0.0  ;;  %v603_v34 = vpop.xlane.xlu2 %602  ;;  %v1478_v57 = vmul.f32 %v1153_v30, %v4605_v14  ;;  %v2048_v15 = vmul.f32 0.044715, %v5019_v58 }
 0x338   :  { %v1137_v19 = vmul.f32 0.5, %v1136_v23  ;;  %605 = vadd.xlane.f32.xlu2 %v604_v37  ;;  %v715_v36 = vmul.f32 %v603_v34, %v3560_v20  ;;  %v597_v51 = vpop.xlane.xlu1 %596  ;;  %v224_v62 = vpop.xlane.xlu0 %223  ;;  %v610_v28 = vsel %vm92_vm0, %v462_v4, 0.0  ;;  %v234_v32 = vsel %vm92_vm0, %v5040_v29, 0.0 }
 0x339   :  { %v1157_v42 = vmul.f32 0.5, %v1156_v38  ;;  %v713_v13 = vmul.f32 %v597_v51, %v3560_v20  ;;  %v335_v21 = vmul.f32 %v3560_v20, %v224_v62  ;;  %v1861_v49 = vpop.f32.mrf.mxu0  ;;  %611 = vadd.xlane.f32.xlu0 %v610_v28  ;;  %v2175_v56 = vmul.f32 %v2111_v44, %v4955_v53 }
 0x33a   :  { %v1138_v46 = vsub.f32 1.5, %v1137_v19  ;;  %v5053_v8 = vadd.f32 1e-05, %v715_v36  ;;  %v1544_v12 = vmul.f32 %v4963_v18, %v1476_v35  ;;  %v1546_v31 = vmul.f32 %v4963_v18, %v1478_v57  ;;  %v5128_v35 = vld [vmem:[%s6383_s0 + $0x190] sm:$0xff] }
 0x33b   :  { %v1158_v25 = vsub.f32 1.5, %v1157_v42  ;;  %v5055_v1 = vpop.eup %3243  ;;  %v5061_v10 = vadd.f32 1e-05, %v713_v13  ;;  %v5064_v33 = vsub.f32 %v4758_v16, %v335_v21  ;;  %vm1170_vm10 = vweird.f32 %v4998_v11 }
 0x33c   :  { %v1139_v2 = vmul.f32 %v4978_v47, %v1138_v46  ;;  %v1165_v14 = vmul.f32 %v5055_v1, %v4998_v11  ;;  %v2112_v52 = vmul.f32 %v2048_v15, %v5019_v58  ;;  %v5111_v46 = vld [vmem:[%s6389_s6] ss:$0 sm:$0xff]  ;;  %v1612_v62 = vadd.f32 %v4975_v43, %v1544_v12 }
 0x33d   :  { %v1159_v6 = vmul.f32 %v4985_v27, %v1158_v25  ;;  %3245 = vrsqrt.f32 %v5061_v10  ;;  %v463_v5 = vmul.f32 %v5064_v33, %v5064_v33  ;;  %vm1171_vm11 = vweird.f32 %v5055_v1 }
 0x33e   :  { %v1143_v17 = vsel %vm1142_vm9, %v4978_v47, %v1139_v2  ;;  %v5085_v47 = vld [vmem:[%s6383_s0 + $0x180] sm:$0xff]  ;;  %v1166_v63 = vmul.f32 %v5055_v1, %v1165_v14  ;;  %3247 = vrsqrt.f32 %v5053_v8  ;;  %vm1180_vm12 = vweird.f32 %v5061_v10  ;;  %vm5152_vm13 = vmor %vm1170_vm10, %vm1171_vm11 }
 0x33f   :  { %v1477_v24 = vmul.f32 %v1143_v17, %v4651_v7  ;;  %v1163_v16 = vsel %vm5049_vm8, %v4985_v27, %v1159_v6  ;;  %v240_v7 = vsel %vm92_vm0, %v5069_v54, 0.0  ;;  %v237_v19 = vsel %vm92_vm0, %v5085_v47, 0.0  ;;  %v2746_v37 = vpop.f32.mrf.mxu1  ;;  %v3403_v6 = vld [vmem:[%s6383_s0 + $0x70] sm:$0xff] }
 0x340   :  { %v1479_v27 = vmul.f32 %v1163_v16, %v4639_v39  ;;  %235 = vadd.xlane.f32.xlu2 %v234_v32  ;;  %v1167_v26 = vmul.f32 0.5, %v1166_v63  ;;  %v600_v38 = vpop.xlane.xlu1 %599  ;;  %v227_v44 = vpop.xlane.xlu0 %226  ;;  %v5103_v39 = vadd.f32 %v4559_v45, %v1861_v49  ;;  %v613_v42 = vsel %vm92_vm0, %v463_v5, 0.0 }
 0x341   :  { %v1545_v23 = vmul.f32 %v4963_v18, %v1477_v24  ;;  %v714_v9 = vmul.f32 %v600_v38, %v3560_v20  ;;  %v336_v34 = vmul.f32 %v3560_v20, %v227_v44  ;;  %v1863_v4 = vpop.f32.mrf.mxu0  ;;  %v2747_v36 = vadd.f32 %v5111_v46, %v2746_v37  ;;  %241 = vadd.xlane.f32.xlu0 %v240_v7 }
 0x342   :  { %v1168_v30 = vsub.f32 1.5, %v1167_v26  ;;  %614 = vadd.xlane.f32.xlu1 %v613_v42  ;;  %v5115_v51 = vadd.f32 %v4559_v45, %v1863_v4  ;;  %v1547_v21 = vmul.f32 %v4963_v18, %v1479_v27  ;;  %v1614_v49 = vadd.f32 %v4975_v43, %v1546_v31 }
 0x343   :  { %v5118_v25 = vpop.eup %3245  ;;  %v5120_v13 = vadd.f32 1e-05, %v714_v9  ;;  %v1613_v28 = vadd.f32 %v4975_v43, %v1545_v23  ;;  %v5137_v22 = vsub.f32 %v4818_v40, %v336_v34  ;;  %v2049_v57 = vmul.f32 0.044715, %v5103_v39 }
 0x344   :  { %v5130_v2 = vpop.eup %3247  ;;  %v1175_v45 = vmul.f32 %v5118_v25, %v5061_v10  ;;  %v2885_v17 = vadd.f32 %v3403_v6, %v2747_v36  ;;  %v2176_v14 = vmul.f32 %v2112_v52, %v5019_v58  ;;  %v1169_v15 = vmul.f32 %v5055_v1, %v1168_v30 }
 0x345   :  { %3249 = vrsqrt.f32 %v5120_v13  ;;  %v2050_v24 = vmul.f32 0.044715, %v5115_v51  ;;  %v243_v40 = vsel %vm92_vm0, %v5128_v35, 0.0  ;;  %v1195_v63 = vmul.f32 %v5130_v2, %v5053_v8 }
 0x346   :  { %v1176_v32 = vmul.f32 %v5118_v25, %v1175_v45  ;;  %vm1181_vm15 = vweird.f32 %v5118_v25  ;;  %2949 = vst.msk [vmem:[#allocation2 + $0x70] sm:$0xff] %vm92_vm0, %v2885_v17  ;;  %v1660_v7 = vpack.c.bf16 %v1613_v28, %v1612_v62  ;;  %v1615_v12 = vadd.f32 %v4975_v43, %v1547_v21  ;;  %v3404_v45 = vld [vmem:[%s6383_s0 + $0x78] sm:$0xff] }
 0x347   :  { %v2114_v5 = vmul.f32 %v2050_v24, %v5115_v51  ;;  %v464_v11 = vmul.f32 %v5137_v22, %v5137_v22  ;;  %v2239_v31 = vadd.f32 %v2175_v56, %v4955_v53  ;;  %v2113_v26 = vmul.f32 %v2049_v57, %v5103_v39  ;;  %v2748_v52 = vpop.f32.mrf.mxu1  ;;  %vm5181_vm1 = vmor %vm1180_vm12, %vm1181_vm15 }
 0x348   :  { %238 = vadd.xlane.f32.xlu2 %v237_v19  ;;  %v1177_v27 = vmul.f32 0.5, %v1176_v32  ;;  %v230_v23 = vpop.xlane.xlu1 %229  ;;  %3041 = vmatmul.msk.bf16.gmra.mxu0 %vm92_vm0, %v1660_v7  ;;  %v1661_v38 = vpack.c.bf16 %v1615_v12, %v1614_v49  ;;  %v2240_v19 = vadd.f32 %v2176_v14, %v5019_v58  ;;  %v1173_v9 = vsel %vm5152_vm13, %v5055_v1, %v1169_v15 }
 0x349   :  { %v337_v44 = vmul.f32 %v3560_v20, %v230_v23  ;;  %v1866_v37 = vpop.f32.mrf.mxu0  ;;  %v2749_v34 = vadd.f32 %v5111_v46, %v2748_v52  ;;  %244 = vadd.xlane.f32.xlu0 %v243_v40  ;;  %v616_v56 = vsel %vm92_vm0, %v464_v11, 0.0  ;;  %v1196_v30 = vmul.f32 %v5130_v2, %v1195_v63 }
 0x34a   :  { %v1178_v42 = vsub.f32 1.5, %v1177_v27  ;;  %3042 = vmatmul.msk.bf16.vlgmr.msra.gmra.mxu3 %vm92_vm0, %v1661_v38  ;;  %617 = vadd.xlane.f32.xlu1 %v616_v56  ;;  %v2303_v62 = vmul.f32 0.7978846, %v2239_v31  ;;  %v2178_v49 = vmul.f32 %v2114_v5, %v5115_v51  ;;  %v1480_v10 = vmul.f32 %v1173_v9, %v4694_v50  ;;  %v5223_v31 = vld [vmem:[%s6387_s4] ss:$0 sm:$0xff] }
 0x34b   :  { %v5174_v4 = vpop.eup %3249  ;;  %v5187_v1 = vsub.f32 %v4859_v61, %v337_v44  ;;  %v2886_v57 = vadd.f32 %v3404_v45, %v2749_v34  ;;  %v2304_v6 = vmul.f32 0.7978846, %v2240_v19  ;;  %v5200_v61 = vld [vmem:[%s6383_s0 + $0x198] sm:$0xff]  ;;  %v2177_v14 = vmul.f32 %v2113_v26, %v5103_v39 }
 0x34c   :  { %v1179_v28 = vmul.f32 %v5118_v25, %v1178_v42  ;;  %v1185_v21 = vmul.f32 %v5174_v4, %v5120_v13  ;;  %v1983_v50 = vmul.f32 0.5, %v4955_v53  ;;  %v1197_v32 = vmul.f32 0.5, %v1196_v30  ;;  %v5247_v30 = vld [vmem:[%s6383_s0 + $0x1a0] sm:$0xff] }
 0x34d   :  { %2950 = vst.msk [vmem:[#allocation2 + $0x78] sm:$0xff] %vm92_vm0, %v2886_v57  ;;  %3251 = vtanh.f32 %v2303_v62  ;;  %v465_v40 = vmul.f32 %v5187_v1, %v5187_v1  ;;  %v2242_v63 = vadd.f32 %v2178_v49, %v5115_v51  ;;  %v246_v7 = vsel %vm92_vm0, %v5200_v61, 0.0 }
 0x34e   :  { %v1183_v17 = vsel %vm5181_vm1, %v5118_v25, %v1179_v28  ;;  %v1186_v15 = vmul.f32 %v5174_v4, %v1185_v21  ;;  %3253 = vtanh.f32 %v2304_v6  ;;  %v2241_v23 = vadd.f32 %v2177_v14, %v5103_v39 }
 0x34f   :  { %v1481_v24 = vmul.f32 %v1183_v17, %v4752_v59  ;;  %v619_v12 = vsel %vm92_vm0, %v465_v40, 0.0  ;;  %v1548_v59 = vmul.f32 %v4963_v18, %v1480_v10  ;;  %v5226_v26 = vadd.f32 %v5223_v31, %v1866_v37 }
 0x350   :  { %v1187_v16 = vmul.f32 0.5, %v1186_v15  ;;  %v233_v25 = vpop.xlane.xlu1 %232  ;;  %620 = vadd.xlane.f32.xlu2 %v619_v12  ;;  %v1198_v38 = vsub.f32 1.5, %v1197_v32  ;;  %vm1200_vm2 = vweird.f32 %v5053_v8  ;;  %vm1190_vm3 = vweird.f32 %v5120_v13 }
 0x351   :  { %v338_v53 = vmul.f32 %v3560_v20, %v233_v25  ;;  %v1868_v27 = vpop.f32.mrf.mxu0  ;;  %v1549_v5 = vmul.f32 %v4963_v18, %v1481_v24  ;;  %vm1191_vm4 = vweird.f32 %v5174_v4  ;;  %v2306_v9 = vmul.f32 0.7978846, %v2242_v63 }
 0x352   :  { %v1188_v11 = vsub.f32 1.5, %v1187_v16  ;;  %v5229_v52 = vadd.f32 %v5223_v31, %v1868_v27  ;;  %247 = vadd.xlane.f32.xlu1 %v246_v7  ;;  %vm1201_vm5 = vweird.f32 %v5130_v2  ;;  %v1984_v34 = vmul.f32 0.5, %v5019_v58  ;;  %vm5256_vm6 = vmor %vm1190_vm3, %vm1191_vm4  ;;  %v3406_v7 = vld [vmem:[%s6383_s0 + $0x80] sm:$0xff]  ;;  %v5317_v58 = vld [vmem:[%s6383_s0 + $0x1b0] sm:$0xff] }
 0x353   :  { %v5233_v44 = vsub.f32 %v4881_v48, %v338_v53  ;;  %v1617_v19 = vadd.f32 %v4975_v43, %v1549_v5  ;;  %v3252_v42 = vpop.eup %3251  ;;  %v1616_v56 = vadd.f32 %v4975_v43, %v1548_v59  ;;  %v2305_v62 = vmul.f32 0.7978846, %v2241_v23  ;;  %v2751_v57 = vpop.f32.mrf.mxu1  ;;  %vm5269_vm7 = vmor %vm1200_vm2, %vm1201_vm5  ;;  %v5289_v53 = vld [vmem:[%s6383_s0 + $0x1a8] sm:$0xff] }
 0x354   :  { %v2052_v37 = vmul.f32 0.044715, %v5229_v52  ;;  %v3254_v36 = vpop.eup %3253  ;;  %v1189_v28 = vmul.f32 %v5174_v4, %v1188_v11  ;;  %v2051_v21 = vmul.f32 0.044715, %v5226_v26  ;;  %v2431_v49 = vadd.f32 1.0, %v3252_v42 }
 0x355   :  { %v466_v48 = vmul.f32 %v5233_v44, %v5233_v44  ;;  %v1199_v10 = vmul.f32 %v5130_v2, %v1198_v38  ;;  %v2432_v45 = vadd.f32 1.0, %v3254_v36  ;;  %v1662_v6 = vpack.c.bf16 %v1617_v19, %v1616_v56  ;;  %v3407_v56 = vld [vmem:[%s6383_s0 + $0x88] sm:$0xff] }
 0x356   :  { %v2752_v14 = vadd.f32 %v5111_v46, %v2751_v57  ;;  %v2116_v15 = vmul.f32 %v2052_v37, %v5229_v52  ;;  %v249_v32 = vsel %vm92_vm0, %v5247_v30, 0.0  ;;  %3255 = vtanh.f32 %v2306_v9 }
 0x357   :  { %v622_v17 = vsel %vm92_vm0, %v466_v48, 0.0  ;;  %v2495_v24 = vmul.f32 %v2431_v49, %v1983_v50  ;;  %v2496_v40 = vmul.f32 %v2432_v45, %v1984_v34  ;;  %v1193_v63 = vsel %vm5256_vm6, %v5174_v4, %v1189_v28 }
 0x358   :  { %v2115_v25 = vmul.f32 %v2051_v21, %v5226_v26  ;;  %v2887_v12 = vadd.f32 %v3406_v7, %v2752_v14  ;;  %623 = vadd.xlane.f32.xlu2 %v622_v17  ;;  %3257 = vtanh.f32 %v2305_v62  ;;  %v1203_v50 = vsel %vm5269_vm7, %v5130_v2, %v1199_v10 }
 0x359   :  { %v1871_v16 = vpop.f32.mrf.mxu0  ;;  %v2548_v8 = vpack.c.bf16 %v2496_v40, %v2495_v24  ;;  %v2180_v4 = vmul.f32 %v2116_v15, %v5229_v52  ;;  %v1482_v27 = vmul.f32 %v1193_v63, %v4798_v60  ;;  %v1483_v23 = vmul.f32 %v1203_v50, %v4749_v55 }
 0x35a   :  { %3043 = vmatmul.msk.bf16.gmra.mxu3 %vm92_vm0, %v1662_v6  ;;  %250 = vadd.xlane.f32.xlu1 %v249_v32  ;;  %2951 = vst.msk [vmem:[#allocation2 + $0x80] sm:$0xff] %vm92_vm0, %v2887_v12  ;;  %v2179_v5 = vmul.f32 %v2115_v25, %v5226_v26  ;;  %v252_v2 = vsel %vm92_vm0, %v5289_v53, 0.0  ;;  %v5305_v48 = vadd.f32 %v5223_v31, %v1871_v16  ;;  %v1986_v62 = vmul.f32 0.5, %v5115_v51  ;;  %v3408_v25 = vld [vmem:[%s6383_s0 + $0x90] sm:$0xff] }
 0x35b   :  { %3084 = vmatmul.msk.bf16.gmra.mxu1 %vm2605_vm14, %v2548_v8  ;;  %v2753_v11 = vpop.f32.mrf.mxu1  ;;  %v2244_v19 = vadd.f32 %v2180_v4, %v5229_v52  ;;  %v1550_v60 = vmul.f32 %v4963_v18, %v1482_v27  ;;  %v1551_v21 = vmul.f32 %v4963_v18, %v1483_v23  ;;  %v1985_v45 = vmul.f32 0.5, %v5103_v39 }
 0x35c   :  { %v3256_v59 = vpop.eup %3255  ;;  %v2754_v9 = vadd.f32 %v5111_v46, %v2753_v11  ;;  %v2243_v34 = vadd.f32 %v2179_v5, %v5226_v26  ;;  %v2053_v51 = vmul.f32 0.044715, %v5305_v48  ;;  %v255_v13 = vsel %vm92_vm0, %v5317_v58, 0.0 }
 0x35d   :  { %v2434_v37 = vadd.f32 1.0, %v3256_v59  ;;  %v2308_v49 = vmul.f32 0.7978846, %v2244_v19  ;;  %v1618_v6 = vadd.f32 %v4975_v43, %v1550_v60  ;;  %v1619_v32 = vadd.f32 %v4975_v43, %v1551_v21  ;;  %v3410_v21 = vld [vmem:[%s6383_s0 + $0xa0] sm:$0xff] }
 0x35e   :  { %v3258_v38 = vpop.eup %3257  ;;  %v2888_v55 = vadd.f32 %v3407_v56, %v2754_v9  ;;  %v2307_v17 = vmul.f32 0.7978846, %v2243_v34  ;;  %v2117_v63 = vmul.f32 %v2053_v51, %v5305_v48  ;;  %v1988_v19 = vmul.f32 0.5, %v5229_v52 }
 0x35f   :  { %v2433_v28 = vadd.f32 1.0, %v3258_v38  ;;  %v2498_v57 = vmul.f32 %v2434_v37, %v1986_v62  ;;  %3259 = vtanh.f32 %v2308_v49  ;;  %v1663_v39 = vpack.c.bf16 %v1619_v32, %v1618_v6  ;;  %v3411_v6 = vld [vmem:[%s6383_s0 + $0xa8] sm:$0xff] }
 0x360   :  { %253 = vadd.xlane.f32.xlu2 %v252_v2  ;;  %2952 = vst.msk [vmem:[#allocation2 + $0x88] sm:$0xff] %vm92_vm0, %v2888_v55  ;;  %3261 = vtanh.f32 %v2307_v17  ;;  %v2181_v50 = vmul.f32 %v2117_v63, %v5305_v48  ;;  %v3409_v2 = vld [vmem:[%s6383_s0 + $0x98] sm:$0xff] }
 0x361   :  { %v1873_v42 = vpop.f32.mrf.mxu0  ;;  %v2497_v14 = vmul.f32 %v2433_v28, %v1985_v45 }
 0x362   :  { %v5308_v36 = vadd.f32 %v5223_v31, %v1873_v42  ;;  %v2245_v11 = vadd.f32 %v2181_v50, %v5305_v48  ;;  %v1987_v42 = vmul.f32 0.5, %v5226_v26 }
 0x363   :  { %v2756_v15 = vpop.f32.mrf.mxu1  ;;  %v2549_v16 = vpack.c.bf16 %v2498_v57, %v2497_v14 }
 0x364   :  { %v2054_v10 = vmul.f32 0.044715, %v5308_v36  ;;  %v2757_v24 = vadd.f32 %v5111_v46, %v2756_v15  ;;  %v2309_v34 = vmul.f32 0.7978846, %v2245_v11  ;;  %v1990_v51 = vmul.f32 0.5, %v5308_v36 }
 0x365   :  { %v3260_v8 = vpop.eup %3259  ;;  %v1989_v15 = vmul.f32 0.5, %v5305_v48 }
 0x366   :  { %v2118_v40 = vmul.f32 %v2054_v10, %v5308_v36  ;;  %v2889_v7 = vadd.f32 %v3408_v25, %v2757_v24  ;;  %v3262_v27 = vpop.eup %3261  ;;  %v2436_v23 = vadd.f32 1.0, %v3260_v8 }
 0x367   :  { %v2435_v9 = vadd.f32 1.0, %v3262_v27 }
 0x368   :  { %256 = vadd.xlane.f32.xlu2 %v255_v13  ;;  %2953 = vst.msk [vmem:[#allocation2 + $0x90] sm:$0xff] %vm92_vm0, %v2889_v7  ;;  %v2182_v12 = vmul.f32 %v2118_v40, %v5308_v36  ;;  %v2500_v60 = vmul.f32 %v2436_v23, %v1988_v19 }
 0x369   :  { %v2499_v56 = vmul.f32 %v2435_v9, %v1987_v42 }
 0x36a   :  { %3044 = vmatmul.msk.bf16.gmra.mxu3 %vm92_vm0, %v1663_v39  ;;  %v2246_v59 = vadd.f32 %v2182_v12, %v5308_v36 }
 0x36b   :  { %3085 = vmatmul.msk.bf16.gmra.mxu1 %vm2605_vm14, %v2549_v16  ;;  %v2758_v4 = vpop.f32.mrf.mxu1  ;;  %v2550_v28 = vpack.c.bf16 %v2500_v60, %v2499_v56 }
 0x36c   :  { %v2759_v5 = vadd.f32 %v5111_v46, %v2758_v4  ;;  %v2310_v37 = vmul.f32 0.7978846, %v2246_v59 }
 0x36e   :  { %v2890_v38 = vadd.f32 %v3409_v2, %v2759_v5  ;;  %3263 = vtanh.f32 %v2310_v37 }
 0x36f   :  { %3265 = vtanh.f32 %v2309_v34 }
 0x370   :  { %2954 = vst.msk [vmem:[#allocation2 + $0x98] sm:$0xff] %vm92_vm0, %v2890_v38 }
 0x373   :  { %v2761_v55 = vpop.f32.mrf.mxu1 }
 0x374   :  { %v2762_v62 = vadd.f32 %v5111_v46, %v2761_v55  ;;  %v3264_v52 = vpop.eup %3263 }
 0x375   :  { %v3266_v10 = vpop.eup %3265  ;;  %v2438_v57 = vadd.f32 1.0, %v3264_v52 }
 0x376   :  { %v2891_v49 = vadd.f32 %v3410_v21, %v2762_v62  ;;  %v2437_v14 = vadd.f32 1.0, %v3266_v10 }
 0x377   :  { %v2502_v32 = vmul.f32 %v2438_v57, %v1990_v51 }
 0x378   :  { %2955 = vst.msk [vmem:[#allocation2 + $0xa0] sm:$0xff] %vm92_vm0, %v2891_v49  ;;  %v2501_v13 = vmul.f32 %v2437_v14, %v1989_v15 }
 0x37a   :  { %v2551_v24 = vpack.c.bf16 %v2502_v32, %v2501_v13 }
 0x37b   :  { %3086 = vmatmul.msk.bf16.gmra.mxu1 %vm2605_vm14, %v2550_v28  ;;  %v2763_v26 = vpop.f32.mrf.mxu1 }
 0x37c   :  { %v2764_v45 = vadd.f32 %v5111_v46, %v2763_v26 }
 0x37e   :  { %v2892_v17 = vadd.f32 %v3411_v6, %v2764_v45 }
 0x380   :  { %2956 = vst.msk [vmem:[#allocation2 + $0xa8] sm:$0xff] %vm92_vm0, %v2892_v17 }
 0x38b   :  { %3087 = vmatmul.msk.bf16.gmra.mxu1 %vm2605_vm14, %v2551_v24 }
 0x3a2   :  { %v609_v40 = vpop.xlane.xlu0 %608 }
 0x3a3   :  { %v717_v16 = vmul.f32 %v609_v40, %v3560_v20 }
 0x3a5   :  { %v781_v39 = vadd.f32 1e-05, %v717_v16 }
 0x3a7   :  { %3267 = vrsqrt.f32 %v781_v39  ;;  %vm1220_vm8 = vweird.f32 %v781_v39 }
 0x3ab   :  { %v606_v63 = vpop.xlane.xlu2 %605 }
 0x3ac   :  { %v716_v25 = vmul.f32 %v606_v63, %v3560_v20  ;;  %v612_v36 = vpop.xlane.xlu0 %611 }
 0x3ad   :  { %v3268_v12 = vpop.eup %3267  ;;  %v718_v8 = vmul.f32 %v612_v36, %v3560_v20 }
 0x3ae   :  { %v780_v7 = vadd.f32 1e-05, %v716_v25  ;;  %v1215_v50 = vmul.f32 %v3268_v12, %v781_v39  ;;  %vm1221_vm9 = vweird.f32 %v3268_v12 }
 0x3af   :  { %v5362_v48 = vadd.f32 1e-05, %v718_v8  ;;  %vm1222_vm10 = vmor %vm1220_vm8, %vm1221_vm9 }
 0x3b0   :  { %3269 = vrsqrt.f32 %v780_v7  ;;  %v1216_v4 = vmul.f32 %v3268_v12, %v1215_v50  ;;  %vm1210_vm12 = vweird.f32 %v780_v7 }
 0x3b1   :  { %3271 = vrsqrt.f32 %v5362_v48  ;;  %vm1230_vm15 = vweird.f32 %v5362_v48 }
 0x3b2   :  { %v1217_v59 = vmul.f32 0.5, %v1216_v4 }
 0x3b3   :  { %v236_v27 = vpop.xlane.xlu2 %235  ;;  %v1876_v23 = vpop.f32.mrf.mxu0 }
 0x3b4   :  { %v339_v5 = vmul.f32 %v3560_v20, %v236_v27  ;;  %v5367_v11 = vadd.f32 %v5223_v31, %v1876_v23  ;;  %v1218_v38 = vsub.f32 1.5, %v1217_v59  ;;  %v242_v37 = vpop.xlane.xlu0 %241 }
 0x3b5   :  { %v615_v9 = vpop.xlane.xlu1 %614  ;;  %v341_v34 = vmul.f32 %v3560_v20, %v242_v37 }
 0x3b6   :  { %v3270_v2 = vpop.eup %3269  ;;  %v5370_v19 = vsub.f32 %v5040_v29, %v339_v5  ;;  %v719_v60 = vmul.f32 %v615_v9, %v3560_v20  ;;  %v1219_v56 = vmul.f32 %v3268_v12, %v1218_v38  ;;  %v2055_v55 = vmul.f32 0.044715, %v5367_v11 }
 0x3b7   :  { %v1205_v42 = vmul.f32 %v3270_v2, %v780_v7  ;;  %v5377_v28 = vpop.eup %3271  ;;  %v5382_v29 = vsub.f32 %v5069_v54, %v341_v34  ;;  %vm1211_vm11 = vweird.f32 %v3270_v2 }
 0x3b8   :  { %v467_v62 = vmul.f32 %v5370_v19, %v5370_v19  ;;  %v5379_v49 = vadd.f32 1e-05, %v719_v60  ;;  %v1223_v52 = vsel %vm1222_vm10, %v3268_v12, %v1219_v56  ;;  %v1225_v26 = vmul.f32 %v5377_v28, %v5362_v48  ;;  %vm1212_vm13 = vmor %vm1210_vm12, %vm1211_vm11 }
 0x3b9   :  { %v1206_v21 = vmul.f32 %v3270_v2, %v1205_v42  ;;  %v2119_v10 = vmul.f32 %v2055_v55, %v5367_v11  ;;  %v1485_v45 = vmul.f32 %v1223_v52, %v4944_v0  ;;  %v469_v13 = vmul.f32 %v5382_v29, %v5382_v29 }
 0x3ba   :  { %3273 = vrsqrt.f32 %v5379_v49  ;;  %v1226_v17 = vmul.f32 %v5377_v28, %v1225_v26  ;;  %v625_v54 = vsel %vm92_vm0, %v467_v62, 0.0  ;;  %vm1231_vm1 = vweird.f32 %v5377_v28 }
 0x3bb   :  { %v1207_v57 = vmul.f32 0.5, %v1206_v21  ;;  %v239_v6 = vpop.xlane.xlu2 %238  ;;  %v2183_v51 = vmul.f32 %v2119_v10, %v5367_v11  ;;  %v1878_v15 = vpop.f32.mrf.mxu0  ;;  %626 = vadd.xlane.f32.xlu0 %v625_v54  ;;  %v631_v36 = vsel %vm92_vm0, %v469_v13, 0.0  ;;  %v1553_v4 = vmul.f32 %v4963_v18, %v1485_v45  ;;  %vm5433_vm4 = vmor %vm1230_vm15, %vm1231_vm1 }
 0x3bc   :  { %v340_v14 = vmul.f32 %v3560_v20, %v239_v6  ;;  %v5396_v0 = vadd.f32 %v5223_v31, %v1878_v15  ;;  %v1227_v24 = vmul.f32 0.5, %v1226_v17  ;;  %v245_v39 = vpop.xlane.xlu0 %244  ;;  %632 = vadd.xlane.f32.xlu1 %v631_v36  ;;  %vm1240_vm2 = vweird.f32 %v5379_v49 }
 0x3bd   :  { %v1208_v32 = vsub.f32 1.5, %v1207_v57  ;;  %v2247_v40 = vadd.f32 %v2183_v51, %v5367_v11  ;;  %v618_v25 = vpop.xlane.xlu1 %617  ;;  %v342_v12 = vmul.f32 %v3560_v20, %v245_v39  ;;  %v1621_v62 = vadd.f32 %v4975_v43, %v1553_v4 }
 0x3be   :  { %v5400_v16 = vsub.f32 %v5085_v47, %v340_v14  ;;  %v2056_v8 = vmul.f32 0.044715, %v5396_v0  ;;  %v720_v50 = vmul.f32 %v618_v25, %v3560_v20  ;;  %v1228_v59 = vsub.f32 1.5, %v1227_v24  ;;  %v5441_v14 = vld [vmem:[%s6383_s0 + $0x1b8] sm:$0xff]  ;;  %v5468_v25 = vld [vmem:[%s6383_s0 + $0x1c8] sm:$0xff] }
 0x3bf   :  { %v1209_v63 = vmul.f32 %v3270_v2, %v1208_v32  ;;  %v5410_v5 = vsub.f32 %v5128_v35, %v342_v12  ;;  %v2311_v37 = vmul.f32 0.7978846, %v2247_v40 }
 0x3c0   :  { %v468_v7 = vmul.f32 %v5400_v16, %v5400_v16  ;;  %v3274_v47 = vpop.eup %3273  ;;  %v2120_v23 = vmul.f32 %v2056_v8, %v5396_v0  ;;  %v5416_v42 = vadd.f32 1e-05, %v720_v50  ;;  %v1229_v56 = vmul.f32 %v5377_v28, %v1228_v59 }
 0x3c1   :  { %v1213_v27 = vsel %vm1212_vm13, %v3270_v2, %v1209_v63  ;;  %v1235_v9 = vmul.f32 %v3274_v47, %v5379_v49  ;;  %v470_v2 = vmul.f32 %v5410_v5, %v5410_v5  ;;  %vm1241_vm3 = vweird.f32 %v3274_v47 }
 0x3c2   :  { %v1484_v38 = vmul.f32 %v1213_v27, %v4982_v3  ;;  %v2184_v60 = vmul.f32 %v2120_v23, %v5396_v0  ;;  %v628_v34 = vsel %vm92_vm0, %v468_v7, 0.0  ;;  %3275 = vrsqrt.f32 %v5416_v42  ;;  %vm5450_vm5 = vmor %vm1240_vm2, %vm1241_vm3 }
 0x3c3   :  { %v1236_v35 = vmul.f32 %v3274_v47, %v1235_v9  ;;  %629 = vadd.xlane.f32.xlu0 %v628_v34  ;;  %v621_v52 = vpop.xlane.xlu2 %620  ;;  %v634_v26 = vsel %vm92_vm0, %v470_v2, 0.0  ;;  %3277 = vtanh.f32 %v2311_v37  ;;  %v1233_v40 = vsel %vm5433_vm4, %v5377_v28, %v1229_v56  ;;  %v5499_v34 = vld [vmem:[%s6383_s0 + $0x1d0] sm:$0xff] }
 0x3c4   :  { %v1552_v3 = vmul.f32 %v4963_v18, %v1484_v38  ;;  %v2248_v55 = vadd.f32 %v2184_v60, %v5396_v0  ;;  %v721_v6 = vmul.f32 %v621_v52, %v3560_v20  ;;  %635 = vadd.xlane.f32.xlu1 %v634_v26  ;;  %v258_v49 = vsel %vm92_vm0, %v5441_v14, 0.0 }
 0x3c5   :  { %v1237_v21 = vmul.f32 0.5, %v1236_v35  ;;  %v248_v17 = vpop.xlane.xlu1 %247  ;;  %v1881_v51 = vpop.f32.mrf.mxu0  ;;  %v1486_v50 = vmul.f32 %v1233_v40, %v4996_v41  ;;  %v264_v27 = vsel %vm92_vm0, %v5468_v25, 0.0  ;;  %v1991_v41 = vmul.f32 0.5, %v5367_v11 }
 0x3c6   :  { %v1620_v10 = vadd.f32 %v4975_v43, %v1552_v3  ;;  %v2312_v57 = vmul.f32 0.7978846, %v2248_v55  ;;  %v343_v15 = vmul.f32 %v3560_v20, %v248_v17  ;;  %v5445_v48 = vadd.f32 %v5223_v31, %v1881_v51 }
 0x3c7   :  { %v1238_v54 = vsub.f32 1.5, %v1237_v21  ;;  %v5454_v24 = vadd.f32 1e-05, %v721_v6  ;;  %vm1250_vm6 = vweird.f32 %v5416_v42  ;;  %v1992_v26 = vmul.f32 0.5, %v5396_v0 }
 0x3c8   :  { %v1664_v32 = vpack.c.bf16 %v1621_v62, %v1620_v10  ;;  %3279 = vtanh.f32 %v2312_v57  ;;  %v5460_v63 = vsub.f32 %v5200_v61, %v343_v15  ;;  %v5470_v36 = vpop.eup %3275  ;;  %v2057_v28 = vmul.f32 0.044715, %v5445_v48 }
 0x3c9   :  { %v1239_v39 = vmul.f32 %v3274_v47, %v1238_v54  ;;  %3281 = vrsqrt.f32 %v5454_v24  ;;  %v1245_v12 = vmul.f32 %v5470_v36, %v5416_v42  ;;  %v3278_v8 = vpop.eup %3277  ;;  %v1554_v10 = vmul.f32 %v4963_v18, %v1486_v50 }
 0x3ca   :  { %3045 = vmatmul.msk.bf16.gmra.mxu3 %vm92_vm0, %v1664_v32  ;;  %v471_v4 = vmul.f32 %v5460_v63, %v5460_v63  ;;  %v2439_v2 = vadd.f32 1.0, %v3278_v8  ;;  %vm1260_vm7 = vweird.f32 %v5454_v24  ;;  %v267_v6 = vsel %vm92_vm0, %v5499_v34, 0.0 }
 0x3cb   :  { %v1243_v61 = vsel %vm5450_vm5, %v3274_v47, %v1239_v39  ;;  %259 = vadd.xlane.f32.xlu0 %v258_v49  ;;  %v1246_v59 = vmul.f32 %v5470_v36, %v1245_v12  ;;  %v5485_v23 = vpop.xlane.xlu2 %623  ;;  %v5490_v47 = vld [vmem:[%s6383_s0 + $0x1c0] sm:$0xff]  ;;  %vm1251_vm8 = vweird.f32 %v5470_v36 }
 0x3cc   :  { %v1487_v7 = vmul.f32 %v1243_v61, %v5064_v33  ;;  %v2121_v33 = vmul.f32 %v2057_v28, %v5445_v48  ;;  %v637_v37 = vsel %vm92_vm0, %v471_v4, 0.0  ;;  %265 = vadd.xlane.f32.xlu1 %v264_v27  ;;  %v261_v52 = vsel %vm92_vm0, %v5490_v47, 0.0  ;;  %vm5537_vm10 = vmor %vm1250_vm6, %vm1251_vm8 }
 0x3cd   :  { %v1886_v9 = vpop.f32.mrf.mxu3  ;;  %v251_v60 = vpop.xlane.xlu1 %250  ;;  %v1247_v35 = vmul.f32 0.5, %v1246_v59  ;;  %638 = vadd.xlane.f32.xlu2 %v637_v37 }
 0x3ce   :  { %v3280_v38 = vpop.eup %3279  ;;  %v344_v3 = vmul.f32 %v3560_v20, %v251_v60  ;;  %v1883_v11 = vpop.f32.mrf.mxu0  ;;  %v1555_v55 = vmul.f32 %v4963_v18, %v1487_v7  ;;  %v5513_v57 = vadd.f32 %v5223_v31, %v1886_v9  ;;  %v2185_v0 = vmul.f32 %v2121_v33, %v5445_v48 }
 0x3cf   :  { %v2440_v56 = vadd.f32 1.0, %v3280_v38  ;;  %v3282_v62 = vpop.eup %3281  ;;  %v5504_v21 = vadd.f32 %v5223_v31, %v1883_v11  ;;  %v1248_v17 = vsub.f32 1.5, %v1247_v35  ;;  %v2503_v18 = vmul.f32 %v2439_v2, %v1991_v41 }
 0x3d0   :  { %v1255_v45 = vmul.f32 %v3282_v62, %v5454_v24  ;;  %v5518_v51 = vsub.f32 %v5247_v30, %v344_v3  ;;  %v1623_v13 = vadd.f32 %v4975_v43, %v1555_v55  ;;  %v1622_v30 = vadd.f32 %v4975_v43, %v1554_v10  ;;  %v5563_v24 = vld [vmem:[%s6383_s0 + $0x1d8] sm:$0xff]  ;;  %v5613_v43 = vld [vmem:[%s6385_s2] ss:$0 sm:$0xff] }
 0x3d1   :  { %v2058_v54 = vmul.f32 0.044715, %v5504_v21  ;;  %v2504_v32 = vmul.f32 %v2440_v56, %v1992_v26  ;;  %vm1261_vm9 = vweird.f32 %v3282_v62  ;;  %v2059_v28 = vmul.f32 0.044715, %v5513_v57 }
 0x3d2   :  { %v1256_v15 = vmul.f32 %v3282_v62, %v1255_v45  ;;  %v472_v39 = vmul.f32 %v5518_v51, %v5518_v51  ;;  %v1249_v8 = vmul.f32 %v5470_v36, %v1248_v17  ;;  %v1665_v38 = vpack.c.bf16 %v1623_v13, %v1622_v30  ;;  %vm5548_vm11 = vmor %vm1260_vm7, %vm1261_vm9 }
 0x3d3   :  { %v2122_v40 = vmul.f32 %v2058_v54, %v5504_v21  ;;  %262 = vadd.xlane.f32.xlu0 %v261_v52  ;;  %v254_v61 = vpop.xlane.xlu2 %253  ;;  %v2552_v12 = vpack.c.bf16 %v2504_v32, %v2503_v18  ;;  %v2249_v33 = vadd.f32 %v2185_v0, %v5445_v48  ;;  %v2123_v2 = vmul.f32 %v2059_v28, %v5513_v57  ;;  %v3412_v54 = vld [vmem:[%s6383_s0 + $0xb0] sm:$0xff] }
 0x3d4   :  { %v1257_v49 = vmul.f32 0.5, %v1256_v15  ;;  %v345_v7 = vmul.f32 %v3560_v20, %v254_v61  ;;  %v640_v4 = vsel %vm92_vm0, %v472_v39, 0.0  ;;  %268 = vadd.xlane.f32.xlu1 %v267_v6 }
 0x3d5   :  { %v1888_v50 = vpop.f32.mrf.mxu3  ;;  %v2186_v27 = vmul.f32 %v2122_v40, %v5504_v21  ;;  %641 = vadd.xlane.f32.xlu2 %v640_v4  ;;  %3088 = vmatmul.msk.bf16.gmra.mxu1 %vm2605_vm14, %v2552_v12  ;;  %v2313_v56 = vmul.f32 0.7978846, %v2249_v33  ;;  %v2187_v15 = vmul.f32 %v2123_v2, %v5513_v57 }
 0x3d6   :  { %v1258_v59 = vsub.f32 1.5, %v1257_v49  ;;  %v5542_v41 = vadd.f32 %v5223_v31, %v1888_v50  ;;  %v5553_v42 = vsub.f32 %v5289_v53, %v345_v7  ;;  %v1253_v53 = vsel %vm5537_vm10, %v5470_v36, %v1249_v8  ;;  %v5602_v49 = vld [vmem:[%s6383_s0 + $0x1e0] sm:$0xff] }
 0x3d7   :  { %v2250_v37 = vadd.f32 %v2186_v27, %v5504_v21  ;;  %v270_v36 = vsel %vm92_vm0, %v5563_v24, 0.0  ;;  %3283 = vtanh.f32 %v2313_v56  ;;  %v1488_v17 = vmul.f32 %v1253_v53, %v5137_v22  ;;  %v5589_v22 = vld [vmem:[%s6384_s1] ss:$0 sm:$0xff] }
 0x3d8   :  { %v1259_v60 = vmul.f32 %v3282_v62, %v1258_v59  ;;  %v2060_v35 = vmul.f32 0.044715, %v5542_v41  ;;  %v2766_v3 = vpop.f32.mrf.mxu1  ;;  %v473_v11 = vmul.f32 %v5553_v42, %v5553_v42  ;;  %v2251_v61 = vadd.f32 %v2187_v15, %v5513_v57  ;;  %v3416_v15 = vld [vmem:[%s6383_s0 + $0xc0] sm:$0xff] }
 0x3d9   :  { %v2314_v55 = vmul.f32 0.7978846, %v2250_v37  ;;  %v2767_v26 = vadd.f32 %v5111_v46, %v2766_v3  ;;  %v1556_v28 = vmul.f32 %v5589_v22, %v1488_v17  ;;  %v1993_v50 = vmul.f32 0.5, %v5445_v48 }
 0x3da   :  { %3046 = vmatmul.msk.bf16.gmra.mxu3 %vm92_vm0, %v1665_v38  ;;  %v1263_v52 = vsel %vm5548_vm11, %v3282_v62, %v1259_v60  ;;  %v2124_v10 = vmul.f32 %v2060_v35, %v5542_v41  ;;  %v643_v6 = vsel %vm92_vm0, %v473_v11, 0.0  ;;  %v273_v9 = vsel %vm92_vm0, %v5602_v49, 0.0  ;;  %v3415_v60 = vld [vmem:[%s6383_s0 + $0xb8] sm:$0xff] }
 0x3db   :  { %v1489_v45 = vmul.f32 %v1263_v52, %v5187_v1  ;;  %v2893_v0 = vadd.f32 %v3412_v54, %v2767_v26  ;;  %v257_v62 = vpop.xlane.xlu2 %256  ;;  %644 = vadd.xlane.f32.xlu0 %v643_v6  ;;  %3285 = vtanh.f32 %v2314_v55  ;;  %v1994_v37 = vmul.f32 0.5, %v5504_v21  ;;  %v5632_v26 = vld [vmem:[%s6383_s0 + $0x1e8] sm:$0xff] }
 0x3dc   :  { %v346_v1 = vmul.f32 %v3560_v20, %v257_v62  ;;  %v2188_v32 = vmul.f32 %v2124_v10, %v5542_v41  ;;  %v1624_v53 = vadd.f32 %v5613_v43, %v1556_v28  ;;  %v2315_v3 = vmul.f32 0.7978846, %v2251_v61  ;;  %v5651_v28 = vld [vmem:[%s6383_s0 + $0x1f0] sm:$0xff] }
 0x3dd   :  { %v1891_v18 = vpop.f32.mrf.mxu3  ;;  %2957 = vst.msk [vmem:[#allocation2 + $0xb0] sm:$0xff] %vm92_vm0, %v2893_v0  ;;  %271 = vadd.xlane.f32.xlu2 %v270_v36  ;;  %v1557_v13 = vmul.f32 %v5589_v22, %v1489_v45  ;;  %v3284_v12 = vpop.eup %3283  ;;  %v276_v17 = vsel %vm92_vm0, %v5632_v26, 0.0 }
 0x3de   :  { %v5593_v40 = vsub.f32 %v5317_v58, %v346_v1  ;;  %v2252_v39 = vadd.f32 %v2188_v32, %v5542_v41  ;;  %v5597_v30 = vadd.f32 %v5223_v31, %v1891_v18  ;;  %v2441_v27 = vadd.f32 1.0, %v3284_v12 }
 0x3df   :  { %v1625_v59 = vadd.f32 %v5613_v43, %v1557_v13 }
 0x3e0   :  { %v2768_v8 = vpop.f32.mrf.mxu1  ;;  %v474_v58 = vmul.f32 %v5593_v40, %v5593_v40  ;;  %v2316_v38 = vmul.f32 0.7978846, %v2252_v39  ;;  %v2061_v35 = vmul.f32 0.044715, %v5597_v30  ;;  %v2505_v56 = vmul.f32 %v2441_v27, %v1993_v50 }
 0x3e1   :  { %v3286_v7 = vpop.eup %3285  ;;  %v2769_v4 = vadd.f32 %v5111_v46, %v2768_v8  ;;  %v1666_v21 = vpack.c.bf16 %v1625_v59, %v1624_v53 }
 0x3e2   :  { %v646_v33 = vsel %vm92_vm0, %v474_v58, 0.0  ;;  %v2442_v48 = vadd.f32 1.0, %v3286_v7  ;;  %3287 = vtanh.f32 %v2316_v38  ;;  %v2125_v45 = vmul.f32 %v2061_v35, %v5597_v30 }
 0x3e3   :  { %v2894_v2 = vadd.f32 %v3415_v60, %v2769_v4  ;;  %647 = vadd.xlane.f32.xlu0 %v646_v33  ;;  %3289 = vtanh.f32 %v2315_v3  ;;  %v279_v7 = vsel %vm92_vm0, %v5651_v28, 0.0  ;;  %v1996_v4 = vmul.f32 0.5, %v5542_v41 }
 0x3e4   :  { %v2506_v55 = vmul.f32 %v2442_v48, %v1994_v37  ;;  %v2189_v1 = vmul.f32 %v2125_v45, %v5597_v30  ;;  %v1995_v33 = vmul.f32 0.5, %v5513_v57  ;;  %v3417_v37 = vld [vmem:[%s6383_s0 + $0xc8] sm:$0xff] }
 0x3e5   :  { %v1893_v11 = vpop.f32.mrf.mxu3  ;;  %2958 = vst.msk [vmem:[#allocation2 + $0xb8] sm:$0xff] %vm92_vm0, %v2894_v2  ;;  %274 = vadd.xlane.f32.xlu2 %v273_v9 }
 0x3e6   :  { %v5627_v52 = vadd.f32 %v5223_v31, %v1893_v11  ;;  %v2553_v10 = vpack.c.bf16 %v2506_v55, %v2505_v56  ;;  %v2253_v58 = vadd.f32 %v2189_v1, %v5597_v30  ;;  %v5674_v56 = vld [vmem:[%s6389_s6] ss:$0 sm:$0xff] }
 0x3e8   :  { %v2062_v6 = vmul.f32 0.044715, %v5627_v52  ;;  %v2771_v36 = vpop.f32.mrf.mxu1  ;;  %3089 = vmatmul.msk.bf16.vlgmr.msra.gmra.mxu2 %vm2605_vm14, %v2553_v10  ;;  %v3288_v62 = vpop.eup %3287  ;;  %v2317_v2 = vmul.f32 0.7978846, %v2253_v58 }
 0x3e9   :  { %v2772_v54 = vadd.f32 %v5111_v46, %v2771_v36  ;;  %v3290_v39 = vpop.eup %3289  ;;  %v2444_v12 = vadd.f32 1.0, %v3288_v62 }
 0x3ea   :  { %3047 = vmatmul.msk.bf16.gmra.mxu3 %vm92_vm0, %v1666_v21  ;;  %v2126_v0 = vmul.f32 %v2062_v6, %v5627_v52  ;;  %v2443_v27 = vadd.f32 1.0, %v3290_v39  ;;  %v1997_v39 = vmul.f32 0.5, %v5597_v30  ;;  %v3421_v30 = vld [vmem:[%s6383_s0 + $0xe0] sm:$0xff] }
 0x3eb   :  { %v2895_v18 = vadd.f32 %v3416_v15, %v2772_v54  ;;  %277 = vadd.xlane.f32.xlu0 %v276_v17  ;;  %v2508_v9 = vmul.f32 %v2444_v12, %v1996_v4  ;;  %v3420_v12 = vld [vmem:[%s6383_s0 + $0xd8] sm:$0xff] }
 0x3ec   :  { %v2190_v32 = vmul.f32 %v2126_v0, %v5627_v52  ;;  %v2507_v53 = vmul.f32 %v2443_v27, %v1995_v33 }
 0x3ed   :  { %v1896_v13 = vpop.f32.mrf.mxu3  ;;  %2959 = vst.msk [vmem:[#allocation2 + $0xc0] sm:$0xff] %vm92_vm0, %v2895_v18  ;;  %v1998_v18 = vmul.f32 0.5, %v5627_v52 }
 0x3ee   :  { %v2254_v61 = vadd.f32 %v2190_v32, %v5627_v52  ;;  %v5655_v8 = vadd.f32 %v5223_v31, %v1896_v13 }
 0x3f0   :  { %v2773_v50 = vpop.f32.mrf.mxu1  ;;  %v2318_v38 = vmul.f32 0.7978846, %v2254_v61  ;;  %v2063_v60 = vmul.f32 0.044715, %v5655_v8 }
 0x3f1   :  { %v2774_v59 = vadd.f32 %v5111_v46, %v2773_v50  ;;  %v2554_v46 = vpack.c.bf16 %v2508_v9, %v2507_v53 }
 0x3f2   :  { %3291 = vtanh.f32 %v2318_v38  ;;  %v2127_v57 = vmul.f32 %v2063_v60, %v5655_v8 }
 0x3f3   :  { %v2896_v48 = vadd.f32 %v3417_v37, %v2774_v59  ;;  %280 = vadd.xlane.f32.xlu0 %v279_v7  ;;  %3293 = vtanh.f32 %v2317_v2 }
 0x3f4   :  { %v2191_v6 = vmul.f32 %v2127_v57, %v5655_v8 }
 0x3f5   :  { %v1898_v35 = vpop.f32.mrf.mxu3  ;;  %2960 = vst.msk [vmem:[#allocation2 + $0xc8] sm:$0xff] %vm92_vm0, %v2896_v48 }
 0x3f6   :  { %v1899_v41 = vadd.f32 %v5223_v31, %v1898_v35  ;;  %v3419_v31 = vld [vmem:[%s6383_s0 + $0xd0] sm:$0xff]  ;;  %v2255_v62 = vadd.f32 %v2191_v6, %v5655_v8  ;;  %v1999_v35 = vmul.f32 0.5, %v5655_v8 }
 0x3f8   :  { %v2064_v3 = vmul.f32 0.044715, %v1899_v41  ;;  %v2776_v11 = vpop.f32.mrf.mxu1  ;;  %3090 = vmatmul.msk.bf16.gmra.mxu2 %vm2605_vm14, %v2554_v46  ;;  %v3292_v10 = vpop.eup %3291  ;;  %v2319_v50 = vmul.f32 0.7978846, %v2255_v62  ;;  %v2000_v48 = vmul.f32 0.5, %v1899_v41  ;;  %v3422_v46 = vld [vmem:[%s6383_s0 + $0xe8] sm:$0xff] }
 0x3f9   :  { %v2777_v55 = vadd.f32 %v5674_v56, %v2776_v11  ;;  %v3294_v17 = vpop.eup %3293  ;;  %v2446_v0 = vadd.f32 1.0, %v3292_v10 }
 0x3fa   :  { %v2128_v21 = vmul.f32 %v2064_v3, %v1899_v41  ;;  %v2445_v1 = vadd.f32 1.0, %v3294_v17 }
 0x3fb   :  { %v2897_v45 = vadd.f32 %v3419_v31, %v2777_v55  ;;  %v2510_v61 = vmul.f32 %v2446_v0, %v1998_v18  ;;  %v722_v55 = vmul.f32 %v5485_v23, %v3560_v20 }
 0x3fc   :  { %v2192_v36 = vmul.f32 %v2128_v21, %v1899_v41  ;;  %v2509_v7 = vmul.f32 %v2445_v1, %v1997_v39 }
 0x3fd   :  { %2961 = vst.msk [vmem:[#allocation2 + $0xd0] sm:$0xff] %vm92_vm0, %v2897_v45 }
 0x3fe   :  { %v2256_v54 = vadd.f32 %v2192_v36, %v1899_v41  ;;  %v2555_v4 = vpack.c.bf16 %v2510_v61, %v2509_v7  ;;  %v786_v41 = vadd.f32 1e-05, %v722_v55 }
 0x400   :  { %v2778_v15 = vpop.f32.mrf.mxu1  ;;  %v2320_v13 = vmul.f32 0.7978846, %v2256_v54  ;;  %vm1270_vm12 = vweird.f32 %v786_v41 }
 0x401   :  { %v2779_v32 = vadd.f32 %v5674_v56, %v2778_v15 }
 0x402   :  { %3295 = vtanh.f32 %v2320_v13 }
 0x403   :  { %v2898_v58 = vadd.f32 %v3420_v12, %v2779_v32  ;;  %3297 = vtanh.f32 %v2319_v50 }
 0x404   :  { %3299 = vrsqrt.f32 %v786_v41 }
 0x405   :  { %2962 = vst.msk [vmem:[#allocation2 + $0xd8] sm:$0xff] %vm92_vm0, %v2898_v58 }
 0x408   :  { %v2781_v52 = vpop.f32.mrf.mxu1  ;;  %3091 = vmatmul.msk.bf16.gmra.mxu2 %vm2605_vm14, %v2555_v4  ;;  %v3296_v59 = vpop.eup %3295 }
 0x409   :  { %v2782_v27 = vadd.f32 %v5674_v56, %v2781_v52  ;;  %v3298_v33 = vpop.eup %3297  ;;  %v2448_v9 = vadd.f32 1.0, %v3296_v59 }
 0x40a   :  { %v2447_v60 = vadd.f32 1.0, %v3298_v33  ;;  %v3300_v21 = vpop.eup %3299 }
 0x40b   :  { %v2899_v38 = vadd.f32 %v3421_v30, %v2782_v27  ;;  %v2512_v53 = vmul.f32 %v2448_v9, %v2000_v48  ;;  %v1265_v10 = vmul.f32 %v3300_v21, %v786_v41  ;;  %vm1271_vm13 = vweird.f32 %v3300_v21 }
 0x40c   :  { %v2511_v3 = vmul.f32 %v2447_v60, %v1999_v35  ;;  %vm1272_vm15 = vmor %vm1270_vm12, %vm1271_vm13 }
 0x40d   :  { %2963 = vst.msk [vmem:[#allocation2 + $0xe0] sm:$0xff] %vm92_vm0, %v2899_v38  ;;  %v1266_v8 = vmul.f32 %v3300_v21, %v1265_v10 }
 0x40e   :  { %v2556_v11 = vpack.c.bf16 %v2512_v53, %v2511_v3 }
 0x40f   :  { %v1267_v17 = vmul.f32 0.5, %v1266_v8 }
 0x410   :  { %v2783_v37 = vpop.f32.mrf.mxu1 }
 0x411   :  { %v2784_v2 = vadd.f32 %v5674_v56, %v2783_v37  ;;  %v1268_v62 = vsub.f32 1.5, %v1267_v17 }
 0x413   :  { %v2900_v57 = vadd.f32 %v3422_v46, %v2784_v2  ;;  %v1269_v13 = vmul.f32 %v3300_v21, %v1268_v62 }
 0x415   :  { %2964 = vst.msk [vmem:[#allocation2 + $0xe8] sm:$0xff] %vm92_vm0, %v2900_v57  ;;  %v1273_v7 = vsel %vm1272_vm15, %v3300_v21, %v1269_v13 }
 0x416   :  { %v1490_v9 = vmul.f32 %v1273_v7, %v5233_v44 }
 0x418   :  { %3092 = vmatmul.msk.bf16.gmra.mxu2 %vm2605_vm14, %v2556_v11  ;;  %v1558_v41 = vmul.f32 %v5589_v22, %v1490_v9 }
 0x42e   :  { %v627_v31 = vpop.xlane.xlu0 %626 }
 0x42f   :  { %v723_v45 = vmul.f32 %v627_v31, %v3560_v20  ;;  %v633_v6 = vpop.xlane.xlu1 %632 }
 0x430   :  { %v725_v54 = vmul.f32 %v633_v6, %v3560_v20 }
 0x431   :  { %v787_v36 = vadd.f32 1e-05, %v723_v45 }
 0x432   :  { %v5707_v0 = vadd.f32 1e-05, %v725_v54 }
 0x433   :  { %3301 = vrsqrt.f32 %v787_v36  ;;  %vm1280_vm2 = vweird.f32 %v787_v36 }
 0x434   :  { %3303 = vrsqrt.f32 %v5707_v0  ;;  %vm1300_vm4 = vweird.f32 %v5707_v0 }
 0x436   :  { %v630_v23 = vpop.xlane.xlu0 %629 }
 0x437   :  { %v724_v15 = vmul.f32 %v630_v23, %v3560_v20  ;;  %v636_v1 = vpop.xlane.xlu1 %635 }
 0x438   :  { %v726_v61 = vmul.f32 %v636_v1, %v3560_v20 }
 0x439   :  { %v3302_v18 = vpop.eup %3301  ;;  %v5711_v32 = vadd.f32 1e-05, %v724_v15  ;;  %v1626_v15 = vadd.f32 %v5613_v43, %v1558_v41 }
 0x43a   :  { %v1275_v39 = vmul.f32 %v3302_v18, %v787_v36  ;;  %v5715_v12 = vpop.eup %3303  ;;  %v5719_v27 = vadd.f32 1e-05, %v726_v61  ;;  %vm1281_vm1 = vweird.f32 %v3302_v18 }
 0x43b   :  { %3305 = vrsqrt.f32 %v5711_v32  ;;  %v1295_v50 = vmul.f32 %v5715_v12, %v5707_v0  ;;  %vm1282_vm3 = vmor %vm1280_vm2, %vm1281_vm1  ;;  %vm1301_vm5 = vweird.f32 %v5715_v12  ;;  %vm1290_vm7 = vweird.f32 %v5711_v32 }
 0x43c   :  { %v1276_v58 = vmul.f32 %v3302_v18, %v1275_v39  ;;  %3307 = vrsqrt.f32 %v5719_v27  ;;  %vm5774_vm8 = vmor %vm1300_vm4, %vm1301_vm5  ;;  %vm1310_vm10 = vweird.f32 %v5719_v27 }
 0x43d   :  { %v1296_v30 = vmul.f32 %v5715_v12, %v1295_v50 }
 0x43e   :  { %v1277_v4 = vmul.f32 0.5, %v1276_v58  ;;  %v260_v52 = vpop.xlane.xlu0 %259 }
 0x43f   :  { %v347_v59 = vmul.f32 %v3560_v20, %v260_v52  ;;  %v266_v48 = vpop.xlane.xlu1 %265  ;;  %v1297_v57 = vmul.f32 0.5, %v1296_v30 }
 0x440   :  { %v1278_v38 = vsub.f32 1.5, %v1277_v4  ;;  %v639_v37 = vpop.xlane.xlu2 %638  ;;  %v349_v46 = vmul.f32 %v3560_v20, %v266_v48 }
 0x441   :  { %v5723_v33 = vpop.eup %3305  ;;  %v5727_v60 = vsub.f32 %v5441_v14, %v347_v59  ;;  %v727_v53 = vmul.f32 %v639_v37, %v3560_v20  ;;  %v1298_v6 = vsub.f32 1.5, %v1297_v57  ;;  %v5786_v59 = vld [vmem:[%s6387_s4] ss:$0 sm:$0xff] }
 0x442   :  { %v1279_v2 = vmul.f32 %v3302_v18, %v1278_v38  ;;  %v1285_v35 = vmul.f32 %v5723_v33, %v5711_v32  ;;  %v5743_v10 = vsub.f32 %v5468_v25, %v349_v46  ;;  %v5750_v54 = vpop.eup %3307  ;;  %vm1291_vm6 = vweird.f32 %v5723_v33 }
 0x443   :  { %v475_v44 = vmul.f32 %v5727_v60, %v5727_v60  ;;  %v5737_v11 = vadd.f32 1e-05, %v727_v53  ;;  %v1299_v7 = vmul.f32 %v5715_v12, %v1298_v6  ;;  %v1305_v32 = vmul.f32 %v5750_v54, %v5719_v27  ;;  %vm5793_vm9 = vmor %vm1290_vm7, %vm1291_vm6 }
 0x444   :  { %v1283_v3 = vsel %vm1282_vm3, %v3302_v18, %v1279_v2  ;;  %v1286_v14 = vmul.f32 %v5723_v33, %v1285_v35  ;;  %v477_v17 = vmul.f32 %v5743_v10, %v5743_v10  ;;  %vm1311_vm13 = vweird.f32 %v5750_v54 }
 0x445   :  { %v1491_v55 = vmul.f32 %v1283_v3, %v5370_v19  ;;  %3309 = vrsqrt.f32 %v5737_v11  ;;  %v649_v31 = vsel %vm92_vm0, %v475_v44, 0.0  ;;  %v1303_v44 = vsel %vm5774_vm8, %v5715_v12, %v1299_v7  ;;  %v5824_v12 = vld [vmem:[%s6383_s0 + $0x1f8] sm:$0xff]  ;;  %vm5885_vm1 = vmor %vm1310_vm10, %vm1311_vm13 }
 0x446   :  { %v1287_v21 = vmul.f32 0.5, %v1286_v14  ;;  %v263_v8 = vpop.xlane.xlu0 %262  ;;  %650 = vadd.xlane.f32.xlu1 %v649_v31  ;;  %v655_v1 = vsel %vm92_vm0, %v477_v17, 0.0  ;;  %v1306_v57 = vmul.f32 %v5750_v54, %v1305_v32  ;;  %v1493_v31 = vmul.f32 %v1303_v44, %v5382_v29 }
 0x447   :  { %v348_v45 = vmul.f32 %v3560_v20, %v263_v8  ;;  %v1559_v19 = vmul.f32 %v5589_v22, %v1491_v55  ;;  %v269_v62 = vpop.xlane.xlu1 %268  ;;  %656 = vadd.xlane.f32.xlu2 %v655_v1  ;;  %v282_v29 = vsel %vm92_vm0, %v5824_v12, 0.0  ;;  %vm1320_vm11 = vweird.f32 %v5737_v11 }
 0x448   :  { %v1288_v36 = vsub.f32 1.5, %v1287_v21  ;;  %v642_v25 = vpop.xlane.xlu2 %641  ;;  %v350_v13 = vmul.f32 %v3560_v20, %v269_v62  ;;  %v1561_v4 = vmul.f32 %v5589_v22, %v1493_v31 }
 0x449   :  { %v5755_v23 = vsub.f32 %v5490_v47, %v348_v45  ;;  %v728_v39 = vmul.f32 %v642_v25, %v3560_v20  ;;  %v1627_v58 = vadd.f32 %v5613_v43, %v1559_v19 }
 0x44a   :  { %v1289_v18 = vmul.f32 %v5723_v33, %v1288_v36  ;;  %v5781_v52 = vsub.f32 %v5499_v34, %v350_v13  ;;  %v1307_v36 = vmul.f32 0.5, %v1306_v57  ;;  %v3424_v13 = vld [vmem:[%s6383_s0 + $0xf0] sm:$0xff] }
 0x44b   :  { %v476_v47 = vmul.f32 %v5755_v23, %v5755_v23  ;;  %v5767_v50 = vpop.eup %3309  ;;  %v1667_v37 = vpack.c.bf16 %v1627_v58, %v1626_v15  ;;  %v5804_v2 = vadd.f32 1e-05, %v728_v39 }
 0x44c   :  { %v1315_v38 = vmul.f32 %v5767_v50, %v5737_v11  ;;  %v1293_v34 = vsel %vm5793_vm9, %v5723_v33, %v1289_v18  ;;  %v478_v35 = vmul.f32 %v5781_v52, %v5781_v52  ;;  %v1308_v58 = vsub.f32 1.5, %v1307_v36 }
 0x44d   :  { %v1901_v61 = vpop.f32.mrf.mxu3  ;;  %v652_v53 = vsel %vm92_vm0, %v476_v47, 0.0  ;;  %3048 = vmatmul.msk.bf16.gmra.mxu3 %vm92_vm0, %v1667_v37  ;;  %v1492_v41 = vmul.f32 %v1293_v34, %v5400_v16  ;;  %3311 = vrsqrt.f32 %v5804_v2  ;;  %vm1321_vm12 = vweird.f32 %v5767_v50 }
 0x44e   :  { %v5789_v30 = vadd.f32 %v5786_v59, %v1901_v61  ;;  %v1316_v48 = vmul.f32 %v5767_v50, %v1315_v38  ;;  %v645_v46 = vpop.xlane.xlu0 %644  ;;  %653 = vadd.xlane.f32.xlu1 %v652_v53  ;;  %v658_v55 = vsel %vm92_vm0, %v478_v35, 0.0  ;;  %v1309_v57 = vmul.f32 %v5750_v54, %v1308_v58  ;;  %vm5872_vm15 = vmor %vm1320_vm11, %vm1321_vm12 }
 0x44f   :  { %v729_v33 = vmul.f32 %v645_v46, %v3560_v20  ;;  %659 = vadd.xlane.f32.xlu2 %v658_v55  ;;  %vm1330_vm4 = vweird.f32 %v5804_v2 }
 0x450   :  { %v2065_v9 = vmul.f32 0.044715, %v5789_v30  ;;  %v272_v14 = vpop.xlane.xlu2 %271  ;;  %v1317_v45 = vmul.f32 0.5, %v1316_v48 }
 0x451   :  { %v351_v21 = vmul.f32 %v3560_v20, %v272_v14  ;;  %v5819_v8 = vadd.f32 1e-05, %v729_v33 }
 0x452   :  { %v2129_v3 = vmul.f32 %v2065_v9, %v5789_v30  ;;  %v2786_v16 = vpop.f32.mrf.mxu1  ;;  %v1318_v1 = vsub.f32 1.5, %v1317_v45 }
 0x453   :  { %v5829_v17 = vsub.f32 %v5563_v24, %v351_v21  ;;  %3313 = vrsqrt.f32 %v5819_v8  ;;  %v2787_v25 = vadd.f32 %v5674_v56, %v2786_v16  ;;  %v1560_v24 = vmul.f32 %v5589_v22, %v1492_v41  ;;  %v5851_v32 = vpop.eup %3311 }
 0x454   :  { %v2193_v62 = vmul.f32 %v2129_v3, %v5789_v30  ;;  %v1319_v35 = vmul.f32 %v5767_v50, %v1318_v1  ;;  %v1629_v41 = vadd.f32 %v5613_v43, %v1561_v4  ;;  %v1325_v11 = vmul.f32 %v5851_v32, %v5804_v2 }
 0x455   :  { %v1903_v6 = vpop.f32.mrf.mxu3  ;;  %v479_v18 = vmul.f32 %v5829_v17, %v5829_v17  ;;  %v2901_v39 = vadd.f32 %v3424_v13, %v2787_v25  ;;  %v1628_v37 = vadd.f32 %v5613_v43, %v1560_v24  ;;  %v3425_v25 = vld [vmem:[%s6383_s0 + $0xf8] sm:$0xff]  ;;  %vm1340_vm2 = vweird.f32 %v5819_v8 }
 0x456   :  { %v5833_v19 = vadd.f32 %v5786_v59, %v1903_v6  ;;  %v5846_v61 = vpop.xlane.xlu0 %647  ;;  %283 = vadd.xlane.f32.xlu1 %v282_v29  ;;  %v2257_v38 = vadd.f32 %v2193_v62, %v5789_v30  ;;  %v1323_v27 = vsel %vm5872_vm15, %v5767_v50, %v1319_v35  ;;  %v1326_v1 = vmul.f32 %v5851_v32, %v1325_v11 }
 0x457   :  { %v661_v7 = vsel %vm92_vm0, %v479_v18, 0.0  ;;  %2965 = vst.msk [vmem:[#allocation2 + $0xf0] sm:$0xff] %vm92_vm0, %v2901_v39  ;;  %v1668_v45 = vpack.c.bf16 %v1629_v41, %v1628_v37  ;;  %v1495_v39 = vmul.f32 %v1323_v27, %v5460_v63  ;;  %vm1331_vm5 = vweird.f32 %v5851_v32 }
 0x458   :  { %v2066_v15 = vmul.f32 0.044715, %v5833_v19  ;;  %662 = vadd.xlane.f32.xlu0 %v661_v7  ;;  %v275_v0 = vpop.xlane.xlu2 %274  ;;  %v2321_v44 = vmul.f32 0.7978846, %v2257_v38  ;;  %v1327_v37 = vmul.f32 0.5, %v1326_v1  ;;  %v2002_v11 = vmul.f32 0.5, %v5833_v19  ;;  %vm5959_vm7 = vmor %vm1330_vm4, %vm1331_vm5 }
 0x459   :  { %v5858_v34 = vpop.eup %3313  ;;  %v352_v9 = vmul.f32 %v3560_v20, %v275_v0  ;;  %v1563_v35 = vmul.f32 %v5589_v22, %v1495_v39 }
 0x45a   :  { %v2130_v47 = vmul.f32 %v2066_v15, %v5833_v19  ;;  %v1335_v53 = vmul.f32 %v5858_v34, %v5819_v8  ;;  %v2788_v14 = vpop.f32.mrf.mxu1  ;;  %3315 = vtanh.f32 %v2321_v44  ;;  %v1313_v15 = vsel %vm5885_vm1, %v5750_v54, %v1309_v57 }
 0x45b   :  { %v5877_v3 = vsub.f32 %v5602_v49, %v352_v9  ;;  %v2789_v31 = vadd.f32 %v5674_v56, %v2788_v14  ;;  %v2001_v44 = vmul.f32 0.5, %v5789_v30  ;;  %v1328_v21 = vsub.f32 1.5, %v1327_v37 }
 0x45c   :  { %v2194_v48 = vmul.f32 %v2130_v47, %v5833_v19  ;;  %v1336_v16 = vmul.f32 %v5858_v34, %v1335_v53  ;;  %v1494_v47 = vmul.f32 %v1313_v15, %v5410_v5  ;;  %vm1341_vm3 = vweird.f32 %v5858_v34 }
 0x45d   :  { %v1906_v46 = vpop.f32.mrf.mxu3  ;;  %v480_v6 = vmul.f32 %v5877_v3, %v5877_v3  ;;  %v2902_v29 = vadd.f32 %v3425_v25, %v2789_v31  ;;  %3049 = vmatmul.msk.bf16.gmra.mxu3 %vm92_vm0, %v1668_v45  ;;  %v1631_v45 = vadd.f32 %v5613_v43, %v1563_v35  ;;  %vm5945_vm6 = vmor %vm1340_vm2, %vm1341_vm3 }
 0x45e   :  { %v5880_v55 = vadd.f32 %v5786_v59, %v1906_v46  ;;  %v2258_v36 = vadd.f32 %v2194_v48, %v5833_v19  ;;  %v278_v62 = vpop.xlane.xlu0 %277  ;;  %v1337_v7 = vmul.f32 0.5, %v1336_v16  ;;  %v1562_v46 = vmul.f32 %v5589_v22, %v1494_v47 }
 0x45f   :  { %v664_v24 = vsel %vm92_vm0, %v480_v6, 0.0  ;;  %v353_v50 = vmul.f32 %v3560_v20, %v278_v62  ;;  %2966 = vst.msk [vmem:[#allocation2 + $0xf8] sm:$0xff] %vm92_vm0, %v2902_v29 }
 0x460   :  { %v2067_v49 = vmul.f32 0.044715, %v5880_v55  ;;  %665 = vadd.xlane.f32.xlu1 %v664_v24  ;;  %v2322_v13 = vmul.f32 0.7978846, %v2258_v36  ;;  %v3316_v9 = vpop.eup %3315  ;;  %v1338_v5 = vsub.f32 1.5, %v1337_v7  ;;  %v1630_v16 = vadd.f32 %v5613_v43, %v1562_v46  ;;  %v3426_v7 = vld [vmem:[%s6383_s0 + $0x100] sm:$0xff] }
 0x461   :  { %v5914_v58 = vsub.f32 %v5632_v26, %v353_v50  ;;  %v2449_v14 = vadd.f32 1.0, %v3316_v9 }
 0x462   :  { %v2131_v18 = vmul.f32 %v2067_v49, %v5880_v55  ;;  %3317 = vtanh.f32 %v2322_v13  ;;  %v1339_v36 = vmul.f32 %v5858_v34, %v1338_v5  ;;  %v1669_v13 = vpack.c.bf16 %v1631_v45, %v1630_v16 }
 0x463   :  { %v481_v38 = vmul.f32 %v5914_v58, %v5914_v58  ;;  %v2513_v62 = vmul.f32 %v2449_v14, %v2001_v44 }
 0x464   :  { %v2195_v54 = vmul.f32 %v2131_v18, %v5880_v55  ;;  %v1329_v18 = vmul.f32 %v5851_v32, %v1328_v21  ;;  %v1343_v47 = vsel %vm5945_vm6, %v5858_v34, %v1339_v36 }
 0x465   :  { %v1908_v4 = vpop.f32.mrf.mxu3  ;;  %v667_v48 = vsel %vm92_vm0, %v481_v38, 0.0  ;;  %v1497_v34 = vmul.f32 %v1343_v47, %v5553_v42  ;;  %v3427_v42 = vld [vmem:[%s6383_s0 + $0x108] sm:$0xff] }
 0x466   :  { %v5919_v0 = vadd.f32 %v5786_v59, %v1908_v4  ;;  %v2259_v63 = vadd.f32 %v2195_v54, %v5880_v55  ;;  %668 = vadd.xlane.f32.xlu2 %v667_v48  ;;  %v281_v53 = vpop.xlane.xlu0 %280  ;;  %v1333_v9 = vsel %vm5959_vm7, %v5851_v32, %v1329_v18 }
 0x467   :  { %v354_v33 = vmul.f32 %v3560_v20, %v281_v53  ;;  %v1496_v48 = vmul.f32 %v1333_v9, %v5518_v51  ;;  %v1565_v32 = vmul.f32 %v5589_v22, %v1497_v34 }
 0x468   :  { %v2068_v26 = vmul.f32 0.044715, %v5919_v0  ;;  %v3318_v41 = vpop.eup %3317  ;;  %v2323_v31 = vmul.f32 0.7978846, %v2259_v63 }
 0x469   :  { %v5935_v49 = vsub.f32 %v5651_v28, %v354_v33  ;;  %v2450_v30 = vadd.f32 1.0, %v3318_v41  ;;  %v2003_v41 = vmul.f32 0.5, %v5880_v55  ;;  %v1564_v21 = vmul.f32 %v5589_v22, %v1496_v48 }
 0x46a   :  { %v2132_v57 = vmul.f32 %v2068_v26, %v5919_v0  ;;  %3319 = vtanh.f32 %v2323_v31 }
 0x46b   :  { %v2791_v28 = vpop.f32.mrf.mxu2  ;;  %v482_v29 = vmul.f32 %v5935_v49, %v5935_v49  ;;  %v2514_v15 = vmul.f32 %v2450_v30, %v2002_v11  ;;  %v2004_v11 = vmul.f32 0.5, %v5919_v0  ;;  %v1633_v30 = vadd.f32 %v5613_v43, %v1565_v32 }
 0x46c   :  { %v2196_v6 = vmul.f32 %v2132_v57, %v5919_v0  ;;  %v2792_v24 = vadd.f32 %v5674_v56, %v2791_v28  ;;  %v1632_v19 = vadd.f32 %v5613_v43, %v1564_v21 }
 0x46d   :  { %v1911_v27 = vpop.f32.mrf.mxu3  ;;  %v670_v39 = vsel %vm92_vm0, %v482_v29, 0.0  ;;  %v2557_v54 = vpack.c.bf16 %v2514_v15, %v2513_v62  ;;  %3050 = vmatmul.msk.bf16.gmra.mxu3 %vm92_vm0, %v1669_v13 }
 0x46e   :  { %v5950_v25 = vadd.f32 %v5786_v59, %v1911_v27  ;;  %v2260_v50 = vadd.f32 %v2196_v6, %v5919_v0  ;;  %v2903_v4 = vadd.f32 %v3426_v7, %v2792_v24  ;;  %671 = vadd.xlane.f32.xlu0 %v670_v39  ;;  %v1670_v62 = vpack.c.bf16 %v1633_v30, %v1632_v19  ;;  %v3428_v0 = vld [vmem:[%s6383_s0 + $0x110] sm:$0xff]  ;;  %v3429_v39 = vld [vmem:[%s6383_s0 + $0x118] sm:$0xff] }
 0x46f   :  { %3093 = vmatmul.msk.bf16.gmra.mxu2 %vm2605_vm14, %v2557_v54 }
 0x470   :  { %v2069_v1 = vmul.f32 0.044715, %v5950_v25  ;;  %v2324_v2 = vmul.f32 0.7978846, %v2260_v50  ;;  %2967 = vst.msk [vmem:[#allocation2 + $0x100] sm:$0xff] %vm92_vm0, %v2903_v4  ;;  %v3320_v63 = vpop.eup %3319  ;;  %v2005_v4 = vmul.f32 0.5, %v5950_v25 }
 0x471   :  { %v2451_v57 = vadd.f32 1.0, %v3320_v63  ;;  %v3430_v63 = vld [vmem:[%s6383_s0 + $0x120] sm:$0xff] }
 0x472   :  { %v2133_v38 = vmul.f32 %v2069_v1, %v5950_v25  ;;  %3321 = vtanh.f32 %v2324_v2 }
 0x473   :  { %v2793_v35 = vpop.f32.mrf.mxu2  ;;  %v2515_v6 = vmul.f32 %v2451_v57, %v2003_v41 }
 0x474   :  { %v2197_v37 = vmul.f32 %v2133_v38, %v5950_v25  ;;  %v2794_v53 = vadd.f32 %v5674_v56, %v2793_v35  ;;  %v3431_v35 = vld [vmem:[%s6383_s0 + $0x128] sm:$0xff] }
 0x475   :  { %v1913_v26 = vpop.f32.mrf.mxu3 }
 0x476   :  { %v1914_v5 = vadd.f32 %v5786_v59, %v1913_v26  ;;  %v2261_v46 = vadd.f32 %v2197_v37, %v5950_v25  ;;  %v2904_v14 = vadd.f32 %v3427_v42, %v2794_v53  ;;  %v730_v42 = vmul.f32 %v5846_v61, %v3560_v20 }
 0x478   :  { %v2070_v44 = vmul.f32 0.044715, %v1914_v5  ;;  %v3322_v33 = vpop.eup %3321  ;;  %2968 = vst.msk [vmem:[#allocation2 + $0x108] sm:$0xff] %vm92_vm0, %v2904_v14  ;;  %v2325_v45 = vmul.f32 0.7978846, %v2261_v46  ;;  %v2006_v47 = vmul.f32 0.5, %v1914_v5 }
 0x479   :  { %v2452_v31 = vadd.f32 1.0, %v3322_v33  ;;  %v3433_v14 = vld [vmem:[%s6383_s0 + $0x138] sm:$0xff] }
 0x47a   :  { %v2134_v51 = vmul.f32 %v2070_v44, %v1914_v5  ;;  %3323 = vtanh.f32 %v2325_v45  ;;  %v3432_v44 = vld [vmem:[%s6383_s0 + $0x130] sm:$0xff] }
 0x47b   :  { %v2516_v36 = vmul.f32 %v2452_v31, %v2004_v11  ;;  %v2796_v16 = vpop.f32.mrf.mxu2 }
 0x47c   :  { %v2198_v27 = vmul.f32 %v2134_v51, %v1914_v5  ;;  %v2797_v55 = vadd.f32 %v5674_v56, %v2796_v16  ;;  %v794_v51 = vadd.f32 1e-05, %v730_v42 }
 0x47d   :  { %v2558_v28 = vpack.c.bf16 %v2516_v36, %v2515_v6  ;;  %3051 = vmatmul.msk.bf16.gmra.mxu3 %vm92_vm0, %v1670_v62 }
 0x47e   :  { %v2262_v29 = vadd.f32 %v2198_v27, %v1914_v5  ;;  %v2905_v18 = vadd.f32 %v3428_v0, %v2797_v55  ;;  %vm1350_vm8 = vweird.f32 %v794_v51 }
 0x47f   :  { %3094 = vmatmul.msk.bf16.gmra.mxu2 %vm2605_vm14, %v2558_v28 }
 0x480   :  { %v2326_v15 = vmul.f32 0.7978846, %v2262_v29  ;;  %2969 = vst.msk [vmem:[#allocation2 + $0x110] sm:$0xff] %vm92_vm0, %v2905_v18  ;;  %v3324_v24 = vpop.eup %3323 }
 0x481   :  { %v2453_v13 = vadd.f32 1.0, %v3324_v24 }
 0x482   :  { %3325 = vtanh.f32 %v2326_v15 }
 0x483   :  { %v2798_v50 = vpop.f32.mrf.mxu2  ;;  %v2517_v38 = vmul.f32 %v2453_v13, %v2005_v4  ;;  %3327 = vrsqrt.f32 %v794_v51 }
 0x484   :  { %v2799_v8 = vadd.f32 %v5674_v56, %v2798_v50 }
 0x486   :  { %v2906_v54 = vadd.f32 %v3429_v39, %v2799_v8 }
 0x488   :  { %v3326_v1 = vpop.eup %3325  ;;  %2970 = vst.msk [vmem:[#allocation2 + $0x118] sm:$0xff] %vm92_vm0, %v2906_v54 }
 0x489   :  { %v2454_v7 = vadd.f32 1.0, %v3326_v1  ;;  %v3328_v21 = vpop.eup %3327 }
 0x48a   :  { %v1345_v11 = vmul.f32 %v3328_v21, %v794_v51  ;;  %vm1351_vm9 = vweird.f32 %v3328_v21 }
 0x48b   :  { %v2518_v2 = vmul.f32 %v2454_v7, %v2006_v47  ;;  %v2801_v9 = vpop.f32.mrf.mxu2  ;;  %vm6037_vm10 = vmor %vm1350_vm8, %vm1351_vm9 }
 0x48c   :  { %v2802_v37 = vadd.f32 %v5674_v56, %v2801_v9  ;;  %v1346_v31 = vmul.f32 %v3328_v21, %v1345_v11 }
 0x48d   :  { %v2559_v34 = vpack.c.bf16 %v2518_v2, %v2517_v38 }
 0x48e   :  { %v2907_v26 = vadd.f32 %v3430_v63, %v2802_v37  ;;  %v1347_v36 = vmul.f32 0.5, %v1346_v31 }
 0x48f   :  { %3095 = vmatmul.msk.bf16.gmra.mxu2 %vm2605_vm14, %v2559_v34 }
 0x490   :  { %2971 = vst.msk [vmem:[#allocation2 + $0x120] sm:$0xff] %vm92_vm0, %v2907_v26  ;;  %v1348_v16 = vsub.f32 1.5, %v1347_v36 }
 0x492   :  { %v1349_v15 = vmul.f32 %v3328_v21, %v1348_v16 }
 0x493   :  { %v2803_v48 = vpop.f32.mrf.mxu2 }
 0x494   :  { %v2804_v25 = vadd.f32 %v5674_v56, %v2803_v48  ;;  %v1353_v13 = vsel %vm6037_vm10, %v3328_v21, %v1349_v15 }
 0x495   :  { %v1498_v37 = vmul.f32 %v1353_v13, %v5593_v40 }
 0x496   :  { %v2908_v5 = vadd.f32 %v3431_v35, %v2804_v25 }
 0x498   :  { %2972 = vst.msk [vmem:[#allocation2 + $0x128] sm:$0xff] %vm92_vm0, %v2908_v5 }
 0x49b   :  { %v2806_v53 = vpop.f32.mrf.mxu2 }
 0x49c   :  { %v2807_v46 = vadd.f32 %v5674_v56, %v2806_v53 }
 0x49e   :  { %v2909_v32 = vadd.f32 %v3432_v44, %v2807_v46 }
 0x4a0   :  { %2973 = vst.msk [vmem:[#allocation2 + $0x130] sm:$0xff] %vm92_vm0, %v2909_v32 }
 0x4a3   :  { %v2808_v57 = vpop.f32.mrf.mxu2 }
 0x4a4   :  { %v2809_v33 = vadd.f32 %v5674_v56, %v2808_v57  ;;  %v1566_v57 = vmul.f32 %v5589_v22, %v1498_v37 }
 0x4a6   :  { %v2910_v41 = vadd.f32 %v3433_v14, %v2809_v33 }
 0x4a8   :  { %2974 = vst.msk [vmem:[#allocation2 + $0x138] sm:$0xff] %vm92_vm0, %v2910_v41 }
 0x4b9   :  { %v651_v45 = vpop.xlane.xlu1 %650 }
 0x4ba   :  { %v731_v30 = vmul.f32 %v651_v45, %v3560_v20  ;;  %v657_v6 = vpop.xlane.xlu2 %656 }
 0x4bb   :  { %v733_v61 = vmul.f32 %v657_v6, %v3560_v20 }
 0x4bc   :  { %v795_v56 = vadd.f32 1e-05, %v731_v30 }
 0x4bd   :  { %v6032_v27 = vadd.f32 1e-05, %v733_v61 }
 0x4be   :  { %3329 = vrsqrt.f32 %v795_v56  ;;  %vm1360_vm12 = vweird.f32 %v795_v56 }
 0x4bf   :  { %3331 = vrsqrt.f32 %v6032_v27  ;;  %vm1380_vm15 = vweird.f32 %v6032_v27 }
 0x4c1   :  { %v654_v19 = vpop.xlane.xlu1 %653 }
 0x4c2   :  { %v732_v28 = vmul.f32 %v654_v19, %v3560_v20  ;;  %v660_v55 = vpop.xlane.xlu2 %659 }
 0x4c3   :  { %v734_v18 = vmul.f32 %v660_v55, %v3560_v20 }
 0x4c4   :  { %v3330_v29 = vpop.eup %3329  ;;  %v796_v62 = vadd.f32 1e-05, %v732_v28 }
 0x4c5   :  { %v1355_v0 = vmul.f32 %v3330_v29, %v795_v56  ;;  %v6041_v50 = vpop.eup %3331  ;;  %v6047_v54 = vadd.f32 1e-05, %v734_v18  ;;  %vm1361_vm11 = vweird.f32 %v3330_v29 }
 0x4c6   :  { %3333 = vrsqrt.f32 %v796_v62  ;;  %v1375_v1 = vmul.f32 %v6041_v50, %v6032_v27  ;;  %vm1362_vm13 = vmor %vm1360_vm12, %vm1361_vm11  ;;  %vm1381_vm1 = vweird.f32 %v6041_v50  ;;  %vm1370_vm3 = vweird.f32 %v796_v62 }
 0x4c7   :  { %v1356_v8 = vmul.f32 %v3330_v29, %v1355_v0  ;;  %3335 = vrsqrt.f32 %v6047_v54  ;;  %vm6080_vm4 = vmor %vm1380_vm15, %vm1381_vm1  ;;  %vm1390_vm8 = vweird.f32 %v6047_v54 }
 0x4c8   :  { %v1376_v7 = vmul.f32 %v6041_v50, %v1375_v1 }
 0x4c9   :  { %v1357_v39 = vmul.f32 0.5, %v1356_v8  ;;  %v284_v47 = vpop.xlane.xlu1 %283 }
 0x4ca   :  { %v355_v4 = vmul.f32 %v3560_v20, %v284_v47  ;;  %v1377_v35 = vmul.f32 0.5, %v1376_v7 }
 0x4cb   :  { %v663_v2 = vpop.xlane.xlu0 %662  ;;  %v1358_v38 = vsub.f32 1.5, %v1357_v39 }
 0x4cc   :  { %v735_v9 = vmul.f32 %v663_v2, %v3560_v20  ;;  %v3334_v34 = vpop.eup %3333  ;;  %v6054_v63 = vsub.f32 %v5824_v12, %v355_v4  ;;  %v1378_v33 = vsub.f32 1.5, %v1377_v35  ;;  %v6110_v2 = vld [vmem:[%s6384_s1] ss:$0 sm:$0xff] }
 0x4cd   :  { %v1359_v26 = vmul.f32 %v3330_v29, %v1358_v38  ;;  %v1365_v48 = vmul.f32 %v3334_v34, %v796_v62  ;;  %v6069_v51 = vpop.eup %3335  ;;  %vm1371_vm2 = vweird.f32 %v3334_v34 }
 0x4ce   :  { %v6057_v25 = vadd.f32 1e-05, %v735_v9  ;;  %v483_v5 = vmul.f32 %v6054_v63, %v6054_v63  ;;  %v1379_v6 = vmul.f32 %v6041_v50, %v1378_v33  ;;  %v1385_v36 = vmul.f32 %v6069_v51, %v6047_v54  ;;  %vm1372_vm5 = vmor %vm1370_vm3, %vm1371_vm2 }
 0x4cf   :  { %v1363_v53 = vsel %vm1362_vm13, %v3330_v29, %v1359_v26  ;;  %v1366_v46 = vmul.f32 %v3334_v34, %v1365_v48  ;;  %vm1391_vm9 = vweird.f32 %v6069_v51 }
 0x4d0   :  { %3337 = vrsqrt.f32 %v6057_v25  ;;  %v1499_v40 = vmul.f32 %v1363_v53, %v5727_v60  ;;  %v1916_v12 = vpop.f32.mrf.mxu3  ;;  %v673_v32 = vsel %vm92_vm0, %v483_v5, 0.0  ;;  %v1383_v0 = vsel %vm6080_vm4, %v6041_v50, %v1379_v6  ;;  %vm6146_vm11 = vmor %vm1390_vm8, %vm1391_vm9 }
 0x4d1   :  { %v1367_v44 = vmul.f32 0.5, %v1366_v46  ;;  %v6066_v42 = vadd.f32 %v5786_v59, %v1916_v12  ;;  %674 = vadd.xlane.f32.xlu1 %v673_v32  ;;  %v1386_v18 = vmul.f32 %v6069_v51, %v1385_v36  ;;  %v1501_v7 = vmul.f32 %v1383_v0, %v5743_v10  ;;  %v6127_v46 = vld [vmem:[%s6385_s2] ss:$0 sm:$0xff]  ;;  %s3491_s2 = smov 8  }
 0x4d2   :  { %v1567_v41 = vmul.f32 %v5589_v22, %v1499_v40  ;;  %v1634_v22 = vadd.f32 %v5613_v43, %v1566_v57  ;;  %vm1400_vm6 = vweird.f32 %v6057_v25 }
 0x4d3   :  { %v666_v14 = vpop.xlane.xlu1 %665  ;;  %v1368_v60 = vsub.f32 1.5, %v1367_v44  ;;  %v2071_v21 = vmul.f32 0.044715, %v6066_v42  ;;  %v1387_v4 = vmul.f32 0.5, %v1386_v18  ;;  %v1569_v26 = vmul.f32 %v6110_v2, %v1501_v7 }
 0x4d4   :  { %v736_v11 = vmul.f32 %v666_v14, %v3560_v20  ;;  %v1635_v31 = vadd.f32 %v5613_v43, %v1567_v41  ;;  %v2007_v0 = vmul.f32 0.5, %v6066_v42 }
 0x4d5   :  { %v1369_v30 = vmul.f32 %v3334_v34, %v1368_v60  ;;  %v2135_v27 = vmul.f32 %v2071_v21, %v6066_v42  ;;  %v1388_v48 = vsub.f32 1.5, %v1387_v4  ;;  %v1637_v33 = vadd.f32 %v6127_v46, %v1569_v26 }
 0x4d6   :  { %v6076_v45 = vpop.eup %3337  ;;  %v1671_v16 = vpack.c.bf16 %v1635_v31, %v1634_v22  ;;  %v6090_v43 = vadd.f32 1e-05, %v736_v11 }
 0x4d7   :  { %v1395_v61 = vmul.f32 %v6076_v45, %v6057_v25  ;;  %v1373_v19 = vsel %vm1372_vm5, %v3334_v34, %v1369_v30  ;;  %v2199_v15 = vmul.f32 %v2135_v27, %v6066_v42  ;;  %vm1401_vm7 = vweird.f32 %v6076_v45 }
 0x4d8   :  { %v1918_v55 = vpop.f32.mrf.mxu3  ;;  %3052 = vmatmul.msk.bf16.gmra.mxu3 %vm92_vm0, %v1671_v16  ;;  %v1500_v8 = vmul.f32 %v1373_v19, %v5755_v23  ;;  %3339 = vrsqrt.f32 %v6090_v43  ;;  %vm6137_vm10 = vmor %vm1400_vm6, %vm1401_vm7  ;;  %v1389_v41 = vmul.f32 %v6069_v51, %v1388_v48  ;;  %vm1410_vm15 = vweird.f32 %v6090_v43 }
 0x4d9   :  { %v1396_v28 = vmul.f32 %v6076_v45, %v1395_v61  ;;  %v669_v29 = vpop.xlane.xlu2 %668  ;;  %v1919_v24 = vadd.f32 %v5786_v59, %v1918_v55  ;;  %v2263_v13 = vadd.f32 %v2199_v15, %v6066_v42 }
 0x4da   :  { %v737_v62 = vmul.f32 %v669_v29, %v3560_v20  ;;  %v1568_v23 = vmul.f32 %v6110_v2, %v1500_v8  ;;  %v1393_v36 = vsel %vm6146_vm11, %v6069_v51, %v1389_v41 }
 0x4db   :  { %v1397_v39 = vmul.f32 0.5, %v1396_v28  ;;  %v2072_v47 = vmul.f32 0.044715, %v1919_v24  ;;  %v2327_v38 = vmul.f32 0.7978846, %v2263_v13  ;;  %v1502_v55 = vmul.f32 %v1393_v36, %v5781_v52 }
 0x4dc   :  { %v6101_v1 = vadd.f32 1e-05, %v737_v62  ;;  %v1636_v40 = vadd.f32 %v6127_v46, %v1568_v23  ;;  %v2008_v51 = vmul.f32 0.5, %v1919_v24 }
 0x4dd   :  { %v2136_v50 = vmul.f32 %v2072_v47, %v1919_v24  ;;  %v1398_v9 = vsub.f32 1.5, %v1397_v39  ;;  %v1570_v23 = vmul.f32 %v6110_v2, %v1502_v55 }
 0x4de   :  { %3341 = vrsqrt.f32 %v6101_v1  ;;  %v6115_v10 = vpop.eup %3339  ;;  %v1672_v11 = vpack.c.bf16 %v1637_v33, %v1636_v40  ;;  %vm1420_vm12 = vweird.f32 %v6101_v1 }
 0x4df   :  { %v2200_v34 = vmul.f32 %v2136_v50, %v1919_v24  ;;  %3343 = vtanh.f32 %v2327_v38  ;;  %v1399_v44 = vmul.f32 %v6076_v45, %v1398_v9  ;;  %v1405_v57 = vmul.f32 %v6115_v10, %v6090_v43 }
 0x4e0   :  { %v1921_v37 = vpop.f32.mrf.mxu3  ;;  %vm1411_vm1 = vweird.f32 %v6115_v10 }
 0x4e1   :  { %v6119_v35 = vadd.f32 %v5786_v59, %v1921_v37  ;;  %v2264_v5 = vadd.f32 %v2200_v34, %v1919_v24  ;;  %v1403_v25 = vsel %vm6137_vm10, %v6076_v45, %v1399_v44  ;;  %v1406_v6 = vmul.f32 %v6115_v10, %v1405_v57  ;;  %v6180_v24 = vld [vmem:[%s6389_s6] ss:$0 sm:$0xff]  ;;  %vm6207_vm3 = vmor %vm1410_vm15, %vm1411_vm1 }
 0x4e2   :  { %v1503_v27 = vmul.f32 %v1403_v25, %v5829_v17 }
 0x4e3   :  { %v2073_v32 = vmul.f32 0.044715, %v6119_v35  ;;  %v2328_v14 = vmul.f32 0.7978846, %v2264_v5  ;;  %v1407_v62 = vmul.f32 0.5, %v1406_v6  ;;  %v3437_v5 = vld [vmem:[%s6383_s0 + $0x140] sm:$0xff] }
 0x4e4   :  { %v6121_v53 = vpop.eup %3341  ;;  %v1571_v8 = vmul.f32 %v6110_v2, %v1503_v27  ;;  %v3438_v6 = vld [vmem:[%s6383_s0 + $0x148] sm:$0xff] }
 0x4e5   :  { %v1415_v12 = vmul.f32 %v6121_v53, %v6101_v1  ;;  %v2137_v60 = vmul.f32 %v2073_v32, %v6119_v35  ;;  %3345 = vtanh.f32 %v2328_v14  ;;  %v3344_v22 = vpop.eup %3343  ;;  %v1408_v4 = vsub.f32 1.5, %v1407_v62 }
 0x4e6   :  { %v2455_v28 = vadd.f32 1.0, %v3344_v22  ;;  %vm1421_vm13 = vweird.f32 %v6121_v53  ;;  %v1639_v34 = vadd.f32 %v6127_v46, %v1571_v8 }
 0x4e7   :  { %v1416_v31 = vmul.f32 %v6121_v53, %v1415_v12  ;;  %v2201_v30 = vmul.f32 %v2137_v60, %v6119_v35  ;;  %vm6197_vm2 = vmor %vm1420_vm12, %vm1421_vm13  ;;  %v1638_v12 = vadd.f32 %v6127_v46, %v1570_v23  ;;  %v1409_v54 = vmul.f32 %v6115_v10, %v1408_v4 }
 0x4e8   :  { %v1923_v56 = vpop.f32.mrf.mxu3  ;;  %3053 = vmatmul.msk.bf16.gmra.mxu3 %vm92_vm0, %v1672_v11  ;;  %v2519_v39 = vmul.f32 %v2455_v28, %v2007_v0 }
 0x4e9   :  { %v6161_v61 = vadd.f32 %v5786_v59, %v1923_v56  ;;  %v2265_v45 = vadd.f32 %v2201_v30, %v6119_v35  ;;  %v1417_v16 = vmul.f32 0.5, %v1416_v31  ;;  %v1673_v1 = vpack.c.bf16 %v1639_v34, %v1638_v12  ;;  %v3440_v12 = vld [vmem:[%s6383_s0 + $0x158] sm:$0xff] }
 0x4ea   :  { %v1413_v43 = vsel %vm6207_vm3, %v6115_v10, %v1409_v54 }
 0x4eb   :  { %v2074_v19 = vmul.f32 0.044715, %v6161_v61  ;;  %v3346_v29 = vpop.eup %3345  ;;  %v2329_v13 = vmul.f32 0.7978846, %v2265_v45  ;;  %v1418_v17 = vsub.f32 1.5, %v1417_v16  ;;  %v1504_v45 = vmul.f32 %v1413_v43, %v5877_v3 }
 0x4ec   :  { %v2456_v18 = vadd.f32 1.0, %v3346_v29  ;;  %v2010_v28 = vmul.f32 0.5, %v6161_v61 }
 0x4ed   :  { %v2138_v15 = vmul.f32 %v2074_v19, %v6161_v61  ;;  %3347 = vtanh.f32 %v2329_v13  ;;  %v1419_v26 = vmul.f32 %v6121_v53, %v1418_v17  ;;  %v2009_v19 = vmul.f32 0.5, %v6119_v35 }
 0x4ee   :  { %v2520_v47 = vmul.f32 %v2456_v18, %v2008_v51  ;;  %v1572_v18 = vmul.f32 %v6110_v2, %v1504_v45 }
 0x4ef   :  { %v2202_v7 = vmul.f32 %v2138_v15, %v6161_v61  ;;  %v1423_v14 = vsel %vm6197_vm2, %v6121_v53, %v1419_v26 }
 0x4f0   :  { %v1926_v50 = vpop.f32.mrf.mxu3  ;;  %v2560_v9 = vpack.c.bf16 %v2520_v47, %v2519_v39  ;;  %v1505_v22 = vmul.f32 %v1423_v14, %v5914_v58  ;;  %v3439_v39 = vld [vmem:[%s6383_s0 + $0x150] sm:$0xff]  ;;  %v1640_v4 = vadd.f32 %v6127_v46, %v1572_v18 }
 0x4f1   :  { %v6175_v42 = vadd.f32 %v5786_v59, %v1926_v50  ;;  %v2266_v37 = vadd.f32 %v2202_v7, %v6161_v61 }
 0x4f2   :  { %v2811_v52 = vpop.f32.mrf.mxu2  ;;  %3096 = vmatmul.msk.bf16.gmra.mxu2 %vm2605_vm14, %v2560_v9  ;;  %v1573_v58 = vmul.f32 %v6110_v2, %v1505_v22 }
 0x4f3   :  { %v2812_v38 = vadd.f32 %v6180_v24, %v2811_v52  ;;  %v2075_v48 = vmul.f32 0.044715, %v6175_v42  ;;  %v2330_v32 = vmul.f32 0.7978846, %v2266_v37  ;;  %v3348_v60 = vpop.eup %3347  ;;  %v2011_v54 = vmul.f32 0.5, %v6175_v42 }
 0x4f4   :  { %v2457_v36 = vadd.f32 1.0, %v3348_v60  ;;  %v1641_v35 = vadd.f32 %v6127_v46, %v1573_v58 }
 0x4f5   :  { %v2911_v40 = vadd.f32 %v3437_v5, %v2812_v38  ;;  %v2139_v57 = vmul.f32 %v2075_v48, %v6175_v42  ;;  %3349 = vtanh.f32 %v2330_v32 }
 0x4f6   :  { %v2521_v55 = vmul.f32 %v2457_v36, %v2009_v19  ;;  %v1674_v23 = vpack.c.bf16 %v1641_v35, %v1640_v4 }
 0x4f7   :  { %2975 = vst.msk [vmem:[#allocation2 + $0x140] sm:$0xff] %vm92_vm0, %v2911_v40  ;;  %v2203_v41 = vmul.f32 %v2139_v57, %v6175_v42 }
 0x4f8   :  { %v1928_v21 = vpop.f32.mrf.mxu3  ;;  %3054 = vmatmul.msk.bf16.gmra.mxu3 %vm92_vm0, %v1673_v1 }
 0x4f9   :  { %v1929_v25 = vadd.f32 %v5786_v59, %v1928_v21  ;;  %v2267_v30 = vadd.f32 %v2203_v41, %v6175_v42 }
 0x4fa   :  { %v2813_v11 = vpop.f32.mrf.mxu2 }
 0x4fb   :  { %v2814_v31 = vadd.f32 %v6180_v24, %v2813_v11  ;;  %v2076_v53 = vmul.f32 0.044715, %v1929_v25  ;;  %v3350_v27 = vpop.eup %3349  ;;  %v2331_v16 = vmul.f32 0.7978846, %v2267_v30  ;;  %v2012_v57 = vmul.f32 0.5, %v1929_v25  ;;  %v3441_v30 = vld [vmem:[%s6383_s0 + $0x160] sm:$0xff] }
 0x4fc   :  { %v2458_v29 = vadd.f32 1.0, %v3350_v27  ;;  %v3442_v27 = vld [vmem:[%s6383_s0 + $0x168] sm:$0xff] }
 0x4fd   :  { %v2912_v56 = vadd.f32 %v3438_v6, %v2814_v31  ;;  %v2140_v10 = vmul.f32 %v2076_v53, %v1929_v25  ;;  %3351 = vtanh.f32 %v2331_v16 }
 0x4fe   :  { %v2522_v62 = vmul.f32 %v2458_v29, %v2010_v28 }
 0x4ff   :  { %2976 = vst.msk [vmem:[#allocation2 + $0x148] sm:$0xff] %vm92_vm0, %v2912_v56  ;;  %v2204_v15 = vmul.f32 %v2140_v10, %v1929_v25 }
 0x500   :  { %v1931_v0 = vpop.f32.mrf.mxu3  ;;  %v2561_v13 = vpack.c.bf16 %v2522_v62, %v2521_v55  ;;  %v672_v55 = vpop.xlane.xlu0 %671 }
 0x501   :  { %v1932_v3 = vadd.f32 %v5786_v59, %v1931_v0  ;;  %v2268_v17 = vadd.f32 %v2204_v15, %v1929_v25  ;;  %v738_v62 = vmul.f32 %v672_v55, %v3560_v20 }
 0x502   :  { %v2816_v51 = vpop.f32.mrf.mxu2  ;;  %3097 = vmatmul.msk.bf16.gmra.mxu2 %vm2605_vm14, %v2561_v13 }
 0x503   :  { %v2817_v8 = vadd.f32 %v6180_v24, %v2816_v51  ;;  %v2077_v61 = vmul.f32 0.044715, %v1932_v3  ;;  %v2332_v7 = vmul.f32 0.7978846, %v2268_v17  ;;  %v3352_v52 = vpop.eup %3351  ;;  %v2013_v16 = vmul.f32 0.5, %v1932_v3 }
 0x504   :  { %v2459_v5 = vadd.f32 1.0, %v3352_v52  ;;  %v802_v15 = vadd.f32 1e-05, %v738_v62 }
 0x505   :  { %v2913_v47 = vadd.f32 %v3439_v39, %v2817_v8  ;;  %v2141_v50 = vmul.f32 %v2077_v61, %v1932_v3  ;;  %3353 = vtanh.f32 %v2332_v7 }
 0x506   :  { %vm1430_vm4 = vweird.f32 %v802_v15 }
 0x507   :  { %2977 = vst.msk [vmem:[#allocation2 + $0x150] sm:$0xff] %vm92_vm0, %v2913_v47  ;;  %v2205_v38 = vmul.f32 %v2141_v50, %v1932_v3 }
 0x508   :  { %v1933_v9 = vpop.f32.mrf.mxu3  ;;  %3055 = vmatmul.msk.bf16.gmra.mxu3 %vm92_vm0, %v1674_v23 }
 0x509   :  { %v1934_v37 = vadd.f32 %v5786_v59, %v1933_v9  ;;  %v2269_v48 = vadd.f32 %v2205_v38, %v1932_v3  ;;  %v2523_v59 = vmul.f32 %v2459_v5, %v2011_v54 }
 0x50a   :  { %v2818_v34 = vpop.f32.mrf.mxu2 }
 0x50b   :  { %v2819_v26 = vadd.f32 %v6180_v24, %v2818_v34  ;;  %v3354_v40 = vpop.eup %3353  ;;  %v2078_v44 = vmul.f32 0.044715, %v1934_v37  ;;  %v2333_v14 = vmul.f32 0.7978846, %v2269_v48  ;;  %v2014_v10 = vmul.f32 0.5, %v1934_v37 }
 0x50c   :  { %v2460_v33 = vadd.f32 1.0, %v3354_v40 }
 0x50d   :  { %v2914_v32 = vadd.f32 %v3440_v12, %v2819_v26  ;;  %v2142_v1 = vmul.f32 %v2078_v44, %v1934_v37  ;;  %3355 = vtanh.f32 %v2333_v14  ;;  %v6269_v26 = vld [vmem:[%s6387_s4] ss:$0 sm:$0xff] }
 0x50e   :  { %v2524_v41 = vmul.f32 %v2460_v33, %v2012_v57 }
 0x50f   :  { %2978 = vst.msk [vmem:[#allocation2 + $0x158] sm:$0xff] %vm92_vm0, %v2914_v32  ;;  %v2206_v60 = vmul.f32 %v2142_v1, %v1934_v37 }
 0x510   :  { %v2562_v11 = vpack.c.bf16 %v2524_v41, %v2523_v59 }
 0x511   :  { %v2270_v31 = vadd.f32 %v2206_v60, %v1934_v37 }
 0x512   :  { %v2821_v21 = vpop.f32.mrf.mxu2  ;;  %3098 = vmatmul.msk.bf16.gmra.mxu2 %vm2605_vm14, %v2562_v11 }
 0x513   :  { %v2822_v43 = vadd.f32 %v6180_v24, %v2821_v21  ;;  %v2334_v25 = vmul.f32 0.7978846, %v2270_v31  ;;  %v3356_v22 = vpop.eup %3355 }
 0x514   :  { %v2461_v56 = vadd.f32 1.0, %v3356_v22 }
 0x515   :  { %v2915_v42 = vadd.f32 %v3441_v30, %v2822_v43  ;;  %3357 = vtanh.f32 %v2334_v25 }
 0x516   :  { %v2525_v28 = vmul.f32 %v2461_v56, %v2013_v16  ;;  %3359 = vrsqrt.f32 %v802_v15 }
 0x517   :  { %2979 = vst.msk [vmem:[#allocation2 + $0x160] sm:$0xff] %vm92_vm0, %v2915_v42 }
 0x51a   :  { %v2823_v53 = vpop.f32.mrf.mxu2 }
 0x51b   :  { %v2824_v6 = vadd.f32 %v6180_v24, %v2823_v53  ;;  %v3358_v36 = vpop.eup %3357 }
 0x51c   :  { %v2462_v19 = vadd.f32 1.0, %v3358_v36  ;;  %v3360_v0 = vpop.eup %3359 }
 0x51d   :  { %v2916_v45 = vadd.f32 %v3442_v27, %v2824_v6  ;;  %v1425_v51 = vmul.f32 %v3360_v0, %v802_v15  ;;  %vm1431_vm5 = vweird.f32 %v3360_v0 }
 0x51e   :  { %v2526_v29 = vmul.f32 %v2462_v19, %v2014_v10  ;;  %vm1432_vm6 = vmor %vm1430_vm4, %vm1431_vm5 }
 0x51f   :  { %2980 = vst.msk [vmem:[#allocation2 + $0x168] sm:$0xff] %vm92_vm0, %v2916_v45  ;;  %v1426_v18 = vmul.f32 %v3360_v0, %v1425_v51 }
 0x520   :  { %v2563_v58 = vpack.c.bf16 %v2526_v29, %v2525_v28  ;;  %v3444_v29 = vld [vmem:[%s6383_s0 + $0x170] sm:$0xff] }
 0x521   :  { %v1427_v17 = vmul.f32 0.5, %v1426_v18 }
 0x522   :  { %3099 = vmatmul.msk.bf16.gmra.mxu2 %vm2605_vm14, %v2563_v58 }
 0x523   :  { %v1428_v35 = vsub.f32 1.5, %v1427_v17 }
 0x525   :  { %v1429_v39 = vmul.f32 %v3360_v0, %v1428_v35 }
 0x527   :  { %v1433_v4 = vsel %vm1432_vm6, %v3360_v0, %v1429_v39  ;;  %v3445_v39 = vld [vmem:[%s6383_s0 + $0x178] sm:$0xff] }
 0x528   :  { %v1506_v23 = vmul.f32 %v1433_v4, %v5935_v49 }
 0x52a   :  { %v1574_v37 = vmul.f32 %v6110_v2, %v1506_v23 }
 0x52c   :  { %v1642_v49 = vadd.f32 %v6127_v46, %v1574_v37 }
 0x544   :  { %v675_v8 = vpop.xlane.xlu1 %674 }
 0x545   :  { %v739_v3 = vmul.f32 %v675_v8, %v3560_v20 }
 0x547   :  { %v803_v13 = vadd.f32 1e-05, %v739_v3 }
 0x549   :  { %3361 = vrsqrt.f32 %v803_v13  ;;  %vm1440_vm8 = vweird.f32 %v803_v13 }
 0x54f   :  { %v3362_v61 = vpop.eup %3361 }
 0x550   :  { %v1435_v47 = vmul.f32 %v3362_v61, %v803_v13  ;;  %vm1441_vm7 = vweird.f32 %v3362_v61 }
 0x551   :  { %vm1442_vm9 = vmor %vm1440_vm8, %vm1441_vm7 }
 0x552   :  { %v1436_v7 = vmul.f32 %v3362_v61, %v1435_v47 }
 0x554   :  { %v1437_v50 = vmul.f32 0.5, %v1436_v7 }
 0x556   :  { %v1438_v52 = vsub.f32 1.5, %v1437_v50 }
 0x558   :  { %v1439_v38 = vmul.f32 %v3362_v61, %v1438_v52 }
 0x55a   :  { %v1443_v20 = vsel %vm1442_vm9, %v3362_v61, %v1439_v38 }
 0x55b   :  { %v1507_v9 = vmul.f32 %v1443_v20, %v6054_v63  ;;  %v1936_v34 = vpop.f32.mrf.mxu3 }
 0x55c   :  { %v1937_v48 = vadd.f32 %v6269_v26, %v1936_v34 }
 0x55d   :  { %v1575_v5 = vmul.f32 %v6110_v2, %v1507_v9 }
 0x55e   :  { %v2079_v40 = vmul.f32 0.044715, %v1937_v48  ;;  %v2015_v45 = vmul.f32 0.5, %v1937_v48 }
 0x55f   :  { %v1643_v44 = vadd.f32 %v6127_v46, %v1575_v5 }
 0x560   :  { %v2143_v12 = vmul.f32 %v2079_v40, %v1937_v48 }
 0x561   :  { %v1675_v32 = vpack.c.bf16 %v1643_v44, %v1642_v49 }
 0x562   :  { %v2207_v63 = vmul.f32 %v2143_v12, %v1937_v48  ;;  %v3446_v12 = vld [vmem:[%s6383_s0 + $0x180] sm:$0xff] }
 0x563   :  { %v1938_v54 = vpop.f32.mrf.mxu3  ;;  %3056 = vmatmul.msk.bf16.gmra.mxu3 %vm92_vm0, %v1675_v32 }
 0x564   :  { %v1939_v57 = vadd.f32 %v6269_v26, %v1938_v54  ;;  %v2271_v33 = vadd.f32 %v2207_v63, %v1937_v48 }
 0x566   :  { %v2080_v1 = vmul.f32 0.044715, %v1939_v57  ;;  %v2335_v59 = vmul.f32 0.7978846, %v2271_v33  ;;  %v2016_v16 = vmul.f32 0.5, %v1939_v57 }
 0x568   :  { %v2144_v14 = vmul.f32 %v2080_v1, %v1939_v57  ;;  %3363 = vtanh.f32 %v2335_v59 }
 0x56a   :  { %v2208_v41 = vmul.f32 %v2144_v14, %v1939_v57 }
 0x56b   :  { %v1941_v60 = vpop.f32.mrf.mxu3 }
 0x56c   :  { %v1942_v2 = vadd.f32 %v6269_v26, %v1941_v60  ;;  %v2272_v21 = vadd.f32 %v2208_v41, %v1939_v57 }
 0x56e   :  { %v2081_v11 = vmul.f32 0.044715, %v1942_v2  ;;  %v2336_v46 = vmul.f32 0.7978846, %v2272_v21  ;;  %v3364_v31 = vpop.eup %3363  ;;  %v2017_v48 = vmul.f32 0.5, %v1942_v2 }
 0x56f   :  { %v2463_v53 = vadd.f32 1.0, %v3364_v31 }
 0x570   :  { %v2145_v43 = vmul.f32 %v2081_v11, %v1942_v2  ;;  %3365 = vtanh.f32 %v2336_v46  ;;  %v3447_v46 = vld [vmem:[%s6383_s0 + $0x188] sm:$0xff] }
 0x571   :  { %v2527_v55 = vmul.f32 %v2463_v53, %v2015_v45 }
 0x572   :  { %v2209_v30 = vmul.f32 %v2145_v43, %v1942_v2 }
 0x573   :  { %v1943_v42 = vpop.f32.mrf.mxu3 }
 0x574   :  { %v2273_v25 = vadd.f32 %v2209_v30, %v1942_v2  ;;  %v1944_v22 = vadd.f32 %v6269_v26, %v1943_v42 }
 0x575   :  { %v2826_v36 = vpop.f32.mrf.mxu2 }
 0x576   :  { %v3366_v6 = vpop.eup %3365  ;;  %v2082_v56 = vmul.f32 0.044715, %v1944_v22  ;;  %v2827_v27 = vadd.f32 %v6180_v24, %v2826_v36  ;;  %v2337_v19 = vmul.f32 0.7978846, %v2273_v25  ;;  %v2018_v5 = vmul.f32 0.5, %v1944_v22 }
 0x577   :  { %v2464_v10 = vadd.f32 1.0, %v3366_v6 }
 0x578   :  { %v2146_v28 = vmul.f32 %v2082_v56, %v1944_v22  ;;  %v2917_v58 = vadd.f32 %v3444_v29, %v2827_v27  ;;  %3367 = vtanh.f32 %v2337_v19  ;;  %v3448_v29 = vld [vmem:[%s6383_s0 + $0x190] sm:$0xff] }
 0x579   :  { %v2528_v62 = vmul.f32 %v2464_v10, %v2016_v16 }
 0x57a   :  { %v2210_v15 = vmul.f32 %v2146_v28, %v1944_v22  ;;  %2981 = vst.msk [vmem:[#allocation2 + $0x170] sm:$0xff] %vm92_vm0, %v2917_v58 }
 0x57b   :  { %v1946_v0 = vpop.f32.mrf.mxu3  ;;  %v2564_v51 = vpack.c.bf16 %v2528_v62, %v2527_v55 }
 0x57c   :  { %v2274_v18 = vadd.f32 %v2210_v15, %v1944_v22  ;;  %v1947_v8 = vadd.f32 %v6269_v26, %v1946_v0 }
 0x57d   :  { %3100 = vmatmul.msk.bf16.gmra.mxu2 %vm2605_vm14, %v2564_v51  ;;  %v2828_v17 = vpop.f32.mrf.mxu2 }
 0x57e   :  { %v2338_v3 = vmul.f32 0.7978846, %v2274_v18  ;;  %v2083_v13 = vmul.f32 0.044715, %v1947_v8  ;;  %v2829_v35 = vadd.f32 %v6180_v24, %v2828_v17  ;;  %v3368_v7 = vpop.eup %3367  ;;  %v2019_v45 = vmul.f32 0.5, %v1947_v8 }
 0x57f   :  { %v2465_v38 = vadd.f32 1.0, %v3368_v7 }
 0x580   :  { %v2147_v61 = vmul.f32 %v2083_v13, %v1947_v8  ;;  %3369 = vtanh.f32 %v2338_v3  ;;  %v2918_v47 = vadd.f32 %v3445_v39, %v2829_v35  ;;  %v3449_v13 = vld [vmem:[%s6383_s0 + $0x198] sm:$0xff] }
 0x581   :  { %v2529_v63 = vmul.f32 %v2465_v38, %v2017_v48 }
 0x582   :  { %v2211_v4 = vmul.f32 %v2147_v61, %v1947_v8  ;;  %2982 = vst.msk [vmem:[#allocation2 + $0x178] sm:$0xff] %vm92_vm0, %v2918_v47 }
 0x583   :  { %v1948_v50 = vpop.f32.mrf.mxu3 }
 0x584   :  { %v2275_v52 = vadd.f32 %v2211_v4, %v1947_v8  ;;  %v1949_v23 = vadd.f32 %v6269_v26, %v1948_v50 }
 0x585   :  { %v2831_v34 = vpop.f32.mrf.mxu2 }
 0x586   :  { %v3370_v20 = vpop.eup %3369  ;;  %v2084_v9 = vmul.f32 0.044715, %v1949_v23  ;;  %v2832_v37 = vadd.f32 %v6180_v24, %v2831_v34  ;;  %v2339_v49 = vmul.f32 0.7978846, %v2275_v52  ;;  %v2020_v16 = vmul.f32 0.5, %v1949_v23 }
 0x587   :  { %v2466_v40 = vadd.f32 1.0, %v3370_v20 }
 0x588   :  { %v2148_v44 = vmul.f32 %v2084_v9, %v1949_v23  ;;  %v2919_v32 = vadd.f32 %v3446_v12, %v2832_v37  ;;  %3371 = vtanh.f32 %v2339_v49 }
 0x589   :  { %v2530_v54 = vmul.f32 %v2466_v40, %v2018_v5  ;;  %v3451_v5 = vld [vmem:[%s6383_s0 + $0x1a8] sm:$0xff] }
 0x58a   :  { %v2212_v57 = vmul.f32 %v2148_v44, %v1949_v23  ;;  %2983 = vst.msk [vmem:[#allocation2 + $0x180] sm:$0xff] %vm92_vm0, %v2919_v32 }
 0x58b   :  { %v1951_v33 = vpop.f32.mrf.mxu3  ;;  %v2565_v1 = vpack.c.bf16 %v2530_v54, %v2529_v63 }
 0x58c   :  { %v2276_v14 = vadd.f32 %v2212_v57, %v1949_v23  ;;  %v1952_v59 = vadd.f32 %v6269_v26, %v1951_v33  ;;  %v3450_v23 = vld [vmem:[%s6383_s0 + $0x1a0] sm:$0xff] }
 0x58d   :  { %3101 = vmatmul.msk.bf16.gmra.mxu2 %vm2605_vm14, %v2565_v1  ;;  %v2833_v2 = vpop.f32.mrf.mxu2 }
 0x58e   :  { %v2340_v41 = vmul.f32 0.7978846, %v2276_v14  ;;  %v2085_v60 = vmul.f32 0.044715, %v1952_v59  ;;  %v2834_v21 = vadd.f32 %v6180_v24, %v2833_v2  ;;  %v3372_v31 = vpop.eup %3371  ;;  %v2021_v4 = vmul.f32 0.5, %v1952_v59 }
 0x58f   :  { %v2467_v53 = vadd.f32 1.0, %v3372_v31 }
 0x590   :  { %v2149_v11 = vmul.f32 %v2085_v60, %v1952_v59  ;;  %3373 = vtanh.f32 %v2340_v41  ;;  %v2920_v43 = vadd.f32 %v3447_v46, %v2834_v21 }
 0x591   :  { %v2531_v55 = vmul.f32 %v2467_v53, %v2019_v45  ;;  %v3453_v45 = vld [vmem:[%s6383_s0 + $0x1b8] sm:$0xff] }
 0x592   :  { %v2213_v30 = vmul.f32 %v2149_v11, %v1952_v59  ;;  %2984 = vst.msk [vmem:[#allocation2 + $0x188] sm:$0xff] %vm92_vm0, %v2920_v43 }
 0x593   :  { %v1953_v42 = vpop.f32.mrf.mxu3 }
 0x594   :  { %v2277_v25 = vadd.f32 %v2213_v30, %v1952_v59  ;;  %v1954_v22 = vadd.f32 %v6269_v26, %v1953_v42 }
 0x595   :  { %v2836_v36 = vpop.f32.mrf.mxu2 }
 0x596   :  { %v3374_v6 = vpop.eup %3373  ;;  %v2086_v56 = vmul.f32 0.044715, %v1954_v22  ;;  %v2837_v27 = vadd.f32 %v6180_v24, %v2836_v36  ;;  %v2341_v19 = vmul.f32 0.7978846, %v2277_v25  ;;  %v2022_v50 = vmul.f32 0.5, %v1954_v22 }
 0x597   :  { %v2468_v10 = vadd.f32 1.0, %v3374_v6 }
 0x598   :  { %v2150_v28 = vmul.f32 %v2086_v56, %v1954_v22  ;;  %v2921_v58 = vadd.f32 %v3448_v29, %v2837_v27  ;;  %3375 = vtanh.f32 %v2341_v19 }
 0x599   :  { %v2532_v62 = vmul.f32 %v2468_v10, %v2020_v16 }
 0x59a   :  { %v2214_v15 = vmul.f32 %v2150_v28, %v1954_v22  ;;  %2985 = vst.msk [vmem:[#allocation2 + $0x190] sm:$0xff] %vm92_vm0, %v2921_v58  ;;  %v3454_v28 = vld [vmem:[%s6383_s0 + $0x1c0] sm:$0xff] }
 0x59b   :  { %v2566_v0 = vpack.c.bf16 %v2532_v62, %v2531_v55  ;;  %v3455_v62 = vld [vmem:[%s6383_s0 + $0x1c8] sm:$0xff] }
 0x59c   :  { %v2278_v51 = vadd.f32 %v2214_v15, %v1954_v22 }
 0x59d   :  { %3102 = vmatmul.msk.bf16.gmra.mxu2 %vm2605_vm14, %v2566_v0  ;;  %v2838_v8 = vpop.f32.mrf.mxu2 }
 0x59e   :  { %v2342_v18 = vmul.f32 0.7978846, %v2278_v51  ;;  %v2839_v3 = vadd.f32 %v6180_v24, %v2838_v8  ;;  %v3376_v35 = vpop.eup %3375 }
 0x59f   :  { %v2469_v61 = vadd.f32 1.0, %v3376_v35 }
 0x5a0   :  { %3377 = vtanh.f32 %v2342_v18  ;;  %v2922_v17 = vadd.f32 %v3449_v13, %v2839_v3  ;;  %v3456_v18 = vld [vmem:[%s6383_s0 + $0x1d0] sm:$0xff] }
 0x5a1   :  { %v2533_v20 = vmul.f32 %v2469_v61, %v2021_v4 }
 0x5a2   :  { %2986 = vst.msk [vmem:[#allocation2 + $0x198] sm:$0xff] %vm92_vm0, %v2922_v17  ;;  %v3457_v17 = vld [vmem:[%s6383_s0 + $0x1d8] sm:$0xff] }
 0x5a5   :  { %v2841_v47 = vpop.f32.mrf.mxu2 }
 0x5a6   :  { %v3378_v39 = vpop.eup %3377  ;;  %v2842_v7 = vadd.f32 %v6180_v24, %v2841_v47  ;;  %v3458_v47 = vld [vmem:[%s6383_s0 + $0x1e0] sm:$0xff] }
 0x5a7   :  { %v2470_v52 = vadd.f32 1.0, %v3378_v39 }
 0x5a8   :  { %v2923_v38 = vadd.f32 %v3450_v23, %v2842_v7 }
 0x5a9   :  { %v2534_v9 = vmul.f32 %v2470_v52, %v2022_v50  ;;  %v3459_v52 = vld [vmem:[%s6383_s0 + $0x1e8] sm:$0xff] }
 0x5aa   :  { %2987 = vst.msk [vmem:[#allocation2 + $0x1a0] sm:$0xff] %vm92_vm0, %v2923_v38 }
 0x5ab   :  { %v2567_v34 = vpack.c.bf16 %v2534_v9, %v2533_v20  ;;  %v3460_v9 = vld [vmem:[%s6383_s0 + $0x1f0] sm:$0xff] }
 0x5ad   :  { %3103 = vmatmul.msk.bf16.gmra.mxu2 %vm2605_vm14, %v2567_v34  ;;  %v2843_v37 = vpop.f32.mrf.mxu2 }
 0x5ae   :  { %v2844_v48 = vadd.f32 %v6180_v24, %v2843_v37 }
 0x5b0   :  { %v2924_v40 = vadd.f32 %v3451_v5, %v2844_v48  ;;  %v3461_v5 = vld [vmem:[%s6383_s0 + $0x1f8] sm:$0xff] }
 0x5b2   :  { %2988 = vst.msk [vmem:[#allocation2 + $0x1a8] sm:$0xff] %vm92_vm0, %v2924_v40 }
 0x5e6   :  { %v1956_v49 = vpop.f32.mrf.mxu3 }
 0x5e7   :  { %v1957_v44 = vadd.f32 %v6269_v26, %v1956_v49 }
 0x5e9   :  { %v2087_v12 = vmul.f32 0.044715, %v1957_v44  ;;  %v2023_v30 = vmul.f32 0.5, %v1957_v44 }
 0x5eb   :  { %v2151_v32 = vmul.f32 %v2087_v12, %v1957_v44 }
 0x5ed   :  { %v2215_v63 = vmul.f32 %v2151_v32, %v1957_v44 }
 0x5ee   :  { %v1958_v54 = vpop.f32.mrf.mxu3 }
 0x5ef   :  { %v2279_v57 = vadd.f32 %v2215_v63, %v1957_v44  ;;  %v1959_v33 = vadd.f32 %v6269_v26, %v1958_v54  ;;  %v3452_v26 = vld [vmem:[%s6383_s0 + $0x1b0] sm:$0xff] }
 0x5f1   :  { %v2088_v1 = vmul.f32 0.044715, %v1959_v33  ;;  %v2343_v14 = vmul.f32 0.7978846, %v2279_v57  ;;  %v2024_v42 = vmul.f32 0.5, %v1959_v33 }
 0x5f3   :  { %v2152_v59 = vmul.f32 %v2088_v1, %v1959_v33  ;;  %3379 = vtanh.f32 %v2343_v14 }
 0x5f5   :  { %v2216_v41 = vmul.f32 %v2152_v59, %v1959_v33 }
 0x5f7   :  { %v2280_v60 = vadd.f32 %v2216_v41, %v1959_v33 }
 0x5f9   :  { %v2344_v2 = vmul.f32 0.7978846, %v2280_v60  ;;  %v3380_v21 = vpop.eup %3379 }
 0x5fa   :  { %v2471_v46 = vadd.f32 1.0, %v3380_v21 }
 0x5fb   :  { %3381 = vtanh.f32 %v2344_v2 }
 0x5fc   :  { %v2535_v53 = vmul.f32 %v2471_v46, %v2023_v30 }
 0x600   :  { %v2846_v11 = vpop.f32.mrf.mxu2 }
 0x601   :  { %v3382_v43 = vpop.eup %3381  ;;  %v2847_v31 = vadd.f32 %v6180_v24, %v2846_v11 }
 0x602   :  { %v2472_v25 = vadd.f32 1.0, %v3382_v43 }
 0x603   :  { %v2925_v22 = vadd.f32 %v3452_v26, %v2847_v31 }
 0x604   :  { %v2536_v6 = vmul.f32 %v2472_v25, %v2024_v42 }
 0x605   :  { %2989 = vst.msk [vmem:[#allocation2 + $0x1b0] sm:$0xff] %vm92_vm0, %v2925_v22 }
 0x606   :  { %v2568_v56 = vpack.c.bf16 %v2536_v6, %v2535_v53 }
 0x608   :  { %v2848_v36 = vpop.f32.mrf.mxu2  ;;  %3104 = vmatmul.msk.bf16.gmra.mxu2 %vm2605_vm14, %v2568_v56 }
 0x609   :  { %v2849_v27 = vadd.f32 %v6180_v24, %v2848_v36 }
 0x60b   :  { %v2926_v16 = vadd.f32 %v3453_v45, %v2849_v27 }
 0x60d   :  { %2990 = vst.msk [vmem:[#allocation2 + $0x1b8] sm:$0xff] %vm92_vm0, %v2926_v16 }
 0x610   :  { %v2851_v10 = vpop.f32.mrf.mxu2 }
 0x611   :  { %v2852_v19 = vadd.f32 %v6180_v24, %v2851_v10 }
 0x613   :  { %v2927_v29 = vadd.f32 %v3454_v28, %v2852_v19 }
 0x615   :  { %2991 = vst.msk [vmem:[#allocation2 + $0x1c0] sm:$0xff] %vm92_vm0, %v2927_v29 }
 0x618   :  { %v2853_v58 = vpop.f32.mrf.mxu2 }
 0x619   :  { %v2854_v55 = vadd.f32 %v6180_v24, %v2853_v58 }
 0x61b   :  { %v2928_v15 = vadd.f32 %v3455_v62, %v2854_v55 }
 0x61d   :  { %2992 = vst.msk [vmem:[#allocation2 + $0x1c8] sm:$0xff] %vm92_vm0, %v2928_v15 }
 0x620   :  { %v2856_v0 = vpop.f32.mrf.mxu2 }
 0x621   :  { %v2857_v51 = vadd.f32 %v6180_v24, %v2856_v0 }
 0x623   :  { %v2929_v8 = vadd.f32 %v3456_v18, %v2857_v51 }
 0x625   :  { %2993 = vst.msk [vmem:[#allocation2 + $0x1d0] sm:$0xff] %vm92_vm0, %v2929_v8 }
 0x628   :  { %v2858_v3 = vpop.f32.mrf.mxu2 }
 0x629   :  { %v2859_v13 = vadd.f32 %v6180_v24, %v2858_v3 }
 0x62b   :  { %v2930_v35 = vadd.f32 %v3457_v17, %v2859_v13 }
 0x62d   :  { %2994 = vst.msk [vmem:[#allocation2 + $0x1d8] sm:$0xff] %vm92_vm0, %v2930_v35 }
 0x630   :  { %v2861_v61 = vpop.f32.mrf.mxu2 }
 0x631   :  { %v2862_v39 = vadd.f32 %v6180_v24, %v2861_v61 }
 0x633   :  { %v2931_v7 = vadd.f32 %v3458_v47, %v2862_v39 }
 0x635   :  { %2995 = vst.msk [vmem:[#allocation2 + $0x1e0] sm:$0xff] %vm92_vm0, %v2931_v7 }
 0x638   :  { %v2863_v4 = vpop.f32.mrf.mxu2 }
 0x639   :  { %v2864_v50 = vadd.f32 %v6180_v24, %v2863_v4 }
 0x63b   :  { %v2932_v23 = vadd.f32 %v3459_v52, %v2864_v50 }
 0x63d   :  { %2996 = vst.msk [vmem:[#allocation2 + $0x1e8] sm:$0xff] %vm92_vm0, %v2932_v23 }
 0x68b   :  { %v2866_v38 = vpop.f32.mrf.mxu2 }
 0x68c   :  { %v2867_v20 = vadd.f32 %v6180_v24, %v2866_v38 }
 0x68e   :  { %v2933_v34 = vadd.f32 %v3460_v9, %v2867_v20 }
 0x690   :  { %2997 = vst.msk [vmem:[#allocation2 + $0x1f0] sm:$0xff] %vm92_vm0, %v2933_v34 }
 0x693   :  { %v2868_v37 = vpop.f32.mrf.mxu2 }
 0x694   :  { %v2869_v48 = vadd.f32 %v6180_v24, %v2868_v37 }
 0x696   :  { %v2934_v40 = vadd.f32 %v3461_v5, %v2869_v48 }
 0x698   :  { %2998 = vst.msk [vmem:[#allocation2 + $0x1f8] sm:$0xff] %vm92_vm0, %v2934_v40 }
 0x699   :  { %3011 = dma.vmem_to_hbm [thread:$0]  %s3004_s24, 8192, %s3006_s27, [#allocation3], %s3490_s29, %s3490_s29, %s3491_s2  }
 0x69a   :  { %3486 = dma.done.wait [#allocation3], 8192  }
 0x69b   :  { %3487 = vsyncadd [#allocation3], 4294959104 }
 0x69c   :  { %3016 = vsyncpa [#allocation3], 1 }

// kernel: swin_block_forward.2
= control target key start
LH: loop header
LB: loop body
LE: loop exit
PB: predicated region body
PF: predicated region fallthrough
CT: control target
= control target key end

     0   :  { %s5771_s24 = smov 0   ;;  %s8993_s0 = inlined_call_operand.vmem [shape: f32[32,16,32], index: 0, kind: input, shape index: {}]   ;;  %s8994_s1 = inlined_call_operand.vmem [shape: f32[16,16,16], index: 1, kind: input, shape index: {}]   ;;  %s8995_s2 = inlined_call_operand.vmem [shape: f32[1,32], index: 2, kind: input, shape index: {}]   ;;  %s8996_s3 = inlined_call_operand.vmem [shape: f32[1,32], index: 3, kind: input, shape index: {}]   ;;  %s8997_s4 = inlined_call_operand.vmem [shape: bf16[32,96], index: 4, kind: input, shape index: {}]   ;;  %s8998_s5 = inlined_call_operand.vmem [shape: bf16[32,32], index: 5, kind: input, shape index: {}]   ;;  %s8999_s6 = inlined_call_operand.vmem [shape: f32[1,32], index: 6, kind: input, shape index: {}]   ;;  %s9000_s7 = inlined_call_operand.vmem [shape: f32[32,16,32], index: 7, kind: output, shape index: {}]  }
   0x1 LB: > { %s5162_s25 = sadd.s32 4294967295, %s5723_s24   ;;  %p5166_p0 = scmp.ge.s32.totalorder %s5723_s24, 1  ;;  %s5723_s24 = sphi %s5771_s24, %s17_s24  }
   0x2   : > { %p239_p1 = scmp.lt.s32.totalorder %s5723_s24, 3 }
   0x4   : > { %p240_p2 = pnand %p5166_p0, %p239_p1 }
   0x6   : > { %243 = sbr.rel (%p240_p2) target bundleno = 2488 (0x9b8), region = 48 }
   0xb   : > { %s5167_s26 = sshll.u32 %s5162_s25, 4  ;;  %vm320_vm0 = vcmask 261120   ;;  %v5725_v30 = vmov 32.0   ;;  %s5726_s16 = smov 96  }
   0xc   : > { %p274_p3 = scmp.lt.s32.totalorder %s5167_s26, 31  ;;  %5329 = vrcp.f32 %v5725_v30  ;;  %s5727_s21 = smov 64  }
   0xd   : > { %s5728_s13 = smov 80   ;;  %s5729_s14 = smov 112  }
   0xe   : > { %s9237_s26 = smov (!%p274_p3, %s5167_s26), 31 }
   0xf   : > { %s5303_s27 = sshll.u32 %s9237_s26, 4 }
  0x10   : > { %s5787_s30 = scalar_lea.vmem %s8993_s0, %s5303_s27 }
  0x11   : > { %v5790_v0 = vld [vmem:[%s5787_s30 + $0x20] sm:$0xff]  ;;  %v5797_v4 = vld [vmem:[%s5787_s30 + $0x10] sm:$0xff]  ;;  %v5802_v6 = vld [vmem:[%s5787_s30 + $0x28] sm:$0xff] }
  0x12   : > { %v288_v1 = vld [vmem:[%s5787_s30] sm:$0xff]  ;;  %v333_v2 = vsel %vm320_vm0, %v5790_v0, 0.0  ;;  %v327_v5 = vsel %vm320_vm0, %v5797_v4, 0.0  ;;  %v289_v7 = vld [vmem:[%s5787_s30 + $0x8] sm:$0xff]  ;;  %v5806_v8 = vld [vmem:[%s5787_s30 + $0x18] sm:$0xff]  ;;  %v336_v9 = vsel %vm320_vm0, %v5802_v6, 0.0  ;;  %v5330_v31 = vpop.eup %5329 }
  0x13   : > { %v321_v3 = vsel %vm320_vm0, %v288_v1, 0.0  ;;  %334 = vadd.xlane.f32.xlu2 %v333_v2  ;;  %328 = vadd.xlane.f32.xlu1 %v327_v5  ;;  %v324_v10 = vsel %vm320_vm0, %v289_v7, 0.0  ;;  %v330_v11 = vsel %vm320_vm0, %v5806_v8, 0.0  ;;  %v5814_v12 = vld [vmem:[%s5787_s30 + $0x30] sm:$0xff]  ;;  %v5817_v13 = vld [vmem:[%s5787_s30 + $0x38] sm:$0xff]  ;;  %v5820_v14 = vld [vmem:[%s5787_s30 + $0x80] sm:$0xff]  ;;  %vm422_vm1 = vweird.f32 %v5330_v31 }
  0x14   : > { %322 = vadd.xlane.f32.xlu0 %v321_v3  ;;  %v339_v15 = vsel %vm320_vm0, %v5814_v12, 0.0  ;;  %v342_v16 = vsel %vm320_vm0, %v5817_v13, 0.0  ;;  %v369_v17 = vsel %vm320_vm0, %v5820_v14, 0.0  ;;  %v5829_v18 = vld [vmem:[%s5787_s30 + $0x88] sm:$0xff]  ;;  %v5834_v20 = vld [vmem:[%s5787_s30 + $0x40] sm:$0xff]  ;;  %v5839_v22 = vld [vmem:[%s5787_s30 + $0x98] sm:$0xff] }
  0x15   : > { %v372_v19 = vsel %vm320_vm0, %v5829_v18, 0.0  ;;  %v345_v21 = vsel %vm320_vm0, %v5834_v20, 0.0  ;;  %v378_v23 = vsel %vm320_vm0, %v5839_v22, 0.0  ;;  %v5844_v24 = vld [vmem:[%s5787_s30 + $0x50] sm:$0xff]  ;;  %v5849_v26 = vld [vmem:[%s5787_s30 + $0xa8] sm:$0xff]  ;;  %v5854_v28 = vld [vmem:[%s5787_s30 + $0x60] sm:$0xff] }
  0x16   : > { %v351_v25 = vsel %vm320_vm0, %v5844_v24, 0.0  ;;  %v384_v27 = vsel %vm320_vm0, %v5849_v26, 0.0  ;;  %v357_v29 = vsel %vm320_vm0, %v5854_v28, 0.0  ;;  %v418_v32 = vmul.f32 32.0, %v5330_v31  ;;  %v5859_v34 = vld [vmem:[%s5787_s30 + $0x78] sm:$0xff]  ;;  %v5874_v50 = vld [vmem:[%s5787_s30 + $0x48] sm:$0xff] }
  0x17   : > { %v366_v35 = vsel %vm320_vm0, %v5859_v34, 0.0  ;;  %v348_v53 = vsel %vm320_vm0, %v5874_v50, 0.0  ;;  %v5890_v60 = vld [vmem:[%s5787_s30 + $0x90] sm:$0xff] }
  0x18   : > { %v419_v33 = vsub.f32 1.0, %v418_v32  ;;  %v375_v62 = vsel %vm320_vm0, %v5890_v60, 0.0 }
  0x1a   : > { %v420_v36 = vmul.f32 %v5330_v31, %v419_v33  ;;  %v5943_v33 = vld [vmem:[%s5787_s30 + $0xc0] sm:$0xff] }
  0x1b   : > { %337 = vadd.xlane.f32.xlu2 %v336_v9  ;;  %331 = vadd.xlane.f32.xlu1 %v330_v11 }
  0x1c   : > { %325 = vadd.xlane.f32.xlu0 %v324_v10  ;;  %v421_v37 = vadd.f32 %v5330_v31, %v420_v36  ;;  %v393_v36 = vsel %vm320_vm0, %v5943_v33, 0.0 }
  0x1e   : > { %v5863_v38 = vsel %vm422_vm1, %v5330_v31, %v421_v37  ;;  %v5938_v31 = vld [vmem:[%s5787_s30 + $0x68] sm:$0xff] }
  0x23   : > { %340 = vadd.xlane.f32.xlu2 %v339_v15  ;;  %370 = vadd.xlane.f32.xlu1 %v369_v17 }
  0x24   : > { %343 = vadd.xlane.f32.xlu0 %v342_v16 }
  0x2b   : > { %373 = vadd.xlane.f32.xlu2 %v372_v19 }
  0x33   : > { %346 = vadd.xlane.f32.xlu2 %v345_v21  ;;  %v5925_v21 = vld [vmem:[%s5787_s30 + $0xa0] sm:$0xff] }
  0x3b   : > { %379 = vadd.xlane.f32.xlu2 %v378_v23 }
  0x43   : > { %352 = vadd.xlane.f32.xlu2 %v351_v25 }
  0x4b   : > { %385 = vadd.xlane.f32.xlu2 %v384_v27 }
  0x53   : > { %358 = vadd.xlane.f32.xlu2 %v357_v29  ;;  %v381_v29 = vsel %vm320_vm0, %v5925_v21, 0.0 }
  0x5b   : > { %367 = vadd.xlane.f32.xlu2 %v366_v35  ;;  %v360_v35 = vsel %vm320_vm0, %v5938_v31, 0.0 }
  0x86   : > { %v335_v39 = vpop.xlane.xlu2 %334  ;;  %v329_v44 = vpop.xlane.xlu1 %328 }
  0x87   : > { %v323_v40 = vpop.xlane.xlu0 %322  ;;  %v426_v49 = vmul.f32 %v5863_v38, %v329_v44  ;;  %v428_v2 = vmul.f32 %v5863_v38, %v335_v39 }
  0x88   : > { %v424_v41 = vmul.f32 %v5863_v38, %v323_v40 }
  0x89   : > { %v5879_v52 = vsub.f32 %v5797_v4, %v426_v49  ;;  %v5901_v4 = vld [vmem:[%s5787_s30 + $0x58] sm:$0xff]  ;;  %v5909_v9 = vsub.f32 %v5790_v0, %v428_v2 }
  0x8a   : > { %v5866_v42 = vsub.f32 %v288_v1, %v424_v41  ;;  %v354_v10 = vsel %vm320_vm0, %v5901_v4, 0.0 }
  0x8b   : > { %v490_v58 = vmul.f32 %v5879_v52, %v5879_v52  ;;  %v492_v0 = vmul.f32 %v5909_v9, %v5909_v9 }
  0x8c   : > { %v488_v43 = vmul.f32 %v5866_v42, %v5866_v42 }
  0x8d   : > { %v526_v61 = vsel %vm320_vm0, %v490_v58, 0.0  ;;  %v532_v25 = vsel %vm320_vm0, %v492_v0, 0.0 }
  0x8e   : > { %v520_v45 = vsel %vm320_vm0, %v488_v43, 0.0  ;;  %v338_v46 = vpop.xlane.xlu2 %337  ;;  %v332_v56 = vpop.xlane.xlu1 %331 }
  0x8f   : > { %521 = vadd.xlane.f32.xlu0 %v520_v45  ;;  %v326_v47 = vpop.xlane.xlu0 %325  ;;  %v427_v59 = vmul.f32 %v5863_v38, %v332_v56 }
  0x90   : > { %v425_v48 = vmul.f32 %v5863_v38, %v326_v47 }
  0x91   : > { %v5896_v63 = vsub.f32 %v5806_v8, %v427_v59  ;;  %v5982_v59 = vld [vmem:[%s5787_s30 + $0x70] sm:$0xff] }
  0x92   : > { %v5876_v51 = vsub.f32 %v289_v7, %v425_v48  ;;  %v5967_v48 = vld [vmem:[%s5787_s30 + $0xb0] sm:$0xff] }
  0x93   : > { %v491_v5 = vmul.f32 %v5896_v63, %v5896_v63 }
  0x94   : > { %v489_v54 = vmul.f32 %v5876_v51, %v5876_v51 }
  0x95   : > { %v529_v11 = vsel %vm320_vm0, %v491_v5, 0.0 }
  0x96   : > { %v523_v55 = vsel %vm320_vm0, %v489_v54, 0.0  ;;  %v341_v57 = vpop.xlane.xlu2 %340 }
  0x97   : > { %349 = vadd.xlane.f32.xlu0 %v348_v53  ;;  %524 = vadd.xlane.f32.xlu1 %v523_v55  ;;  %v344_v39 = vpop.xlane.xlu0 %343  ;;  %v387_v53 = vsel %vm320_vm0, %v5967_v48, 0.0 }
  0x98   : > { %v431_v41 = vmul.f32 %v5863_v38, %v344_v39 }
  0x9a   : > { %v5963_v45 = vsub.f32 %v5817_v13, %v431_v41 }
  0x9c   : > { %v495_v49 = vmul.f32 %v5963_v45, %v5963_v45 }
  0x9e   : > { %v374_v1 = vpop.xlane.xlu2 %373  ;;  %v541_v13 = vsel %vm320_vm0, %v495_v49, 0.0 }
  0x9f   : > { %527 = vadd.xlane.f32.xlu0 %v526_v61  ;;  %376 = vadd.xlane.f32.xlu1 %v375_v62  ;;  %v441_v3 = vmul.f32 %v5863_v38, %v374_v1 }
  0xa1   : > { %v5906_v7 = vsub.f32 %v5829_v18, %v441_v3  ;;  %v429_v18 = vmul.f32 %v5863_v38, %v338_v46  ;;  %v371_v46 = vpop.xlane.xlu1 %370 }
  0xa2   : > { %v440_v47 = vmul.f32 %v5863_v38, %v371_v46 }
  0xa3   : > { %v505_v8 = vmul.f32 %v5906_v7, %v5906_v7  ;;  %v5931_v27 = vsub.f32 %v5802_v6, %v429_v18 }
  0xa4   : > { %v5974_v54 = vsub.f32 %v5820_v14, %v440_v47  ;;  %v363_v14 = vsel %vm320_vm0, %v5982_v59, 0.0 }
  0xa5   : > { %v571_v15 = vsel %vm320_vm0, %v505_v8, 0.0  ;;  %v493_v32 = vmul.f32 %v5931_v27, %v5931_v27 }
  0xa6   : > { %572 = vadd.xlane.f32.xlu2 %v571_v15  ;;  %v347_v16 = vpop.xlane.xlu2 %346  ;;  %v504_v56 = vmul.f32 %v5974_v54, %v5974_v54 }
  0xa7   : > { %355 = vadd.xlane.f32.xlu0 %v354_v10  ;;  %v432_v17 = vmul.f32 %v5863_v38, %v347_v16  ;;  %530 = vadd.xlane.f32.xlu1 %v529_v11  ;;  %v535_v37 = vsel %vm320_vm0, %v493_v32, 0.0 }
  0xa9   : > { %v5922_v19 = vsub.f32 %v5834_v20, %v432_v17  ;;  %v430_v20 = vmul.f32 %v5863_v38, %v341_v57  ;;  %v568_v57 = vsel %vm320_vm0, %v504_v56, 0.0 }
  0xab   : > { %v496_v23 = vmul.f32 %v5922_v19, %v5922_v19  ;;  %v5946_v6 = vsub.f32 %v5814_v12, %v430_v20  ;;  %v5957_v12 = vld [vmem:[%s5787_s30 + $0xb8] sm:$0xff]  ;;  %v5305_v20 = vld [vmem:[%s8997_s4] sm:$0xff] }
  0xac   : > { %v390_v44 = vsel %vm320_vm0, %v5957_v12, 0.0 }
  0xad   : > { %v544_v30 = vsel %vm320_vm0, %v496_v23, 0.0  ;;  %v494_v40 = vmul.f32 %v5946_v6, %v5946_v6 }
  0xae   : > { %545 = vadd.xlane.f32.xlu2 %v544_v30  ;;  %v380_v55 = vpop.xlane.xlu2 %379 }
  0xaf   : > { %533 = vadd.xlane.f32.xlu0 %v532_v25  ;;  %382 = vadd.xlane.f32.xlu1 %v381_v29  ;;  %v538_v43 = vsel %vm320_vm0, %v494_v40, 0.0  ;;  %v443_v58 = vmul.f32 %v5863_v38, %v380_v55  ;;  %v5306_v25 = vld [vmem:[%s8997_s4 + $0x8] sm:$0xff] }
  0xb0   : > { %1190 = vmatpush.bf16.msra.mxu0 %v5306_v25  ;;  %5309 = vmatpush.bf16.msra.mxu2 %v5306_v25 }
  0xb1   : > { %v5985_v62 = vsub.f32 %v5839_v22, %v443_v58 }
  0xb3   : > { %v507_v2 = vmul.f32 %v5985_v62, %v5985_v62 }
  0xb4   : > { %1191 = vmatpush.bf16.msra.mxu0 %v5305_v20  ;;  %5310 = vmatpush.bf16.msra.mxu2 %v5305_v20 }
  0xb5   : > { %v577_v8 = vsel %vm320_vm0, %v507_v2, 0.0 }
  0xb6   : > { %394 = vadd.xlane.f32.xlu2 %v393_v36  ;;  %v353_v61 = vpop.xlane.xlu2 %352 }
  0xb7   : > { %361 = vadd.xlane.f32.xlu0 %v360_v35  ;;  %536 = vadd.xlane.f32.xlu1 %v535_v37  ;;  %v434_v1 = vmul.f32 %v5863_v38, %v353_v61 }
  0xb9   : > { %v5993_v5 = vsub.f32 %v5844_v24, %v434_v1 }
  0xbb   : > { %v498_v22 = vmul.f32 %v5993_v5, %v5993_v5 }
  0xbd   : > { %v550_v15 = vsel %vm320_vm0, %v498_v22, 0.0 }
  0xbe   : > { %v386_v3 = vpop.xlane.xlu2 %385 }
  0xbf   : > { %539 = vadd.xlane.f32.xlu0 %v538_v43  ;;  %391 = vadd.xlane.f32.xlu1 %v390_v44  ;;  %v445_v10 = vmul.f32 %v5863_v38, %v386_v3 }
  0xc1   : > { %v6000_v11 = vsub.f32 %v5849_v26, %v445_v10 }
  0xc3   : > { %v509_v24 = vmul.f32 %v6000_v11, %v6000_v11 }
  0xc5   : > { %v583_v18 = vsel %vm320_vm0, %v509_v24, 0.0 }
  0xc6   : > { %v359_v16 = vpop.xlane.xlu2 %358 }
  0xc7   : > { %388 = vadd.xlane.f32.xlu0 %v387_v53  ;;  %542 = vadd.xlane.f32.xlu1 %v541_v13  ;;  %v436_v17 = vmul.f32 %v5863_v38, %v359_v16 }
  0xc9   : > { %v6007_v0 = vsub.f32 %v5854_v28, %v436_v17 }
  0xcb   : > { %v500_v23 = vmul.f32 %v6007_v0, %v6007_v0 }
  0xcd   : > { %v556_v26 = vsel %vm320_vm0, %v500_v23, 0.0  ;;  %v6048_v23 = vld [vmem:[%s5787_s30 + $0xc8] sm:$0xff] }
  0xce   : > { %v368_v20 = vpop.xlane.xlu2 %367 }
  0xcf   : > { %569 = vadd.xlane.f32.xlu1 %v568_v57 }
  0xd7   : > { %364 = vadd.xlane.f32.xlu1 %v363_v14 }
  0xdf   : > { %578 = vadd.xlane.f32.xlu1 %v577_v8 }
  0xe7   : > { %551 = vadd.xlane.f32.xlu1 %v550_v15 }
  0xef   : > { %584 = vadd.xlane.f32.xlu1 %v583_v18 }
  0xf7   : > { %557 = vadd.xlane.f32.xlu1 %v556_v26 }
 0x102   : > { %v522_v29 = vpop.xlane.xlu0 %521 }
 0x103   : > { %v616_v30 = vmul.f32 %v522_v29, %v5863_v38 }
 0x105   : > { %v648_v28 = vadd.f32 1e-05, %v616_v30 }
 0x107   : > { %5331 = vrsqrt.f32 %v648_v28  ;;  %vm686_vm3 = vweird.f32 %v648_v28 }
 0x10a   : > { %v525_v32 = vpop.xlane.xlu1 %524  ;;  %v350_v35 = vpop.xlane.xlu0 %349 }
 0x10b   : > { %v617_v36 = vmul.f32 %v525_v32, %v5863_v38  ;;  %v433_v37 = vmul.f32 %v5863_v38, %v350_v35  ;;  %v396_v32 = vsel %vm320_vm0, %v6048_v23, 0.0 }
 0x10d   : > { %v5332_v39 = vpop.eup %5331  ;;  %v649_v40 = vadd.f32 1e-05, %v617_v36  ;;  %v6023_v41 = vsub.f32 %v5874_v50, %v433_v37 }
 0x10e   : > { %v681_v43 = vmul.f32 %v5332_v39, %v648_v28  ;;  %vm687_vm2 = vweird.f32 %v5332_v39 }
 0x10f   : > { %5333 = vrsqrt.f32 %v649_v40  ;;  %v497_v44 = vmul.f32 %v6023_v41, %v6023_v41  ;;  %vm6039_vm4 = vmor %vm686_vm3, %vm687_vm2  ;;  %vm696_vm5 = vweird.f32 %v649_v40 }
 0x110   : > { %v682_v46 = vmul.f32 %v5332_v39, %v681_v43 }
 0x111   : > { %v547_v47 = vsel %vm320_vm0, %v497_v44, 0.0 }
 0x112   : > { %v683_v49 = vmul.f32 0.5, %v682_v46  ;;  %v377_v53 = vpop.xlane.xlu1 %376  ;;  %548 = vadd.xlane.f32.xlu0 %v547_v47  ;;  %v528_v13 = vpop.xlane.xlu0 %527 }
 0x113   : > { %v442_v55 = vmul.f32 %v5863_v38, %v377_v53  ;;  %v618_v56 = vmul.f32 %v528_v13, %v5863_v38  ;;  %v6079_v13 = vld [vmem:[%s8996_s3] ss:$0 sm:$0xff] }
 0x114   : > { %v684_v57 = vsub.f32 1.5, %v683_v49 }
 0x115   : > { %v5334_v58 = vpop.eup %5333  ;;  %v6031_v50 = vsub.f32 %v5890_v60, %v442_v55  ;;  %v6033_v61 = vadd.f32 1e-05, %v618_v56  ;;  %v6082_v55 = vld [vmem:[%s5787_s30 + $0xd0] sm:$0xff] }
 0x116   : > { %v691_v14 = vmul.f32 %v5334_v58, %v649_v40  ;;  %v685_v2 = vmul.f32 %v5332_v39, %v684_v57  ;;  %vm697_vm6 = vweird.f32 %v5334_v58 }
 0x117   : > { %5335 = vrsqrt.f32 %v6033_v61  ;;  %v506_v1 = vmul.f32 %v6031_v50, %v6031_v50  ;;  %vm698_vm7 = vmor %vm696_vm5, %vm697_vm6  ;;  %vm706_vm9 = vweird.f32 %v6033_v61 }
 0x118   : > { %v692_v3 = vmul.f32 %v5334_v58, %v691_v14  ;;  %v689_v17 = vsel %vm6039_vm4, %v5332_v39, %v685_v2  ;;  %v399_v2 = vsel %vm320_vm0, %v6082_v55, 0.0 }
 0x119   : > { %v574_v8 = vsel %vm320_vm0, %v506_v1, 0.0  ;;  %v1000_v36 = vmul.f32 %v689_v17, %v5866_v42 }
 0x11a   : > { %v693_v10 = vmul.f32 0.5, %v692_v3  ;;  %575 = vadd.xlane.f32.xlu0 %v574_v8  ;;  %v356_v22 = vpop.xlane.xlu0 %355  ;;  %v531_v15 = vpop.xlane.xlu1 %530 }
 0x11b   : > { %v435_v16 = vmul.f32 %v5863_v38, %v356_v22  ;;  %v619_v18 = vmul.f32 %v531_v15, %v5863_v38  ;;  %v573_v22 = vpop.xlane.xlu2 %572 }
 0x11c   : > { %v694_v24 = vsub.f32 1.5, %v693_v10 }
 0x11d   : > { %v6050_v26 = vpop.eup %5335  ;;  %v6053_v25 = vsub.f32 %v5901_v4, %v435_v16  ;;  %v6057_v28 = vadd.f32 1e-05, %v619_v18  ;;  %v6067_v4 = vld [vmem:[%s8995_s2] ss:$0 sm:$0xff] }
 0x11e   : > { %v695_v29 = vmul.f32 %v5334_v58, %v694_v24  ;;  %v701_v30 = vmul.f32 %v6050_v26, %v6033_v61  ;;  %v1036_v49 = vmul.f32 %v6067_v4, %v1000_v36  ;;  %vm707_vm8 = vweird.f32 %v6050_v26 }
 0x11f   : > { %v499_v35 = vmul.f32 %v6053_v25, %v6053_v25  ;;  %5337 = vrsqrt.f32 %v6057_v28  ;;  %vm6101_vm10 = vmor %vm706_vm9, %vm707_vm8  ;;  %vm716_vm11 = vweird.f32 %v6057_v28 }
 0x120   : > { %v699_v37 = vsel %vm698_vm7, %v5334_v58, %v695_v29  ;;  %v702_v39 = vmul.f32 %v6050_v26, %v701_v30  ;;  %v1072_v10 = vadd.f32 %v6079_v13, %v1036_v49 }
 0x121   : > { %v553_v40 = vsel %vm320_vm0, %v499_v35, 0.0  ;;  %v1001_v43 = vmul.f32 %v699_v37, %v5876_v51 }
 0x122   : > { %v703_v44 = vmul.f32 0.5, %v702_v39  ;;  %397 = vadd.xlane.f32.xlu0 %v396_v32  ;;  %554 = vadd.xlane.f32.xlu2 %v553_v40  ;;  %v534_v46 = vpop.xlane.xlu0 %533  ;;  %v383_v42 = vpop.xlane.xlu1 %382  ;;  %v633_v32 = vmul.f32 %v573_v22, %v5863_v38  ;;  %v6122_v40 = vld [vmem:[%s5787_s30 + $0xd8] sm:$0xff] }
 0x123   : > { %v620_v47 = vmul.f32 %v534_v46, %v5863_v38  ;;  %v1037_v53 = vmul.f32 %v6067_v4, %v1001_v43  ;;  %v444_v51 = vmul.f32 %v5863_v38, %v383_v42 }
 0x124   : > { %v704_v56 = vsub.f32 1.5, %v703_v44 }
 0x125   : > { %v6085_v57 = vadd.f32 1e-05, %v620_v47  ;;  %v1073_v58 = vadd.f32 %v6079_v13, %v1037_v53  ;;  %v5338_v14 = vpop.eup %5337  ;;  %v6089_v1 = vsub.f32 %v5925_v21, %v444_v51 }
 0x126   : > { %v705_v3 = vmul.f32 %v6050_v26, %v704_v56  ;;  %v711_v8 = vmul.f32 %v5338_v14, %v6057_v28  ;;  %vm717_vm12 = vweird.f32 %v5338_v14  ;;  %v439_v28 = vmul.f32 %v5863_v38, %v368_v20 }
 0x127   : > { %5339 = vrsqrt.f32 %v6085_v57  ;;  %v1104_v15 = vpack.c.bf16 %v1073_v58, %v1072_v10  ;;  %v508_v21 = vmul.f32 %v6089_v1, %v6089_v1  ;;  %vm718_vm13 = vmor %vm716_vm11, %vm717_vm12  ;;  %vm726_vm15 = vweird.f32 %v6085_v57 }
 0x128   : > { %v712_v60 = vmul.f32 %v5338_v14, %v711_v8  ;;  %v709_v24 = vsel %vm6101_vm10, %v6050_v26, %v705_v3  ;;  %v6141_v8 = vld [vmem:[%s5787_s30 + $0xe0] sm:$0xff]  ;;  %v6147_v22 = vsub.f32 %v5859_v34, %v439_v28 }
 0x129   : > { %5181 = vmatmul.msk.bf16.vlgmr.msra.gmra.mxu0 %vm320_vm0, %v1104_v15  ;;  %v580_v29 = vsel %vm320_vm0, %v508_v21, 0.0  ;;  %v1002_v43 = vmul.f32 %v709_v24, %v5879_v52  ;;  %v402_v52 = vsel %vm320_vm0, %v6122_v40, 0.0  ;;  %v405_v24 = vsel %vm320_vm0, %v6141_v8, 0.0 }
 0x12a   : > { %400 = vadd.xlane.f32.xlu2 %v399_v2  ;;  %v362_v17 = vpop.xlane.xlu0 %361  ;;  %v713_v18 = vmul.f32 0.5, %v712_v60  ;;  %v537_v61 = vpop.xlane.xlu1 %536  ;;  %581 = vadd.xlane.f32.xlu0 %v580_v29  ;;  %v503_v28 = vmul.f32 %v6147_v22, %v6147_v22 }
 0x12b   : > { %v437_v30 = vmul.f32 %v5863_v38, %v362_v17  ;;  %v621_v35 = vmul.f32 %v537_v61, %v5863_v38  ;;  %v1038_v58 = vmul.f32 %v6067_v4, %v1002_v43 }
 0x12c   : > { %v714_v36 = vsub.f32 1.5, %v713_v18  ;;  %v6158_v18 = vpop.xlane.xlu2 %545 }
 0x12d   : > { %v6115_v37 = vsub.f32 %v5938_v31, %v437_v30  ;;  %v6117_v26 = vpop.eup %5339  ;;  %v6119_v39 = vadd.f32 1e-05, %v621_v35  ;;  %v6130_v31 = vadd.f32 1e-05, %v633_v32  ;;  %v1074_v16 = vadd.f32 %v6079_v13, %v1038_v58 }
 0x12e   : > { %v715_v44 = vmul.f32 %v5338_v14, %v714_v36  ;;  %v721_v46 = vmul.f32 %v6117_v26, %v6085_v57  ;;  %vm727_vm14 = vweird.f32 %v6117_v26 }
 0x12f   : > { %v501_v42 = vmul.f32 %v6115_v37, %v6115_v37  ;;  %5341 = vrsqrt.f32 %v6119_v39  ;;  %vm6169_vm1 = vmor %vm726_vm15, %vm727_vm14  ;;  %vm736_vm3 = vweird.f32 %v6119_v39  ;;  %vm856_vm10 = vweird.f32 %v6130_v31 }
 0x130   : > { %v719_v47 = vsel %vm718_vm13, %v5338_v14, %v715_v44  ;;  %v722_v49 = vmul.f32 %v6117_v26, %v721_v46  ;;  %5343 = vrsqrt.f32 %v6130_v31 }
 0x131   : > { %v559_v53 = vsel %vm320_vm0, %v501_v42, 0.0  ;;  %v1003_v51 = vmul.f32 %v719_v47, %v5896_v63 }
 0x132   : > { %560 = vadd.xlane.f32.xlu2 %v559_v53  ;;  %v540_v56 = vpop.xlane.xlu0 %539  ;;  %v723_v20 = vmul.f32 0.5, %v722_v49  ;;  %v392_v2 = vpop.xlane.xlu1 %391  ;;  %403 = vadd.xlane.f32.xlu0 %v402_v52 }
 0x133   : > { %v622_v3 = vmul.f32 %v540_v56, %v5863_v38  ;;  %v447_v14 = vmul.f32 %v5863_v38, %v392_v2  ;;  %v1039_v10 = vmul.f32 %v6067_v4, %v1003_v51  ;;  %v565_v2 = vsel %vm320_vm0, %v503_v28, 0.0 }
 0x134   : > { %v724_v60 = vsub.f32 1.5, %v723_v20 }
 0x135   : > { %v6149_v63 = vadd.f32 1e-05, %v622_v3  ;;  %v5342_v15 = vpop.eup %5341  ;;  %v6152_v21 = vsub.f32 %v5957_v12, %v447_v14  ;;  %v1075_v17 = vadd.f32 %v6079_v13, %v1039_v10  ;;  %v395_v14 = vpop.xlane.xlu2 %394 }
 0x136   : > { %v725_v61 = vmul.f32 %v6117_v26, %v724_v60  ;;  %v731_v34 = vmul.f32 %v5342_v15, %v6119_v39  ;;  %v6167_v32 = vpop.eup %5343  ;;  %vm737_vm2 = vweird.f32 %v5342_v15 }
 0x137   : > { %5345 = vrsqrt.f32 %v6149_v63  ;;  %v1105_v29 = vpack.c.bf16 %v1075_v17, %v1074_v16  ;;  %v511_v12 = vmul.f32 %v6152_v21, %v6152_v21  ;;  %v851_v52 = vmul.f32 %v6167_v32, %v6130_v31  ;;  %vm738_vm4 = vmor %vm736_vm3, %vm737_vm2 }
 0x138   : > { %v732_v30 = vmul.f32 %v5342_v15, %v731_v34  ;;  %v729_v44 = vsel %vm6169_vm1, %v6117_v26, %v725_v61  ;;  %v6203_v61 = vld [vmem:[%s5787_s30 + $0xf0] sm:$0xff]  ;;  %vm746_vm6 = vweird.f32 %v6149_v63  ;;  %vm857_vm11 = vweird.f32 %v6167_v32 }
 0x139   : > { %v589_v36 = vsel %vm320_vm0, %v511_v12, 0.0  ;;  %5182 = vmatmul.msk.bf16.gmra.mxu0 %vm320_vm0, %v1105_v29  ;;  %v1004_v58 = vmul.f32 %v729_v44, %v5909_v9  ;;  %v852_v10 = vmul.f32 %v6167_v32, %v851_v52  ;;  %vm6241_vm13 = vmor %vm856_vm10, %vm857_vm11 }
 0x13a   : > { %406 = vadd.xlane.f32.xlu2 %v405_v24  ;;  %v389_v43 = vpop.xlane.xlu0 %388  ;;  %v733_v46 = vmul.f32 0.5, %v732_v30  ;;  %590 = vadd.xlane.f32.xlu1 %v589_v36  ;;  %v543_v57 = vpop.xlane.xlu1 %542  ;;  %v448_v24 = vmul.f32 %v5863_v38, %v395_v14  ;;  %v411_v36 = vsel %vm320_vm0, %v6203_v61, 0.0 }
 0x13b   : > { %v446_v42 = vmul.f32 %v5863_v38, %v389_v43  ;;  %v623_v47 = vmul.f32 %v543_v57, %v5863_v38  ;;  %v1040_v17 = vmul.f32 %v6067_v4, %v1004_v58  ;;  %v853_v35 = vmul.f32 0.5, %v852_v10 }
 0x13c   : > { %v734_v53 = vsub.f32 1.5, %v733_v46  ;;  %v6215_v57 = vsub.f32 %v5943_v33, %v448_v24  ;;  %v624_v58 = vmul.f32 %v6158_v18, %v5863_v38 }
 0x13d   : > { %v6182_v49 = vpop.eup %5345  ;;  %v6187_v26 = vsub.f32 %v5967_v48, %v446_v42  ;;  %v655_v51 = vadd.f32 1e-05, %v623_v47  ;;  %v1076_v44 = vadd.f32 %v6079_v13, %v1040_v17 }
 0x13e   : > { %v741_v56 = vmul.f32 %v6182_v49, %v6149_v63  ;;  %v735_v20 = vmul.f32 %v5342_v15, %v734_v53  ;;  %vm747_vm5 = vweird.f32 %v6182_v49  ;;  %v512_v33 = vmul.f32 %v6215_v57, %v6215_v57 }
 0x13f   : > { %v510_v3 = vmul.f32 %v6187_v26, %v6187_v26  ;;  %5347 = vrsqrt.f32 %v655_v51  ;;  %vm6222_vm7 = vmor %vm746_vm6, %vm747_vm5  ;;  %vm756_vm8 = vweird.f32 %v655_v51 }
 0x140   : > { %v742_v48 = vmul.f32 %v6182_v49, %v741_v56  ;;  %v739_v60 = vsel %vm738_vm4, %v5342_v15, %v735_v20  ;;  %v6208_v15 = vld [vmem:[%s5787_s30 + $0xe8] sm:$0xff]  ;;  %v854_v56 = vsub.f32 1.5, %v853_v35  ;;  %v6255_v35 = vld [vmem:[%s5787_s30 + $0xf8] sm:$0xff] }
 0x141   : > { %v586_v9 = vsel %vm320_vm0, %v510_v3, 0.0  ;;  %v1005_v39 = vmul.f32 %v739_v60, %v5931_v27  ;;  %v408_v47 = vsel %vm320_vm0, %v6208_v15, 0.0 }
 0x142   : > { %v743_v16 = vmul.f32 0.5, %v742_v48  ;;  %566 = vadd.xlane.f32.xlu2 %v565_v2  ;;  %587 = vadd.xlane.f32.xlu0 %v586_v9  ;;  %v570_v34 = vpop.xlane.xlu1 %569 }
 0x143   : > { %v632_v12 = vmul.f32 %v570_v34, %v5863_v38  ;;  %v1041_v30 = vmul.f32 %v6067_v4, %v1005_v39 }
 0x144   : > { %v744_v29 = vsub.f32 1.5, %v743_v16  ;;  %v592_v16 = vsel %vm320_vm0, %v512_v33, 0.0 }
 0x145   : > { %v5348_v43 = vpop.eup %5347  ;;  %v664_v27 = vadd.f32 1e-05, %v632_v12  ;;  %v1077_v46 = vadd.f32 %v6079_v13, %v1041_v30 }
 0x146   : > { %v745_v42 = vmul.f32 %v6182_v49, %v744_v29  ;;  %v751_v28 = vmul.f32 %v5348_v43, %v655_v51  ;;  %vm757_vm9 = vweird.f32 %v5348_v43  ;;  %v855_v51 = vmul.f32 %v6167_v32, %v854_v56 }
 0x147   : > { %5349 = vrsqrt.f32 %v664_v27  ;;  %v1106_v52 = vpack.c.bf16 %v1077_v46, %v1076_v44  ;;  %vm758_vm12 = vmor %vm756_vm8, %vm757_vm9  ;;  %vm846_vm14 = vweird.f32 %v664_v27 }
 0x148   : > { %v752_v53 = vmul.f32 %v5348_v43, %v751_v28  ;;  %v749_v20 = vsel %vm6222_vm7, %v6182_v49, %v745_v42  ;;  %v859_v29 = vsel %vm6241_vm13, %v6167_v32, %v855_v51  ;;  %v414_v32 = vsel %vm320_vm0, %v6255_v35, 0.0 }
 0x149   : > { %5183 = vmatmul.msk.bf16.gmra.mxu0 %vm320_vm0, %v1106_v52  ;;  %v1006_v49 = vmul.f32 %v749_v20, %v5946_v6  ;;  %v1017_v44 = vmul.f32 %v859_v29, %v5906_v7  ;;  %v656_v20 = vadd.f32 1e-05, %v624_v58 }
 0x14a   : > { %412 = vadd.xlane.f32.xlu2 %v411_v36  ;;  %409 = vadd.xlane.f32.xlu0 %v408_v47  ;;  %v753_v2 = vmul.f32 0.5, %v752_v53  ;;  %v365_v63 = vpop.xlane.xlu1 %364 }
 0x14b   : > { %v438_v3 = vmul.f32 %v5863_v38, %v365_v63  ;;  %v1042_v34 = vmul.f32 %v6067_v4, %v1006_v49  ;;  %v1053_v47 = vmul.f32 %v6067_v4, %v1017_v44  ;;  %5351 = vrsqrt.f32 %v656_v20 }
 0x14c   : > { %v754_v14 = vsub.f32 1.5, %v753_v2  ;;  %vm766_vm2 = vweird.f32 %v656_v20 }
 0x14d   : > { %v5350_v48 = vpop.eup %5349  ;;  %v6236_v10 = vsub.f32 %v5982_v59, %v438_v3  ;;  %v1089_v56 = vadd.f32 %v6079_v13, %v1053_v47 }
 0x14e   : > { %v755_v60 = vmul.f32 %v5348_v43, %v754_v14  ;;  %v841_v9 = vmul.f32 %v5350_v48, %v664_v27  ;;  %vm847_vm15 = vweird.f32 %v5350_v48 }
 0x14f   : > { %v502_v31 = vmul.f32 %v6236_v10, %v6236_v10  ;;  %vm848_vm1 = vmor %vm846_vm14, %vm847_vm15 }
 0x150   : > { %v759_v17 = vsel %vm758_vm12, %v5348_v43, %v755_v60  ;;  %v842_v24 = vmul.f32 %v5350_v48, %v841_v9  ;;  %v1078_v43 = vadd.f32 %v6079_v13, %v1042_v34 }
 0x151   : > { %v562_v59 = vsel %vm320_vm0, %v502_v31, 0.0  ;;  %v1007_v6 = vmul.f32 %v759_v17, %v5963_v45  ;;  %v5352_v3 = vpop.eup %5351 }
 0x152   : > { %593 = vadd.xlane.f32.xlu0 %v592_v16  ;;  %v843_v12 = vmul.f32 0.5, %v842_v24  ;;  %563 = vadd.xlane.f32.xlu1 %v562_v59  ;;  %v579_v33 = vpop.xlane.xlu1 %578  ;;  %v761_v14 = vmul.f32 %v5352_v3, %v656_v20  ;;  %vm767_vm3 = vweird.f32 %v5352_v3 }
 0x153   : > { %v1043_v30 = vmul.f32 %v6067_v4, %v1007_v6  ;;  %vm6285_vm4 = vmor %vm766_vm2, %vm767_vm3 }
 0x154   : > { %v844_v36 = vsub.f32 1.5, %v843_v12  ;;  %v762_v49 = vmul.f32 %v5352_v3, %v761_v14 }
 0x155   : > { %v1079_v45 = vadd.f32 %v6079_v13, %v1043_v30 }
 0x156   : > { %v845_v46 = vmul.f32 %v5350_v48, %v844_v36  ;;  %v763_v18 = vmul.f32 0.5, %v762_v49 }
 0x157   : > { %v1107_v42 = vpack.c.bf16 %v1079_v45, %v1078_v43 }
 0x158   : > { %v849_v27 = vsel %vm848_vm1, %v5350_v48, %v845_v46  ;;  %v764_v24 = vsub.f32 1.5, %v763_v18 }
 0x159   : > { %v1016_v28 = vmul.f32 %v849_v27, %v5974_v54  ;;  %5184 = vmatmul.msk.bf16.gmra.mxu0 %vm320_vm0, %v1107_v42  ;;  %v635_v54 = vmul.f32 %v579_v33, %v5863_v38 }
 0x15a   : > { %415 = vadd.xlane.f32.xlu0 %v414_v32  ;;  %v552_v63 = vpop.xlane.xlu1 %551  ;;  %v765_v12 = vmul.f32 %v5352_v3, %v764_v24 }
 0x15b   : > { %v1052_v52 = vmul.f32 %v6067_v4, %v1016_v28  ;;  %v667_v2 = vadd.f32 1e-05, %v635_v54  ;;  %v626_v48 = vmul.f32 %v552_v63, %v5863_v38 }
 0x15c   : > { %v769_v47 = vsel %vm6285_vm4, %v5352_v3, %v765_v12 }
 0x15d   : > { %v1088_v53 = vadd.f32 %v6079_v13, %v1052_v52  ;;  %5353 = vrsqrt.f32 %v667_v2  ;;  %v6273_v51 = vadd.f32 1e-05, %v626_v48  ;;  %vm876_vm5 = vweird.f32 %v667_v2 }
 0x15e   : > { %v1008_v3 = vmul.f32 %v769_v47, %v5922_v19 }
 0x15f   : > { %v1112_v7 = vpack.c.bf16 %v1089_v56, %v1088_v53  ;;  %5355 = vrsqrt.f32 %v6273_v51  ;;  %vm786_vm11 = vweird.f32 %v6273_v51 }
 0x161   : > { %5189 = vmatmul.msk.bf16.vlgmr.msra.gmra.mxu2 %vm320_vm0, %v1112_v7 }
 0x162   : > { %v585_v9 = vpop.xlane.xlu1 %584 }
 0x163   : > { %v6275_v60 = vpop.eup %5353  ;;  %v637_v6 = vmul.f32 %v585_v9, %v5863_v38 }
 0x164   : > { %v871_v31 = vmul.f32 %v6275_v60, %v667_v2  ;;  %vm877_vm6 = vweird.f32 %v6275_v60 }
 0x165   : > { %v6282_v34 = vpop.eup %5355  ;;  %v6291_v46 = vadd.f32 1e-05, %v637_v6  ;;  %vm6308_vm8 = vmor %vm876_vm5, %vm877_vm6 }
 0x166   : > { %v872_v59 = vmul.f32 %v6275_v60, %v871_v31  ;;  %v781_v44 = vmul.f32 %v6282_v34, %v6273_v51  ;;  %vm787_vm12 = vweird.f32 %v6282_v34 }
 0x167   : > { %vm6346_vm15 = vmor %vm786_vm11, %vm787_vm12  ;;  %vm896_vm3 = vweird.f32 %v6291_v46 }
 0x168   : > { %v873_v45 = vmul.f32 0.5, %v872_v59  ;;  %v782_v53 = vmul.f32 %v6282_v34, %v781_v44  ;;  %v1044_v59 = vmul.f32 %v6067_v4, %v1008_v3 }
 0x16a   : > { %v558_v30 = vpop.xlane.xlu1 %557  ;;  %v874_v52 = vsub.f32 1.5, %v873_v45  ;;  %v783_v48 = vmul.f32 0.5, %v782_v53 }
 0x16b   : > { %v628_v27 = vmul.f32 %v558_v30, %v5863_v38 }
 0x16c   : > { %v875_v14 = vmul.f32 %v6275_v60, %v874_v52  ;;  %v784_v6 = vsub.f32 1.5, %v783_v48 }
 0x16d   : > { %v6302_v7 = vadd.f32 1e-05, %v628_v27 }
 0x16e   : > { %v785_v47 = vmul.f32 %v6282_v34, %v784_v6 }
 0x185   : > { %v549_v16 = vpop.xlane.xlu0 %548 }
 0x186   : > { %v625_v39 = vmul.f32 %v549_v16, %v5863_v38 }
 0x188   : > { %v657_v17 = vadd.f32 1e-05, %v625_v39 }
 0x18a   : > { %5357 = vrsqrt.f32 %v657_v17  ;;  %vm776_vm9 = vweird.f32 %v657_v17 }
 0x18d   : > { %v576_v29 = vpop.xlane.xlu0 %575 }
 0x18e   : > { %v634_v36 = vmul.f32 %v576_v29, %v5863_v38 }
 0x190   : > { %v5358_v32 = vpop.eup %5357  ;;  %v6293_v42 = vadd.f32 1e-05, %v634_v36 }
 0x191   : > { %v771_v28 = vmul.f32 %v5358_v32, %v657_v17  ;;  %vm777_vm7 = vweird.f32 %v5358_v32 }
 0x192   : > { %5359 = vrsqrt.f32 %v6293_v42  ;;  %vm778_vm10 = vmor %vm776_vm9, %vm777_vm7  ;;  %vm866_vm13 = vweird.f32 %v6293_v42 }
 0x193   : > { %5361 = vrsqrt.f32 %v6291_v46  ;;  %v772_v56 = vmul.f32 %v5358_v32, %v771_v28 }
 0x194   : > { %5363 = vrsqrt.f32 %v6302_v7 }
 0x195   : > { %v773_v58 = vmul.f32 0.5, %v772_v56  ;;  %v555_v33 = vpop.xlane.xlu2 %554  ;;  %v398_v20 = vpop.xlane.xlu0 %397 }
 0x196   : > { %v627_v54 = vmul.f32 %v555_v33, %v5863_v38  ;;  %v449_v63 = vmul.f32 %v5863_v38, %v398_v20 }
 0x197   : > { %v774_v49 = vsub.f32 1.5, %v773_v58 }
 0x198   : > { %v5360_v9 = vpop.eup %5359  ;;  %v6312_v16 = vadd.f32 1e-05, %v627_v54  ;;  %v6315_v18 = vsub.f32 %v6048_v23, %v449_v63  ;;  %v879_v23 = vsel %vm6308_vm8, %v6275_v60, %v875_v14  ;;  %vm806_vm8 = vweird.f32 %v6302_v7 }
 0x199   : > { %v6317_v39 = vpop.eup %5361  ;;  %v775_v19 = vmul.f32 %v5358_v32, %v774_v49  ;;  %v861_v31 = vmul.f32 %v5360_v9, %v6293_v42  ;;  %v1019_v27 = vmul.f32 %v879_v23, %v5985_v62  ;;  %vm867_vm14 = vweird.f32 %v5360_v9 }
 0x19a   : > { %5365 = vrsqrt.f32 %v6312_v16  ;;  %v513_v24 = vmul.f32 %v6315_v18, %v6315_v18  ;;  %v891_v17 = vmul.f32 %v6317_v39, %v6291_v46  ;;  %v6338_v28 = vpop.eup %5363  ;;  %vm868_vm1 = vmor %vm866_vm13, %vm867_vm14  ;;  %vm897_vm4 = vweird.f32 %v6317_v39 }
 0x19b   : > { %v779_v29 = vsel %vm778_vm10, %v5358_v32, %v775_v19  ;;  %v862_v12 = vmul.f32 %v5360_v9, %v861_v31  ;;  %v1080_v32 = vadd.f32 %v6079_v13, %v1044_v59  ;;  %v801_v63 = vmul.f32 %v6338_v28, %v6302_v7  ;;  %vm6401_vm7 = vmor %vm896_vm3, %vm897_vm4 }
 0x19c   : > { %v595_v30 = vsel %vm320_vm0, %v513_v24, 0.0  ;;  %v1009_v36 = vmul.f32 %v779_v29, %v6023_v41  ;;  %v892_v62 = vmul.f32 %v6317_v39, %v891_v17  ;;  %v1055_v2 = vmul.f32 %v6067_v4, %v1019_v27 }
 0x19d   : > { %v863_v43 = vmul.f32 0.5, %v862_v12  ;;  %v401_v45 = vpop.xlane.xlu2 %400  ;;  %596 = vadd.xlane.f32.xlu1 %v595_v30  ;;  %v582_v52 = vpop.xlane.xlu0 %581  ;;  %v802_v6 = vmul.f32 %v6338_v28, %v801_v63  ;;  %vm796_vm5 = vweird.f32 %v6312_v16  ;;  %vm807_vm9 = vweird.f32 %v6338_v28 }
 0x19e   : > { %v450_v44 = vmul.f32 %v5863_v38, %v401_v45  ;;  %v1045_v60 = vmul.f32 %v6067_v4, %v1009_v36  ;;  %v636_v33 = vmul.f32 %v582_v52, %v5863_v38  ;;  %v893_v19 = vmul.f32 0.5, %v892_v62  ;;  %vm6432_vm12 = vmor %vm806_vm8, %vm807_vm9 }
 0x19f   : > { %v864_v41 = vsub.f32 1.5, %v863_v43  ;;  %v1091_v17 = vadd.f32 %v6079_v13, %v1055_v2  ;;  %v803_v27 = vmul.f32 0.5, %v802_v6 }
 0x1a0   : > { %v5366_v53 = vpop.eup %5365  ;;  %v6352_v58 = vsub.f32 %v6082_v55, %v450_v44  ;;  %v1081_v42 = vadd.f32 %v6079_v13, %v1045_v60  ;;  %v6359_v51 = vadd.f32 1e-05, %v636_v33  ;;  %v789_v55 = vsel %vm6346_vm15, %v6282_v34, %v785_v47 }
 0x1a1   : > { %v865_v20 = vmul.f32 %v5360_v9, %v864_v41  ;;  %v791_v54 = vmul.f32 %v5366_v53, %v6312_v16  ;;  %vm797_vm2 = vweird.f32 %v5366_v53  ;;  %v1010_v30 = vmul.f32 %v789_v55, %v5993_v5 }
 0x1a2   : > { %v1108_v3 = vpack.c.bf16 %v1081_v42, %v1080_v32  ;;  %v514_v14 = vmul.f32 %v6352_v58, %v6352_v58  ;;  %5367 = vrsqrt.f32 %v6359_v51  ;;  %v894_v36 = vsub.f32 1.5, %v893_v19  ;;  %vm798_vm6 = vmor %vm796_vm5, %vm797_vm2 }
 0x1a3   : > { %v869_v48 = vsel %vm868_vm1, %v5360_v9, %v865_v20  ;;  %v792_v49 = vmul.f32 %v5366_v53, %v791_v54  ;;  %v1046_v56 = vmul.f32 %v6067_v4, %v1010_v30  ;;  %v804_v20 = vsub.f32 1.5, %v803_v27 }
 0x1a4   : > { %5185 = vmatmul.msk.bf16.gmra.mxu0 %vm320_vm0, %v1108_v3  ;;  %v598_v31 = vsel %vm320_vm0, %v514_v14, 0.0  ;;  %v1018_v24 = vmul.f32 %v869_v48, %v6031_v50  ;;  %v895_v62 = vmul.f32 %v6317_v39, %v894_v36  ;;  %vm886_vm10 = vweird.f32 %v6359_v51 }
 0x1a5   : > { %v793_v59 = vmul.f32 0.5, %v792_v49  ;;  %v561_v23 = vpop.xlane.xlu2 %560  ;;  %599 = vadd.xlane.f32.xlu1 %v598_v31  ;;  %v404_v12 = vpop.xlane.xlu0 %403  ;;  %v1082_v55 = vadd.f32 %v6079_v13, %v1046_v56  ;;  %v805_v6 = vmul.f32 %v6338_v28, %v804_v20 }
 0x1a6   : > { %v629_v34 = vmul.f32 %v561_v23, %v5863_v38  ;;  %v1054_v9 = vmul.f32 %v6067_v4, %v1018_v24  ;;  %v451_v50 = vmul.f32 %v5863_v38, %v404_v12  ;;  %v6379_v45 = vpop.f32.mrf.mxu0  ;;  %v899_v49 = vsel %vm6401_vm7, %v6317_v39, %v895_v62 }
 0x1a7   : > { %v794_v29 = vsub.f32 1.5, %v793_v59 }
 0x1a8   : > { %v6376_v43 = vadd.f32 1e-05, %v629_v34  ;;  %v1090_v44 = vadd.f32 %v6079_v13, %v1054_v9  ;;  %v5368_v32 = vpop.eup %5367  ;;  %v6388_v5 = vsub.f32 %v6122_v40, %v451_v50 }
 0x1a9   : > { %v795_v60 = vmul.f32 %v5366_v53, %v794_v29  ;;  %v881_v52 = vmul.f32 %v5368_v32, %v6359_v51  ;;  %vm887_vm11 = vweird.f32 %v5368_v32 }
 0x1aa   : > { %5369 = vrsqrt.f32 %v6376_v43  ;;  %v1113_v47 = vpack.c.bf16 %v1091_v17, %v1090_v44  ;;  %v515_v16 = vmul.f32 %v6388_v5, %v6388_v5  ;;  %vm888_vm13 = vmor %vm886_vm10, %vm887_vm11  ;;  %v1021_v17 = vmul.f32 %v899_v49, %v6000_v11 }
 0x1ab   : > { %v799_v41 = vsel %vm798_vm6, %v5366_v53, %v795_v60  ;;  %v882_v53 = vmul.f32 %v5368_v32, %v881_v52  ;;  %v809_v44 = vsel %vm6432_vm12, %v6338_v28, %v805_v6  ;;  %vm816_vm15 = vweird.f32 %v6376_v43 }
 0x1ac   : > { %5190 = vmatmul.msk.bf16.gmra.mxu2 %vm320_vm0, %v1113_v47  ;;  %v1011_v33 = vmul.f32 %v799_v41, %v6053_v25  ;;  %v601_v3 = vsel %vm320_vm0, %v515_v16, 0.0  ;;  %v1057_v56 = vmul.f32 %v6067_v4, %v1021_v17  ;;  %v1012_v16 = vmul.f32 %v809_v44, %v6007_v0 }
 0x1ad   : > { %v407_v42 = vpop.xlane.xlu2 %406  ;;  %v591_v54 = vpop.xlane.xlu1 %590  ;;  %v883_v14 = vmul.f32 0.5, %v882_v53  ;;  %602 = vadd.xlane.f32.xlu2 %v601_v3 }
 0x1ae   : > { %v452_v63 = vmul.f32 %v5863_v38, %v407_v42  ;;  %v1047_v25 = vmul.f32 %v6067_v4, %v1011_v33  ;;  %v639_v46 = vmul.f32 %v591_v54, %v5863_v38  ;;  %v6419_v19 = vpop.f32.mrf.mxu0  ;;  %v1093_v42 = vadd.f32 %v6079_v13, %v1057_v56 }
 0x1af   : > { %v884_v24 = vsub.f32 1.5, %v883_v14 }
 0x1b0   : > { %v5370_v48 = vpop.eup %5369  ;;  %v6417_v2 = vsub.f32 %v6141_v8, %v452_v63  ;;  %v1083_v31 = vadd.f32 %v6079_v13, %v1047_v25  ;;  %v6423_v23 = vadd.f32 1e-05, %v639_v46 }
 0x1b1   : > { %v811_v59 = vmul.f32 %v5370_v48, %v6376_v43  ;;  %v885_v9 = vmul.f32 %v5368_v32, %v884_v24  ;;  %vm817_vm14 = vweird.f32 %v5370_v48  ;;  %v1048_v43 = vmul.f32 %v6067_v4, %v1012_v16 }
 0x1b2   : > { %v1109_v34 = vpack.c.bf16 %v1083_v31, %v1082_v55  ;;  %v516_v39 = vmul.f32 %v6417_v2, %v6417_v2  ;;  %5371 = vrsqrt.f32 %v6423_v23  ;;  %vm818_vm1 = vmor %vm816_vm15, %vm817_vm14  ;;  %vm916_vm2 = vweird.f32 %v6423_v23 }
 0x1b3   : > { %v812_v29 = vmul.f32 %v5370_v48, %v811_v59  ;;  %v889_v30 = vsel %vm888_vm13, %v5368_v32, %v885_v9  ;;  %v1084_v59 = vadd.f32 %v6079_v13, %v1048_v43 }
 0x1b4   : > { %5186 = vmatmul.msk.bf16.gmra.mxu0 %vm320_vm0, %v1109_v34  ;;  %v604_v12 = vsel %vm320_vm0, %v516_v39, 0.0  ;;  %v1020_v27 = vmul.f32 %v889_v30, %v6089_v1 }
 0x1b5   : > { %v813_v36 = vmul.f32 0.5, %v812_v29  ;;  %v567_v7 = vpop.xlane.xlu2 %566  ;;  %605 = vadd.xlane.f32.xlu0 %v604_v12  ;;  %v588_v50 = vpop.xlane.xlu0 %587 }
 0x1b6   : > { %v631_v60 = vmul.f32 %v567_v7, %v5863_v38  ;;  %v638_v51 = vmul.f32 %v588_v50, %v5863_v38  ;;  %v6452_v32 = vpop.f32.mrf.mxu0  ;;  %v1056_v52 = vmul.f32 %v6067_v4, %v1020_v27 }
 0x1b7   : > { %v814_v47 = vsub.f32 1.5, %v813_v36 }
 0x1b8   : > { %v6448_v41 = vadd.f32 1e-05, %v631_v60  ;;  %v6450_v11 = vadd.f32 1e-05, %v638_v51  ;;  %v5372_v62 = vpop.eup %5371  ;;  %v1092_v53 = vadd.f32 %v6079_v13, %v1056_v52 }
 0x1b9   : > { %v815_v28 = vmul.f32 %v5370_v48, %v814_v47  ;;  %v911_v1 = vmul.f32 %v5372_v62, %v6423_v23  ;;  %vm917_vm3 = vweird.f32 %v5372_v62 }
 0x1ba   : > { %5373 = vrsqrt.f32 %v6448_v41  ;;  %v1114_v3 = vpack.c.bf16 %v1093_v42, %v1092_v53  ;;  %vm6489_vm4 = vmor %vm916_vm2, %vm917_vm3  ;;  %vm906_vm6 = vweird.f32 %v6450_v11  ;;  %vm836_vm8 = vweird.f32 %v6448_v41 }
 0x1bb   : > { %v819_v33 = vsel %vm818_vm1, %v5370_v48, %v815_v28  ;;  %5375 = vrsqrt.f32 %v6450_v11  ;;  %v912_v40 = vmul.f32 %v5372_v62, %v911_v1 }
 0x1bc   : > { %v1013_v20 = vmul.f32 %v819_v33, %v6115_v37  ;;  %5191 = vmatmul.msk.bf16.gmra.mxu2 %vm320_vm0, %v1114_v3 }
 0x1bd   : > { %v413_v54 = vpop.xlane.xlu2 %412  ;;  %v410_v63 = vpop.xlane.xlu0 %409  ;;  %v913_v0 = vmul.f32 0.5, %v912_v40 }
 0x1be   : > { %v454_v25 = vmul.f32 %v5863_v38, %v413_v54  ;;  %v453_v14 = vmul.f32 %v5863_v38, %v410_v63  ;;  %v1049_v46 = vmul.f32 %v6067_v4, %v1013_v20  ;;  %v6478_v31 = vpop.f32.mrf.mxu0 }
 0x1bf   : > { %v914_v48 = vsub.f32 1.5, %v913_v0 }
 0x1c0   : > { %v6469_v55 = vpop.eup %5373  ;;  %v6473_v37 = vsub.f32 %v6203_v61, %v454_v25  ;;  %v6476_v49 = vsub.f32 %v6208_v15, %v453_v14  ;;  %v1085_v6 = vadd.f32 %v6079_v13, %v1049_v46  ;;  %v1309_v14 = vpack.c.bf16 %v6379_v45, %v6379_v45 }
 0x1c1   : > { %v5376_v24 = vpop.eup %5375  ;;  %v915_v34 = vmul.f32 %v5372_v62, %v914_v48  ;;  %v831_v39 = vmul.f32 %v6469_v55, %v6448_v41  ;;  %vm837_vm9 = vweird.f32 %v6469_v55  ;;  %v1312_v46 = vpack.c.bf16 %v6478_v31, %v6478_v31 }
 0x1c2   : > { %v901_v8 = vmul.f32 %v5376_v24, %v6450_v11  ;;  %v518_v61 = vmul.f32 %v6473_v37, %v6473_v37  ;;  %v1110_v9 = vpack.c.bf16 %v1085_v6, %v1084_v59  ;;  %v517_v29 = vmul.f32 %v6476_v49, %v6476_v49  ;;  %vm6524_vm10 = vmor %vm836_vm8, %vm837_vm9 }
 0x1c3   : > { %v919_v23 = vsel %vm6489_vm4, %v5372_v62, %v915_v34  ;;  %v832_v7 = vmul.f32 %v6469_v55, %v831_v39  ;;  %vm907_vm5 = vweird.f32 %v5376_v24  ;;  %v1311_v59 = vpack.c.bf16 %v6452_v32, %v6452_v32 }
 0x1c4   : > { %v902_v12 = vmul.f32 %v5376_v24, %v901_v8  ;;  %v610_v17 = vsel %vm320_vm0, %v518_v61, 0.0  ;;  %5187 = vmatmul.msk.bf16.gmra.mxu0 %vm320_vm0, %v1110_v9  ;;  %v607_v30 = vsel %vm320_vm0, %v517_v29, 0.0  ;;  %v1023_v52 = vmul.f32 %v919_v23, %v6152_v21  ;;  %vm908_vm7 = vmor %vm906_vm6, %vm907_vm5 }
 0x1c5   : > { %611 = vadd.xlane.f32.xlu2 %v610_v17  ;;  %v6498_v36 = vpop.xlane.xlu0 %593  ;;  %v564_v44 = vpop.xlane.xlu1 %563  ;;  %608 = vadd.xlane.f32.xlu1 %v607_v30  ;;  %v833_v56 = vmul.f32 0.5, %v832_v7  ;;  %v1343_v45 = vunpack.c.l.b16 %v1309_v14  ;;  %v1372_v39 = vunpack.c.l.b16 %v1312_v46  ;;  %v1371_v15 = vunpack.c.l.b16 %v1311_v59 }
 0x1c6   : > { %v903_v50 = vmul.f32 0.5, %v902_v12  ;;  %v630_v60 = vmul.f32 %v564_v44, %v5863_v38  ;;  %v6504_v27 = vpop.f32.mrf.mxu0  ;;  %v1059_v33 = vmul.f32 %v6067_v4, %v1023_v52 }
 0x1c7   : > { %v834_v40 = vsub.f32 1.5, %v833_v56  ;;  %v6542_v29 = vpack.c.b16 %v1372_v39, %v1371_v15  ;;  %v1313_v12 = vpack.c.bf16 %v6504_v27, %v6504_v27 }
 0x1c8   : > { %v904_v51 = vsub.f32 1.5, %v903_v50  ;;  %v662_v47 = vadd.f32 1e-05, %v630_v60 }
 0x1c9   : > { %v835_v63 = vmul.f32 %v6469_v55, %v834_v40  ;;  %9061 = vst [vmem:[#allocation3_spill] sm:$0xff] %v6542_v29  ;;  %v1398_v44 = vunpack.c.l.b16 %v1313_v12 }
 0x1ca   : > { %v905_v28 = vmul.f32 %v5376_v24, %v904_v51  ;;  %5377 = vrsqrt.f32 %v662_v47  ;;  %vm826_vm11 = vweird.f32 %v662_v47 }
 0x1cc   : > { %v909_v62 = vsel %vm908_vm7, %v5376_v24, %v905_v28 }
 0x1cd   : > { %v416_v16 = vpop.xlane.xlu0 %415  ;;  %v1022_v1 = vmul.f32 %v909_v62, %v6187_v26  ;;  %v1095_v26 = vadd.f32 %v6079_v13, %v1059_v33 }
 0x1ce   : > { %v455_v53 = vmul.f32 %v5863_v38, %v416_v16  ;;  %v1205_v11 = vpop.f32.mrf.mxu0 }
 0x1cf   : > { %v1058_v42 = vmul.f32 %v6067_v4, %v1022_v1  ;;  %v1310_v4 = vpack.c.bf16 %v6419_v19, %v6419_v19  ;;  %v839_v19 = vsel %vm6524_vm10, %v6469_v55, %v835_v63  ;;  %v1314_v9 = vpack.c.bf16 %v1205_v11, %v1205_v11 }
 0x1d0   : > { %v6515_v21 = vsub.f32 %v6255_v35, %v455_v53  ;;  %v5378_v20 = vpop.eup %5377  ;;  %v1015_v31 = vmul.f32 %v839_v19, %v6147_v22  ;;  %v6552_v22 = vld [vmem:[%s8995_s2] ss:$0 sm:$0xff] }
 0x1d1   : > { %v1094_v54 = vadd.f32 %v6079_v13, %v1058_v42  ;;  %v821_v43 = vmul.f32 %v5378_v20, %v662_v47  ;;  %vm827_vm12 = vweird.f32 %v5378_v20  ;;  %v1344_v24 = vunpack.c.l.b16 %v1310_v4 }
 0x1d2   : > { %v519_v0 = vmul.f32 %v6515_v21, %v6515_v21  ;;  %vm828_vm13 = vmor %vm826_vm11, %vm827_vm12  ;;  %v1051_v17 = vmul.f32 %v6552_v22, %v1015_v31  ;;  %v1399_v30 = vunpack.c.l.b16 %v1314_v9  ;;  %vm1348_vm11 = vcmask 130048  }
 0x1d3   : > { %v1115_v35 = vpack.c.bf16 %v1095_v26, %v1094_v54  ;;  %v822_v3 = vmul.f32 %v5378_v20, %v821_v43  ;;  %v6540_v61 = vpack.c.b16 %v1344_v24, %v1343_v45 }
 0x1d4   : > { %v613_v25 = vsel %vm320_vm0, %v519_v0, 0.0  ;;  %v6565_v47 = vpack.c.b16 %v1399_v30, %v1398_v44 }
 0x1d5   : > { %5192 = vmatmul.msk.bf16.gmra.mxu2 %vm320_vm0, %v1115_v35  ;;  %614 = vadd.xlane.f32.xlu0 %v613_v25  ;;  %v823_v48 = vmul.f32 0.5, %v822_v3  ;;  %9060 = vst [vmem:[#allocation2_spill] sm:$0xff] %v6540_v61 }
 0x1d6   : > { %v1208_v34 = vpop.f32.mrf.mxu0 }
 0x1d7   : > { %v824_v6 = vsub.f32 1.5, %v823_v48  ;;  %v1315_v23 = vpack.c.bf16 %v1208_v34, %v1208_v34 }
 0x1d9   : > { %v825_v8 = vmul.f32 %v5378_v20, %v824_v6  ;;  %v1425_v52 = vunpack.c.l.b16 %v1315_v23 }
 0x1db   : > { %v829_v55 = vsel %vm828_vm13, %v5378_v20, %v825_v8 }
 0x1dc   : > { %v1014_v32 = vmul.f32 %v829_v55, %v6236_v10  ;;  %v6562_v10 = vld [vmem:[%s8996_s3] ss:$0 sm:$0xff] }
 0x1dd   : > { %1346 = vrot.lane.b32.xlu2 %v6540_v61, %s5726_s16  ;;  %v1087_v27 = vadd.f32 %v6562_v10, %v1051_v17 }
 0x1de   : > { %1374 = vrot.lane.b32.xlu1 %v6542_v29, %s5726_s16  ;;  %v1050_v7 = vmul.f32 %v6552_v22, %v1014_v32  ;;  %v1210_v50 = vpop.f32.mrf.mxu0 }
 0x1df   : > { %v1316_v60 = vpack.c.bf16 %v1210_v50, %v1210_v50 }
 0x1e0   : > { %v1086_v51 = vadd.f32 %v6079_v13, %v1050_v7  ;;  %v640_v13 = vmul.f32 %v6498_v36, %v5863_v38 }
 0x1e1   : > { %v1426_v56 = vunpack.c.l.b16 %v1316_v60 }
 0x1e2   : > { %v1111_v28 = vpack.c.bf16 %v1087_v27, %v1086_v51  ;;  %v672_v16 = vadd.f32 1e-05, %v640_v13 }
 0x1e3   : > { %v6567_v62 = vpack.c.b16 %v1426_v56, %v1425_v52 }
 0x1e4   : > { %5188 = vmatmul.msk.bf16.gmra.mxu0 %vm320_vm0, %v1111_v28  ;;  %5379 = vrsqrt.f32 %v672_v16  ;;  %vm926_vm14 = vweird.f32 %v672_v16  ;;  %v6578_v3 = vpop.f32.mrf.mxu2 }
 0x1e5   : > { %1401 = vrot.lane.b32.xlu2 %v6565_v47, %s5726_s16 }
 0x1e6   : > { %1428 = vrot.lane.b32.xlu1 %v6567_v62, %s5726_s16 }
 0x1ea   : > { %v5380_v1 = vpop.eup %5379 }
 0x1eb   : > { %v921_v33 = vmul.f32 %v5380_v1, %v672_v16  ;;  %vm927_vm15 = vweird.f32 %v5380_v1 }
 0x1ec   : > { %vm928_vm1 = vmor %vm926_vm14, %vm927_vm15 }
 0x1ed   : > { %v922_v40 = vmul.f32 %v5380_v1, %v921_v33 }
 0x1ef   : > { %v923_v20 = vmul.f32 0.5, %v922_v40 }
 0x1f1   : > { %v924_v54 = vsub.f32 1.5, %v923_v20 }
 0x1f3   : > { %v925_v36 = vmul.f32 %v5380_v1, %v924_v54 }
 0x1f5   : > { %v929_v35 = vsel %vm928_vm1, %v5380_v1, %v925_v36 }
 0x1f6   : > { %v1024_v59 = vmul.f32 %v929_v35, %v6215_v57  ;;  %v6586_v57 = vpop.f32.mrf.mxu2 }
 0x1f8   : > { %v1060_v15 = vmul.f32 %v6552_v22, %v1024_v59 }
 0x1fa   : > { %v1096_v44 = vadd.f32 %v6562_v10, %v1060_v15 }
 0x210   : > { %v597_v53 = vpop.xlane.xlu1 %596 }
 0x211   : > { %v641_v42 = vmul.f32 %v597_v53, %v5863_v38 }
 0x213   : > { %v673_v11 = vadd.f32 1e-05, %v641_v42 }
 0x215   : > { %5381 = vrsqrt.f32 %v673_v11  ;;  %vm936_vm2 = vweird.f32 %v673_v11 }
 0x218   : > { %v600_v26 = vpop.xlane.xlu1 %599 }
 0x219   : > { %v642_v63 = vmul.f32 %v600_v26, %v5863_v38 }
 0x21b   : > { %v5382_v43 = vpop.eup %5381  ;;  %v674_v0 = vadd.f32 1e-05, %v642_v63 }
 0x21c   : > { %v931_v4 = vmul.f32 %v5382_v43, %v673_v11  ;;  %vm937_vm3 = vweird.f32 %v5382_v43 }
 0x21d   : > { %5383 = vrsqrt.f32 %v674_v0  ;;  %vm938_vm4 = vmor %vm936_vm2, %vm937_vm3  ;;  %vm946_vm5 = vweird.f32 %v674_v0 }
 0x21e   : > { %v932_v41 = vmul.f32 %v5382_v43, %v931_v4 }
 0x220   : > { %v933_v25 = vmul.f32 0.5, %v932_v41  ;;  %v603_v19 = vpop.xlane.xlu2 %602 }
 0x221   : > { %v1213_v14 = vpop.f32.mrf.mxu0  ;;  %v643_v24 = vmul.f32 %v603_v19, %v5863_v38 }
 0x222   : > { %v934_v46 = vsub.f32 1.5, %v933_v25  ;;  %v1317_v55 = vpack.c.bf16 %v1213_v14, %v1213_v14 }
 0x223   : > { %v5384_v48 = vpop.eup %5383  ;;  %v675_v45 = vadd.f32 1e-05, %v643_v24 }
 0x224   : > { %v935_v6 = vmul.f32 %v5382_v43, %v934_v46  ;;  %v941_v34 = vmul.f32 %v5384_v48, %v674_v0  ;;  %vm947_vm6 = vweird.f32 %v5384_v48  ;;  %v1452_v60 = vunpack.c.l.b16 %v1317_v55 }
 0x225   : > { %5385 = vrsqrt.f32 %v675_v45  ;;  %vm948_vm7 = vmor %vm946_vm5, %vm947_vm6  ;;  %vm956_vm8 = vweird.f32 %v675_v45 }
 0x226   : > { %v939_v39 = vsel %vm938_vm4, %v5382_v43, %v935_v6  ;;  %v942_v31 = vmul.f32 %v5384_v48, %v941_v34 }
 0x227   : > { %v1025_v8 = vmul.f32 %v939_v39, %v6315_v18 }
 0x228   : > { %v943_v9 = vmul.f32 0.5, %v942_v31  ;;  %v606_v12 = vpop.xlane.xlu0 %605  ;;  %v1326_v31 = vpack.c.bf16 %v6586_v57, %v6586_v57 }
 0x229   : > { %v644_v32 = vmul.f32 %v606_v12, %v5863_v38  ;;  %v1215_v17 = vpop.f32.mrf.mxu0  ;;  %v1061_v30 = vmul.f32 %v6552_v22, %v1025_v8 }
 0x22a   : > { %v944_v23 = vsub.f32 1.5, %v943_v9  ;;  %v1318_v7 = vpack.c.bf16 %v1215_v17, %v1215_v17  ;;  %v1325_v9 = vpack.c.bf16 %v6578_v3, %v6578_v3  ;;  %v1561_v17 = vunpack.c.l.b16 %v1326_v31 }
 0x22b   : > { %v6588_v50 = vadd.f32 1e-05, %v644_v32  ;;  %v1097_v18 = vadd.f32 %v6562_v10, %v1061_v30  ;;  %v5386_v27 = vpop.eup %5385 }
 0x22c   : > { %v1453_v51 = vunpack.c.l.b16 %v1318_v7  ;;  %v945_v56 = vmul.f32 %v5384_v48, %v944_v23  ;;  %v951_v28 = vmul.f32 %v5386_v27, %v675_v45  ;;  %vm957_vm9 = vweird.f32 %v5386_v27 }
 0x22d   : > { %5387 = vrsqrt.f32 %v6588_v50  ;;  %v1116_v52 = vpack.c.bf16 %v1097_v18, %v1096_v44  ;;  %vm958_vm10 = vmor %vm956_vm8, %vm957_vm9  ;;  %vm966_vm12 = vweird.f32 %v6588_v50  ;;  %v1560_v3 = vunpack.c.l.b16 %v1325_v9 }
 0x22e   : > { %v6593_v13 = vpack.c.b16 %v1453_v51, %v1452_v60  ;;  %v952_v16 = vmul.f32 %v5386_v27, %v951_v28  ;;  %v949_v33 = vsel %vm948_vm7, %v5384_v48, %v945_v56 }
 0x22f   : > { %5193 = vmatmul.msk.bf16.gmra.mxu2 %vm320_vm0, %v1116_v52  ;;  %v6598_v53 = vpop.f32.mrf.mxu2  ;;  %v1026_v54 = vmul.f32 %v949_v33, %v6352_v58  ;;  %v6639_v51 = vpack.c.b16 %v1561_v17, %v1560_v3 }
 0x230   : > { %1455 = vrot.lane.b32.xlu0 %v6593_v13, %s5726_s16  ;;  %v953_v40 = vmul.f32 0.5, %v952_v16 }
 0x231   : > { %v1218_v1 = vpop.f32.mrf.mxu0  ;;  %v1062_v14 = vmul.f32 %v6552_v22, %v1026_v54  ;;  %9064 = vst [vmem:[#allocation4_spill] sm:$0xff] %v6639_v51 }
 0x232   : > { %v954_v11 = vsub.f32 1.5, %v953_v40  ;;  %v1319_v0 = vpack.c.bf16 %v1218_v1, %v1218_v1 }
 0x233   : > { %v6600_v42 = vpop.eup %5387  ;;  %v1098_v39 = vadd.f32 %v6562_v10, %v1062_v14 }
 0x234   : > { %v961_v20 = vmul.f32 %v6600_v42, %v6588_v50  ;;  %v955_v26 = vmul.f32 %v5386_v27, %v954_v11  ;;  %v1479_v59 = vunpack.c.l.b16 %v1319_v0  ;;  %vm967_vm13 = vweird.f32 %v6600_v42 }
 0x235   : > { %vm6635_vm14 = vmor %vm966_vm12, %vm967_vm13 }
 0x236   : > { %v959_v63 = vsel %vm958_vm10, %v5386_v27, %v955_v26  ;;  %v962_v43 = vmul.f32 %v6600_v42, %v961_v20 }
 0x237   : > { %v1027_v25 = vmul.f32 %v959_v63, %v6388_v5  ;;  %v6613_v6 = vpop.f32.mrf.mxu2 }
 0x238   : > { %v612_v36 = vpop.xlane.xlu2 %611  ;;  %v609_v41 = vpop.xlane.xlu1 %608  ;;  %v963_v24 = vmul.f32 0.5, %v962_v43 }
 0x239   : > { %v646_v4 = vmul.f32 %v612_v36, %v5863_v38  ;;  %v1220_v35 = vpop.f32.mrf.mxu0  ;;  %v645_v46 = vmul.f32 %v609_v41, %v5863_v38  ;;  %v1063_v58 = vmul.f32 %v6552_v22, %v1027_v25 }
 0x23a   : > { %v1320_v19 = vpack.c.bf16 %v1220_v35, %v1220_v35  ;;  %v964_v55 = vsub.f32 1.5, %v963_v24 }
 0x23b   : > { %v6610_v48 = vadd.f32 1e-05, %v646_v4  ;;  %v677_v34 = vadd.f32 1e-05, %v645_v46  ;;  %v1099_v5 = vadd.f32 %v6562_v10, %v1063_v58 }
 0x23c   : > { %v1480_v45 = vunpack.c.l.b16 %v1320_v19  ;;  %v965_v7 = vmul.f32 %v6600_v42, %v964_v55 }
 0x23d   : > { %5389 = vrsqrt.f32 %v6610_v48  ;;  %v1117_v15 = vpack.c.bf16 %v1099_v5, %v1098_v39  ;;  %vm976_vm1 = vweird.f32 %v677_v34  ;;  %vm986_vm3 = vweird.f32 %v6610_v48 }
 0x23e   : > { %5391 = vrsqrt.f32 %v677_v34  ;;  %v6620_v8 = vpack.c.b16 %v1480_v45, %v1479_v59  ;;  %v969_v52 = vsel %vm6635_vm14, %v6600_v42, %v965_v7 }
 0x23f   : > { %5194 = vmatmul.msk.bf16.gmra.mxu2 %vm320_vm0, %v1117_v15  ;;  %v6641_v50 = vpop.f32.mrf.mxu2  ;;  %v1028_v43 = vmul.f32 %v969_v52, %v6417_v2  ;;  %v1327_v2 = vpack.c.bf16 %v6598_v53, %v6598_v53 }
 0x240   : > { %1482 = vrot.lane.b32.xlu2 %v6620_v8, %s5726_s16  ;;  %v1347_v12 = vpop.permute.xlu2 %1346 }
 0x241   : > { %v1353_v32 = vsel %vm1348_vm11, %v1347_v12, 0  ;;  %v1223_v30 = vpop.f32.mrf.mxu0  ;;  %v1064_v19 = vmul.f32 %v6552_v22, %v1028_v43  ;;  %v1587_v5 = vunpack.c.l.b16 %v1327_v2 }
 0x242   : > { %1362 = vmatpush.bf16.xpose.msra.mxu1 %v1353_v32  ;;  %v1321_v33 = vpack.c.bf16 %v1223_v30, %v1223_v30 }
 0x243   : > { %v6630_v57 = vpop.eup %5389  ;;  %v1100_v45 = vadd.f32 %v6562_v10, %v1064_v19 }
 0x244   : > { %v5392_v23 = vpop.eup %5391  ;;  %v981_v44 = vmul.f32 %v6630_v57, %v6610_v48  ;;  %v1506_v36 = vunpack.c.l.b16 %v1321_v33  ;;  %vm987_vm4 = vweird.f32 %v6630_v57 }
 0x245   : > { %v971_v60 = vmul.f32 %v5392_v23, %v677_v34  ;;  %vm977_vm15 = vweird.f32 %v5392_v23  ;;  %vm6675_vm5 = vmor %vm986_vm3, %vm987_vm4 }
 0x246   : > { %v982_v56 = vmul.f32 %v6630_v57, %v981_v44  ;;  %vm978_vm2 = vmor %vm976_vm1, %vm977_vm15 }
 0x247   : > { %v972_v27 = vmul.f32 %v5392_v23, %v971_v60  ;;  %v6658_v14 = vpop.f32.mrf.mxu2 }
 0x248   : > { %1563 = vrot.lane.b32.xlu2 %v6639_v51, %s5726_s16  ;;  %v1402_v28 = vpop.permute.xlu2 %1401  ;;  %v615_v16 = vpop.xlane.xlu0 %614  ;;  %v983_v63 = vmul.f32 0.5, %v982_v56 }
 0x249   : > { %v973_v1 = vmul.f32 0.5, %v972_v27  ;;  %v647_v40 = vmul.f32 %v615_v16, %v5863_v38  ;;  %5197 = vmatmul.msk.bf16.vlgmr.msra.gmra.mxu1 %vm1348_vm11, %v6540_v61  ;;  %v1407_v11 = vsel %vm1348_vm11, %v1402_v28, 0  ;;  %v1225_v20 = vpop.f32.mrf.mxu0  ;;  %v1328_v38 = vpack.c.bf16 %v6613_v6, %v6613_v6 }
 0x24a   : > { %1416 = vmatpush.bf16.xpose.msra.mxu3 %v1407_v11  ;;  %v1322_v26 = vpack.c.bf16 %v1225_v20, %v1225_v20  ;;  %v984_v25 = vsub.f32 1.5, %v983_v63 }
 0x24b   : > { %v974_v54 = vsub.f32 1.5, %v973_v1  ;;  %v679_v42 = vadd.f32 1e-05, %v647_v40  ;;  %v1588_v6 = vunpack.c.l.b16 %v1328_v38 }
 0x24c   : > { %v1507_v4 = vunpack.c.l.b16 %v1322_v26  ;;  %v985_v53 = vmul.f32 %v6630_v57, %v984_v25  ;;  %v1330_v26 = vpack.c.bf16 %v6658_v14, %v6658_v14 }
 0x24d   : > { %v975_v0 = vmul.f32 %v5392_v23, %v974_v54  ;;  %5393 = vrsqrt.f32 %v679_v42  ;;  %v6679_v9 = vpack.c.b16 %v1588_v6, %v1587_v5  ;;  %vm996_vm6 = vweird.f32 %v679_v42 }
 0x24e   : > { %v6656_v35 = vpack.c.b16 %v1507_v4, %v1506_v36  ;;  %v989_v55 = vsel %vm6675_vm5, %v6630_v57, %v985_v53  ;;  %v1615_v43 = vunpack.c.l.b16 %v1330_v26 }
 0x24f   : > { %v979_v41 = vsel %vm978_vm2, %v5392_v23, %v975_v0  ;;  %9068 = vst [vmem:[#allocation6_spill] sm:$0xff] %v6679_v9  ;;  %v1030_v3 = vmul.f32 %v989_v55, %v6473_v37 }
 0x250   : > { %9065 = vst [vmem:[#allocation5_spill] sm:$0xff] %v6656_v35  ;;  %v1029_v46 = vmul.f32 %v979_v41, %v6476_v49  ;;  %1509 = vrot.lane.b32.xlu1 %v6656_v35, %s5726_s16  ;;  %v1375_v58 = vpop.permute.xlu1 %1374 }
 0x251   : > { %5199 = vmatmul.msk.bf16.vlgmr.msra.gmra.mxu3 %vm1348_vm11, %v6565_v47  ;;  %v1380_v24 = vsel %vm1348_vm11, %v1375_v58, 0  ;;  %v1066_v60 = vmul.f32 %v6552_v22, %v1030_v3 }
 0x252   : > { %v1065_v49 = vmul.f32 %v6552_v22, %v1029_v46  ;;  %1389 = vmatpush.bf16.xpose.msrb.mxu2 %v1380_v24 }
 0x253   : > { %v5394_v59 = vpop.eup %5393  ;;  %v1102_v33 = vadd.f32 %v6562_v10, %v1066_v60 }
 0x254   : > { %v991_v34 = vmul.f32 %v5394_v59, %v679_v42  ;;  %v1101_v39 = vadd.f32 %v6562_v10, %v1065_v49  ;;  %vm997_vm7 = vweird.f32 %v5394_v59 }
 0x255   : > { %vm998_vm8 = vmor %vm996_vm6, %vm997_vm7 }
 0x256   : > { %v992_v48 = vmul.f32 %v5394_v59, %v991_v34  ;;  %v1118_v15 = vpack.c.bf16 %v1101_v39, %v1100_v45 }
 0x258   : > { %v993_v12 = vmul.f32 0.5, %v992_v48  ;;  %v1248_v32 = vpop.f32.mrf.mxu2  ;;  %5195 = vmatmul.msk.bf16.gmra.mxu2 %vm320_vm0, %v1118_v15  ;;  %1590 = vrot.lane.b32.xlu1 %v6679_v9, %s5726_s16  ;;  %v1429_v17 = vpop.permute.xlu1 %1428 }
 0x259   : > { %v1434_v23 = vsel %vm1348_vm11, %v1429_v17, 0  ;;  %v1331_v57 = vpack.c.bf16 %v1248_v32, %v1248_v32 }
 0x25a   : > { %v994_v30 = vsub.f32 1.5, %v993_v12  ;;  %1443 = vmatpush.bf16.xpose.msrb.mxu1 %v1434_v23 }
 0x25b   : > { %v1641_v16 = vunpack.c.l.b16 %v1331_v57 }
 0x25c   : > { %v995_v7 = vmul.f32 %v5394_v59, %v994_v30 }
 0x25e   : > { %v999_v44 = vsel %vm998_vm8, %v5394_v59, %v995_v7 }
 0x25f   : > { %v1031_v18 = vmul.f32 %v999_v44, %v6515_v21 }
 0x260   : > { %v1250_v27 = vpop.f32.mrf.mxu2 }
 0x261   : > { %v1332_v52 = vpack.c.bf16 %v1250_v27, %v1250_v27  ;;  %v1067_v56 = vmul.f32 %v6552_v22, %v1031_v18  ;;  %v1228_v28 = vpop.f32.mrf.mxu0  ;;  %5200 = vmatmul.msk.bf16.vlgmr.msrb.gmra.mxu1 %vm1348_vm11, %v6567_v62 }
 0x262   : > { %v1323_v21 = vpack.c.bf16 %v1228_v28, %v1228_v28 }
 0x263   : > { %v1642_v1 = vunpack.c.l.b16 %v1332_v52  ;;  %v1103_v37 = vadd.f32 %v6562_v10, %v1067_v56  ;;  %v1329_v10 = vpack.c.bf16 %v6641_v50, %v6641_v50 }
 0x264   : > { %v1533_v54 = vunpack.c.l.b16 %v1323_v21 }
 0x265   : > { %v6696_v40 = vpack.c.b16 %v1642_v1, %v1641_v16  ;;  %v1119_v11 = vpack.c.bf16 %v1103_v37, %v1102_v33  ;;  %v1614_v0 = vunpack.c.l.b16 %v1329_v10 }
 0x267   : > { %9069 = vst [vmem:[#allocation7_spill] sm:$0xff] %v6696_v40  ;;  %1644 = vrot.lane.b32.xlu2 %v6696_v40, %s5726_s16  ;;  %v6711_v36 = vpack.c.b16 %v1615_v43, %v1614_v0 }
 0x268   : > { %5196 = vmatmul.msk.bf16.gmra.mxu2 %vm320_vm0, %v1119_v11 }
 0x269   : > { %v1230_v22 = vpop.f32.mrf.mxu0  ;;  %9071 = vst [vmem:[#allocation9_spill] sm:$0xff] %v6711_v36 }
 0x26a   : > { %v1324_v20 = vpack.c.bf16 %v1230_v22, %v1230_v22  ;;  %v1274_v22 = vld [vmem:[%s8994_s1 + $0x8] sm:$0xff] }
 0x26c   : > { %v1534_v42 = vunpack.c.l.b16 %v1324_v20 }
 0x26e   : > { %v6703_v63 = vpack.c.b16 %v1534_v42, %v1533_v54 }
 0x26f   : > { %2743 = vrot.lane.b32.xlu2 %v6593_v13, %s5727_s21 }
 0x270   : > { %9070 = vst [vmem:[#allocation8_spill] sm:$0xff] %v6703_v63  ;;  %1536 = vrot.lane.b32.xlu0 %v6703_v63, %s5726_s16 }
 0x277   : > { %2693 = vrot.lane.b32.xlu2 %v6565_v47, %s5727_s21 }
 0x278   : > { %5198 = vmatmul.msk.bf16.vlgmr.msrb.gmra.mxu2 %vm1348_vm11, %v6542_v29  ;;  %1617 = vrot.lane.b32.xlu0 %v6711_v36, %s5726_s16 }
 0x27f   : > { %2718 = vrot.lane.b32.xlu2 %v6567_v62, %s5727_s21 }
 0x287   : > { %2768 = vrot.lane.b32.xlu2 %v6620_v8, %s5727_s21 }
 0x28f   : > { %2793 = vrot.lane.b32.xlu2 %v6656_v35, %s5727_s21 }
 0x297   : > { %2893 = vrot.lane.b32.xlu2 %v6711_v36, %s5727_s21 }
 0x29a   : > { %v1483_v50 = vpop.permute.xlu2 %1482 }
 0x29b   : > { %v1488_v4 = vsel %vm1348_vm11, %v1483_v50, 0  ;;  %v1275_v50 = vld [vmem:[%s8994_s1 + $0x10] sm:$0xff] }
 0x29c   : > { %1497 = vmatpush.bf16.xpose.msrb.mxu3 %v1488_v4 }
 0x29f   : > { %2843 = vrot.lane.b32.xlu2 %v6639_v51, %s5727_s21 }
 0x2a2   : > { %v1564_v38 = vpop.permute.xlu2 %1563  ;;  %v1456_v41 = vpop.permute.xlu0 %1455 }
 0x2a3   : > { %v1569_v25 = vsel %vm1348_vm11, %v1564_v38, 0  ;;  %v1461_v14 = vsel %vm1348_vm11, %v1456_v41, 0  ;;  %5202 = vmatmul.msk.bf16.vlgmr.msrb.gmra.mxu3 %vm1348_vm11, %v6620_v8 }
 0x2a4   : > { %1470 = vmatpush.bf16.xpose.msra.mxu2 %v1461_v14  ;;  %1578 = vmatpush.bf16.xpose.msra.mxu3 %v1569_v25 }
 0x2a7   : > { %2818 = vrot.lane.b32.xlu2 %v6703_v63, %s5727_s21 }
 0x2ab   : > { %5201 = vmatmul.msk.bf16.vlgmr.msra.gmra.mxu2 %vm1348_vm11, %v6593_v13 }
 0x2b2   : > { %v1253_v46 = vpop.f32.mrf.mxu2 }
 0x2b3   : > { %5205 = vmatmul.msk.bf16.vlgmr.msra.gmra.mxu3 %vm1348_vm11, %v6639_v51  ;;  %v1333_v19 = vpack.c.bf16 %v1253_v46, %v1253_v46  ;;  %v1277_v46 = vld [vmem:[%s8994_s1 + $0x20] sm:$0xff] }
 0x2b5   : > { %v1668_v24 = vunpack.c.l.b16 %v1333_v19 }
 0x2ba   : > { %v1255_v2 = vpop.f32.mrf.mxu2 }
 0x2bb   : > { %v1334_v58 = vpack.c.bf16 %v1255_v2, %v1255_v2 }
 0x2bd   : > { %v1669_v49 = vunpack.c.l.b16 %v1334_v58 }
 0x2bf   : > { %v6740_v59 = vpack.c.b16 %v1669_v49, %v1668_v24 }
 0x2c1   : > { %v1645_v6 = vpop.permute.xlu2 %1644  ;;  %1671 = vrot.lane.b32.xlu1 %v6740_v59, %s5726_s16 }
 0x2c2   : > { %v1650_v53 = vsel %vm1348_vm11, %v1645_v6, 0  ;;  %v1510_v34 = vpop.permute.xlu1 %1509  ;;  %v1258_v39 = vpop.f32.mrf.mxu2  ;;  %v1280_v6 = vld [vmem:[%s8994_s1 + $0x38] sm:$0xff] }
 0x2c3   : > { %1659 = vmatpush.bf16.xpose.msrb.mxu3 %v1650_v53  ;;  %v1515_v45 = vsel %vm1348_vm11, %v1510_v34, 0  ;;  %v1335_v5 = vpack.c.bf16 %v1258_v39, %v1258_v39 }
 0x2c4   : > { %1524 = vmatpush.bf16.xpose.msra.mxu1 %v1515_v45 }
 0x2c5   : > { %v1695_v12 = vunpack.c.l.b16 %v1335_v5 }
 0x2c6   : > { %v1364_v27 = vpop.f32.mrf.mxu1 }
 0x2c7   : > { %v1774_v5 = vmul.f32 0.25, %v1364_v27 }
 0x2c9   : > { %2668 = vrot.lane.b32.xlu1 %v6542_v29, %s5727_s21  ;;  %v6796_v19 = vpop.permute.xlu2 %2743 }
 0x2ca   : > { %5208 = vmatmul.msk.bf16.vlgmr.msrb.gmra.mxu3 %vm1348_vm11, %v6696_v40  ;;  %v1591_v31 = vpop.permute.xlu1 %1590  ;;  %v1260_v15 = vpop.f32.mrf.mxu2 }
 0x2cb   : > { %v1596_v48 = vsel %vm1348_vm11, %v1591_v31, 0  ;;  %5203 = vmatmul.msk.bf16.vlgmr.msra.gmra.mxu1 %vm1348_vm11, %v6656_v35  ;;  %v1336_v55 = vpack.c.bf16 %v1260_v15, %v1260_v15  ;;  %v1273_v15 = vld [vmem:[%s8994_s1] sm:$0xff] }
 0x2cc   : > { %1605 = vmatpush.bf16.xpose.msrb.mxu1 %v1596_v48 }
 0x2cd   : > { %v1696_v32 = vunpack.c.l.b16 %v1336_v55  ;;  %v1276_v55 = vld [vmem:[%s8994_s1 + $0x18] sm:$0xff] }
 0x2ce   : > { %v1366_v1 = vpop.f32.mrf.mxu1 }
 0x2cf   : > { %v6753_v17 = vpack.c.b16 %v1696_v32, %v1695_v12  ;;  %v1775_v11 = vmul.f32 0.25, %v1366_v1  ;;  %v6819_v32 = vadd.f32 %v1774_v5, %v1273_v15 }
 0x2d1   : > { %9072 = vst [vmem:[#allocation10_spill] sm:$0xff] %v6753_v17  ;;  %2968 = vrot.lane.b32.xlu1 %v6753_v17, %s5727_s21  ;;  %1698 = vrot.lane.b32.xlu0 %v6753_v17, %s5726_s16  ;;  %v6776_v26 = vadd.f32 %v1775_v11, %v1274_v22  ;;  %v6805_v53 = vpop.permute.xlu2 %2693 }
 0x2d3   : > { %v1841_v0 = vsel %vm1348_vm11, %v6776_v26, -inf }
 0x2d4   : > { %v1418_v41 = vpop.f32.mrf.mxu3 }
 0x2d5   : > { %v1778_v25 = vmul.f32 0.25, %v1418_v41 }
 0x2d7   : > { %v6798_v2 = vadd.f32 %v1778_v25, %v1277_v46 }
 0x2d9   : > { %v1850_v49 = vsel %vm1348_vm11, %v6798_v2, -inf  ;;  %v6811_v31 = vpop.permute.xlu2 %2718 }
 0x2db   : > { %v1263_v30 = vpop.f32.mrf.mxu2  ;;  %5206 = vmatmul.msk.bf16.vlgmr.msrb.gmra.mxu1 %vm1348_vm11, %v6679_v9 }
 0x2dc   : > { %v1337_v23 = vpack.c.bf16 %v1263_v30, %v1263_v30  ;;  %v1420_v12 = vpop.f32.mrf.mxu3 }
 0x2de   : > { %v1722_v18 = vunpack.c.l.b16 %v1337_v23  ;;  %v1445_v4 = vpop.f32.mrf.mxu1 }
 0x2df   : > { %v1780_v23 = vmul.f32 0.25, %v1445_v4 }
 0x2e2   : > { %v1537_v7 = vpop.permute.xlu0 %1536 }
 0x2e3   : > { %v1265_v3 = vpop.f32.mrf.mxu2  ;;  %v1542_v57 = vsel %vm1348_vm11, %v1537_v7, 0  ;;  %v1779_v7 = vmul.f32 0.25, %v1420_v12 }
 0x2e4   : > { %v1338_v44 = vpack.c.bf16 %v1265_v3, %v1265_v3  ;;  %1551 = vmatpush.bf16.xpose.msrb.mxu2 %v1542_v57  ;;  %v1838_v3 = vsel %vm1348_vm11, %v6819_v32, -inf  ;;  %v1279_v57 = vld [vmem:[%s8994_s1 + $0x30] sm:$0xff] }
 0x2e6   : > { %v1723_v60 = vunpack.c.l.b16 %v1338_v44  ;;  %v1447_v58 = vpop.f32.mrf.mxu1 }
 0x2e7   : > { %v1781_v24 = vmul.f32 0.25, %v1447_v58  ;;  %v1282_v58 = vld [vmem:[%s8994_s1 + $0x48] sm:$0xff] }
 0x2e8   : > { %v6762_v52 = vpack.c.b16 %v1723_v60, %v1722_v18  ;;  %v6830_v18 = vpop.permute.xlu2 %2768  ;;  %v1278_v60 = vld [vmem:[%s8994_s1 + $0x28] sm:$0xff] }
 0x2e9   : > { %v6807_v34 = vadd.f32 %v1781_v24, %v1280_v6  ;;  %v6840_v1 = vadd.f32 %v1779_v7, %v1278_v60 }
 0x2ea   : > { %1725 = vrot.lane.b32.xlu0 %v6762_v52, %s5726_s16  ;;  %v1618_v28 = vpop.permute.xlu0 %1617 }
 0x2eb   : > { %v1268_v56 = vpop.f32.mrf.mxu2  ;;  %v1623_v16 = vsel %vm1348_vm11, %v1618_v28, 0  ;;  %5204 = vmatmul.msk.bf16.vlgmr.msrb.gmra.mxu2 %vm1348_vm11, %v6703_v63  ;;  %v1859_v45 = vsel %vm1348_vm11, %v6807_v34, -inf  ;;  %v1283_v28 = vld [vmem:[%s8994_s1 + $0x50] sm:$0xff]  ;;  %v1853_v11 = vsel %vm1348_vm11, %v6840_v1, -inf }
 0x2ec   : > { %1632 = vmatpush.bf16.xpose.msra.mxu2 %v1623_v16  ;;  %v1339_v33 = vpack.c.bf16 %v1268_v56, %v1268_v56  ;;  %v6835_v56 = vadd.f32 %v1780_v23, %v1279_v57 }
 0x2ee   : > { %v1749_v20 = vunpack.c.l.b16 %v1339_v33 }
 0x2f0   : > { %v6850_v22 = vpop.permute.xlu2 %2793 }
 0x2f2   : > { %2643 = vrot.lane.b32.xlu0 %v6540_v61, %s5727_s21 }
 0x2f3   : > { %v1270_v37 = vpop.f32.mrf.mxu2 }
 0x2f4   : > { %v1340_v21 = vpack.c.bf16 %v1270_v37, %v1270_v37  ;;  %v1856_v37 = vsel %vm1348_vm11, %v6835_v56, -inf }
 0x2f6   : > { %v1750_v54 = vunpack.c.l.b16 %v1340_v21 }
 0x2f8   : > { %v6774_v42 = vpack.c.b16 %v1750_v54, %v1749_v20  ;;  %v1281_v54 = vld [vmem:[%s8994_s1 + $0x40] sm:$0xff]  ;;  %v6868_v6 = vpop.permute.xlu2 %2893 }
 0x2fa   : > { %2868 = vrot.lane.b32.xlu0 %v6679_v9, %s5727_s21  ;;  %1752 = vrot.lane.b32.xlu2 %v6774_v42, %s5726_s16 }
 0x2fb   : > { %v1391_v10 = vpop.f32.mrf.mxu2  ;;  %5207 = vmatmul.msk.bf16.vlgmr.msra.gmra.mxu2 %vm1348_vm11, %v6711_v36  ;;  %1842 = vmax.xlane.f32.xlu1 %v1841_v0 }
 0x2fc   : > { %v1776_v43 = vmul.f32 0.25, %v1391_v10 }
 0x2fe   : > { %v6789_v38 = vadd.f32 %v1776_v43, %v1275_v50 }
 0x300   : > { %v1844_v14 = vsel %vm1348_vm11, %v6789_v38, -inf }
 0x303   : > { %1845 = vmax.xlane.f32.xlu1 %v1844_v14  ;;  %v1393_v39 = vpop.f32.mrf.mxu2  ;;  %v1284_v14 = vld [vmem:[%s8994_s1 + $0x58] sm:$0xff] }
 0x304   : > { %v1777_v48 = vmul.f32 0.25, %v1393_v39 }
 0x306   : > { %v6821_v30 = vadd.f32 %v1777_v48, %v1276_v55  ;;  %v6878_v48 = vpop.permute.xlu2 %2843 }
 0x308   : > { %v1847_v44 = vsel %vm1348_vm11, %v6821_v30, -inf }
 0x30b   : > { %1851 = vmax.xlane.f32.xlu1 %v1850_v49 }
 0x313   : > { %1860 = vmax.xlane.f32.xlu1 %v1859_v45 }
 0x323   : > { %1839 = vmax.xlane.f32.xlu2 %v1838_v3  ;;  %v1285_v3 = vld [vmem:[%s8994_s1 + $0x60] sm:$0xff] }
 0x324   : > { %1848 = vmax.xlane.f32.xlu0 %v1847_v44  ;;  %v6884_v44 = vpop.permute.xlu2 %2818 }
 0x326   : > { %v1499_v27 = vpop.f32.mrf.mxu3 }
 0x327   : > { %v1784_v16 = vmul.f32 0.25, %v1499_v27 }
 0x329   : > { %v6842_v33 = vadd.f32 %v1784_v16, %v1283_v28  ;;  %v1289_v28 = vld [vmem:[%s8994_s1 + $0x80] sm:$0xff] }
 0x32b   : > { %1857 = vmax.xlane.f32.xlu2 %v1856_v37  ;;  %v1868_v21 = vsel %vm1348_vm11, %v6842_v33, -inf  ;;  %v1286_v37 = vld [vmem:[%s8994_s1 + $0x68] sm:$0xff] }
 0x32c   : > { %1854 = vmax.xlane.f32.xlu0 %v1853_v11  ;;  %1869 = vmax.xlane.f32.xlu1 %v1868_v21 }
 0x32e   : > { %v1472_v20 = vpop.f32.mrf.mxu2  ;;  %v1501_v43 = vpop.f32.mrf.mxu3 }
 0x32f   : > { %v1782_v10 = vmul.f32 0.25, %v1472_v20  ;;  %v1785_v50 = vmul.f32 0.25, %v1501_v43 }
 0x331   : > { %v6855_v0 = vadd.f32 %v1782_v10, %v1281_v54  ;;  %v6866_v49 = vadd.f32 %v1785_v50, %v1284_v14 }
 0x333   : > { %v1672_v4 = vpop.permute.xlu1 %1671  ;;  %v1862_v41 = vsel %vm1348_vm11, %v6855_v0, -inf  ;;  %v1871_v39 = vsel %vm1348_vm11, %v6866_v49, -inf }
 0x334   : > { %v1677_v25 = vsel %vm1348_vm11, %v1672_v4, 0  ;;  %1863 = vmax.xlane.f32.xlu0 %v1862_v41 }
 0x335   : > { %1686 = vmatpush.bf16.xpose.msra.mxu1 %v1677_v25  ;;  %v1290_v25 = vld [vmem:[%s8994_s1 + $0x88] sm:$0xff] }
 0x336   : > { %v1474_v46 = vpop.f32.mrf.mxu2  ;;  %v1580_v12 = vpop.f32.mrf.mxu3 }
 0x337   : > { %v1783_v24 = vmul.f32 0.25, %v1474_v46  ;;  %v1790_v27 = vmul.f32 0.25, %v1580_v12  ;;  %v1291_v46 = vld [vmem:[%s8994_s1 + $0x90] sm:$0xff] }
 0x339   : > { %v6870_v45 = vadd.f32 %v1783_v24, %v1282_v58  ;;  %v6898_v20 = vadd.f32 %v1790_v27, %v1289_v28  ;;  %v1292_v27 = vld [vmem:[%s8994_s1 + $0x98] sm:$0xff] }
 0x33b   : > { %v1865_v5 = vsel %vm1348_vm11, %v6870_v45, -inf  ;;  %v1886_v41 = vsel %vm1348_vm11, %v6898_v20, -inf }
 0x33c   : > { %5209 = vmatmul.msk.bf16.vlgmr.msra.gmra.mxu1 %vm1348_vm11, %v6740_v59  ;;  %1872 = vmax.xlane.f32.xlu0 %v1871_v39 }
 0x33d   : > { %1866 = vmax.xlane.f32.xlu2 %v1865_v5 }
 0x33e   : > { %v1582_v21 = vpop.f32.mrf.mxu3 }
 0x33f   : > { %v1791_v50 = vmul.f32 0.25, %v1582_v21 }
 0x341   : > { %v6914_v24 = vadd.f32 %v1791_v50, %v1290_v25 }
 0x343   : > { %v1699_v15 = vpop.permute.xlu0 %1698  ;;  %v1889_v12 = vsel %vm1348_vm11, %v6914_v24, -inf }
 0x344   : > { %v1704_v55 = vsel %vm1348_vm11, %v1699_v15, 0 }
 0x345   : > { %1713 = vmatpush.bf16.xpose.msrb.mxu2 %v1704_v55 }
 0x348   : > { %v1526_v23 = vpop.f32.mrf.mxu1 }
 0x349   : > { %v1786_v7 = vmul.f32 0.25, %v1526_v23 }
 0x34b   : > { %v6886_v57 = vadd.f32 %v1786_v7, %v1285_v3  ;;  %v2669_v3 = vpop.permute.xlu1 %2668  ;;  %v1295_v7 = vld [vmem:[%s8994_s1 + $0xb0] sm:$0xff] }
 0x34c   : > { %5210 = vmatmul.msk.bf16.vlgmr.msrb.gmra.mxu2 %vm1348_vm11, %v6753_v17 }
 0x34d   : > { %v1874_v60 = vsel %vm1348_vm11, %v6886_v57, -inf  ;;  %v1661_v39 = vpop.f32.mrf.mxu3 }
 0x34e   : > { %1875 = vmax.xlane.f32.xlu2 %v1874_v60  ;;  %v1796_v55 = vmul.f32 0.25, %v1661_v39 }
 0x350   : > { %v1528_v16 = vpop.f32.mrf.mxu1  ;;  %v6932_v28 = vadd.f32 %v1796_v55, %v1295_v7 }
 0x351   : > { %v1787_v11 = vmul.f32 0.25, %v1528_v16 }
 0x353   : > { %v6900_v10 = vadd.f32 %v1787_v11, %v1286_v37  ;;  %v1904_v11 = vsel %vm1348_vm11, %v6932_v28, -inf  ;;  %v6947_v50 = vpop.permute.xlu1 %2968 }
 0x354   : > { %v1753_v54 = vpop.permute.xlu2 %1752  ;;  %9073 = vst [vmem:[#allocation11_spill] sm:$0xff] %v6947_v50 }
 0x355   : > { %v1758_v43 = vsel %vm1348_vm11, %v1753_v54, 0  ;;  %v1877_v4 = vsel %vm1348_vm11, %v6900_v10, -inf }
 0x356   : > { %1767 = vmatpush.bf16.xpose.msrb.mxu1 %v1758_v43  ;;  %1878 = vmax.xlane.f32.xlu1 %v1877_v4  ;;  %v1287_v43 = vld [vmem:[%s8994_s1 + $0x70] sm:$0xff] }
 0x357   : > { %1887 = vmax.xlane.f32.xlu2 %v1886_v41  ;;  %v1663_v41 = vpop.f32.mrf.mxu3 }
 0x358   : > { %v1607_v14 = vpop.f32.mrf.mxu1 }
 0x359   : > { %v1792_v58 = vmul.f32 0.25, %v1607_v14  ;;  %v1296_v14 = vld [vmem:[%s8994_s1 + $0xb8] sm:$0xff] }
 0x35b   : > { %v6916_v15 = vadd.f32 %v1792_v58, %v1291_v46  ;;  %v1288_v58 = vld [vmem:[%s8994_s1 + $0x78] sm:$0xff] }
 0x35c   : > { %v1726_v5 = vpop.permute.xlu0 %1725 }
 0x35d   : > { %5212 = vmatmul.msk.bf16.vlgmr.msrb.gmra.mxu1 %vm1348_vm11, %v6774_v42  ;;  %v1892_v23 = vsel %vm1348_vm11, %v6916_v15, -inf }
 0x35e   : > { %2706 = vmatpush.bf16.msra.mxu1 %v6805_v53  ;;  %v1731_v53 = vsel %vm1348_vm11, %v1726_v5, 0  ;;  %1890 = vmax.xlane.f32.xlu1 %v1889_v12 }
 0x35f   : > { %1740 = vmatpush.bf16.xpose.msra.mxu3 %v1731_v53  ;;  %1893 = vmax.xlane.f32.xlu0 %v1892_v23 }
 0x360   : > { %v1609_v60 = vpop.f32.mrf.mxu1 }
 0x362   : > { %2781 = vmatpush.bf16.msrb.mxu1 %v6830_v18  ;;  %v1793_v18 = vmul.f32 0.25, %v1609_v60 }
 0x364   : > { %v2644_v16 = vpop.permute.xlu0 %2643  ;;  %v6934_v37 = vadd.f32 %v1793_v18, %v1292_v27  ;;  %v1293_v27 = vld [vmem:[%s8994_s1 + $0xa0] sm:$0xff] }
 0x365   : > { %2656 = vmatpush.bf16.msra.mxu2 %v2644_v16 }
 0x366   : > { %5211 = vmatmul.msk.bf16.vlgmr.msra.gmra.mxu3 %vm1348_vm11, %v6762_v52  ;;  %v1895_v21 = vsel %vm1348_vm11, %v6934_v37, -inf  ;;  %1905 = vmax.xlane.f32.xlu1 %v1904_v11 }
 0x367   : > { %2681 = vmatpush.bf16.msrb.mxu3 %v2669_v3  ;;  %1896 = vmax.xlane.f32.xlu2 %v1895_v21 }
 0x369   : > { %2731 = vmatpush.bf16.msrb.mxu2 %v6811_v31 }
 0x36b   : > { %2756 = vmatpush.bf16.msra.mxu3 %v6796_v19  ;;  %v1797_v19 = vmul.f32 0.25, %v1663_v41 }
 0x36d   : > { %v6959_v53 = vadd.f32 %v1797_v19, %v1296_v14 }
 0x36e   : > { %v1553_v54 = vpop.f32.mrf.mxu2  ;;  %v1843_v39 = vpop.xlane.xlu1 %1842 }
 0x36f   : > { %v1788_v4 = vmul.f32 0.25, %v1553_v54  ;;  %v1935_v12 = vsub.f32 %v6776_v26, %v1843_v39  ;;  %v1907_v23 = vsel %vm1348_vm11, %v6959_v53, -inf }
 0x371   : > { %v6949_v31 = vadd.f32 %v1788_v4, %v1287_v43  ;;  %v1968_v7 = vmul.f32 1.442695, %v1935_v12  ;;  %v6981_v43 = vpop.permute.xlu0 %2868 }
 0x373   : > { %v1880_v25 = vsel %vm1348_vm11, %v6949_v31, -inf  ;;  %5395 = vpow2.f32 %v1968_v7 }
 0x374   : > { %1881 = vmax.xlane.f32.xlu0 %v1880_v25 }
 0x376   : > { %v1555_v46 = vpop.f32.mrf.mxu2  ;;  %v6979_v54 = vpop.xlane.xlu1 %1845 }
 0x377   : > { %v1789_v5 = vmul.f32 0.25, %v1555_v46  ;;  %v1936_v36 = vsub.f32 %v6789_v38, %v6979_v54 }
 0x379   : > { %v6961_v55 = vadd.f32 %v1789_v5, %v1288_v58  ;;  %v6975_v11 = vpop.eup %5395 }
 0x37a   : > { %v2033_v21 = vsel %vm1348_vm11, %v6975_v11, 0.0 }
 0x37b   : > { %v1883_v3 = vsel %vm1348_vm11, %v6961_v55, -inf }
 0x37c   : > { %1908 = vmax.xlane.f32.xlu0 %v1907_v23  ;;  %1884 = vmax.xlane.f32.xlu2 %v1883_v3 }
 0x37e   : > { %v1634_v60 = vpop.f32.mrf.mxu2  ;;  %v1852_v41 = vpop.xlane.xlu1 %1851 }
 0x37f   : > { %v1794_v18 = vmul.f32 0.25, %v1634_v60  ;;  %v1938_v58 = vsub.f32 %v6798_v2, %v1852_v41 }
 0x381   : > { %v6971_v16 = vadd.f32 %v1794_v18, %v1293_v27  ;;  %v1974_v5 = vmul.f32 1.442695, %v1938_v58 }
 0x383   : > { %v1898_v26 = vsel %vm1348_vm11, %v6971_v16, -inf }
 0x384   : > { %1899 = vmax.xlane.f32.xlu0 %v1898_v26 }
 0x386   : > { %v6997_v27 = vpop.xlane.xlu1 %1860 }
 0x38c   : > { %2034 = vadd.xlane.f32.xlu0 %v2033_v21 }
 0x396   : > { %v1840_v4 = vpop.xlane.xlu2 %1839 }
 0x397   : > { %v1934_v19 = vsub.f32 %v6819_v32, %v1840_v4  ;;  %v1849_v25 = vpop.xlane.xlu0 %1848 }
 0x398   : > { %v1937_v14 = vsub.f32 %v6821_v30, %v1849_v25 }
 0x399   : > { %v1966_v46 = vmul.f32 1.442695, %v1934_v19 }
 0x39a   : > { %v1972_v39 = vmul.f32 1.442695, %v1937_v14 }
 0x39b   : > { %5397 = vpow2.f32 %v1966_v46 }
 0x39c   : > { %5399 = vpow2.f32 %v1972_v39 }
 0x39d   : > { %5401 = vpow2.f32 %v1974_v5 }
 0x39e   : > { %v1858_v12 = vpop.xlane.xlu2 %1857 }
 0x39f   : > { %v6986_v23 = vpop.xlane.xlu0 %1854  ;;  %v1940_v32 = vsub.f32 %v6835_v56, %v1858_v12  ;;  %v1870_v41 = vpop.xlane.xlu1 %1869 }
 0x3a0   : > { %v1944_v25 = vsub.f32 %v6842_v33, %v1870_v41 }
 0x3a1   : > { %v6988_v3 = vpop.eup %5397  ;;  %v1978_v60 = vmul.f32 1.442695, %v1940_v32 }
 0x3a2   : > { %v6990_v7 = vpop.eup %5399  ;;  %v2030_v30 = vsel %vm1348_vm11, %v6988_v3, 0.0  ;;  %v1986_v46 = vmul.f32 1.442695, %v1944_v25 }
 0x3a3   : > { %2031 = vadd.xlane.f32.xlu1 %v2030_v30  ;;  %v2039_v2 = vsel %vm1348_vm11, %v6990_v7, 0.0  ;;  %v6999_v26 = vpop.eup %5401  ;;  %5403 = vpow2.f32 %v1978_v60 }
 0x3a4   : > { %2040 = vadd.xlane.f32.xlu0 %v2039_v2  ;;  %v2042_v56 = vsel %vm1348_vm11, %v6999_v26, 0.0 }
 0x3a7   : > { %v1864_v18 = vpop.xlane.xlu0 %1863 }
 0x3a8   : > { %v1942_v21 = vsub.f32 %v6855_v0, %v1864_v18  ;;  %v1297_v0 = vld [vmem:[%s8994_s1 + $0xc0] sm:$0xff]  ;;  %v1298_v18 = vld [vmem:[%s8994_s1 + $0xc8] sm:$0xff] }
 0x3a9   : > { %v7004_v19 = vpop.eup %5403 }
 0x3aa   : > { %v1982_v4 = vmul.f32 1.442695, %v1942_v21  ;;  %v2048_v14 = vsel %vm1348_vm11, %v7004_v19, 0.0 }
 0x3ac   : > { %2043 = vadd.xlane.f32.xlu0 %v2042_v56  ;;  %5405 = vpow2.f32 %v1982_v4 }
 0x3ad   : > { %5407 = vpow2.f32 %v1986_v46 }
 0x3b0   : > { %v7014_v5 = vpop.xlane.xlu2 %1866 }
 0x3b2   : > { %v7009_v58 = vpop.eup %5405 }
 0x3b3   : > { %v2054_v33 = vsel %vm1348_vm11, %v7009_v58, 0.0  ;;  %v7022_v2 = vpop.eup %5407 }
 0x3b4   : > { %2049 = vadd.xlane.f32.xlu0 %v2048_v14  ;;  %v2060_v4 = vsel %vm1348_vm11, %v7022_v2, 0.0  ;;  %v7035_v14 = vpop.xlane.xlu0 %1872 }
 0x3b9   : > { %v1688_v39 = vpop.f32.mrf.mxu1 }
 0x3ba   : > { %v1798_v12 = vmul.f32 0.25, %v1688_v39 }
 0x3bc   : > { %2055 = vadd.xlane.f32.xlu0 %v2054_v33  ;;  %v7018_v32 = vadd.f32 %v1798_v12, %v1297_v0 }
 0x3be   : > { %v1910_v30 = vsel %vm1348_vm11, %v7018_v32, -inf }
 0x3bf   : > { %1911 = vmax.xlane.f32.xlu2 %v1910_v30 }
 0x3c1   : > { %v1690_v60 = vpop.f32.mrf.mxu1  ;;  %v7027_v56 = vpop.xlane.xlu2 %1875 }
 0x3c2   : > { %v1799_v21 = vmul.f32 0.25, %v1690_v60 }
 0x3c4   : > { %2061 = vadd.xlane.f32.xlu0 %v2060_v4  ;;  %v7031_v41 = vadd.f32 %v1799_v21, %v1298_v18 }
 0x3c6   : > { %v1913_v25 = vsel %vm1348_vm11, %v7031_v41, -inf }
 0x3c7   : > { %1914 = vmax.xlane.f32.xlu1 %v1913_v25 }
 0x3c9   : > { %v7038_v33 = vpop.xlane.xlu1 %1878 }
 0x3ca   : > { %v1888_v46 = vpop.xlane.xlu2 %1887 }
 0x3cb   : > { %v1950_v39 = vsub.f32 %v6898_v20, %v1888_v46  ;;  %v1636_v46 = vpop.f32.mrf.mxu2 }
 0x3cd   : > { %v1998_v0 = vmul.f32 1.442695, %v1950_v39 }
 0x3cf   : > { %5409 = vpow2.f32 %v1998_v0 }
 0x3d1   : > { %v7045_v21 = vpop.xlane.xlu1 %1890 }
 0x3d2   : > { %v1894_v12 = vpop.xlane.xlu0 %1893 }
 0x3d3   : > { %v1952_v30 = vsub.f32 %v6916_v15, %v1894_v12  ;;  %v1301_v12 = vld [vmem:[%s8994_s1 + $0xe0] sm:$0xff] }
 0x3d5   : > { %v2002_v60 = vmul.f32 1.442695, %v1952_v30  ;;  %v7041_v4 = vpop.eup %5409 }
 0x3d6   : > { %v2078_v18 = vsel %vm1348_vm11, %v7041_v4, 0.0 }
 0x3d7   : > { %5411 = vpow2.f32 %v2002_v60  ;;  %2079 = vadd.xlane.f32.xlu0 %v2078_v18 }
 0x3d9   : > { %v1906_v39 = vpop.xlane.xlu1 %1905 }
 0x3da   : > { %v1956_v18 = vsub.f32 %v6932_v28, %v1906_v39  ;;  %v1302_v39 = vld [vmem:[%s8994_s1 + $0xe8] sm:$0xff]  ;;  %v1769_v54 = vpop.f32.mrf.mxu1 }
 0x3dc   : > { %v2010_v63 = vmul.f32 1.442695, %v1956_v18 }
 0x3dd   : > { %v7047_v25 = vpop.eup %5411 }
 0x3de   : > { %9074 = vst [vmem:[#allocation12_spill] sm:$0xff] %v7047_v25  ;;  %v2084_v20 = vsel %vm1348_vm11, %v7047_v25, 0.0 }
 0x3df   : > { %2085 = vadd.xlane.f32.xlu0 %v2084_v20  ;;  %v1795_v20 = vmul.f32 0.25, %v1636_v46 }
 0x3e7   : > { %v1882_v15 = vpop.xlane.xlu0 %1881 }
 0x3e8   : > { %v1948_v60 = vsub.f32 %v6949_v31, %v1882_v15  ;;  %v1970_v31 = vmul.f32 1.442695, %v1936_v36  ;;  %v1715_v15 = vpop.f32.mrf.mxu2 }
 0x3e9   : > { %v1742_v0 = vpop.f32.mrf.mxu3 }
 0x3ea   : > { %v1802_v30 = vmul.f32 0.25, %v1742_v0  ;;  %v1994_v9 = vmul.f32 1.442695, %v1948_v60  ;;  %v1294_v0 = vld [vmem:[%s8994_s1 + $0xa8] sm:$0xff] }
 0x3ec   : > { %v7056_v17 = vadd.f32 %v1802_v30, %v1301_v12  ;;  %5413 = vpow2.f32 %v1994_v9  ;;  %v7070_v9 = vadd.f32 %v1795_v20, %v1294_v0  ;;  %v1804_v30 = vmul.f32 0.25, %v1769_v54 }
 0x3ed   : > { %5415 = vpow2.f32 %v2010_v63  ;;  %v1303_v63 = vld [vmem:[%s8994_s1 + $0xf0] sm:$0xff] }
 0x3ee   : > { %v1922_v51 = vsel %vm1348_vm11, %v7056_v17, -inf  ;;  %5417 = vpow2.f32 %v1970_v31  ;;  %v1901_v60 = vsel %vm1348_vm11, %v7070_v9, -inf  ;;  %v7089_v31 = vadd.f32 %v1804_v30, %v1303_v63  ;;  %v1299_v30 = vld [vmem:[%s8994_s1 + $0xd0] sm:$0xff] }
 0x3ef   : > { %1923 = vmax.xlane.f32.xlu2 %v1922_v51  ;;  %v7068_v38 = vpop.xlane.xlu0 %1908 }
 0x3f1   : > { %v1744_v28 = vpop.f32.mrf.mxu3 }
 0x3f2   : > { %v1803_v12 = vmul.f32 0.25, %v1744_v28  ;;  %v7072_v46 = vpop.eup %5413 }
 0x3f3   : > { %v2072_v36 = vsel %vm1348_vm11, %v7072_v46, 0.0  ;;  %v7085_v20 = vpop.eup %5415 }
 0x3f4   : > { %v7074_v51 = vadd.f32 %v1803_v12, %v1302_v39  ;;  %2073 = vadd.xlane.f32.xlu0 %v2072_v36  ;;  %9075 = vst [vmem:[#allocation13_spill] sm:$0xff] %v7085_v20  ;;  %v7091_v28 = vpop.eup %5417  ;;  %v1717_v39 = vpop.f32.mrf.mxu2  ;;  %v1946_v12 = vsub.f32 %v6886_v57, %v7027_v56  ;;  %v2096_v54 = vsel %vm1348_vm11, %v7085_v20, 0.0  ;;  %v1800_v36 = vmul.f32 0.25, %v1715_v15  ;;  %v1300_v57 = vld [vmem:[%s8994_s1 + $0xd8] sm:$0xff] }
 0x3f5   : > { %v2036_v50 = vsel %vm1348_vm11, %v7091_v28, 0.0 }
 0x3f6   : > { %v1925_v18 = vsel %vm1348_vm11, %v7074_v51, -inf  ;;  %v1990_v56 = vmul.f32 1.442695, %v1946_v12  ;;  %v7107_v15 = vadd.f32 %v1800_v36, %v1299_v30 }
 0x3f7   : > { %1902 = vmax.xlane.f32.xlu2 %v1901_v60  ;;  %1926 = vmax.xlane.f32.xlu1 %v1925_v18  ;;  %v7087_v0 = vpop.xlane.xlu0 %1899  ;;  %v1801_v60 = vmul.f32 0.25, %v1717_v39  ;;  %v1928_v18 = vsel %vm1348_vm11, %v7089_v31, -inf  ;;  %v1771_v39 = vpop.f32.mrf.mxu1 }
 0x3f8   : > { %5419 = vpow2.f32 %v1990_v56  ;;  %v1805_v20 = vmul.f32 0.25, %v1771_v39  ;;  %v1916_v12 = vsel %vm1348_vm11, %v7107_v15, -inf  ;;  %v1951_v56 = vsub.f32 %v6914_v24, %v7045_v21 }
 0x3f9   : > { %v7109_v63 = vadd.f32 %v1801_v60, %v1300_v57  ;;  %v1304_v60 = vld [vmem:[%s8994_s1 + $0xf8] sm:$0xff]  ;;  %v1941_v57 = vsub.f32 %v6807_v34, %v6997_v27  ;;  %v1897_v34 = vpop.xlane.xlu2 %1896  ;;  %v1943_v24 = vsub.f32 %v6870_v45, %v7014_v5 }
 0x3fa   : > { %v7125_v30 = vadd.f32 %v1805_v20, %v1304_v60  ;;  %v1953_v21 = vsub.f32 %v6934_v37, %v1897_v34  ;;  %v1945_v37 = vsub.f32 %v6866_v49, %v7035_v14 }
 0x3fb   : > { %9076 = vst [vmem:[#allocation14_spill] sm:$0xff] %v7109_v63  ;;  %v1919_v36 = vsel %vm1348_vm11, %v7109_v63, -inf }
 0x3fc   : > { %2097 = vadd.xlane.f32.xlu0 %v2096_v54  ;;  %v1931_v39 = vsel %vm1348_vm11, %v7125_v30, -inf  ;;  %v1988_v14 = vmul.f32 1.442695, %v1945_v37 }
 0x3ff   : > { %1929 = vmax.xlane.f32.xlu2 %v1928_v18  ;;  %2037 = vadd.xlane.f32.xlu1 %v2036_v50  ;;  %v7111_v54 = vpop.xlane.xlu0 %2034  ;;  %v1939_v18 = vsub.f32 %v6840_v1, %v6986_v23  ;;  %v1947_v50 = vsub.f32 %v6900_v10, %v7038_v33  ;;  %v7127_v10 = vpop.eup %5419 }
 0x400   : > { %5421 = vrcp.f32 %v7111_v54  ;;  %v2152_v5 = vand.u32 2147483648, %v7111_v54  ;;  %vm2146_vm10 = vweird.f32 %v7111_v54  ;;  %v2150_v34 = vand.u32 2147483647, %v7111_v54 }
 0x401   : > { %v1976_v1 = vmul.f32 1.442695, %v1939_v18  ;;  %v1992_v23 = vmul.f32 1.442695, %v1947_v50  ;;  %v2066_v18 = vsel %vm1348_vm11, %v7127_v10, 0.0 }
 0x402   : > { %v1980_v50 = vmul.f32 1.442695, %v1941_v57  ;;  %vm2151_vm13 = vcmp.eq.f32.partialorder %v2150_v34, 8.507059e+37 }
 0x403   : > { %5423 = vpow2.f32 %v1976_v1 }
 0x404   : > { %5425 = vpow2.f32 %v1992_v23 }
 0x405   : > { %5427 = vpow2.f32 %v1980_v50 }
 0x406   : > { %v5422_v33 = vpop.eup %5421 }
 0x407   : > { %1917 = vmax.xlane.f32.xlu2 %v1916_v12  ;;  %1920 = vmax.xlane.f32.xlu1 %v1919_v36  ;;  %v2142_v20 = vmul.f32 %v5422_v33, %v7111_v54  ;;  %v2000_v12 = vmul.f32 1.442695, %v1951_v56  ;;  %vm2147_vm9 = vweird.f32 %v5422_v33 }
 0x408   : > { %vm2148_vm12 = vmor %vm2146_vm10, %vm2147_vm9 }
 0x409   : > { %v7138_v36 = vpop.eup %5423  ;;  %v2143_v60 = vsub.f32 1.0, %v2142_v20  ;;  %5429 = vpow2.f32 %v2000_v12  ;;  %v1957_v12 = vsub.f32 %v6959_v53, %v7068_v38 }
 0x40a   : > { %v7140_v27 = vpop.eup %5425  ;;  %v2045_v23 = vsel %vm1348_vm11, %v7138_v36, 0.0 }
 0x40b   : > { %v2069_v1 = vsel %vm1348_vm11, %v7140_v27, 0.0  ;;  %v2144_v57 = vmul.f32 %v5422_v33, %v2143_v60  ;;  %v7149_v20 = vpop.eup %5427  ;;  %v2012_v53 = vmul.f32 1.442695, %v1957_v12 }
 0x40d   : > { %v2145_v45 = vadd.f32 %v5422_v33, %v2144_v57  ;;  %v1885_v57 = vpop.xlane.xlu2 %1884 }
 0x40f   : > { %1932 = vmax.xlane.f32.xlu2 %v1931_v39  ;;  %2067 = vadd.xlane.f32.xlu1 %v2066_v18  ;;  %v1984_v39 = vmul.f32 1.442695, %v1943_v24  ;;  %v2004_v18 = vmul.f32 1.442695, %v1953_v21  ;;  %v7151_v50 = vpop.eup %5429  ;;  %v2051_v21 = vsel %vm1348_vm11, %v7149_v20, 0.0 }
 0x410   : > { %v2081_v24 = vsel %vm1348_vm11, %v7151_v50, 0.0 }
 0x416   : > { %v2032_v56 = vpop.xlane.xlu1 %2031 }
 0x417   : > { %2070 = vadd.xlane.f32.xlu1 %v2069_v1  ;;  %2046 = vadd.xlane.f32.xlu2 %v2045_v23  ;;  %5431 = vrcp.f32 %v2032_v56  ;;  %v2149_v1 = vsel %vm2148_vm12, %v5422_v33, %v2145_v45  ;;  %v2153_v23 = vor.u32 1.1754944e-38, %v2152_v5  ;;  %v2135_v63 = vand.u32 2147483647, %v2032_v56 }
 0x418   : > { %5433 = vpow2.f32 %v1984_v39  ;;  %v1949_v33 = vsub.f32 %v6961_v55, %v1885_v57  ;;  %vm2131_vm15 = vweird.f32 %v2032_v56 }
 0x419   : > { %5435 = vpow2.f32 %v2004_v18  ;;  %v2154_v54 = vsel %vm2151_vm13, %v2153_v23, %v2149_v1  ;;  %v2137_v18 = vand.u32 2147483648, %v2032_v56  ;;  %vm2136_vm2 = vcmp.eq.f32.partialorder %v2135_v63, 8.507059e+37 }
 0x41a   : > { %5437 = vpow2.f32 %v1988_v14  ;;  %v2155_v45 = vmul.f32 %v6975_v11, %v2154_v54  ;;  %v1996_v1 = vmul.f32 1.442695, %v1949_v33  ;;  %v1954_v54 = vsub.f32 %v6971_v16, %v7087_v0 }
 0x41b   : > { %5439 = vpow2.f32 %v2012_v53  ;;  %v2138_v5 = vor.u32 1.1754944e-38, %v2137_v18 }
 0x41c   : > { %v2607_v55 = vpack.c.bf16 %v2155_v45, %v2155_v45  ;;  %5441 = vpow2.f32 %v1996_v1  ;;  %v2006_v45 = vmul.f32 1.442695, %v1954_v54 }
 0x41d   : > { %v5432_v60 = vpop.eup %5431 }
 0x41e   : > { %v2127_v49 = vmul.f32 %v5432_v60, %v2032_v56  ;;  %v7164_v39 = vpop.eup %5433  ;;  %vm2132_vm14 = vweird.f32 %v5432_v60  ;;  %v2641_v14 = vunpack.c.l.b16 %v2607_v55 }
 0x41f   : > { %2082 = vadd.xlane.f32.xlu1 %v2081_v24  ;;  %2052 = vadd.xlane.f32.xlu2 %v2051_v21  ;;  %v7166_v25 = vpop.eup %5435  ;;  %vm2133_vm1 = vmor %vm2131_vm15, %vm2132_vm14  ;;  %v2057_v34 = vsel %vm1348_vm11, %v7164_v39, 0.0 }
 0x420   : > { %v2128_v38 = vsub.f32 1.0, %v2127_v49  ;;  %9077 = vst [vmem:[#allocation15_spill] sm:$0xff] %v7166_v25  ;;  %v2087_v12 = vsel %vm1348_vm11, %v7166_v25, 0.0  ;;  %v7175_v11 = vpop.eup %5437 }
 0x421   : > { %v2063_v57 = vsel %vm1348_vm11, %v7175_v11, 0.0 }
 0x422   : > { %v2129_v35 = vmul.f32 %v5432_v60, %v2128_v38 }
 0x424   : > { %v2130_v37 = vadd.f32 %v5432_v60, %v2129_v35  ;;  %v7177_v35 = vpop.eup %5439 }
 0x425   : > { %9078 = vst [vmem:[#allocation16_spill] sm:$0xff] %v7177_v35  ;;  %v2099_v63 = vsel %vm1348_vm11, %v7177_v35, 0.0 }
 0x426   : > { %v2134_v24 = vsel %vm2133_vm1, %v5432_v60, %v2130_v37  ;;  %v2041_v37 = vpop.xlane.xlu0 %2040 }
 0x427   : > { %2088 = vadd.xlane.f32.xlu1 %v2087_v12  ;;  %2058 = vadd.xlane.f32.xlu2 %v2057_v34  ;;  %v2139_v21 = vsel %vm2136_vm2, %v2138_v5, %v2134_v24  ;;  %vm2176_vm4 = vweird.f32 %v2041_v37 }
 0x428   : > { %v2140_v49 = vmul.f32 %v6988_v3, %v2139_v21  ;;  %v7185_v3 = vpop.eup %5441 }
 0x429   : > { %v2075_v33 = vsel %vm1348_vm11, %v7185_v3, 0.0 }
 0x42a   : > { %v2606_v56 = vpack.c.bf16 %v2140_v49, %v2140_v49 }
 0x42c   : > { %v2640_v23 = vunpack.c.l.b16 %v2606_v56 }
 0x42e   : > { %v2642_v60 = vpack.c.b16 %v2641_v14, %v2640_v23 }
 0x42f   : > { %2064 = vadd.xlane.f32.xlu2 %v2063_v57  ;;  %2100 = vadd.xlane.f32.xlu1 %v2099_v63 }
 0x430   : > { %5213 = vmatmul.msk.bf16.vlgmr.msra.gmra.mxu2 %vm1348_vm11, %v2642_v60 }
 0x431   : > { %2806 = vmatpush.bf16.msra.mxu2 %v6850_v22 }
 0x432   : > { %v1912_v53 = vpop.xlane.xlu2 %1911 }
 0x433   : > { %v1958_v38 = vsub.f32 %v7018_v32, %v1912_v53  ;;  %v7198_v32 = vpop.xlane.xlu0 %2043 }
 0x434   : > { %vm2191_vm8 = vweird.f32 %v7198_v32 }
 0x435   : > { %v2014_v18 = vmul.f32 1.442695, %v1958_v38 }
 0x437   : > { %2076 = vadd.xlane.f32.xlu2 %v2075_v33  ;;  %5443 = vpow2.f32 %v2014_v18 }
 0x438   : > { %5445 = vpow2.f32 %v2006_v45 }
 0x439   : > { %5447 = vrcp.f32 %v2041_v37 }
 0x43a   : > { %v1915_v1 = vpop.xlane.xlu1 %1914  ;;  %5449 = vrcp.f32 %v7198_v32 }
 0x43b   : > { %v7202_v0 = vpop.xlane.xlu0 %2049  ;;  %v1959_v23 = vsub.f32 %v7031_v41, %v1915_v1 }
 0x43c   : > { %vm2221_vm9 = vweird.f32 %v7202_v0 }
 0x43d   : > { %v7192_v5 = vpop.eup %5443  ;;  %v2016_v53 = vmul.f32 1.442695, %v1959_v23 }
 0x43e   : > { %9079 = vst [vmem:[#allocation17_spill] sm:$0xff] %v7192_v5  ;;  %v2102_v22 = vsel %vm1348_vm11, %v7192_v5, 0.0  ;;  %v7196_v12 = vpop.eup %5445 }
 0x43f   : > { %2103 = vadd.xlane.f32.xlu0 %v2102_v22  ;;  %9080 = vst [vmem:[#allocation18_spill] sm:$0xff] %v7196_v12  ;;  %v2090_v16 = vsel %vm1348_vm11, %v7196_v12, 0.0  ;;  %v5448_v24 = vpop.eup %5447 }
 0x440   : > { %v2172_v21 = vmul.f32 %v5448_v24, %v2041_v37  ;;  %v7213_v63 = vpop.eup %5449  ;;  %vm2177_vm3 = vweird.f32 %v5448_v24 }
 0x441   : > { %v2187_v41 = vmul.f32 %v7213_v63, %v7198_v32  ;;  %vm2178_vm5 = vmor %vm2176_vm4, %vm2177_vm3  ;;  %vm2192_vm7 = vweird.f32 %v7213_v63 }
 0x442   : > { %v2173_v14 = vsub.f32 1.0, %v2172_v21  ;;  %v2182_v21 = vand.u32 2147483648, %v2041_v37  ;;  %vm7272_vm10 = vmor %vm2191_vm8, %vm2192_vm7 }
 0x443   : > { %v7206_v34 = vpop.xlane.xlu0 %2055 }
 0x444   : > { %v2174_v60 = vmul.f32 %v5448_v24, %v2173_v14  ;;  %v2188_v14 = vsub.f32 1.0, %v2187_v41  ;;  %vm2251_vm2 = vweird.f32 %v7206_v34 }
 0x446   : > { %v2175_v45 = vadd.f32 %v5448_v24, %v2174_v60 }
 0x447   : > { %2091 = vadd.xlane.f32.xlu0 %v2090_v16 }
 0x44b   : > { %v7209_v49 = vpop.xlane.xlu0 %2061 }
 0x44c   : > { %vm2281_vm8 = vweird.f32 %v7209_v49 }
 0x44f   : > { %2918 = vrot.lane.b32.xlu2 %v6696_v40, %s5727_s21 }
 0x453   : > { %v7218_v18 = vpop.xlane.xlu0 %2079 }
 0x462   : > { %v1924_v55 = vpop.xlane.xlu2 %1923 }
 0x463   : > { %v1962_v56 = vsub.f32 %v7056_v17, %v1924_v55 }
 0x465   : > { %v2022_v57 = vmul.f32 1.442695, %v1962_v56  ;;  %v2180_v56 = vand.u32 2147483647, %v2041_v37 }
 0x467   : > { %5451 = vpow2.f32 %v2022_v57  ;;  %v2179_v57 = vsel %vm2178_vm5, %v5448_v24, %v2175_v45  ;;  %vm2181_vm6 = vcmp.eq.f32.partialorder %v2180_v56, 8.507059e+37 }
 0x468   : > { %5453 = vrcp.f32 %v7202_v0 }
 0x469   : > { %5455 = vrcp.f32 %v7206_v34 }
 0x46a   : > { %v1903_v38 = vpop.xlane.xlu2 %1902  ;;  %v1927_v54 = vpop.xlane.xlu1 %1926  ;;  %5457 = vrcp.f32 %v7209_v49 }
 0x46b   : > { %v1963_v17 = vsub.f32 %v7074_v51, %v1927_v54  ;;  %5459 = vpow2.f32 %v2016_v53  ;;  %v1955_v22 = vsub.f32 %v7070_v9, %v1903_v38  ;;  %v2183_v9 = vor.u32 1.1754944e-38, %v2182_v21 }
 0x46d   : > { %v7223_v33 = vpop.eup %5451  ;;  %v2024_v16 = vmul.f32 1.442695, %v1963_v17  ;;  %v2008_v60 = vmul.f32 1.442695, %v1955_v22  ;;  %v2184_v41 = vsel %vm2181_vm6, %v2183_v9, %v2179_v57  ;;  %v7247_v22 = vpop.xlane.xlu0 %2085 }
 0x46e   : > { %9081 = vst [vmem:[#allocation19_spill] sm:$0xff] %v7223_v33  ;;  %v2114_v1 = vsel %vm1348_vm11, %v7223_v33, 0.0  ;;  %v7228_v55 = vpop.eup %5453  ;;  %v7256_v57 = vmul.f32 %v6990_v7, %v2184_v41  ;;  %v2225_v7 = vand.u32 2147483647, %v7202_v0 }
 0x46f   : > { %2115 = vadd.xlane.f32.xlu1 %v2114_v1  ;;  %v7230_v51 = vpop.eup %5455  ;;  %5461 = vpow2.f32 %v2024_v16  ;;  %v2217_v37 = vmul.f32 %v7228_v55, %v7202_v0  ;;  %v2189_v16 = vmul.f32 %v7213_v63, %v2188_v14  ;;  %vm2222_vm14 = vweird.f32 %v7228_v55 }
 0x470   : > { %v7232_v23 = vpop.eup %5457  ;;  %v2247_v24 = vmul.f32 %v7230_v51, %v7206_v34  ;;  %vm2252_vm15 = vweird.f32 %v7230_v51  ;;  %vm7314_vm4 = vmor %vm2221_vm9, %vm2222_vm14  ;;  %vm2226_vm9 = vcmp.eq.f32.partialorder %v2225_v7, 8.507059e+37 }
 0x471   : > { %v7236_v54 = vpop.eup %5459  ;;  %v2277_v45 = vmul.f32 %v7232_v23, %v7209_v49  ;;  %v2218_v56 = vsub.f32 1.0, %v2217_v37  ;;  %v7259_v9 = vadd.f32 %v7213_v63, %v2189_v16  ;;  %v2195_v37 = vand.u32 2147483647, %v7198_v32  ;;  %vm7331_vm7 = vmor %vm2251_vm2, %vm2252_vm15 }
 0x472   : > { %v1930_v53 = vpop.xlane.xlu2 %1929  ;;  %v7234_v38 = vpop.xlane.xlu1 %2037  ;;  %9082 = vst [vmem:[#allocation20_spill] sm:$0xff] %v7236_v54  ;;  %vm2282_vm5 = vweird.f32 %v7232_v23 }
 0x473   : > { %v1964_v17 = vsub.f32 %v7089_v31, %v1930_v53  ;;  %5463 = vrcp.f32 %v7234_v38  ;;  %v2105_v31 = vsel %vm1348_vm11, %v7236_v54, 0.0  ;;  %v2278_v53 = vsub.f32 1.0, %v2277_v45 }
 0x474   : > { %5465 = vpow2.f32 %v2008_v60  ;;  %v2248_v60 = vsub.f32 1.0, %v2247_v24  ;;  %v2219_v45 = vmul.f32 %v7228_v55, %v2218_v56  ;;  %v2194_v12 = vsel %vm7272_vm10, %v7213_v63, %v7259_v9  ;;  %vm7347_vm10 = vmor %vm2281_vm8, %vm2282_vm5 }
 0x475   : > { %v2026_v21 = vmul.f32 1.442695, %v1964_v17  ;;  %v7249_v1 = vpop.eup %5461  ;;  %v2279_v33 = vmul.f32 %v7232_v23, %v2278_v53  ;;  %v7290_v56 = vpop.xlane.xlu0 %2073  ;;  %vm7294_vm12 = vcmp.eq.f32.partialorder %v2195_v37, 8.507059e+37  ;;  %vm2161_vm1 = vweird.f32 %v7234_v38 }
 0x476   : > { %9083 = vst [vmem:[#allocation21_spill] sm:$0xff] %v7249_v1  ;;  %v2117_v14 = vsel %vm1348_vm11, %v7249_v1, 0.0  ;;  %v2249_v1 = vmul.f32 %v7230_v51, %v2248_v60  ;;  %v2220_v53 = vadd.f32 %v7228_v55, %v2219_v45  ;;  %v2257_v24 = vand.u32 2147483648, %v7206_v34 }
 0x477   : > { %5467 = vpow2.f32 %v2026_v21  ;;  %2106 = vadd.xlane.f32.xlu1 %v2105_v31  ;;  %v2197_v21 = vand.u32 2147483648, %v7198_v32  ;;  %vm2341_vm2 = vweird.f32 %v7290_v56 }
 0x478   : > { %2118 = vadd.xlane.f32.xlu2 %v2117_v14  ;;  %v2227_v14 = vand.u32 2147483648, %v7202_v0  ;;  %5469 = vrcp.f32 %v7218_v18  ;;  %v2250_v37 = vadd.f32 %v7230_v51, %v2249_v1  ;;  %v2280_v1 = vadd.f32 %v7232_v23, %v2279_v33 }
 0x479   : > { %v5464_v17 = vpop.eup %5463  ;;  %v2224_v0 = vsel %vm7314_vm4, %v7228_v55, %v2220_v53  ;;  %v2287_v33 = vand.u32 2147483648, %v7209_v49  ;;  %v2198_v53 = vor.u32 1.1754944e-38, %v2197_v21 }
 0x47a   : > { %v2157_v41 = vmul.f32 %v5464_v17, %v7234_v38  ;;  %v1918_v16 = vpop.xlane.xlu2 %1917  ;;  %v7268_v31 = vpop.xlane.xlu1 %1920  ;;  %vm2162_vm13 = vweird.f32 %v5464_v17 }
 0x47b   : > { %v7270_v5 = vpop.eup %5465  ;;  %v1960_v32 = vsub.f32 %v7107_v15, %v1918_v16  ;;  %v2165_v15 = vand.u32 2147483647, %v7234_v38  ;;  %v2167_v16 = vand.u32 2147483648, %v7234_v38  ;;  %vm2163_vm3 = vmor %vm2161_vm1, %vm2162_vm13  ;;  %v2199_v21 = vsel %vm7294_vm12, %v2198_v53, %v2194_v12 }
 0x47c   : > { %9084 = vst [vmem:[#allocation22_spill] sm:$0xff] %v7270_v5  ;;  %v2158_v40 = vsub.f32 1.0, %v2157_v41  ;;  %v2093_v9 = vsel %vm1348_vm11, %v7270_v5, 0.0  ;;  %v2255_v41 = vand.u32 2147483647, %v7206_v34  ;;  %vm2371_vm12 = vweird.f32 %v7218_v18 }
 0x47d   : > { %v7287_v35 = vpop.eup %5467  ;;  %v2018_v54 = vmul.f32 1.442695, %v1960_v32  ;;  %v2168_v45 = vor.u32 1.1754944e-38, %v2167_v16  ;;  %vm2166_vm6 = vcmp.eq.f32.partialorder %v2165_v15, 8.507059e+37  ;;  %v2254_v15 = vsel %vm7331_vm7, %v7230_v51, %v2250_v37 }
 0x47e   : > { %9087 = vst [vmem:[#allocation23_spill] sm:$0xff] %v7287_v35  ;;  %v2159_v63 = vmul.f32 %v5464_v17, %v2158_v40  ;;  %v2120_v60 = vsel %vm1348_vm11, %v7287_v35, 0.0  ;;  %v7324_v34 = vpop.eup %5469  ;;  %vm2256_vm13 = vcmp.eq.f32.partialorder %v2255_v41, 8.507059e+37  ;;  %v2288_v37 = vor.u32 1.1754944e-38, %v2287_v33 }
 0x47f   : > { %5471 = vpow2.f32 %v2018_v54  ;;  %2094 = vadd.xlane.f32.xlu1 %v2093_v9  ;;  %2121 = vadd.xlane.f32.xlu0 %v2120_v60  ;;  %v2285_v9 = vand.u32 2147483647, %v7209_v49  ;;  %v2258_v54 = vor.u32 1.1754944e-38, %v2257_v24  ;;  %v2284_v49 = vsel %vm7347_vm10, %v7232_v23, %v2280_v1 }
 0x480   : > { %5473 = vrcp.f32 %v7290_v56  ;;  %v2160_v40 = vadd.f32 %v5464_v17, %v2159_v63  ;;  %v2367_v24 = vmul.f32 %v7324_v34, %v7218_v18  ;;  %v9097_v16 = vpack.c.bf16 %v7256_v57, %v7256_v57 }
 0x481   : > { %5475 = vrcp.f32 %v7247_v22  ;;  %vm2286_vm14 = vcmp.eq.f32.partialorder %v2285_v9, 8.507059e+37  ;;  %v2200_v9 = vmul.f32 %v6999_v26, %v2199_v21  ;;  %vm2372_vm15 = vweird.f32 %v7324_v34 }
 0x482   : > { %v2164_v38 = vsel %vm2163_vm3, %v5464_v17, %v2160_v40  ;;  %v7320_v32 = vpop.xlane.xlu2 %1932  ;;  %v7322_v63 = vpop.xlane.xlu1 %2067  ;;  %v2228_v40 = vor.u32 1.1754944e-38, %v2227_v14  ;;  %v2259_v14 = vsel %vm2256_vm13, %v2258_v54, %v2254_v15  ;;  %v2666_v23 = vunpack.c.l.b16 %v9097_v16  ;;  %vm7422_vm3 = vmor %vm2371_vm12, %vm2372_vm15 }
 0x483   : > { %v2169_v17 = vsel %vm2166_vm6, %v2168_v45, %v2164_v38  ;;  %v2368_v53 = vsub.f32 1.0, %v2367_v24  ;;  %v2610_v45 = vpack.c.bf16 %v2200_v9, %v2200_v9  ;;  %v2377_v24 = vand.u32 2147483648, %v7218_v18 }
 0x484   : > { %v2170_v55 = vmul.f32 %v7091_v28, %v2169_v17  ;;  %v2229_v7 = vsel %vm2226_vm9, %v2228_v40, %v2224_v0  ;;  %v2289_v17 = vsel %vm2286_vm14, %v2288_v37, %v2284_v49  ;;  %v2375_v37 = vand.u32 2147483647, %v7218_v18 }
 0x485   : > { %v7343_v60 = vpop.eup %5471  ;;  %v2230_v12 = vmul.f32 %v7004_v19, %v2229_v7  ;;  %v2290_v57 = vmul.f32 %v7022_v2, %v2289_v17  ;;  %v7392_v7 = vunpack.c.l.b16 %v2610_v45  ;;  %vm2401_vm10 = vweird.f32 %v7247_v22 }
 0x486   : > { %9094 = vst [vmem:[#allocation24_spill] sm:$0xff] %v7343_v60  ;;  %v7351_v38 = vpop.eup %5473  ;;  %v2108_v28 = vsel %vm1348_vm11, %v7343_v60, 0.0  ;;  %v2608_v51 = vpack.c.bf16 %v2170_v55, %v2170_v55  ;;  %v2260_v55 = vmul.f32 %v7009_v58, %v2259_v14  ;;  %v2369_v58 = vmul.f32 %v7324_v34, %v2368_v53 }
 0x487   : > { %2109 = vadd.xlane.f32.xlu0 %v2108_v28  ;;  %v7365_v1 = vpop.eup %5475  ;;  %v2337_v25 = vmul.f32 %v7351_v38, %v7290_v56  ;;  %v2612_v54 = vpack.c.bf16 %v2230_v12, %v2230_v12  ;;  %v2616_v26 = vpack.c.bf16 %v2290_v57, %v2290_v57  ;;  %vm2342_vm1 = vweird.f32 %v7351_v38 }
 0x488   : > { %v2665_v41 = vunpack.c.l.b16 %v2608_v51  ;;  %v2397_v40 = vmul.f32 %v7365_v1, %v7247_v22  ;;  %v2614_v49 = vpack.c.bf16 %v2260_v55, %v2260_v55  ;;  %v2370_v17 = vadd.f32 %v7324_v34, %v2369_v58  ;;  %vm7437_vm6 = vmor %vm2341_vm2, %vm2342_vm1 }
 0x489   : > { %v2338_v19 = vsub.f32 1.0, %v2337_v25  ;;  %v7388_v21 = vunpack.c.l.b16 %v2612_v54  ;;  %v2347_v53 = vand.u32 2147483648, %v7290_v56  ;;  %v2345_v54 = vand.u32 2147483647, %v7290_v56 }
 0x48a   : > { %v7370_v0 = vpop.xlane.xlu1 %2070  ;;  %v7372_v33 = vpop.xlane.xlu2 %2046  ;;  %v2667_v15 = vpack.c.b16 %v2666_v23, %v2665_v41  ;;  %v2398_v2 = vsub.f32 1.0, %v2397_v40  ;;  %v7394_v14 = vunpack.c.l.b16 %v2614_v49  ;;  %v7402_v23 = vunpack.c.l.b16 %v2616_v26 }
 0x48b   : > { %5477 = vrcp.f32 %v7372_v33  ;;  %v2339_v28 = vmul.f32 %v7351_v38, %v2338_v19  ;;  %v7399_v41 = vpop.xlane.xlu0 %2097  ;;  %v2212_v40 = vand.u32 2147483648, %v7372_v33  ;;  %v2210_v49 = vand.u32 2147483647, %v7372_v33 }
 0x48c   : > { %5214 = vmatmul.msk.bf16.vlgmr.msrb.gmra.mxu3 %vm1348_vm11, %v2667_v15  ;;  %5479 = vrcp.f32 %v7322_v63  ;;  %v2399_v25 = vmul.f32 %v7365_v1, %v2398_v2  ;;  %v2374_v26 = vsel %vm7422_vm3, %v7324_v34, %v2370_v17  ;;  %vm7431_vm5 = vcmp.eq.f32.partialorder %v2375_v37, 8.507059e+37 }
 0x48d   : > { %2831 = vmatpush.bf16.msrb.mxu3 %v6884_v44  ;;  %5481 = vrcp.f32 %v7370_v0  ;;  %v2340_v9 = vadd.f32 %v7351_v38, %v2339_v28  ;;  %v2378_v2 = vor.u32 1.1754944e-38, %v2377_v24  ;;  %vm2206_vm7 = vweird.f32 %v7372_v33 }
 0x48e   : > { %v7454_v24 = vadd.f32 %v7365_v1, %v2399_v25  ;;  %vm2402_vm8 = vweird.f32 %v7365_v1  ;;  %v2213_v17 = vor.u32 1.1754944e-38, %v2212_v40  ;;  %vm2346_vm13 = vcmp.eq.f32.partialorder %v2345_v54, 8.507059e+37  ;;  %v9127_v54 = vld [vmem:[#allocation12_spill] sm:$0xff] }
 0x48f   : > { %v2344_v34 = vsel %vm7437_vm6, %v7351_v38, %v2340_v9  ;;  %vm2211_vm14 = vcmp.eq.f32.partialorder %v2210_v49, 8.507059e+37  ;;  %v7468_v40 = vsel %vm7431_vm5, %v2378_v2, %v2374_v26  ;;  %vm7472_vm12 = vmor %vm2401_vm10, %vm2402_vm8  ;;  %vm2311_vm1 = vweird.f32 %v7322_v63 }
 0x490   : > { %3056 = vrot.lane.b32.xlu2 %v6540_v61, %s5728_s13  ;;  %v2332_v35 = vand.u32 2147483648, %v7370_v0 }
 0x491   : > { %v5478_v51 = vpop.eup %5477 }
 0x492   : > { %v7390_v44 = vpop.xlane.xlu2 %2052  ;;  %v2202_v16 = vmul.f32 %v5478_v51, %v7372_v33  ;;  %v7407_v12 = vpop.xlane.xlu1 %2082  ;;  %vm2207_vm4 = vweird.f32 %v5478_v51 }
 0x493   : > { %v7409_v15 = vpop.eup %5479  ;;  %5483 = vrcp.f32 %v7390_v44  ;;  %vm2208_vm9 = vmor %vm2206_vm7, %vm2207_vm4  ;;  %vm2236_vm2 = vweird.f32 %v7390_v44 }
 0x494   : > { %v2203_v55 = vsub.f32 1.0, %v2202_v16  ;;  %v7414_v57 = vpop.eup %5481  ;;  %5485 = vrcp.f32 %v7399_v41  ;;  %v2307_v56 = vmul.f32 %v7409_v15, %v7322_v63  ;;  %v2348_v16 = vor.u32 1.1754944e-38, %v2347_v53 }
 0x495   : > { %v2322_v28 = vmul.f32 %v7414_v57, %v7370_v0  ;;  %vm2312_vm3 = vweird.f32 %v7409_v15  ;;  %vm2327_vm6 = vweird.f32 %v7414_v57 }
 0x496   : > { %v2204_v45 = vmul.f32 %v5478_v51, %v2203_v55  ;;  %v2349_v25 = vsel %vm2346_vm13, %v2348_v16, %v2344_v34  ;;  %v2308_v9 = vsub.f32 1.0, %v2307_v56  ;;  %v2330_v56 = vand.u32 2147483647, %v7370_v0  ;;  %vm7535_vm8 = vmor %vm2311_vm1, %vm2312_vm3 }
 0x497   : > { %v2323_v18 = vsub.f32 1.0, %v2322_v28  ;;  %v7487_v34 = vmul.f32 %v7072_v46, %v2349_v25  ;;  %v2242_v28 = vand.u32 2147483648, %v7390_v44  ;;  %v2315_v25 = vand.u32 2147483647, %v7322_v63 }
 0x498   : > { %2993 = vrot.lane.b32.xlu2 %v6762_v52, %s5727_s21  ;;  %3054 = vrot.lane.b32.xlu1 %v6540_v61, %s5729_s14  ;;  %v2205_v37 = vadd.f32 %v5478_v51, %v2204_v45  ;;  %v2309_v16 = vmul.f32 %v7409_v15, %v2308_v9  ;;  %vm7540_vm10 = vcmp.eq.f32.partialorder %v2330_v56, 8.507059e+37 }
 0x499   : > { %v5484_v19 = vpop.eup %5483  ;;  %vm7523_vm7 = vcmp.eq.f32.partialorder %v2315_v25, 8.507059e+37 }
 0x49a   : > { %v7458_v55 = vpop.xlane.xlu2 %2058  ;;  %v2209_v38 = vsel %vm2208_vm9, %v5478_v51, %v2205_v37  ;;  %v7463_v33 = vpop.eup %5485  ;;  %v2232_v53 = vmul.f32 %v5484_v19, %v7390_v44  ;;  %vm2237_vm15 = vweird.f32 %v5484_v19  ;;  %v2243_v51 = vor.u32 1.1754944e-38, %v2242_v28 }
 0x49b   : > { %2943 = vrot.lane.b32.xlu0 %v6740_v59, %s5727_s21  ;;  %v2214_v45 = vsel %vm2211_vm14, %v2213_v17, %v2209_v38  ;;  %v7483_v2 = vpop.xlane.xlu1 %2088  ;;  %5487 = vrcp.f32 %v7458_v55  ;;  %v7491_v37 = vmul.f32 %v7463_v33, %v7399_v41  ;;  %v2324_v38 = vmul.f32 %v7414_v57, %v2323_v18  ;;  %vm2238_vm4 = vmor %vm2236_vm2, %vm2237_vm15 }
 0x49c   : > { %v2215_v58 = vmul.f32 %v7138_v36, %v2214_v45  ;;  %v2233_v26 = vsub.f32 1.0, %v2232_v53  ;;  %5489 = vrcp.f32 %v7407_v12  ;;  %v2240_v36 = vand.u32 2147483647, %v7390_v44 }
 0x49d   : > { %5491 = vrcp.f32 %v7483_v2  ;;  %v2325_v49 = vadd.f32 %v7414_v57, %v2324_v38  ;;  %vm2326_vm9 = vweird.f32 %v7370_v0  ;;  %vm2266_vm15 = vweird.f32 %v7458_v55 }
 0x49e   : > { %v2234_v17 = vmul.f32 %v5484_v19, %v2233_v26  ;;  %v2611_v9 = vpack.c.bf16 %v2215_v58, %v2215_v58  ;;  %v2317_v26 = vand.u32 2147483648, %v7322_v63  ;;  %v2310_v58 = vadd.f32 %v7409_v15, %v2309_v16  ;;  %vm7547_vm13 = vmor %vm2326_vm9, %vm2327_vm6 }
 0x49f   : > { %vm2241_vm5 = vcmp.eq.f32.partialorder %v2240_v36, 8.507059e+37 }
 0x4a0   : > { %3080 = vrot.lane.b32.xlu2 %v6542_v29, %s5728_s13  ;;  %3128 = vrot.lane.b32.xlu1 %v6567_v62, %s5728_s13  ;;  %v2235_v45 = vadd.f32 %v5484_v19, %v2234_v17  ;;  %v2691_v16 = vunpack.c.l.b16 %v2611_v9 }
 0x4a1   : > { %v5488_v18 = vpop.eup %5487 }
 0x4a2   : > { %v7508_v53 = vpop.xlane.xlu2 %2064  ;;  %v2239_v17 = vsel %vm2238_vm4, %v5484_v19, %v2235_v45  ;;  %v7518_v44 = vpop.eup %5489  ;;  %v2262_v60 = vmul.f32 %v5488_v18, %v7458_v55  ;;  %vm2267_vm14 = vweird.f32 %v5488_v18 }
 0x4a3   : > { %3018 = vrot.lane.b32.xlu0 %v6774_v42, %s5727_s21  ;;  %5493 = vrcp.f32 %v7508_v53  ;;  %v2244_v46 = vsel %vm2241_vm5, %v2243_v51, %v2239_v17  ;;  %v7529_v36 = vpop.eup %5491  ;;  %v2318_v51 = vor.u32 1.1754944e-38, %v2317_v26  ;;  %v2382_v63 = vmul.f32 %v7518_v44, %v7407_v12  ;;  %vm2268_vm1 = vmor %vm2266_vm15, %vm2267_vm14  ;;  %s5730_s21 = smov 48  }
 0x4a4   : > { %v2245_v19 = vmul.f32 %v7149_v20, %v2244_v46  ;;  %v2263_v9 = vsub.f32 1.0, %v2262_v60  ;;  %v2314_v20 = vsel %vm7535_vm8, %v7409_v15, %v2310_v58  ;;  %v2272_v26 = vand.u32 2147483648, %v7458_v55 }
 0x4a5   : > { %v2329_v60 = vsel %vm7547_vm13, %v7414_v57, %v2325_v49  ;;  %v2270_v15 = vand.u32 2147483647, %v7458_v55  ;;  %v2333_v58 = vor.u32 1.1754944e-38, %v2332_v35  ;;  %v2412_v38 = vmul.f32 %v7529_v36, %v7483_v2  ;;  %v7576_v55 = vpop.xlane.xlu1 %2100 }
 0x4a6   : > { %v2613_v45 = vpack.c.bf16 %v2245_v19, %v2245_v19  ;;  %v2264_v0 = vmul.f32 %v5488_v18, %v2263_v9  ;;  %v2692_v19 = vpack.c.b16 %v2691_v16, %v7392_v7  ;;  %v2319_v61 = vsel %vm7523_vm7, %v2318_v51, %v2314_v20 }
 0x4a7   : > { %v2334_v35 = vsel %vm7540_vm10, %v2333_v58, %v2329_v60  ;;  %v2383_v49 = vsub.f32 1.0, %v2382_v63  ;;  %v2273_v7 = vor.u32 1.1754944e-38, %v2272_v26  ;;  %vm2271_vm2 = vcmp.eq.f32.partialorder %v2270_v15, 8.507059e+37 }
 0x4a8   : > { %3078 = vrot.lane.b32.xlu2 %v6542_v29, %s5729_s14  ;;  %v2716_v17 = vunpack.c.l.b16 %v2613_v45  ;;  %v2265_v29 = vadd.f32 %v5488_v18, %v2264_v0  ;;  %5215 = vmatmul.msk.bf16.vlgmr.msra.gmra.mxu1 %vm1348_vm11, %v2692_v19  ;;  %v2320_v51 = vmul.f32 %v7127_v10, %v2319_v61  ;;  %v2413_v25 = vsub.f32 1.0, %v2412_v38 }
 0x4a9   : > { %v5494_v56 = vpop.eup %5493  ;;  %2856 = vmatpush.bf16.msra.mxu1 %v6878_v48  ;;  %v9114_v48 = vsub.f32 %v7125_v30, %v7320_v32  ;;  %v2335_v61 = vmul.f32 %v7140_v27, %v2334_v35  ;;  %v2390_v10 = vand.u32 2147483647, %v7407_v12  ;;  %vm2296_vm4 = vweird.f32 %v7508_v53 }
 0x4aa   : > { %v7563_v5 = vpop.xlane.xlu2 %2076  ;;  %v2292_v57 = vmul.f32 %v5494_v56, %v7508_v53  ;;  %v2717_v9 = vpack.c.b16 %v2716_v17, %v7388_v21  ;;  %v2269_v28 = vsel %vm2268_vm1, %v5488_v18, %v2265_v29  ;;  %v2302_v21 = vand.u32 2147483648, %v7508_v53 }
 0x4ab   : > { %3104 = vrot.lane.b32.xlu0 %v6565_v47, %s5728_s13  ;;  %5495 = vrcp.f32 %v7563_v5  ;;  %v2274_v20 = vsel %vm2271_vm2, %v2273_v7, %v2269_v28  ;;  %vm2297_vm3 = vweird.f32 %v5494_v56  ;;  %v2300_v29 = vand.u32 2147483647, %v7508_v53 }
 0x4ac   : > { %v2293_v16 = vsub.f32 1.0, %v2292_v57  ;;  %5216 = vmatmul.msk.bf16.vlgmr.msrb.gmra.mxu2 %vm1348_vm11, %v2717_v9  ;;  %v2275_v46 = vmul.f32 %v7164_v39, %v2274_v20  ;;  %v7589_v18 = vmul.f32 1.442695, %v9114_v48  ;;  %5497 = vrcp.f32 %v7576_v55  ;;  %vm2298_vm6 = vmor %vm2296_vm4, %vm2297_vm3 }
 0x4ad   : > { %2881 = vmatpush.bf16.msrb.mxu2 %v6981_v43  ;;  %v2384_v39 = vmul.f32 %v7518_v44, %v2383_v49  ;;  %vm2386_vm5 = vweird.f32 %v7407_v12  ;;  %v2392_v43 = vand.u32 2147483648, %v7407_v12  ;;  %v2414_v30 = vmul.f32 %v7529_v36, %v2413_v25 }
 0x4ae   : > { %v2294_v63 = vmul.f32 %v5494_v56, %v2293_v16  ;;  %v2615_v45 = vpack.c.bf16 %v2275_v46, %v2275_v46  ;;  %v2303_v27 = vor.u32 1.1754944e-38, %v2302_v21  ;;  %v2618_v60 = vpack.c.bf16 %v2320_v51, %v2320_v51 }
 0x4af   : > { %vm2301_vm7 = vcmp.eq.f32.partialorder %v2300_v29, 8.507059e+37  ;;  %v2619_v58 = vpack.c.bf16 %v2335_v61, %v2335_v61  ;;  %vm7604_vm8 = vcmp.eq.f32.partialorder %v2390_v10, 8.507059e+37  ;;  %v2385_v19 = vadd.f32 %v7518_v44, %v2384_v39 }
 0x4b0   : > { %3126 = vrot.lane.b32.xlu2 %v6567_v62, %s5729_s14  ;;  %v2295_v26 = vadd.f32 %v5494_v56, %v2294_v63  ;;  %v2741_v0 = vunpack.c.l.b16 %v2615_v45  ;;  %vm2387_vm9 = vweird.f32 %v7518_v44  ;;  %v2415_v49 = vadd.f32 %v7529_v36, %v2414_v30 }
 0x4b1   : > { %v5496_v32 = vpop.eup %5495  ;;  %vm2416_vm10 = vweird.f32 %v7483_v2  ;;  %vm2417_vm13 = vweird.f32 %v7529_v36  ;;  %v2420_v7 = vand.u32 2147483647, %v7483_v2  ;;  %v2422_v28 = vand.u32 2147483648, %v7483_v2  ;;  %vm7624_vm14 = vmor %vm2386_vm5, %vm2387_vm9 }
 0x4b2   : > { %v2299_v15 = vsel %vm2298_vm6, %v5494_v56, %v2295_v26  ;;  %v2352_v38 = vmul.f32 %v5496_v32, %v7563_v5  ;;  %v2742_v56 = vpack.c.b16 %v2741_v0, %v7394_v14  ;;  %v7613_v35 = vpop.eup %5497  ;;  %v2362_v51 = vand.u32 2147483648, %v7563_v5  ;;  %vm7639_vm1 = vmor %vm2416_vm10, %vm2417_vm13 }
 0x4b3   : > { %3102 = vrot.lane.b32.xlu0 %v6565_v47, %s5729_s14  ;;  %v2304_v17 = vsel %vm2301_vm7, %v2303_v27, %v2299_v15  ;;  %vm2357_vm15 = vweird.f32 %v5496_v32  ;;  %v2360_v20 = vand.u32 2147483647, %v7563_v5  ;;  %v2389_v21 = vsel %vm7624_vm14, %v7518_v44, %v2385_v19 }
 0x4b4   : > { %v2305_v57 = vmul.f32 %v7175_v11, %v2304_v17  ;;  %v2353_v9 = vsub.f32 1.0, %v2352_v38  ;;  %5217 = vmatmul.msk.bf16.vlgmr.msra.gmra.mxu3 %vm1348_vm11, %v2742_v56  ;;  %v2791_v11 = vunpack.c.l.b16 %v2619_v58  ;;  %v2393_v46 = vor.u32 1.1754944e-38, %v2392_v43 }
 0x4b5   : > { %2906 = vmatpush.bf16.msra.mxu3 %v6868_v6  ;;  %v2472_v6 = vmul.f32 %v7613_v35, %v7576_v55  ;;  %v2790_v29 = vunpack.c.l.b16 %v2618_v60  ;;  %v2419_v48 = vsel %vm7639_vm1, %v7529_v36, %v2415_v49  ;;  %vm2356_vm2 = vweird.f32 %v7563_v5  ;;  %v2919_v60 = vpop.permute.xlu2 %2918 }
 0x4b6   : > { %v2617_v16 = vpack.c.bf16 %v2305_v57, %v2305_v57  ;;  %v2354_v25 = vmul.f32 %v5496_v32, %v2353_v9  ;;  %vm2421_vm3 = vcmp.eq.f32.partialorder %v2420_v7, 8.507059e+37  ;;  %v2423_v44 = vor.u32 1.1754944e-38, %v2422_v28  ;;  %vm2358_vm4 = vmor %vm2356_vm2, %vm2357_vm15 }
 0x4b7   : > { %v2363_v2 = vor.u32 1.1754944e-38, %v2362_v51  ;;  %v2792_v39 = vpack.c.b16 %v2791_v11, %v2790_v29  ;;  %v2394_v45 = vsel %vm7604_vm8, %v2393_v46, %v2389_v21  ;;  %vm2361_vm5 = vcmp.eq.f32.partialorder %v2360_v20, 8.507059e+37 }
 0x4b8   : > { %3176 = vrot.lane.b32.xlu2 %v6620_v8, %s5728_s13  ;;  %v2766_v63 = vunpack.c.l.b16 %v2617_v16  ;;  %v2355_v61 = vadd.f32 %v5496_v32, %v2354_v25  ;;  %v9121_v36 = vand.u32 2147483648, %v7247_v22  ;;  %v2424_v5 = vsel %vm2421_vm3, %v2423_v44, %v2419_v48 }
 0x4b9   : > { %v2473_v30 = vsub.f32 1.0, %v2472_v6  ;;  %v9122_v0 = vand.u32 2147483647, %v7247_v22  ;;  %v9123_v58 = vsel %vm7472_vm12, %v7365_v1, %v7454_v24  ;;  %v2458_v22 = vsub.f32 1.0, %v7491_v37  ;;  %v9131_v6 = vld [vmem:[#allocation8_spill] sm:$0xff] }
 0x4ba   : > { %v2767_v10 = vpack.c.b16 %v2766_v63, %v7402_v23  ;;  %v2359_v26 = vsel %vm2358_vm4, %v5496_v32, %v2355_v61  ;;  %v2408_v43 = vor.u32 1.1754944e-38, %v9121_v36  ;;  %v2620_v23 = vpack.c.bf16 %v7487_v34, %v7487_v34  ;;  %v9124_v34 = vld [vmem:[#allocation14_spill] sm:$0xff]  ;;  %v9130_v63 = vld [vmem:[#allocation11_spill] sm:$0xff] }
 0x4bb   : > { %3152 = vrot.lane.b32.xlu0 %v6593_v13, %s5728_s13  ;;  %v2364_v27 = vsel %vm2361_vm5, %v2363_v2, %v2359_v26  ;;  %vm2406_vm6 = vcmp.eq.f32.partialorder %v9122_v0, 8.507059e+37  ;;  %v2380_v32 = vmul.f32 %v7041_v4, %v7468_v40  ;;  %v2395_v17 = vmul.f32 %v7151_v50, %v2394_v45  ;;  %v9126_v4 = vld [vmem:[#allocation5_spill] sm:$0xff] }
 0x4bc   : > { %5218 = vmatmul.msk.bf16.vlgmr.msrb.gmra.mxu1 %vm1348_vm11, %v2767_v10  ;;  %v2365_v15 = vmul.f32 %v7185_v3, %v2364_v27  ;;  %5219 = vmatmul.msk.bf16.vlgmr.msra.gmra.mxu2 %vm1348_vm11, %v2792_v39  ;;  %v2409_v53 = vsel %vm2406_vm6, %v2408_v43, %v9123_v58  ;;  %v1961_v38 = vsub.f32 %v9124_v34, %v7268_v31  ;;  %5499 = vpow2.f32 %v7589_v18  ;;  %v9125_v3 = vld [vmem:[#allocation15_spill] sm:$0xff]  ;;  %v9132_v10 = vld [vmem:[#allocation4_spill] sm:$0xff] }
 0x4bd   : > { %2931 = vmatpush.bf16.msrb.mxu1 %v2919_v60  ;;  %v2425_v19 = vmul.f32 %v9125_v3, %v2424_v5  ;;  %v2474_v40 = vmul.f32 %v7613_v35, %v2473_v30  ;;  %v2410_v1 = vmul.f32 %v9127_v54, %v2409_v53  ;;  %v2815_v24 = vunpack.c.l.b16 %v2620_v23  ;;  %v9133_v43 = vld [vmem:[#allocation16_spill] sm:$0xff]  ;;  %v7724_v60 = vpop.xlane.xlu0 %2103 }
 0x4be   : > { %v2621_v57 = vpack.c.bf16 %v2365_v15, %v2365_v15  ;;  %v2459_v37 = vmul.f32 %v7463_v33, %v2458_v22  ;;  %v2623_v50 = vpack.c.bf16 %v2395_v17, %v2395_v17  ;;  %v2622_v31 = vpack.c.bf16 %v2380_v32, %v2380_v32  ;;  %v9135_v32 = vld [vmem:[#allocation9_spill] sm:$0xff]  ;;  %v9136_v17 = vld [vmem:[#allocation7_spill] sm:$0xff] }
 0x4bf   : > { %v2020_v18 = vmul.f32 1.442695, %v1961_v38  ;;  %v2625_v49 = vpack.c.bf16 %v2425_v19, %v2425_v19  ;;  %v2475_v7 = vadd.f32 %v7613_v35, %v2474_v40  ;;  %vm2477_vm12 = vweird.f32 %v7613_v35  ;;  %v9137_v19 = vld [vmem:[#allocation10_spill] sm:$0xff] }
 0x4c0   : > { %3198 = vrot.lane.b32.xlu2 %v9126_v4, %s5729_s14  ;;  %v2816_v56 = vunpack.c.l.b16 %v2621_v57  ;;  %v2624_v16 = vpack.c.bf16 %v2410_v1, %v2410_v1  ;;  %vm2462_vm7 = vweird.f32 %v7463_v33  ;;  %v2482_v51 = vand.u32 2147483648, %v7576_v55 }
 0x4c1   : > { %v2460_v11 = vadd.f32 %v7463_v33, %v2459_v37  ;;  %v2841_v14 = vunpack.c.l.b16 %v2623_v50  ;;  %vm2476_vm8 = vweird.f32 %v7576_v55  ;;  %v2480_v25 = vand.u32 2147483647, %v7576_v55 }
 0x4c2   : > { %v2817_v9 = vpack.c.b16 %v2816_v56, %v2815_v24  ;;  %v7686_v28 = vpop.eup %5499  ;;  %v2840_v20 = vunpack.c.l.b16 %v2622_v31  ;;  %v2467_v21 = vand.u32 2147483648, %v7399_v41  ;;  %5501 = vpow2.f32 %v2020_v18  ;;  %vm7695_vm9 = vmor %vm2476_vm8, %vm2477_vm12 }
 0x4c3   : > { %3174 = vrot.lane.b32.xlu0 %v6620_v8, %s5729_s14  ;;  %v2866_v46 = vunpack.c.l.b16 %v2625_v49  ;;  %vm2461_vm10 = vweird.f32 %v7399_v41  ;;  %v2465_v55 = vand.u32 2147483647, %v7399_v41  ;;  %v2479_v29 = vsel %vm7695_vm9, %v7613_v35, %v2475_v7 }
 0x4c4   : > { %5220 = vmatmul.msk.bf16.vlgmr.msrb.gmra.mxu3 %vm1348_vm11, %v2817_v9  ;;  %v2123_v48 = vsel %vm1348_vm11, %v7686_v28, 0.0  ;;  %v2865_v61 = vunpack.c.l.b16 %v2624_v16  ;;  %vm2463_vm13 = vmor %vm2461_vm10, %vm2462_vm7  ;;  %v2483_v44 = vor.u32 1.1754944e-38, %v2482_v51  ;;  %vm2481_vm14 = vcmp.eq.f32.partialorder %v2480_v25, 8.507059e+37 }
 0x4c5   : > { %2981 = vmatpush.bf16.msrb.mxu3 %v9130_v63  ;;  %v2464_v2 = vsel %vm2463_vm13, %v7463_v33, %v2460_v11  ;;  %v2842_v41 = vpack.c.b16 %v2841_v14, %v2840_v20  ;;  %v2468_v39 = vor.u32 1.1754944e-38, %v2467_v21  ;;  %vm2466_vm15 = vcmp.eq.f32.partialorder %v2465_v55, 8.507059e+37  ;;  %v9134_v33 = vld [vmem:[#allocation13_spill] sm:$0xff]  ;;  %v7732_v22 = vpop.xlane.xlu0 %2091 }
 0x4c6   : > { %v2867_v45 = vpack.c.b16 %v2866_v46, %v2865_v61  ;;  %v2484_v26 = vsel %vm2481_vm14, %v2483_v44, %v2479_v29  ;;  %5503 = vrcp.f32 %v7732_v22  ;;  %v2435_v14 = vand.u32 2147483647, %v7732_v22 }
 0x4c7   : > { %v2469_v36 = vsel %vm2466_vm15, %v2468_v39, %v2464_v2  ;;  %v2485_v5 = vmul.f32 %v9133_v43, %v2484_v26  ;;  %v2437_v46 = vand.u32 2147483648, %v7732_v22  ;;  %vm2491_vm5 = vweird.f32 %v7724_v60 }
 0x4c8   : > { %3224 = vrot.lane.b32.xlu2 %v9131_v6, %s5728_s13  ;;  %v7715_v35 = vpop.eup %5501  ;;  %v2470_v30 = vmul.f32 %v9134_v33, %v2469_v36  ;;  %v2497_v44 = vand.u32 2147483648, %v7724_v60  ;;  %vm2431_vm6 = vweird.f32 %v7732_v22  ;;  %vm7803_vm10 = vcmp.eq.f32.partialorder %v2435_v14, 8.507059e+37  ;;  %v9150_v14 = vld [vmem:[#allocation21_spill] sm:$0xff] }
 0x4c9   : > { %v2111_v27 = vsel %vm1348_vm11, %v7715_v35, 0.0  ;;  %v2629_v0 = vpack.c.bf16 %v2485_v5, %v2485_v5 }
 0x4ca   : > { %2124 = vadd.xlane.f32.xlu1 %v2123_v48  ;;  %v2628_v23 = vpack.c.bf16 %v2470_v30, %v2470_v30 }
 0x4cb   : > { %3248 = vrot.lane.b32.xlu0 %v9132_v10, %s5728_s13  ;;  %v2916_v15 = vunpack.c.l.b16 %v2629_v0  ;;  %v9144_v0 = vld [vmem:[#allocation3_spill] sm:$0xff] }
 0x4cc   : > { %5221 = vmatmul.msk.bf16.vlgmr.msra.gmra.mxu1 %vm1348_vm11, %v2842_v41  ;;  %5222 = vmatmul.msk.bf16.vlgmr.msrb.gmra.mxu2 %vm1348_vm11, %v2867_v45  ;;  %v2915_v58 = vunpack.c.l.b16 %v2628_v23  ;;  %v7740_v38 = vpop.eup %5503 }
 0x4cd   : > { %v2427_v3 = vmul.f32 %v7740_v38, %v7732_v22  ;;  %vm2432_vm4 = vweird.f32 %v7740_v38 }
 0x4ce   : > { %v2917_v53 = vpack.c.b16 %v2916_v15, %v2915_v58  ;;  %vm7795_vm8 = vmor %vm2431_vm6, %vm2432_vm4  ;;  %v9145_v15 = vld [vmem:[#allocation19_spill] sm:$0xff] }
 0x4cf   : > { %v2428_v56 = vsub.f32 1.0, %v2427_v3 }
 0x4d0   : > { %3222 = vrot.lane.b32.xlu2 %v9131_v6, %s5729_s14 }
 0x4d1   : > { %v2429_v18 = vmul.f32 %v7740_v38, %v2428_v56 }
 0x4d2   : > { %2112 = vadd.xlane.f32.xlu1 %v2111_v27  ;;  %v2438_v27 = vor.u32 1.1754944e-38, %v2437_v46 }
 0x4d3   : > { %3246 = vrot.lane.b32.xlu0 %v9132_v10, %s5729_s14  ;;  %v2430_v29 = vadd.f32 %v7740_v38, %v2429_v18  ;;  %v2495_v18 = vand.u32 2147483647, %v7724_v60 }
 0x4d5   : > { %v2434_v33 = vsel %vm7795_vm8, %v7740_v38, %v2430_v29 }
 0x4d8   : > { %3296 = vrot.lane.b32.xlu2 %v9135_v32, %s5728_s13 }
 0x4db   : > { %3344 = vrot.lane.b32.xlu0 %v6740_v59, %s5728_s13 }
 0x4dc   : > { %5224 = vmatmul.msk.bf16.vlgmr.msrb.gmra.mxu1 %vm1348_vm11, %v2917_v53 }
 0x4e0   : > { %3318 = vrot.lane.b32.xlu2 %v9136_v17, %s5729_s14 }
 0x4e2   : > { %v2116_v34 = vpop.xlane.xlu1 %2115 }
 0x4e3   : > { %5505 = vrcp.f32 %v2116_v34  ;;  %3294 = vrot.lane.b32.xlu0 %v9135_v32, %s5729_s14  ;;  %v2557_v9 = vand.u32 2147483648, %v2116_v34  ;;  %vm2551_vm2 = vweird.f32 %v2116_v34  ;;  %v2555_v16 = vand.u32 2147483647, %v2116_v34 }
 0x4e4   : > { %5507 = vrcp.f32 %v7724_v60 }
 0x4e5   : > { %v2558_v48 = vor.u32 1.1754944e-38, %v2557_v9  ;;  %vm2556_vm12 = vcmp.eq.f32.partialorder %v2555_v16, 8.507059e+37 }
 0x4e8   : > { %3368 = vrot.lane.b32.xlu2 %v9137_v19, %s5728_s13 }
 0x4e9   : > { %v5506_v57 = vpop.eup %5505 }
 0x4ea   : > { %v2547_v40 = vmul.f32 %v5506_v57, %v2116_v34  ;;  %v7747_v54 = vpop.xlane.xlu1 %2106  ;;  %v7749_v1 = vpop.eup %5507  ;;  %vm2552_vm1 = vweird.f32 %v5506_v57 }
 0x4eb   : > { %5509 = vrcp.f32 %v7747_v54  ;;  %v7752_v24 = vpop.xlane.xlu2 %2118  ;;  %3150 = vrot.lane.b32.xlu1 %v6593_v13, %s5729_s14  ;;  %3366 = vrot.lane.b32.xlu0 %v9137_v19, %s5729_s14  ;;  %v2487_v50 = vmul.f32 %v7749_v1, %v7724_v60  ;;  %vm7767_vm3 = vmor %vm2551_vm2, %vm2552_vm1  ;;  %vm2492_vm7 = vweird.f32 %v7749_v1  ;;  %v2512_v38 = vand.u32 2147483648, %v7747_v54 }
 0x4ec   : > { %v2548_v37 = vsub.f32 1.0, %v2547_v40  ;;  %5511 = vrcp.f32 %v7752_v24  ;;  %v2572_v26 = vand.u32 2147483648, %v7752_v24  ;;  %v2570_v5 = vand.u32 2147483647, %v7752_v24  ;;  %vm7843_vm4 = vmor %vm2491_vm5, %vm2492_vm7 }
 0x4ed   : > { %v2488_v11 = vsub.f32 1.0, %v2487_v50  ;;  %vm2566_vm13 = vweird.f32 %v7752_v24  ;;  %vm2506_vm1 = vweird.f32 %v7747_v54  ;;  %v2510_v40 = vand.u32 2147483647, %v7747_v54  ;;  %v9146_v50 = vld [vmem:[#allocation6_spill] sm:$0xff] }
 0x4ee   : > { %v2549_v31 = vmul.f32 %v5506_v57, %v2548_v37  ;;  %v2573_v3 = vor.u32 1.1754944e-38, %v2572_v26  ;;  %vm2571_vm2 = vcmp.eq.f32.partialorder %v2570_v5, 8.507059e+37  ;;  %vm2496_vm7 = vcmp.eq.f32.partialorder %v2495_v18, 8.507059e+37 }
 0x4ef   : > { %v2489_v41 = vmul.f32 %v7749_v1, %v2488_v11 }
 0x4f0   : > { %v2550_v49 = vadd.f32 %v5506_v57, %v2549_v31  ;;  %3390 = vrot.lane.b32.xlu2 %v6762_v52, %s5729_s14  ;;  %v9147_v31 = vld [vmem:[#allocation2_spill] sm:$0xff] }
 0x4f1   : > { %v7764_v7 = vpop.eup %5509  ;;  %v2490_v34 = vadd.f32 %v7749_v1, %v2489_v41 }
 0x4f2   : > { %v5512_v51 = vpop.eup %5511  ;;  %v2502_v20 = vmul.f32 %v7764_v7, %v7747_v54  ;;  %v7773_v21 = vpop.xlane.xlu1 %2094  ;;  %v2554_v12 = vsel %vm7767_vm3, %v5506_v57, %v2550_v49  ;;  %vm2507_vm14 = vweird.f32 %v7764_v7  ;;  %v2439_v49 = vsel %vm7803_vm10, %v2438_v27, %v2434_v33 }
 0x4f3   : > { %v2562_v63 = vmul.f32 %v5512_v51, %v7752_v24  ;;  %5513 = vrcp.f32 %v7773_v21  ;;  %v7780_v55 = vpop.permute.xlu2 %3056  ;;  %3200 = vrot.lane.b32.xlu1 %v9126_v4, %s5728_s13  ;;  %3414 = vrot.lane.b32.xlu0 %v6774_v42, %s5729_s14  ;;  %v2559_v39 = vsel %vm2556_vm12, %v2558_v48, %v2554_v12  ;;  %vm2567_vm9 = vweird.f32 %v5512_v51  ;;  %v7819_v56 = vpop.xlane.xlu0 %2121  ;;  %vm7830_vm3 = vmor %vm2506_vm1, %vm2507_vm14 }
 0x4f4   : > { %v2503_v61 = vsub.f32 1.0, %v2502_v20  ;;  %v2560_v58 = vmul.f32 %v9145_v15, %v2559_v39  ;;  %vm2568_vm15 = vmor %vm2566_vm13, %vm2567_vm9  ;;  %v2452_v20 = vand.u32 2147483648, %v7773_v21  ;;  %v2513_v12 = vor.u32 1.1754944e-38, %v2512_v38 }
 0x4f5   : > { %v2563_v2 = vsub.f32 1.0, %v2562_v63  ;;  %v2450_v29 = vand.u32 2147483647, %v7773_v21  ;;  %v2498_v48 = vor.u32 1.1754944e-38, %v2497_v44  ;;  %vm2511_vm12 = vcmp.eq.f32.partialorder %v2510_v40, 8.507059e+37 }
 0x4f6   : > { %v2504_v45 = vmul.f32 %v7764_v7, %v2503_v61  ;;  %vm2446_vm5 = vweird.f32 %v7773_v21  ;;  %v2453_v36 = vor.u32 1.1754944e-38, %v2452_v20  ;;  %5515 = vrcp.f32 %v7819_v56 }
 0x4f7   : > { %v2564_v43 = vmul.f32 %v5512_v51, %v2563_v2  ;;  %v9153_v2 = vld [vmem:[#allocation18_spill] sm:$0xff]  ;;  %vm2451_vm9 = vcmp.eq.f32.partialorder %v2450_v29, 8.507059e+37  ;;  %vm2581_vm13 = vweird.f32 %v7819_v56 }
 0x4f8   : > { %4332 = vrot.lane.b32.xlu2 %v9144_v0, %s5730_s21  ;;  %v2505_v53 = vadd.f32 %v7764_v7, %v2504_v45  ;;  %v2440_v41 = vmul.f32 %v9153_v2, %v2439_v49  ;;  %v9155_v0 = vld [vmem:[#allocation22_spill] sm:$0xff] }
 0x4f9   : > { %v5514_v23 = vpop.eup %5513  ;;  %v2565_v22 = vadd.f32 %v5512_v51, %v2564_v43 }
 0x4fa   : > { %v2442_v57 = vmul.f32 %v5514_v23, %v7773_v21  ;;  %v2509_v11 = vsel %vm7830_vm3, %v7764_v7, %v2505_v53  ;;  %vm2447_vm6 = vweird.f32 %v5514_v23  ;;  %v2494_v7 = vsel %vm7843_vm4, %v7749_v1, %v2490_v34  ;;  %v9154_v1 = vld [vmem:[#allocation20_spill] sm:$0xff] }
 0x4fb   : > { %v2569_v24 = vsel %vm2568_vm15, %v5512_v51, %v2565_v22  ;;  %v2994_v37 = vpop.permute.xlu2 %2993  ;;  %3272 = vrot.lane.b32.xlu1 %v9146_v50, %s5728_s13  ;;  %4307 = vrot.lane.b32.xlu0 %v9147_v31, %s5730_s21  ;;  %v2634_v51 = vpack.c.bf16 %v2560_v58, %v2560_v58  ;;  %v2514_v39 = vsel %vm2511_vm12, %v2513_v12, %v2509_v11  ;;  %vm2448_vm8 = vmor %vm2446_vm5, %vm2447_vm6  ;;  %v9156_v58 = vld [vmem:[#allocation17_spill] sm:$0xff]  ;;  %v7861_v22 = vpop.xlane.xlu0 %2109  ;;  %v3062_v31 = vsel %vm1348_vm11, %v7780_v55, 0 }
 0x4fc   : > { %v2574_v9 = vsel %vm2571_vm2, %v2573_v3, %v2569_v24  ;;  %v2443_v16 = vsub.f32 1.0, %v2442_v57  ;;  %3006 = vmatpush.bf16.msra.mxu1 %v2994_v37  ;;  %v2499_v43 = vsel %vm2496_vm7, %v2498_v48, %v2494_v7  ;;  %v2515_v44 = vmul.f32 %v9154_v1, %v2514_v39 }
 0x4fd   : > { %v2575_v25 = vmul.f32 %v9150_v14, %v2574_v9  ;;  %v2990_v45 = vunpack.c.l.b16 %v2634_v51  ;;  %v2626_v21 = vpack.c.bf16 %v2440_v41, %v2440_v41  ;;  %v2500_v53 = vmul.f32 %v9156_v58, %v2499_v43  ;;  %v7880_v14 = vpop.f32.mrf.mxu2 }
 0x4fe   : > { %v2444_v63 = vmul.f32 %v5514_v23, %v2443_v16  ;;  %v2631_v34 = vpack.c.bf16 %v2515_v44, %v2515_v44  ;;  %5517 = vrcp.f32 %v7861_v22  ;;  %vm2521_vm3 = vweird.f32 %v7861_v22 }
 0x4ff   : > { %v2635_v61 = vpack.c.bf16 %v2575_v25, %v2575_v25  ;;  %v2890_v38 = vunpack.c.l.b16 %v2626_v21  ;;  %v2630_v57 = vpack.c.bf16 %v2500_v53, %v2500_v53 }
 0x500   : > { %v2445_v60 = vadd.f32 %v5514_v23, %v2444_v63  ;;  %4382 = vrot.lane.b32.xlu2 %v6567_v62, %s5730_s21  ;;  %v2941_v24 = vunpack.c.l.b16 %v2631_v34 }
 0x501   : > { %v2991_v26 = vunpack.c.l.b16 %v2635_v61  ;;  %v2940_v18 = vunpack.c.l.b16 %v2630_v57  ;;  %v5516_v61 = vpop.eup %5515 }
 0x502   : > { %v2449_v5 = vsel %vm2448_vm8, %v5514_v23, %v2445_v60  ;;  %v2577_v41 = vmul.f32 %v5516_v61, %v7819_v56  ;;  %vm2582_vm10 = vweird.f32 %v5516_v61 }
 0x503   : > { %v2454_v33 = vsel %vm2451_vm9, %v2453_v36, %v2449_v5  ;;  %v3081_v30 = vpop.permute.xlu2 %3080  ;;  %3270 = vrot.lane.b32.xlu1 %v9146_v50, %s5729_s14  ;;  %v2992_v27 = vpack.c.b16 %v2991_v26, %v2990_v45  ;;  %v2942_v54 = vpack.c.b16 %v2941_v24, %v2940_v18  ;;  %vm2583_vm14 = vmor %vm2581_vm13, %vm2582_vm10 }
 0x504   : > { %v2455_v15 = vmul.f32 %v9155_v0, %v2454_v33  ;;  %v3086_v62 = vsel %vm1348_vm11, %v3081_v30, 0  ;;  %v2578_v45 = vsub.f32 1.0, %v2577_v41  ;;  %v5518_v36 = vpop.eup %5517 }
 0x505   : > { %5227 = vmatmul.msk.bf16.vlgmr.msra.gmra.mxu1 %vm1348_vm11, %v2992_v27  ;;  %v7888_v46 = vpop.f32.mrf.mxu2  ;;  %v2517_v5 = vmul.f32 %v5518_v36, %v7861_v22  ;;  %v2587_v27 = vand.u32 2147483648, %v7819_v56  ;;  %vm2522_vm1 = vweird.f32 %v5518_v36 }
 0x506   : > { %v2627_v23 = vpack.c.bf16 %v2455_v15, %v2455_v15  ;;  %3095 = vmatpush.bf16.xpose.msrb.mxu1 %v3086_v62  ;;  %9157 = vst [vmem:[#allocation14_spill] sm:$0xff] %v7888_v46  ;;  %v2579_v43 = vmul.f32 %v5516_v61, %v2578_v45  ;;  %v2585_v15 = vand.u32 2147483647, %v7819_v56  ;;  %vm7928_vm4 = vmor %vm2521_vm3, %vm2522_vm1 }
 0x507   : > { %v2518_v21 = vsub.f32 1.0, %v2517_v5  ;;  %v2588_v53 = vor.u32 1.1754944e-38, %v2587_v27 }
 0x508   : > { %v2891_v3 = vunpack.c.l.b16 %v2627_v23  ;;  %v2580_v33 = vadd.f32 %v5516_v61, %v2579_v43  ;;  %vm2586_vm15 = vcmp.eq.f32.partialorder %v2585_v15, 8.507059e+37 }
 0x509   : > { %v2519_v23 = vmul.f32 %v5518_v36, %v2518_v21 }
 0x50a   : > { %v2892_v40 = vpack.c.b16 %v2891_v3, %v2890_v38  ;;  %v7891_v12 = vpop.permute.xlu1 %3054  ;;  %v2584_v58 = vsel %vm2583_vm14, %v5516_v61, %v2580_v33 }
 0x50b   : > { %v3079_v37 = vpop.permute.xlu2 %3078  ;;  %3342 = vrot.lane.b32.xlu1 %v6740_v59, %s5729_s14  ;;  %v2589_v57 = vsel %vm2586_vm15, %v2588_v53, %v2584_v58  ;;  %s8822_s14 = scalar_lea.vmem %s9000_s7, %s5303_s27 }
 0x50c   : > { %5223 = vmatmul.msk.bf16.vlgmr.msra.gmra.mxu3 %vm1348_vm11, %v2892_v40 }
 0x50d   : > { %3071 = vmatpush.bf16.xpose.msra.mxu3 %v3062_v31  ;;  %v2944_v49 = vpop.permute.xlu0 %2943  ;;  %v2520_v31 = vadd.f32 %v5518_v36, %v2519_v23 }
 0x50e   : > { %2956 = vmatpush.bf16.msra.mxu2 %v2944_v49 }
 0x50f   : > { %v2524_v41 = vsel %vm7928_vm4, %v5518_v36, %v2520_v31 }
 0x511   : > { %5225 = vmatmul.msk.bf16.vlgmr.msra.gmra.mxu2 %vm1348_vm11, %v2942_v54  ;;  %v9165_v54 = vld [vmem:[#allocation23_spill] sm:$0xff] }
 0x512   : > { %v7901_v39 = vpop.permute.xlu1 %3128 }
 0x513   : > { %v7870_v9 = vpop.permute.xlu2 %3126  ;;  %3320 = vrot.lane.b32.xlu1 %v9136_v17, %s5728_s13 }
 0x515   : > { %5230 = vmatmul.msk.bf16.vlgmr.msrb.gmra.mxu1 %vm1348_vm11, %v3079_v37  ;;  %v3019_v16 = vpop.permute.xlu0 %3018 }
 0x516   : > { %3031 = vmatpush.bf16.msrb.mxu2 %v3019_v16  ;;  %v2590_v16 = vmul.f32 %v9165_v54, %v2589_v57 }
 0x518   : > { %v2636_v33 = vpack.c.bf16 %v2590_v16, %v2590_v16 }
 0x51a   : > { %v3015_v36 = vunpack.c.l.b16 %v2636_v33 }
 0x51b   : > { %v7875_v51 = vpop.permute.xlu2 %3176  ;;  %3392 = vrot.lane.b32.xlu1 %v6762_v52, %s5728_s13 }
 0x51d   : > { %v3105_v55 = vpop.permute.xlu0 %3104 }
 0x51e   : > { %v3110_v11 = vsel %vm1348_vm11, %v3105_v55, 0  ;;  %v2527_v55 = vand.u32 2147483648, %v7861_v22 }
 0x51f   : > { %3119 = vmatpush.bf16.xpose.msra.mxu2 %v3110_v11 }
 0x520   : > { %v2528_v27 = vor.u32 1.1754944e-38, %v2527_v55 }
 0x523   : > { %v7882_v25 = vpop.permute.xlu2 %3198  ;;  %3416 = vrot.lane.b32.xlu1 %v6774_v42, %s5728_s13 }
 0x525   : > { %v7886_v20 = vpop.permute.xlu0 %3102 }
 0x52b   : > { %4357 = vrot.lane.b32.xlu1 %v6565_v47, %s5730_s21  ;;  %v3225_v63 = vpop.permute.xlu2 %3224  ;;  %v7905_v47 = vpop.f32.mrf.mxu1 }
 0x52c   : > { %v3230_v48 = vsel %vm1348_vm11, %v3225_v63, 0  ;;  %9159 = vst [vmem:[#allocation5_spill] sm:$0xff] %v7905_v47  ;;  %v2525_v63 = vand.u32 2147483647, %v7861_v22 }
 0x52d   : > { %v3153_v29 = vpop.permute.xlu0 %3152 }
 0x52e   : > { %v3158_v7 = vsel %vm1348_vm11, %v3153_v29, 0  ;;  %vm2526_vm7 = vcmp.eq.f32.partialorder %v2525_v63, 8.507059e+37 }
 0x52f   : > { %3167 = vmatpush.bf16.xpose.msra.mxu1 %v3158_v7  ;;  %v7897_v2 = vpop.f32.mrf.mxu2  ;;  %v2529_v15 = vsel %vm2526_vm7, %v2528_v27, %v2524_v41 }
 0x530   : > { %9158 = vst [vmem:[#allocation15_spill] sm:$0xff] %v7897_v2 }
 0x533   : > { %v7912_v30 = vpop.f32.mrf.mxu1 }
 0x534   : > { %9161 = vst [vmem:[#allocation11_spill] sm:$0xff] %v7912_v30 }
 0x535   : > { %v7903_v60 = vpop.permute.xlu0 %3174 }
 0x537   : > { %3239 = vmatpush.bf16.xpose.msrb.mxu1 %v3230_v48  ;;  %v7907_v26 = vpop.f32.mrf.mxu2  ;;  %v7933_v48 = vpop.permute.xlu2 %3222 }
 0x538   : > { %9160 = vst [vmem:[#allocation12_spill] sm:$0xff] %v7907_v26 }
 0x53b   : > { %v7921_v24 = vpop.f32.mrf.mxu1 }
 0x53c   : > { %9163 = vst [vmem:[#allocation4_spill] sm:$0xff] %v7921_v24 }
 0x53d   : > { %v2125_v1 = vpop.xlane.xlu1 %2124  ;;  %v7910_v44 = vpop.permute.xlu0 %3248 }
 0x53e   : > { %5519 = vrcp.f32 %v2125_v1  ;;  %v2602_v37 = vand.u32 2147483648, %v2125_v1  ;;  %v2600_v56 = vand.u32 2147483647, %v2125_v1  ;;  %vm2596_vm6 = vweird.f32 %v2125_v1 }
 0x53f   : > { %v7915_v0 = vpop.f32.mrf.mxu2  ;;  %v3297_v55 = vpop.permute.xlu2 %3296 }
 0x540   : > { %9162 = vst [vmem:[#allocation8_spill] sm:$0xff] %v7915_v0  ;;  %v2603_v61 = vor.u32 1.1754944e-38, %v2602_v37  ;;  %vm2601_vm5 = vcmp.eq.f32.partialorder %v2600_v56, 8.507059e+37 }
 0x544   : > { %v5520_v62 = vpop.eup %5519 }
 0x545   : > { %v2592_v34 = vmul.f32 %v5520_v62, %v2125_v1  ;;  %v2113_v38 = vpop.xlane.xlu1 %2112  ;;  %v7919_v3 = vpop.permute.xlu0 %3246  ;;  %vm2597_vm2 = vweird.f32 %v5520_v62 }
 0x546   : > { %5521 = vrcp.f32 %v2113_v38  ;;  %vm2598_vm12 = vmor %vm2596_vm6, %vm2597_vm2  ;;  %v2542_v58 = vand.u32 2147483648, %v2113_v38  ;;  %vm2536_vm9 = vweird.f32 %v2113_v38 }
 0x547   : > { %v2593_v40 = vsub.f32 1.0, %v2592_v34  ;;  %v7923_v49 = vpop.f32.mrf.mxu2  ;;  %v2540_v34 = vand.u32 2147483647, %v2113_v38 }
 0x548   : > { %9164 = vst [vmem:[#allocation16_spill] sm:$0xff] %v7923_v49  ;;  %v2543_v56 = vor.u32 1.1754944e-38, %v2542_v58 }
 0x549   : > { %v2594_v18 = vmul.f32 %v5520_v62, %v2593_v40  ;;  %v9170_v40 = vld [vmem:[#allocation24_spill] sm:$0xff]  ;;  %vm2541_vm13 = vcmp.eq.f32.partialorder %v2540_v34, 8.507059e+37 }
 0x54a   : > { %v2530_v37 = vmul.f32 %v9170_v40, %v2529_v15 }
 0x54b   : > { %v2595_v29 = vadd.f32 %v5520_v62, %v2594_v18 }
 0x54c   : > { %v5522_v7 = vpop.eup %5521  ;;  %v2632_v63 = vpack.c.bf16 %v2530_v37, %v2530_v37 }
 0x54d   : > { %v2599_v45 = vsel %vm2598_vm12, %v5520_v62, %v2595_v29  ;;  %v2532_v43 = vmul.f32 %v5522_v7, %v2113_v38  ;;  %v7937_v5 = vpop.permute.xlu0 %3344  ;;  %vm2537_vm8 = vweird.f32 %v5522_v7  ;;  %v7942_v62 = vpop.f32.mrf.mxu1  ;;  %v3182_v29 = vsel %vm1348_vm11, %v7875_v51, 0 }
 0x54e   : > { %v2604_v21 = vsel %vm2601_vm5, %v2603_v61, %v2599_v45  ;;  %9169 = vst [vmem:[#allocation9_spill] sm:$0xff] %v7942_v62  ;;  %vm2538_vm10 = vmor %vm2536_vm9, %vm2537_vm8  ;;  %v3302_v51 = vsel %vm1348_vm11, %v3297_v55, 0 }
 0x54f   : > { %v2605_v22 = vmul.f32 %v7686_v28, %v2604_v21  ;;  %v2533_v1 = vsub.f32 1.0, %v2532_v43  ;;  %v7940_v57 = vpop.f32.mrf.mxu2 }
 0x550   : > { %9168 = vst [vmem:[#allocation13_spill] sm:$0xff] %v7940_v57 }
 0x551   : > { %v2637_v53 = vpack.c.bf16 %v2605_v22, %v2605_v22  ;;  %v2534_v23 = vmul.f32 %v5522_v7, %v2533_v1  ;;  %v3319_v1 = vpop.permute.xlu2 %3318 }
 0x553   : > { %v3016_v31 = vunpack.c.l.b16 %v2637_v53  ;;  %v2535_v18 = vadd.f32 %v5522_v7, %v2534_v23  ;;  %v3254_v23 = vsel %vm1348_vm11, %v7910_v44, 0 }
 0x555   : > { %v3017_v28 = vpack.c.b16 %v3016_v31, %v3015_v36  ;;  %v2539_v54 = vsel %vm2538_vm10, %v5522_v7, %v2535_v18  ;;  %v3295_v16 = vpop.permute.xlu0 %3294  ;;  %v2965_v7 = vunpack.c.l.b16 %v2632_v63  ;;  %v7953_v33 = vpop.f32.mrf.mxu1 }
 0x556   : > { %v2544_v11 = vsel %vm2541_vm13, %v2543_v56, %v2539_v54  ;;  %9172 = vst [vmem:[#allocation10_spill] sm:$0xff] %v7953_v33 }
 0x557   : > { %v2545_v61 = vmul.f32 %v7715_v35, %v2544_v11  ;;  %5228 = vmatmul.msk.bf16.vlgmr.msrb.gmra.mxu2 %vm1348_vm11, %v3017_v28  ;;  %v7949_v45 = vpop.f32.mrf.mxu2  ;;  %v3134_v35 = vsel %vm1348_vm11, %v7901_v39, 0 }
 0x558   : > { %3191 = vmatpush.bf16.xpose.msrb.mxu2 %v3182_v29  ;;  %9171 = vst [vmem:[#allocation7_spill] sm:$0xff] %v7949_v45 }
 0x559   : > { %v2633_v41 = vpack.c.bf16 %v2545_v61, %v2545_v61  ;;  %v3369_v34 = vpop.permute.xlu2 %3368 }
 0x55a   : > { %v3374_v40 = vsel %vm1348_vm11, %v3369_v34, 0 }
 0x55b   : > { %v2966_v43 = vunpack.c.l.b16 %v2633_v41 }
 0x55d   : > { %v3151_v27 = vpop.permute.xlu1 %3150  ;;  %v3367_v21 = vpop.permute.xlu0 %3366  ;;  %v2967_v22 = vpack.c.b16 %v2966_v43, %v2965_v7 }
 0x55e   : > { %5233 = vmatmul.msk.bf16.vlgmr.msra.gmra.mxu1 %vm1348_vm11, %v3151_v27  ;;  %v7962_v53 = vpop.f32.mrf.mxu1  ;;  %v8007_v43 = vpop.f32.mrf.mxu3 }
 0x55f   : > { %3311 = vmatpush.bf16.xpose.msra.mxu1 %v3302_v51  ;;  %5226 = vmatmul.msk.bf16.vlgmr.msrb.gmra.mxu3 %vm1348_vm11, %v2967_v22  ;;  %9173 = vst [vmem:[#allocation3_spill] sm:$0xff] %v7962_v53 }
 0x560   : > { %3143 = vmatpush.bf16.xpose.msrb.mxu3 %v3134_v35  ;;  %9179 = vst [vmem:[#allocation20_spill] sm:$0xff] %v8007_v43  ;;  %v5654_v35 = vld [vmem:[%s8994_s1 + $0x18] sm:$0xff] }
 0x565   : > { %v3201_v15 = vpop.permute.xlu1 %3200  ;;  %v7960_v58 = vpop.permute.xlu0 %3414 }
 0x566   : > { %v3206_v37 = vsel %vm1348_vm11, %v3201_v15, 0  ;;  %v7974_v44 = vpop.f32.mrf.mxu1  ;;  %v8022_v34 = vpop.f32.mrf.mxu3 }
 0x567   : > { %5231 = vmatmul.msk.bf16.vlgmr.msra.gmra.mxu2 %vm1348_vm11, %v7886_v20  ;;  %9174 = vst [vmem:[#allocation19_spill] sm:$0xff] %v7974_v44  ;;  %v3391_v20 = vpop.permute.xlu2 %3390 }
 0x568   : > { %3263 = vmatpush.bf16.xpose.msra.mxu2 %v3254_v23  ;;  %9181 = vst [vmem:[#allocation17_spill] sm:$0xff] %v8022_v34 }
 0x56d   : > { %v3273_v36 = vpop.permute.xlu1 %3272  ;;  %v4308_v39 = vpop.permute.xlu0 %4307 }
 0x56e   : > { %5236 = vmatmul.msk.bf16.vlgmr.msrb.gmra.mxu1 %vm1348_vm11, %v7933_v48  ;;  %4320 = vmatpush.bf16.msrb.mxu0 %v4308_v39  ;;  %v7978_v18 = vpop.f32.mrf.mxu1  ;;  %v3278_v48 = vsel %vm1348_vm11, %v3273_v36, 0  ;;  %v8025_v36 = vpop.f32.mrf.mxu3 }
 0x56f   : > { %3383 = vmatpush.bf16.xpose.msrb.mxu1 %v3374_v40  ;;  %5229 = vmatmul.msk.bf16.vlgmr.msra.gmra.mxu3 %vm1348_vm11, %v7891_v12  ;;  %9175 = vst [vmem:[#allocation6_spill] sm:$0xff] %v7978_v18  ;;  %v4333_v28 = vpop.permute.xlu2 %4332  ;;  %v5672_v18 = vld [vmem:[%s8994_s1 + $0xc8] sm:$0xff] }
 0x570   : > { %3215 = vmatpush.bf16.xpose.msra.mxu3 %v3206_v37  ;;  %9182 = vst [vmem:[#allocation23_spill] sm:$0xff] %v8025_v36 }
 0x575   : > { %v3271_v31 = vpop.permute.xlu1 %3270 }
 0x576   : > { %v8028_v40 = vpop.f32.mrf.mxu3 }
 0x577   : > { %5234 = vmatmul.msk.bf16.vlgmr.msrb.gmra.mxu2 %vm1348_vm11, %v7903_v60  ;;  %v4383_v39 = vpop.permute.xlu2 %4382  ;;  %9183 = vst [vmem:[#allocation24_spill] sm:$0xff] %v8028_v40 }
 0x57d   : > { %v3343_v56 = vpop.permute.xlu1 %3342 }
 0x57e   : > { %5239 = vmatmul.msk.bf16.vlgmr.msra.gmra.mxu1 %vm1348_vm11, %v3295_v16  ;;  %v8030_v37 = vpop.f32.mrf.mxu3 }
 0x57f   : > { %4345 = vmatpush.bf16.msra.mxu1 %v4333_v28  ;;  %5232 = vmatmul.msk.bf16.vlgmr.msrb.gmra.mxu3 %vm1348_vm11, %v7870_v9  ;;  %v3350_v9 = vsel %vm1348_vm11, %v7937_v5, 0  ;;  %9184 = vst [vmem:[#allocation25_spill] sm:$0xff] %v8030_v37 }
 0x580   : > { %3287 = vmatpush.bf16.xpose.msrb.mxu3 %v3278_v48 }
 0x582   : > { %v7984_v12 = vpop.f32.mrf.mxu1 }
 0x583   : > { %9176 = vst [vmem:[#allocation2_spill] sm:$0xff] %v7984_v12 }
 0x585   : > { %v3321_v54 = vpop.permute.xlu1 %3320 }
 0x586   : > { %v3326_v55 = vsel %vm1348_vm11, %v3321_v54, 0 }
 0x587   : > { %5237 = vmatmul.msk.bf16.vlgmr.msra.gmra.mxu2 %vm1348_vm11, %v7919_v3  ;;  %v5653_v3 = vld [vmem:[%s8994_s1 + $0x10] sm:$0xff] }
 0x588   : > { %3335 = vmatpush.bf16.xpose.msrb.mxu2 %v3326_v55 }
 0x58a   : > { %v7989_v60 = vpop.f32.mrf.mxu1 }
 0x58b   : > { %9177 = vst [vmem:[#allocation21_spill] sm:$0xff] %v7989_v60 }
 0x58d   : > { %v3393_v11 = vpop.permute.xlu1 %3392 }
 0x58e   : > { %v3398_v16 = vsel %vm1348_vm11, %v3393_v11, 0  ;;  %5242 = vmatmul.msk.bf16.vlgmr.msrb.gmra.mxu1 %vm1348_vm11, %v3367_v21 }
 0x58f   : > { %5235 = vmatmul.msk.bf16.vlgmr.msra.gmra.mxu3 %vm1348_vm11, %v7882_v25 }
 0x590   : > { %3407 = vmatpush.bf16.xpose.msra.mxu2 %v3398_v16  ;;  %3359 = vmatpush.bf16.xpose.msra.mxu3 %v3350_v9 }
 0x592   : > { %v3097_v63 = vpop.f32.mrf.mxu1 }
 0x593   : > { %v3440_v29 = vmul.f32 0.25, %v3097_v63 }
 0x594   : > { %v7997_v61 = vpop.f32.mrf.mxu2 }
 0x595   : > { %9178 = vst [vmem:[#allocation18_spill] sm:$0xff] %v7997_v61  ;;  %v8002_v41 = vadd.f32 %v5653_v3, %v3440_v29  ;;  %v3417_v7 = vpop.permute.xlu1 %3416 }
 0x597   : > { %5240 = vmatmul.msk.bf16.vlgmr.msrb.gmra.mxu2 %vm1348_vm11, %v3319_v1  ;;  %v3508_v5 = vsel %vm1348_vm11, %v8002_v41, -inf  ;;  %v3422_v1 = vsel %vm1348_vm11, %v3417_v7, 0  ;;  %v5656_v7 = vld [vmem:[%s8994_s1 + $0x48] sm:$0xff] }
 0x598   : > { %3509 = vmax.xlane.f32.xlu2 %v3508_v5 }
 0x59a   : > { %v3099_v25 = vpop.f32.mrf.mxu1 }
 0x59b   : > { %v3441_v27 = vmul.f32 0.25, %v3099_v25 }
 0x59c   : > { %v8009_v21 = vpop.f32.mrf.mxu2 }
 0x59d   : > { %9180 = vst [vmem:[#allocation22_spill] sm:$0xff] %v8009_v21  ;;  %v4358_v51 = vpop.permute.xlu1 %4357  ;;  %v8016_v15 = vadd.f32 %v5654_v35, %v3441_v27 }
 0x59e   : > { %4370 = vmatpush.bf16.msrb.mxu2 %v4358_v51 }
 0x59f   : > { %5238 = vmatmul.msk.bf16.vlgmr.msrb.gmra.mxu3 %vm1348_vm11, %v3271_v31  ;;  %v3511_v23 = vsel %vm1348_vm11, %v8016_v15, -inf  ;;  %v8034_v31 = vpop.f32.mrf.mxu3 }
 0x5a0   : > { %3431 = vmatpush.bf16.xpose.msrb.mxu3 %v3422_v1  ;;  %3512 = vmax.xlane.f32.xlu0 %v3511_v23  ;;  %9185 = vst [vmem:[#allocation26_spill] sm:$0xff] %v8034_v31  ;;  %v5657_v1 = vld [vmem:[%s8994_s1 + $0x20] sm:$0xff] }
 0x5a7   : > { %5243 = vmatmul.msk.bf16.vlgmr.msra.gmra.mxu2 %vm1348_vm11, %v3391_v20  ;;  %v8036_v28 = vpop.f32.mrf.mxu3 }
 0x5a8   : > { %9186 = vst [vmem:[#allocation27_spill] sm:$0xff] %v8036_v28 }
 0x5af   : > { %5241 = vmatmul.msk.bf16.vlgmr.msra.gmra.mxu3 %vm1348_vm11, %v3343_v56  ;;  %v8038_v48 = vpop.f32.mrf.mxu3  ;;  %v5655_v56 = vld [vmem:[%s8994_s1 + $0x40] sm:$0xff] }
 0x5b0   : > { %4395 = vmatpush.bf16.msra.mxu3 %v4383_v39  ;;  %9187 = vst [vmem:[#allocation28_spill] sm:$0xff] %v8038_v48 }
 0x5bf   : > { %5244 = vmatmul.msk.bf16.vlgmr.msrb.gmra.mxu3 %vm1348_vm11, %v7960_v58 }
 0x5da   : > { %v8040_v20 = vpop.f32.mrf.mxu2 }
 0x5db   : > { %9188 = vst [vmem:[#allocation29_spill] sm:$0xff] %v8040_v20  ;;  %v3169_v54 = vpop.f32.mrf.mxu1  ;;  %v5661_v20 = vld [vmem:[%s8994_s1 + $0x78] sm:$0xff] }
 0x5dc   : > { %v3446_v55 = vmul.f32 0.25, %v3169_v54 }
 0x5de   : > { %v8045_v11 = vadd.f32 %v5655_v56, %v3446_v55 }
 0x5e0   : > { %v3526_v16 = vsel %vm1348_vm11, %v8045_v11, -inf }
 0x5e1   : > { %3527 = vmax.xlane.f32.xlu1 %v3526_v16 }
 0x5e2   : > { %v8049_v58 = vpop.f32.mrf.mxu3  ;;  %v8051_v9 = vpop.f32.mrf.mxu2 }
 0x5e3   : > { %9189 = vst [vmem:[#allocation30_spill] sm:$0xff] %v8049_v58  ;;  %v3171_v29 = vpop.f32.mrf.mxu1 }
 0x5e4   : > { %9190 = vst [vmem:[#allocation31_spill] sm:$0xff] %v8051_v9  ;;  %v3447_v3 = vmul.f32 0.25, %v3171_v29  ;;  %v5658_v29 = vld [vmem:[%s8994_s1] sm:$0xff] }
 0x5e6   : > { %v8058_v5 = vadd.f32 %v5656_v7, %v3447_v3 }
 0x5e8   : > { %v3529_v25 = vsel %vm1348_vm11, %v8058_v5, -inf }
 0x5e9   : > { %3530 = vmax.xlane.f32.xlu2 %v3529_v25 }
 0x5ea   : > { %v8062_v27 = vpop.f32.mrf.mxu3  ;;  %v3121_v51 = vpop.f32.mrf.mxu2 }
 0x5eb   : > { %9191 = vst [vmem:[#allocation32_spill] sm:$0xff] %v8062_v27  ;;  %v3442_v35 = vmul.f32 0.25, %v3121_v51  ;;  %v3241_v54 = vpop.f32.mrf.mxu1 }
 0x5ed   : > { %v8067_v23 = vadd.f32 %v5657_v1, %v3442_v35  ;;  %v5659_v1 = vld [vmem:[%s8994_s1 + $0x28] sm:$0xff] }
 0x5ef   : > { %v3514_v39 = vsel %vm1348_vm11, %v8067_v23, -inf }
 0x5f0   : > { %3515 = vmax.xlane.f32.xlu0 %v3514_v39 }
 0x5f2   : > { %v3073_v55 = vpop.f32.mrf.mxu3  ;;  %v3123_v56 = vpop.f32.mrf.mxu2 }
 0x5f3   : > { %v3438_v16 = vmul.f32 0.25, %v3073_v55  ;;  %v3443_v7 = vmul.f32 0.25, %v3123_v56  ;;  %v3243_v63 = vpop.f32.mrf.mxu1 }
 0x5f4   : > { %v3453_v56 = vmul.f32 0.25, %v3243_v63  ;;  %v5662_v63 = vld [vmem:[%s8994_s1 + $0x50] sm:$0xff] }
 0x5f5   : > { %v8074_v3 = vadd.f32 %v5658_v29, %v3438_v16  ;;  %v8081_v39 = vadd.f32 %v5659_v1, %v3443_v7  ;;  %v5660_v16 = vld [vmem:[%s8994_s1 + $0x8] sm:$0xff] }
 0x5f6   : > { %v8095_v9 = vadd.f32 %v5661_v20, %v3453_v56  ;;  %v3452_v56 = vmul.f32 0.25, %v3241_v54 }
 0x5f7   : > { %v3502_v25 = vsel %vm1348_vm11, %v8074_v3, -inf }
 0x5f8   : > { %3503 = vmax.xlane.f32.xlu0 %v3502_v25  ;;  %v3517_v25 = vsel %vm1348_vm11, %v8081_v39, -inf  ;;  %v3547_v20 = vsel %vm1348_vm11, %v8095_v9, -inf }
 0x5fa   : > { %v3075_v51 = vpop.f32.mrf.mxu3  ;;  %v3193_v35 = vpop.f32.mrf.mxu2 }
 0x5fb   : > { %v3439_v55 = vmul.f32 0.25, %v3075_v51  ;;  %v3448_v38 = vmul.f32 0.25, %v3193_v35  ;;  %v5663_v35 = vld [vmem:[%s8994_s1 + $0x30] sm:$0xff] }
 0x5fd   : > { %v8086_v29 = vadd.f32 %v5660_v16, %v3439_v55  ;;  %v8100_v55 = vadd.f32 %v5662_v63, %v3448_v38 }
 0x5ff   : > { %v3505_v22 = vsel %vm1348_vm11, %v8086_v29, -inf  ;;  %v3532_v38 = vsel %vm1348_vm11, %v8100_v55, -inf }
 0x600   : > { %3518 = vmax.xlane.f32.xlu0 %v3517_v25  ;;  %3506 = vmax.xlane.f32.xlu1 %v3505_v22 }
 0x602   : > { %v3145_v7 = vpop.f32.mrf.mxu3  ;;  %v3195_v1 = vpop.f32.mrf.mxu2 }
 0x603   : > { %v3444_v51 = vmul.f32 0.25, %v3145_v7  ;;  %v3449_v16 = vmul.f32 0.25, %v3195_v1 }
 0x605   : > { %v8105_v22 = vadd.f32 %v5663_v35, %v3444_v51  ;;  %v5664_v51 = vld [vmem:[%s8994_s1 + $0x58] sm:$0xff]  ;;  %v5665_v35 = vld [vmem:[%s8994_s1 + $0x70] sm:$0xff] }
 0x606   : > { %v8116_v1 = vadd.f32 %v5664_v51, %v3449_v16  ;;  %v8121_v60 = vadd.f32 %v5665_v35, %v3452_v56  ;;  %v5666_v16 = vld [vmem:[%s8994_s1 + $0x80] sm:$0xff] }
 0x607   : > { %v3520_v25 = vsel %vm1348_vm11, %v8105_v22, -inf }
 0x608   : > { %3521 = vmax.xlane.f32.xlu2 %v3520_v25  ;;  %3548 = vmax.xlane.f32.xlu0 %v3547_v20  ;;  %v3535_v25 = vsel %vm1348_vm11, %v8116_v1, -inf }
 0x609   : > { %3533 = vmax.xlane.f32.xlu1 %v3532_v38  ;;  %v3544_v38 = vsel %vm1348_vm11, %v8121_v60, -inf }
 0x60a   : > { %v3147_v7 = vpop.f32.mrf.mxu3  ;;  %v3265_v63 = vpop.f32.mrf.mxu2 }
 0x60b   : > { %v3454_v54 = vmul.f32 0.25, %v3265_v63  ;;  %v3445_v20 = vmul.f32 0.25, %v3147_v7  ;;  %v3510_v63 = vpop.xlane.xlu2 %3509  ;;  %v5667_v7 = vld [vmem:[%s8994_s1 + $0x38] sm:$0xff] }
 0x60d   : > { %v8130_v51 = vadd.f32 %v5666_v16, %v3454_v54  ;;  %v8136_v61 = vadd.f32 %v5667_v7, %v3445_v20  ;;  %v3600_v54 = vsub.f32 %v8002_v41, %v3510_v63  ;;  %v5669_v41 = vld [vmem:[%s8994_s1 + $0x60] sm:$0xff] }
 0x60f   : > { %v3523_v20 = vsel %vm1348_vm11, %v8136_v61, -inf }
 0x610   : > { %3536 = vmax.xlane.f32.xlu2 %v3535_v25  ;;  %v5668_v25 = vld [vmem:[%s8994_s1 + $0x88] sm:$0xff] }
 0x611   : > { %3545 = vmax.xlane.f32.xlu1 %v3544_v38 }
 0x612   : > { %v3217_v12 = vpop.f32.mrf.mxu3  ;;  %v3267_v27 = vpop.f32.mrf.mxu2 }
 0x613   : > { %v3455_v56 = vmul.f32 0.25, %v3267_v27  ;;  %v3513_v35 = vpop.xlane.xlu0 %3512  ;;  %v3550_v27 = vsel %vm1348_vm11, %v8130_v51, -inf  ;;  %v3450_v16 = vmul.f32 0.25, %v3217_v12  ;;  %v5670_v12 = vld [vmem:[%s8994_s1 + $0x68] sm:$0xff] }
 0x614   : > { %v3601_v58 = vsub.f32 %v8016_v15, %v3513_v35 }
 0x615   : > { %v8141_v38 = vadd.f32 %v5668_v25, %v3455_v56  ;;  %v3634_v56 = vmul.f32 1.442695, %v3600_v54 }
 0x616   : > { %v3636_v21 = vmul.f32 1.442695, %v3601_v58  ;;  %v8153_v58 = vadd.f32 %v5669_v41, %v3450_v16  ;;  %v5671_v41 = vld [vmem:[%s8994_s1 + $0xc0] sm:$0xff] }
 0x617   : > { %v3553_v15 = vsel %vm1348_vm11, %v8141_v38, -inf }
 0x618   : > { %5523 = vpow2.f32 %v3636_v21  ;;  %3551 = vmax.xlane.f32.xlu2 %v3550_v27  ;;  %3554 = vmax.xlane.f32.xlu0 %v3553_v15  ;;  %v3538_v27 = vsel %vm1348_vm11, %v8153_v58, -inf }
 0x619   : > { %3524 = vmax.xlane.f32.xlu1 %v3523_v20  ;;  %5525 = vpow2.f32 %v3634_v56 }
 0x61a   : > { %v3219_v35 = vpop.f32.mrf.mxu3 }
 0x61b   : > { %v3451_v7 = vmul.f32 0.25, %v3219_v35 }
 0x61d   : > { %v8158_v21 = vadd.f32 %v5670_v12, %v3451_v7 }
 0x61e   : > { %v8160_v63 = vpop.eup %5523 }
 0x61f   : > { %v3541_v25 = vsel %vm1348_vm11, %v8158_v21, -inf  ;;  %v3703_v54 = vsel %vm1348_vm11, %v8160_v63, 0.0  ;;  %v8170_v16 = vpop.eup %5525 }
 0x620   : > { %3542 = vmax.xlane.f32.xlu0 %v3541_v25  ;;  %3704 = vadd.xlane.f32.xlu2 %v3703_v54  ;;  %v3700_v20 = vsel %vm1348_vm11, %v8170_v16, 0.0 }
 0x621   : > { %3539 = vmax.xlane.f32.xlu1 %v3538_v27 }
 0x622   : > { %v8168_v15 = vpop.f32.mrf.mxu3 }
 0x629   : > { %3701 = vadd.xlane.f32.xlu1 %v3700_v20 }
 0x62a   : > { %v3291_v35 = vpop.f32.mrf.mxu3 }
 0x632   : > { %v3361_v56 = vpop.f32.mrf.mxu3 }
 0x633   : > { %v3462_v7 = vmul.f32 0.25, %v3361_v56 }
 0x635   : > { %v8177_v12 = vadd.f32 %v5671_v41, %v3462_v7 }
 0x637   : > { %v3574_v25 = vsel %vm1348_vm11, %v8177_v12, -inf }
 0x638   : > { %3575 = vmax.xlane.f32.xlu0 %v3574_v25 }
 0x63a   : > { %v3363_v54 = vpop.f32.mrf.mxu3 }
 0x63b   : > { %v3463_v27 = vmul.f32 0.25, %v3363_v54 }
 0x63d   : > { %v8184_v20 = vadd.f32 %v5672_v18, %v3463_v27  ;;  %v3313_v27 = vpop.f32.mrf.mxu1 }
 0x63f   : > { %v3577_v56 = vsel %vm1348_vm11, %v8184_v20, -inf }
 0x640   : > { %3578 = vmax.xlane.f32.xlu0 %v3577_v56 }
 0x654   : > { %v3528_v44 = vpop.xlane.xlu1 %3527 }
 0x655   : > { %v3606_v7 = vsub.f32 %v8045_v11, %v3528_v44 }
 0x657   : > { %v3646_v41 = vmul.f32 1.442695, %v3606_v7  ;;  %v3457_v7 = vmul.f32 0.25, %v3291_v35 }
 0x659   : > { %5527 = vpow2.f32 %v3646_v41 }
 0x65c   : > { %v3531_v48 = vpop.xlane.xlu2 %3530 }
 0x65d   : > { %v3607_v44 = vsub.f32 %v8058_v5, %v3531_v48 }
 0x65f   : > { %v8189_v31 = vpop.eup %5527 }
 0x660   : > { %v3718_v25 = vsel %vm1348_vm11, %v8189_v31, 0.0 }
 0x661   : > { %3719 = vadd.xlane.f32.xlu0 %v3718_v25  ;;  %v3648_v25 = vmul.f32 1.442695, %v3607_v44 }
 0x663   : > { %v3516_v54 = vpop.xlane.xlu0 %3515 }
 0x664   : > { %v3602_v37 = vsub.f32 %v8067_v23, %v3516_v54  ;;  %v5673_v54 = vld [vmem:[%s8994_s1 + $0x98] sm:$0xff] }
 0x666   : > { %v3638_v18 = vmul.f32 1.442695, %v3602_v37 }
 0x668   : > { %5529 = vpow2.f32 %v3638_v18  ;;  %v8203_v18 = vadd.f32 %v5673_v54, %v3457_v7  ;;  %v3337_v7 = vpop.f32.mrf.mxu2 }
 0x66a   : > { %v3559_v44 = vsel %vm1348_vm11, %v8203_v18, -inf }
 0x66b   : > { %v3504_v28 = vpop.xlane.xlu0 %3503 }
 0x66c   : > { %v3598_v56 = vsub.f32 %v8074_v3, %v3504_v28  ;;  %v3315_v28 = vpop.f32.mrf.mxu1 }
 0x66d   : > { %v3459_v35 = vmul.f32 0.25, %v3315_v28 }
 0x66e   : > { %v8195_v49 = vpop.eup %5529  ;;  %v3630_v11 = vmul.f32 1.442695, %v3598_v56 }
 0x66f   : > { %v3706_v41 = vsel %vm1348_vm11, %v8195_v49, 0.0 }
 0x670   : > { %5531 = vpow2.f32 %v3630_v11  ;;  %3707 = vadd.xlane.f32.xlu1 %v3706_v41 }
 0x671   : > { %5533 = vpow2.f32 %v3648_v25 }
 0x673   : > { %v3507_v23 = vpop.xlane.xlu1 %3506  ;;  %v3519_v37 = vpop.xlane.xlu0 %3518 }
 0x674   : > { %v3603_v3 = vsub.f32 %v8081_v39, %v3519_v37  ;;  %v3599_v56 = vsub.f32 %v8086_v29, %v3507_v23  ;;  %v5674_v39 = vld [vmem:[%s8994_s1 + $0xa8] sm:$0xff]  ;;  %v3458_v37 = vmul.f32 0.25, %v3313_v27  ;;  %v5675_v27 = vld [vmem:[%s8994_s1 + $0xa0] sm:$0xff] }
 0x675   : > { %v8218_v25 = vadd.f32 %v5674_v39, %v3459_v35  ;;  %v3339_v39 = vpop.f32.mrf.mxu2 }
 0x676   : > { %v8206_v48 = vpop.eup %5531  ;;  %v3640_v5 = vmul.f32 1.442695, %v3603_v3  ;;  %v3632_v41 = vmul.f32 1.442695, %v3599_v56  ;;  %v3460_v3 = vmul.f32 0.25, %v3337_v7  ;;  %v3461_v0 = vmul.f32 0.25, %v3339_v39 }
 0x677   : > { %v3694_v11 = vsel %vm1348_vm11, %v8206_v48, 0.0  ;;  %v8220_v29 = vpop.eup %5533 }
 0x678   : > { %3560 = vmax.xlane.f32.xlu1 %v3559_v44  ;;  %3695 = vadd.xlane.f32.xlu0 %v3694_v11  ;;  %5535 = vpow2.f32 %v3640_v5  ;;  %v3565_v5 = vsel %vm1348_vm11, %v8218_v25, -inf  ;;  %v3721_v56 = vsel %vm1348_vm11, %v8220_v29, 0.0  ;;  %v8235_v44 = vadd.f32 %v5675_v27, %v3458_v37  ;;  %v5676_v11 = vld [vmem:[%s8994_s1 + $0xb0] sm:$0xff] }
 0x679   : > { %5537 = vpow2.f32 %v3632_v41  ;;  %v8240_v7 = vadd.f32 %v5676_v11, %v3460_v3  ;;  %v5677_v3 = vld [vmem:[%s8994_s1 + $0xb8] sm:$0xff] }
 0x67a   : > { %v3562_v37 = vsel %vm1348_vm11, %v8235_v44, -inf  ;;  %v8255_v11 = vadd.f32 %v5677_v3, %v3461_v0 }
 0x67b   : > { %v8213_v54 = vpop.xlane.xlu2 %3521 }
 0x67c   : > { %v8222_v23 = vpop.xlane.xlu1 %3533  ;;  %v3571_v45 = vsel %vm1348_vm11, %v8255_v11, -inf }
 0x67e   : > { %v8224_v28 = vpop.eup %5535 }
 0x67f   : > { %v3709_v35 = vsel %vm1348_vm11, %v8224_v28, 0.0 }
 0x680   : > { %3566 = vmax.xlane.f32.xlu1 %v3565_v5  ;;  %3722 = vadd.xlane.f32.xlu0 %v3721_v56  ;;  %v8244_v56 = vpop.eup %5537 }
 0x681   : > { %3710 = vadd.xlane.f32.xlu2 %v3709_v35  ;;  %v3568_v35 = vsel %vm1348_vm11, %v8240_v7, -inf  ;;  %v3697_v27 = vsel %vm1348_vm11, %v8244_v56, 0.0 }
 0x683   : > { %v8242_v41 = vpop.xlane.xlu2 %3536 }
 0x684   : > { %v3546_v5 = vpop.xlane.xlu1 %3545 }
 0x688   : > { %3569 = vmax.xlane.f32.xlu1 %v3568_v35  ;;  %3563 = vmax.xlane.f32.xlu0 %v3562_v37 }
 0x689   : > { %3698 = vadd.xlane.f32.xlu2 %v3697_v27 }
 0x68b   : > { %v8257_v57 = vpop.xlane.xlu2 %3551 }
 0x68c   : > { %v8259_v39 = vpop.xlane.xlu1 %3524 }
 0x690   : > { %3572 = vmax.xlane.f32.xlu1 %v3571_v45 }
 0x693   : > { %v3705_v35 = vpop.xlane.xlu2 %3704 }
 0x694   : > { %v8263_v37 = vpop.xlane.xlu1 %3539  ;;  %5539 = vrcp.f32 %v3705_v35  ;;  %v3846_v33 = vand.u32 2147483648, %v3705_v35  ;;  %vm3840_vm15 = vweird.f32 %v3705_v35  ;;  %v3844_v45 = vand.u32 2147483647, %v3705_v35 }
 0x696   : > { %v3847_v2 = vor.u32 1.1754944e-38, %v3846_v33  ;;  %vm3845_vm2 = vcmp.eq.f32.partialorder %v3844_v45, 8.507059e+37  ;;  %v3612_v45 = vsub.f32 %v8121_v60, %v3546_v5 }
 0x69a   : > { %v5540_v62 = vpop.eup %5539 }
 0x69b   : > { %v3836_v27 = vmul.f32 %v5540_v62, %v3705_v35  ;;  %vm3841_vm14 = vweird.f32 %v5540_v62 }
 0x69c   : > { %v3702_v24 = vpop.xlane.xlu1 %3701  ;;  %4432 = vrot.lane.b32.xlu0 %v6620_v8, %s5730_s21  ;;  %vm3842_vm1 = vmor %vm3840_vm15, %vm3841_vm14 }
 0x69d   : > { %v3837_v0 = vsub.f32 1.0, %v3836_v27  ;;  %5541 = vrcp.f32 %v3702_v24  ;;  %v3831_v8 = vand.u32 2147483648, %v3702_v24  ;;  %vm3825_vm4 = vweird.f32 %v3702_v24 }
 0x69f   : > { %v3838_v3 = vmul.f32 %v5540_v62, %v3837_v0  ;;  %v3829_v0 = vand.u32 2147483647, %v3702_v24  ;;  %v3832_v35 = vor.u32 1.1754944e-38, %v3831_v8 }
 0x6a1   : > { %v3839_v53 = vadd.f32 %v5540_v62, %v3838_v3  ;;  %4407 = vrot.lane.b32.xlu2 %v6593_v13, %s5730_s21  ;;  %vm3830_vm12 = vcmp.eq.f32.partialorder %v3829_v0, 8.507059e+37 }
 0x6a3   : > { %v5542_v40 = vpop.eup %5541  ;;  %v3843_v36 = vsel %vm3842_vm1, %v5540_v62, %v3839_v53 }
 0x6a4   : > { %v3821_v26 = vmul.f32 %v5542_v40, %v3702_v24  ;;  %v3848_v47 = vsel %vm3845_vm2, %v3847_v2, %v3843_v36  ;;  %vm3826_vm3 = vweird.f32 %v5542_v40  ;;  %v3549_v2 = vpop.xlane.xlu0 %3548  ;;  %v3609_v24 = vsub.f32 %v8116_v1, %v8242_v41 }
 0x6a5   : > { %v3849_v3 = vmul.f32 %v8160_v63, %v3848_v47  ;;  %vm3827_vm6 = vmor %vm3825_vm4, %vm3826_vm3  ;;  %v3658_v47 = vmul.f32 1.442695, %v3612_v45  ;;  %v3608_v63 = vsub.f32 %v8100_v55, %v8222_v23  ;;  %v3604_v55 = vsub.f32 %v8105_v22, %v8213_v54 }
 0x6a6   : > { %v3822_v30 = vsub.f32 1.0, %v3821_v26  ;;  %v3614_v45 = vsub.f32 %v8130_v51, %v8257_v57 }
 0x6a7   : > { %v4273_v33 = vpack.c.bf16 %v3849_v3, %v3849_v3  ;;  %5543 = vpow2.f32 %v3658_v47  ;;  %v3642_v41 = vmul.f32 1.442695, %v3604_v55 }
 0x6a8   : > { %v3823_v27 = vmul.f32 %v5542_v40, %v3822_v30 }
 0x6a9   : > { %4507 = vrot.lane.b32.xlu1 %v9132_v10, %s5730_s21  ;;  %v4330_v30 = vunpack.c.l.b16 %v4273_v33 }
 0x6aa   : > { %v3824_v13 = vadd.f32 %v5542_v40, %v3823_v27  ;;  %v3650_v27 = vmul.f32 1.442695, %v3608_v63 }
 0x6ac   : > { %v3828_v34 = vsel %vm3827_vm6, %v5542_v40, %v3824_v13  ;;  %v8275_v10 = vpop.xlane.xlu0 %3554  ;;  %v3456_v40 = vmul.f32 0.25, %v8168_v15  ;;  %v3613_v13 = vsub.f32 %v8095_v9, %v3549_v2 }
 0x6ad   : > { %v3833_v62 = vsel %vm3830_vm12, %v3832_v35, %v3828_v34  ;;  %v3652_v34 = vmul.f32 1.442695, %v3609_v24  ;;  %v8282_v8 = vpop.eup %5543  ;;  %v3662_v24 = vmul.f32 1.442695, %v3614_v45 }
 0x6ae   : > { %v3834_v26 = vmul.f32 %v8170_v16, %v3833_v62  ;;  %v3736_v1 = vsel %vm1348_vm11, %v8282_v8, 0.0  ;;  %v3660_v62 = vmul.f32 1.442695, %v3613_v13 }
 0x6af   : > { %5545 = vpow2.f32 %v3652_v34 }
 0x6b0   : > { %v4272_v53 = vpack.c.bf16 %v3834_v26, %v3834_v26  ;;  %5547 = vpow2.f32 %v3650_v27 }
 0x6b2   : > { %v4329_v36 = vunpack.c.l.b16 %v4272_v53  ;;  %v3605_v53 = vsub.f32 %v8136_v61, %v8259_v39 }
 0x6b4   : > { %v4331_v43 = vpack.c.b16 %v4330_v30, %v4329_v36  ;;  %v3543_v16 = vpop.xlane.xlu0 %3542  ;;  %v3644_v30 = vmul.f32 1.442695, %v3605_v53 }
 0x6b5   : > { %v3611_v60 = vsub.f32 %v8158_v21, %v3543_v16  ;;  %v8296_v21 = vpop.eup %5545  ;;  %v3615_v16 = vsub.f32 %v8141_v38, %v8275_v10 }
 0x6b6   : > { %5246 = vmatmul.msk.bf16.vlgmr.msra.gmra.mxu1 %vm1348_vm11, %v4331_v43  ;;  %v5678_v43 = vld [vmem:[%s8994_s1 + $0x90] sm:$0xff]  ;;  %v3727_v0 = vsel %vm1348_vm11, %v8296_v21, 0.0  ;;  %v8300_v3 = vpop.eup %5547 }
 0x6b7   : > { %v8288_v5 = vadd.f32 %v5678_v43, %v3456_v40  ;;  %v3656_v15 = vmul.f32 1.442695, %v3611_v60  ;;  %v3724_v54 = vsel %vm1348_vm11, %v8300_v3, 0.0  ;;  %v3610_v40 = vsub.f32 %v8153_v58, %v8263_v37 }
 0x6b8   : > { %v3664_v37 = vmul.f32 1.442695, %v3615_v16 }
 0x6b9   : > { %v3556_v23 = vsel %vm1348_vm11, %v8288_v5, -inf  ;;  %5549 = vpow2.f32 %v3656_v15  ;;  %v3654_v60 = vmul.f32 1.442695, %v3610_v40 }
 0x6ba   : > { %5551 = vpow2.f32 %v3642_v41 }
 0x6bb   : > { %5553 = vpow2.f32 %v3660_v62 }
 0x6bc   : > { %v8303_v35 = vpop.xlane.xlu0 %3575  ;;  %5555 = vpow2.f32 %v3644_v30 }
 0x6bf   : > { %v8305_v22 = vpop.eup %5549 }
 0x6c0   : > { %v3733_v33 = vsel %vm1348_vm11, %v8305_v22, 0.0  ;;  %v8311_v26 = vpop.eup %5551 }
 0x6c1   : > { %v3712_v9 = vsel %vm1348_vm11, %v8311_v26, 0.0  ;;  %v8319_v36 = vpop.eup %5553 }
 0x6c2   : > { %v3739_v47 = vsel %vm1348_vm11, %v8319_v36, 0.0  ;;  %v8329_v34 = vpop.eup %5555 }
 0x6c4   : > { %v8317_v2 = vpop.xlane.xlu0 %3578 }
 0x6c6   : > { %3737 = vadd.xlane.f32.xlu0 %v3736_v1 }
 0x6ca   : > { %3557 = vmax.xlane.f32.xlu2 %v3556_v23 }
 0x6ce   : > { %3728 = vadd.xlane.f32.xlu0 %v3727_v0 }
 0x6d3   : > { %3725 = vadd.xlane.f32.xlu1 %v3724_v54 }
 0x6d4   : > { %v8327_v61 = vpop.xlane.xlu0 %3719 }
 0x6d6   : > { %3734 = vadd.xlane.f32.xlu0 %v3733_v33 }
 0x6db   : > { %3713 = vadd.xlane.f32.xlu1 %v3712_v9 }
 0x6e2   : > { %4457 = vrot.lane.b32.xlu2 %v9126_v4, %s5730_s21  ;;  %v3715_v4 = vsel %vm1348_vm11, %v8329_v34, 0.0 }
 0x6e3   : > { %v3708_v39 = vpop.xlane.xlu1 %3707  ;;  %3740 = vadd.xlane.f32.xlu1 %v3739_v47 }
 0x6e4   : > { %5557 = vrcp.f32 %v3708_v39  ;;  %v3861_v0 = vand.u32 2147483648, %v3708_v39  ;;  %vm3855_vm7 = vweird.f32 %v3708_v39  ;;  %v3859_v54 = vand.u32 2147483647, %v3708_v39 }
 0x6e5   : > { %5559 = vpow2.f32 %v3662_v24 }
 0x6e6   : > { %v3862_v45 = vor.u32 1.1754944e-38, %v3861_v0  ;;  %vm3860_vm9 = vcmp.eq.f32.partialorder %v3859_v54, 8.507059e+37 }
 0x6ea   : > { %v5558_v63 = vpop.eup %5557  ;;  %4482 = vrot.lane.b32.xlu0 %v9131_v6, %s5730_s21 }
 0x6eb   : > { %v3851_v57 = vmul.f32 %v5558_v63, %v3708_v39  ;;  %3716 = vadd.xlane.f32.xlu1 %v3715_v4  ;;  %v8337_v51 = vpop.xlane.xlu0 %3695  ;;  %v8342_v43 = vpop.eup %5559  ;;  %vm3856_vm5 = vweird.f32 %v5558_v63 }
 0x6ec   : > { %5561 = vrcp.f32 %v8337_v51  ;;  %v3742_v6 = vsel %vm1348_vm11, %v8342_v43, 0.0  ;;  %v8350_v55 = vpop.xlane.xlu1 %3560  ;;  %vm3857_vm8 = vmor %vm3855_vm7, %vm3856_vm5  ;;  %vm3795_vm14 = vweird.f32 %v8337_v51 }
 0x6ed   : > { %v3852_v58 = vsub.f32 1.0, %v3851_v57  ;;  %5563 = vpow2.f32 %v3654_v60 }
 0x6ee   : > { %5565 = vpow2.f32 %v3664_v37 }
 0x6ef   : > { %v3853_v1 = vmul.f32 %v5558_v63, %v3852_v58  ;;  %v3801_v58 = vand.u32 2147483648, %v8337_v51 }
 0x6f1   : > { %v3854_v41 = vadd.f32 %v5558_v63, %v3853_v1 }
 0x6f2   : > { %v8344_v27 = vpop.eup %5561 }
 0x6f3   : > { %3743 = vadd.xlane.f32.xlu1 %v3742_v6  ;;  %v8348_v15 = vpop.xlane.xlu0 %3722  ;;  %v3791_v38 = vmul.f32 %v8344_v27, %v8337_v51  ;;  %v8354_v23 = vpop.eup %5563  ;;  %v3858_v9 = vsel %vm3857_vm8, %v5558_v63, %v3854_v41  ;;  %vm3796_vm10 = vweird.f32 %v8344_v27 }
 0x6f4   : > { %v3711_v10 = vpop.xlane.xlu2 %3710  ;;  %v8357_v62 = vpop.eup %5565  ;;  %v3730_v33 = vsel %vm1348_vm11, %v8354_v23, 0.0  ;;  %v3863_v4 = vsel %vm3860_vm9, %v3862_v45, %v3858_v9  ;;  %vm8381_vm15 = vmor %vm3795_vm14, %vm3796_vm10  ;;  %v3799_v9 = vand.u32 2147483647, %v8337_v51  ;;  %vm3930_vm10 = vweird.f32 %v8348_v15 }
 0x6f5   : > { %5567 = vrcp.f32 %v3711_v10  ;;  %v3792_v13 = vsub.f32 1.0, %v3791_v38  ;;  %v3567_v57 = vpop.xlane.xlu1 %3566  ;;  %v3745_v63 = vsel %vm1348_vm11, %v8357_v62, 0.0  ;;  %v3874_v37 = vand.u32 2147483647, %v3711_v10 }
 0x6f6   : > { %5569 = vrcp.f32 %v8348_v15  ;;  %v3876_v6 = vand.u32 2147483648, %v3711_v10  ;;  %vm3870_vm1 = vweird.f32 %v3711_v10  ;;  %vm3800_vm4 = vcmp.eq.f32.partialorder %v3799_v9, 8.507059e+37 }
 0x6f7   : > { %5571 = vrcp.f32 %v8327_v61  ;;  %v3793_v47 = vmul.f32 %v8344_v27, %v3792_v13  ;;  %v3864_v13 = vmul.f32 %v8195_v49, %v3863_v4  ;;  %vm3875_vm3 = vcmp.eq.f32.partialorder %v3874_v37, 8.507059e+37 }
 0x6f9   : > { %v3794_v38 = vadd.f32 %v8344_v27, %v3793_v47  ;;  %v3802_v47 = vor.u32 1.1754944e-38, %v3801_v58 }
 0x6fb   : > { %v5568_v53 = vpop.eup %5567  ;;  %3731 = vadd.xlane.f32.xlu1 %v3730_v33  ;;  %v3564_v30 = vpop.xlane.xlu0 %3563 }
 0x6fc   : > { %v3866_v24 = vmul.f32 %v5568_v53, %v3711_v10  ;;  %v8363_v40 = vpop.xlane.xlu2 %3698  ;;  %v8366_v39 = vpop.eup %5569  ;;  %v3618_v60 = vsub.f32 %v8235_v44, %v3564_v30  ;;  %vm3871_vm13 = vweird.f32 %v5568_v53  ;;  %v3619_v44 = vsub.f32 %v8218_v25, %v3567_v57 }
 0x6fd   : > { %5573 = vrcp.f32 %v8363_v40  ;;  %v8373_v1 = vpop.eup %5571  ;;  %v3926_v54 = vmul.f32 %v8366_v39, %v8348_v15  ;;  %vm3872_vm2 = vmor %vm3870_vm1, %vm3871_vm13  ;;  %v3798_v25 = vsel %vm8381_vm15, %v8344_v27, %v3794_v38  ;;  %v3816_v46 = vand.u32 2147483648, %v8363_v40 }
 0x6fe   : > { %v3867_v16 = vsub.f32 1.0, %v3866_v24  ;;  %v3670_v0 = vmul.f32 1.442695, %v3618_v60  ;;  %v3911_v49 = vmul.f32 %v8373_v1, %v8327_v61  ;;  %v3877_v24 = vor.u32 1.1754944e-38, %v3876_v6 }
 0x6ff   : > { %v3672_v10 = vmul.f32 1.442695, %v3619_v44  ;;  %v3814_v37 = vand.u32 2147483647, %v8363_v40  ;;  %v8398_v44 = vpop.xlane.xlu1 %3569  ;;  %vm3810_vm12 = vweird.f32 %v8363_v40  ;;  %vm3931_vm8 = vweird.f32 %v8366_v39 }
 0x700   : > { %v3868_v41 = vmul.f32 %v5568_v53, %v3867_v16  ;;  %5575 = vpow2.f32 %v3670_v0  ;;  %v4274_v16 = vpack.c.bf16 %v3864_v13, %v3864_v13  ;;  %v3912_v6 = vsub.f32 1.0, %v3911_v49  ;;  %vm3932_vm14 = vmor %vm3930_vm10, %vm3931_vm8 }
 0x701   : > { %5577 = vpow2.f32 %v3672_v10  ;;  %v3817_v49 = vor.u32 1.1754944e-38, %v3816_v46  ;;  %vm3815_vm7 = vcmp.eq.f32.partialorder %v3814_v37, 8.507059e+37  ;;  %vm3916_vm9 = vweird.f32 %v8373_v1 }
 0x702   : > { %v3869_v30 = vadd.f32 %v5568_v53, %v3868_v41  ;;  %v3927_v41 = vsub.f32 1.0, %v3926_v54  ;;  %v4354_v38 = vunpack.c.l.b16 %v4274_v16  ;;  %v3936_v46 = vand.u32 2147483648, %v8348_v15 }
 0x703   : > { %v5574_v45 = vpop.eup %5573  ;;  %3746 = vadd.xlane.f32.xlu1 %v3745_v63  ;;  %v3803_v63 = vsel %vm3800_vm4, %v3802_v47, %v3798_v25  ;;  %v3913_v47 = vmul.f32 %v8373_v1, %v3912_v6  ;;  %vm3915_vm13 = vweird.f32 %v8327_v61 }
 0x704   : > { %v3873_v4 = vsel %vm3872_vm2, %v5568_v53, %v3869_v30  ;;  %v3806_v57 = vmul.f32 %v5574_v45, %v8363_v40  ;;  %v4408_v51 = vpop.permute.xlu2 %4407  ;;  %vm3811_vm6 = vweird.f32 %v5574_v45  ;;  %v3928_v13 = vmul.f32 %v8366_v39, %v3927_v41  ;;  %vm3917_vm15 = vmor %vm3915_vm13, %vm3916_vm9 }
 0x705   : > { %v3878_v60 = vsel %vm3875_vm3, %v3877_v24, %v3873_v4  ;;  %4420 = vmatpush.bf16.msra.mxu0 %v4408_v51  ;;  %v3804_v30 = vmul.f32 %v8206_v48, %v3803_v63  ;;  %vm3812_vm5 = vmor %vm3810_vm12, %vm3811_vm6  ;;  %v3385_v4 = vpop.f32.mrf.mxu1 }
 0x706   : > { %v3879_v58 = vmul.f32 %v8224_v28, %v3878_v60  ;;  %v3807_v0 = vsub.f32 1.0, %v3806_v57  ;;  %v8394_v33 = vpop.eup %5575  ;;  %v3929_v51 = vadd.f32 %v8366_v39, %v3928_v13  ;;  %v3934_v60 = vand.u32 2147483647, %v8348_v15 }
 0x707   : > { %v3754_v9 = vsel %vm1348_vm11, %v8394_v33, 0.0  ;;  %v4270_v48 = vpack.c.bf16 %v3804_v30, %v3804_v30  ;;  %v8409_v10 = vpop.eup %5577  ;;  %v3937_v15 = vor.u32 1.1754944e-38, %v3936_v46  ;;  %v8426_v37 = vpop.xlane.xlu1 %3572 }
 0x708   : > { %v4275_v27 = vpack.c.bf16 %v3879_v58, %v3879_v58  ;;  %v3808_v53 = vmul.f32 %v5574_v45, %v3807_v0  ;;  %v3464_v58 = vmul.f32 0.25, %v3385_v4  ;;  %v3921_v0 = vand.u32 2147483648, %v8327_v61  ;;  %v3409_v46 = vpop.f32.mrf.mxu2 }
 0x709   : > { %v3933_v6 = vsel %vm3932_vm14, %v8366_v39, %v3929_v51  ;;  %v3757_v63 = vsel %vm1348_vm11, %v8409_v10, 0.0  ;;  %vm3935_vm1 = vcmp.eq.f32.partialorder %v3934_v60, 8.507059e+37  ;;  %v5679_v39 = vld [vmem:[%s8994_s1 + $0xd0] sm:$0xff]  ;;  %v3466_v60 = vmul.f32 0.25, %v3409_v46 }
 0x70a   : > { %v4355_v28 = vunpack.c.l.b16 %v4275_v27  ;;  %v3809_v54 = vadd.f32 %v5574_v45, %v3808_v53  ;;  %v4304_v27 = vunpack.c.l.b16 %v4270_v48  ;;  %v3922_v13 = vor.u32 1.1754944e-38, %v3921_v0 }
 0x70b   : > { %3755 = vadd.xlane.f32.xlu2 %v3754_v9 }
 0x70c   : > { %v4356_v24 = vpack.c.b16 %v4355_v28, %v4354_v38  ;;  %v3813_v25 = vsel %vm3812_vm5, %v5574_v45, %v3809_v54  ;;  %v3914_v45 = vadd.f32 %v8373_v1, %v3913_v47  ;;  %v3938_v28 = vsel %vm3935_vm1, %v3937_v15, %v3933_v6 }
 0x70d   : > { %v3818_v57 = vsel %vm3815_vm7, %v3817_v49, %v3813_v25  ;;  %v8432_v54 = vadd.f32 %v5679_v39, %v3464_v58  ;;  %v3387_v9 = vpop.f32.mrf.mxu1  ;;  %v3939_v49 = vmul.f32 %v8220_v29, %v3938_v28  ;;  %v5680_v29 = vld [vmem:[%s8994_s1 + $0xd8] sm:$0xff]  ;;  %v3617_v15 = vsub.f32 %v8203_v18, %v8350_v55 }
 0x70e   : > { %5247 = vmatmul.msk.bf16.vlgmr.msrb.gmra.mxu2 %vm1348_vm11, %v4356_v24  ;;  %v4433_v40 = vpop.permute.xlu0 %4432  ;;  %v3819_v16 = vmul.f32 %v8244_v56, %v3818_v57  ;;  %v3919_v56 = vand.u32 2147483647, %v8327_v61  ;;  %v3918_v38 = vsel %vm3917_vm15, %v8373_v1, %v3914_v45  ;;  %v3623_v1 = vsub.f32 %v8184_v20, %v8317_v2 }
 0x70f   : > { %4445 = vmatpush.bf16.msrb.mxu1 %v4433_v40  ;;  %v3465_v47 = vmul.f32 0.25, %v3387_v9  ;;  %v3580_v25 = vsel %vm1348_vm11, %v8432_v54, -inf  ;;  %v4279_v57 = vpack.c.bf16 %v3939_v49, %v3939_v49  ;;  %v3620_v45 = vsub.f32 %v8240_v7, %v8398_v44 }
 0x710   : > { %v4271_v41 = vpack.c.bf16 %v3819_v16, %v3819_v16  ;;  %vm3920_vm2 = vcmp.eq.f32.partialorder %v3919_v56, 8.507059e+37  ;;  %v3680_v51 = vmul.f32 1.442695, %v3623_v1  ;;  %v5681_v56 = vld [vmem:[%s8994_s1 + $0xe0] sm:$0xff]  ;;  %v3622_v7 = vsub.f32 %v8177_v12, %v8303_v35 }
 0x711   : > { %v3923_v30 = vsel %vm3920_vm2, %v3922_v13, %v3918_v38  ;;  %v8446_v20 = vadd.f32 %v5680_v29, %v3465_v47  ;;  %v4405_v2 = vunpack.c.l.b16 %v4279_v57  ;;  %v3674_v58 = vmul.f32 1.442695, %v3620_v45 }
 0x712   : > { %v4305_v53 = vunpack.c.l.b16 %v4271_v41  ;;  %v3924_v24 = vmul.f32 %v8189_v31, %v3923_v30  ;;  %5579 = vpow2.f32 %v3680_v51  ;;  %v8460_v0 = vadd.f32 %v5681_v56, %v3466_v60  ;;  %v3411_v30 = vpop.f32.mrf.mxu2 }
 0x713   : > { %3758 = vadd.xlane.f32.xlu2 %v3757_v63  ;;  %v3583_v16 = vsel %vm1348_vm11, %v8446_v20, -inf  ;;  %5581 = vpow2.f32 %v3674_v58  ;;  %v3678_v63 = vmul.f32 1.442695, %v3622_v7  ;;  %v3668_v13 = vmul.f32 1.442695, %v3617_v15 }
 0x714   : > { %v4306_v61 = vpack.c.b16 %v4305_v53, %v4304_v27  ;;  %v4278_v40 = vpack.c.bf16 %v3924_v24, %v3924_v24  ;;  %v3586_v6 = vsel %vm1348_vm11, %v8460_v0, -inf  ;;  %v3467_v1 = vmul.f32 0.25, %v3411_v30 }
 0x715   : > { %5583 = vpow2.f32 %v3678_v63 }
 0x716   : > { %5245 = vmatmul.msk.bf16.vlgmr.msrb.gmra.mxu0 %vm1348_vm11, %v4306_v61  ;;  %v4404_v31 = vunpack.c.l.b16 %v4278_v40  ;;  %v5682_v40 = vld [vmem:[%s8994_s1 + $0xe8] sm:$0xff] }
 0x717   : > { %v8490_v29 = vadd.f32 %v5682_v40, %v3467_v1 }
 0x718   : > { %v4406_v48 = vpack.c.b16 %v4405_v2, %v4404_v31 }
 0x719   : > { %v3589_v58 = vsel %vm1348_vm11, %v8490_v29, -inf }
 0x71b   : > { %3581 = vmax.xlane.f32.xlu2 %v3580_v25  ;;  %v4508_v4 = vpop.permute.xlu1 %4507 }
 0x71c   : > { %4607 = vrot.lane.b32.xlu1 %v6740_v59, %s5730_s21  ;;  %4520 = vmatpush.bf16.msrb.mxu0 %v4508_v4  ;;  %v8451_v59 = vpop.eup %5579 }
 0x71d   : > { %v3769_v41 = vsel %vm1348_vm11, %v8451_v59, 0.0  ;;  %v8466_v44 = vpop.eup %5581 }
 0x71e   : > { %v3760_v53 = vsel %vm1348_vm11, %v8466_v44, 0.0  ;;  %v8475_v12 = vpop.eup %5583 }
 0x71f   : > { %v3766_v9 = vsel %vm1348_vm11, %v8475_v12, 0.0 }
 0x723   : > { %3584 = vmax.xlane.f32.xlu2 %v3583_v16 }
 0x726   : > { %5249 = vmatmul.msk.bf16.vlgmr.msra.gmra.mxu0 %vm1348_vm11, %v4406_v48 }
 0x72b   : > { %3770 = vadd.xlane.f32.xlu2 %v3769_v41 }
 0x733   : > { %3587 = vmax.xlane.f32.xlu2 %v3586_v6 }
 0x739   : > { %v8468_v27 = vpop.xlane.xlu0 %3737 }
 0x73b   : > { %3761 = vadd.xlane.f32.xlu2 %v3760_v53  ;;  %v3433_v53 = vpop.f32.mrf.mxu3 }
 0x73d   : > { %v3558_v38 = vpop.xlane.xlu2 %3557 }
 0x73e   : > { %v3616_v61 = vsub.f32 %v8288_v5, %v3558_v38  ;;  %v3621_v5 = vsub.f32 %v8255_v11, %v8426_v37 }
 0x740   : > { %v3666_v28 = vmul.f32 1.442695, %v3616_v61  ;;  %v3676_v4 = vmul.f32 1.442695, %v3621_v5 }
 0x741   : > { %v3729_v39 = vpop.xlane.xlu0 %3728 }
 0x742   : > { %5585 = vpow2.f32 %v3666_v28  ;;  %v3964_v2 = vand.u32 2147483647, %v3729_v39  ;;  %v3966_v11 = vand.u32 2147483648, %v3729_v39  ;;  %vm3960_vm4 = vweird.f32 %v3729_v39 }
 0x743   : > { %5587 = vrcp.f32 %v3729_v39  ;;  %v3435_v40 = vpop.f32.mrf.mxu3 }
 0x744   : > { %5589 = vpow2.f32 %v3668_v13  ;;  %vm3965_vm12 = vcmp.eq.f32.partialorder %v3964_v2, 8.507059e+37  ;;  %v3967_v60 = vor.u32 1.1754944e-38, %v3966_v11 }
 0x745   : > { %v4458_v35 = vpop.permute.xlu2 %4457 }
 0x746   : > { %4470 = vmatpush.bf16.msra.mxu2 %v4458_v35  ;;  %v3726_v49 = vpop.xlane.xlu1 %3725  ;;  %3767 = vadd.xlane.f32.xlu1 %v3766_v9 }
 0x747   : > { %5591 = vrcp.f32 %v3726_v49  ;;  %v3951_v41 = vand.u32 2147483648, %v3726_v49  ;;  %v3949_v7 = vand.u32 2147483647, %v3726_v49  ;;  %vm3945_vm7 = vweird.f32 %v3726_v49 }
 0x748   : > { %v8479_v18 = vpop.eup %5585 }
 0x749   : > { %v5588_v55 = vpop.eup %5587  ;;  %v3748_v47 = vsel %vm1348_vm11, %v8479_v18, 0.0  ;;  %v8502_v61 = vpop.xlane.xlu0 %3734  ;;  %v3952_v28 = vor.u32 1.1754944e-38, %v3951_v41  ;;  %vm3950_vm9 = vcmp.eq.f32.partialorder %v3949_v7, 8.507059e+37 }
 0x74a   : > { %v8485_v24 = vpop.eup %5589  ;;  %v3956_v25 = vmul.f32 %v5588_v55, %v3729_v39  ;;  %3749 = vadd.xlane.f32.xlu0 %v3748_v47  ;;  %vm3961_vm3 = vweird.f32 %v5588_v55 }
 0x74b   : > { %v3751_v37 = vsel %vm1348_vm11, %v8485_v24, 0.0  ;;  %vm3962_vm6 = vmor %vm3960_vm4, %vm3961_vm3 }
 0x74c   : > { %v3957_v57 = vsub.f32 1.0, %v3956_v25 }
 0x74d   : > { %v5592_v51 = vpop.eup %5591 }
 0x74e   : > { %v3958_v31 = vmul.f32 %v5588_v55, %v3957_v57  ;;  %v3941_v16 = vmul.f32 %v5592_v51, %v3726_v49  ;;  %v8494_v48 = vpop.xlane.xlu1 %3713  ;;  %3752 = vadd.xlane.f32.xlu1 %v3751_v37  ;;  %vm3946_vm5 = vweird.f32 %v5592_v51 }
 0x74f   : > { %5593 = vrcp.f32 %v8494_v48  ;;  %vm3947_vm8 = vmor %vm3945_vm7, %vm3946_vm5  ;;  %vm3885_vm13 = vweird.f32 %v8494_v48  ;;  %v3889_v7 = vand.u32 2147483647, %v8494_v48 }
 0x750   : > { %5595 = vpow2.f32 %v3676_v4  ;;  %v3959_v46 = vadd.f32 %v5588_v55, %v3958_v31  ;;  %v3942_v45 = vsub.f32 1.0, %v3941_v16 }
 0x751   : > { %5597 = vrcp.f32 %v8468_v27  ;;  %vm3890_vm15 = vcmp.eq.f32.partialorder %v3889_v7, 8.507059e+37 }
 0x752   : > { %v3963_v56 = vsel %vm3962_vm6, %v5588_v55, %v3959_v46  ;;  %v3943_v6 = vmul.f32 %v5592_v51, %v3942_v45  ;;  %3590 = vmax.xlane.f32.xlu0 %v3589_v58  ;;  %v3469_v46 = vmul.f32 0.25, %v3435_v40 }
 0x753   : > { %v3968_v63 = vsel %vm3965_vm12, %v3967_v60, %v3963_v56  ;;  %4557 = vrot.lane.b32.xlu2 %v9135_v32, %s5730_s21  ;;  %v3891_v56 = vand.u32 2147483648, %v8494_v48 }
 0x754   : > { %v3969_v15 = vmul.f32 %v8296_v21, %v3968_v63  ;;  %v3944_v38 = vadd.f32 %v5592_v51, %v3943_v6  ;;  %v3468_v21 = vmul.f32 0.25, %v3433_v53 }
 0x755   : > { %v5594_v13 = vpop.eup %5593 }
 0x756   : > { %v8504_v39 = vpop.eup %5595  ;;  %v3948_v35 = vsel %vm3947_vm8, %v5592_v51, %v3944_v38  ;;  %v3881_v9 = vmul.f32 %v5594_v13, %v8494_v48  ;;  %v8507_v30 = vpop.xlane.xlu1 %3740  ;;  %v4281_v32 = vpack.c.bf16 %v3969_v15, %v3969_v15  ;;  %vm3886_vm10 = vweird.f32 %v5594_v13  ;;  %v5684_v15 = vld [vmem:[%s8994_s1 + $0xf8] sm:$0xff] }
 0x757   : > { %v3953_v5 = vsel %vm3950_vm9, %v3952_v28, %v3948_v35  ;;  %v3763_v49 = vsel %vm1348_vm11, %v8504_v39, 0.0  ;;  %5599 = vrcp.f32 %v8507_v30  ;;  %v8520_v31 = vpop.eup %5597  ;;  %vm3887_vm14 = vmor %vm3885_vm13, %vm3886_vm10  ;;  %v8541_v38 = vadd.f32 %v5684_v15, %v3469_v46 }
 0x758   : > { %v3954_v55 = vmul.f32 %v8300_v3, %v3953_v5  ;;  %v3882_v47 = vsub.f32 1.0, %v3881_v9  ;;  %v4430_v25 = vunpack.c.l.b16 %v4281_v32  ;;  %5601 = vrcp.f32 %v8502_v61  ;;  %v5683_v3 = vld [vmem:[%s8994_s1 + $0xf0] sm:$0xff] }
 0x759   : > { %v8518_v51 = vadd.f32 %v5683_v3, %v3468_v21  ;;  %v4001_v41 = vmul.f32 %v8520_v31, %v8468_v27  ;;  %v3892_v32 = vor.u32 1.1754944e-38, %v3891_v56  ;;  %vm4006_vm3 = vweird.f32 %v8520_v31 }
 0x75a   : > { %v4280_v1 = vpack.c.bf16 %v3954_v55, %v3954_v55  ;;  %3764 = vadd.xlane.f32.xlu0 %v3763_v49  ;;  %v3883_v11 = vmul.f32 %v5594_v13, %v3882_v47  ;;  %v3595_v47 = vsel %vm1348_vm11, %v8541_v38, -inf  ;;  %vm4020_vm7 = vweird.f32 %v8507_v30 }
 0x75b   : > { %v3592_v45 = vsel %vm1348_vm11, %v8518_v51, -inf  ;;  %v4002_v28 = vsub.f32 1.0, %v4001_v41  ;;  %vm4005_vm8 = vweird.f32 %v8468_v27  ;;  %vm3990_vm13 = vweird.f32 %v8502_v61 }
 0x75c   : > { %v4429_v4 = vunpack.c.l.b16 %v4280_v1  ;;  %v4483_v57 = vpop.permute.xlu0 %4482  ;;  %v3884_v58 = vadd.f32 %v5594_v13, %v3883_v11  ;;  %vm8582_vm10 = vmor %vm4005_vm8, %vm4006_vm3 }
 0x75d   : > { %4495 = vmatpush.bf16.msrb.mxu3 %v4483_v57  ;;  %v8522_v16 = vpop.eup %5599 }
 0x75e   : > { %v4431_v2 = vpack.c.b16 %v4430_v25, %v4429_v4  ;;  %v3717_v37 = vpop.xlane.xlu1 %3716  ;;  %v8527_v60 = vpop.eup %5601  ;;  %v4016_v6 = vmul.f32 %v8522_v16, %v8507_v30  ;;  %v3888_v35 = vsel %vm3887_vm14, %v5594_v13, %v3884_v58  ;;  %v4003_v13 = vmul.f32 %v8520_v31, %v4002_v28 }
 0x75f   : > { %5603 = vrcp.f32 %v3717_v37  ;;  %v3986_v53 = vmul.f32 %v8527_v60, %v8502_v61  ;;  %v3893_v49 = vsel %vm3890_vm15, %v3892_v32, %v3888_v35  ;;  %v3906_v1 = vand.u32 2147483648, %v3717_v37 }
 0x760   : > { %5250 = vmatmul.msk.bf16.vlgmr.msrb.gmra.mxu1 %vm1348_vm11, %v4431_v2  ;;  %v4017_v55 = vsub.f32 1.0, %v4016_v6  ;;  %v3904_v4 = vand.u32 2147483647, %v3717_v37  ;;  %v3894_v3 = vmul.f32 %v8311_v26, %v3893_v49  ;;  %vm3900_vm2 = vweird.f32 %v3717_v37 }
 0x761   : > { %v3987_v21 = vsub.f32 1.0, %v3986_v53  ;;  %v4011_v2 = vand.u32 2147483648, %v8468_v27  ;;  %v3907_v46 = vor.u32 1.1754944e-38, %v3906_v1  ;;  %vm4021_vm12 = vweird.f32 %v8522_v16 }
 0x762   : > { %3593 = vmax.xlane.f32.xlu0 %v3592_v45  ;;  %v4018_v57 = vmul.f32 %v8522_v16, %v4017_v55  ;;  %v4004_v45 = vadd.f32 %v8520_v31, %v4003_v13  ;;  %vm3905_vm6 = vcmp.eq.f32.partialorder %v3904_v4, 8.507059e+37  ;;  %v3996_v6 = vand.u32 2147483648, %v8502_v61  ;;  %vm8576_vm9 = vmor %vm4020_vm7, %vm4021_vm12 }
 0x763   : > { %v3988_v11 = vmul.f32 %v8527_v60, %v3987_v21  ;;  %v4276_v7 = vpack.c.bf16 %v3894_v3, %v3894_v3  ;;  %vm3991_vm5 = vweird.f32 %v8527_v60  ;;  %v4024_v28 = vand.u32 2147483647, %v8507_v30 }
 0x764   : > { %v4009_v32 = vand.u32 2147483647, %v8468_v27  ;;  %vm8592_vm14 = vmor %vm3990_vm13, %vm3991_vm5  ;;  %v4008_v27 = vsel %vm8582_vm10, %v8520_v31, %v4004_v45 }
 0x765   : > { %v5604_v63 = vpop.eup %5603  ;;  %v3989_v15 = vadd.f32 %v8527_v60, %v3988_v11  ;;  %v4379_v49 = vunpack.c.l.b16 %v4276_v7  ;;  %vm4025_vm15 = vcmp.eq.f32.partialorder %v4024_v28, 8.507059e+37 }
 0x766   : > { %v3896_v9 = vmul.f32 %v5604_v63, %v3717_v37  ;;  %v8543_v5 = vpop.xlane.xlu1 %3743  ;;  %vm3901_vm1 = vweird.f32 %v5604_v63  ;;  %v4019_v37 = vadd.f32 %v8522_v16, %v4018_v57 }
 0x767   : > { %5605 = vrcp.f32 %v8543_v5  ;;  %4532 = vrot.lane.b32.xlu1 %v9146_v50, %s5730_s21  ;;  %vm3902_vm4 = vmor %vm3900_vm2, %vm3901_vm1  ;;  %vm4010_vm1 = vcmp.eq.f32.partialorder %v4009_v32, 8.507059e+37  ;;  %v4039_v7 = vand.u32 2147483647, %v8543_v5 }
 0x768   : > { %v3897_v48 = vsub.f32 1.0, %v3896_v9  ;;  %v4023_v55 = vsel %vm8576_vm9, %v8522_v16, %v4019_v37 }
 0x769   : > { %vm4040_vm9 = vcmp.eq.f32.partialorder %v4039_v7, 8.507059e+37 }
 0x76a   : > { %v3898_v25 = vmul.f32 %v5604_v63, %v3897_v48  ;;  %3596 = vmax.xlane.f32.xlu0 %v3595_v47  ;;  %v4012_v48 = vor.u32 1.1754944e-38, %v4011_v2 }
 0x76c   : > { %v3899_v40 = vadd.f32 %v5604_v63, %v3898_v25  ;;  %v3997_v25 = vor.u32 1.1754944e-38, %v3996_v6  ;;  %v4013_v2 = vsel %vm4010_vm1, %v4012_v48, %v4008_v27  ;;  %v4041_v6 = vand.u32 2147483648, %v8543_v5 }
 0x76d   : > { %v8553_v50 = vpop.eup %5605  ;;  %v4014_v37 = vmul.f32 %v8282_v8, %v4013_v2 }
 0x76e   : > { %v3903_v41 = vsel %vm3902_vm4, %v5604_v63, %v3899_v40  ;;  %v4031_v58 = vmul.f32 %v8553_v50, %v8543_v5  ;;  %v8561_v26 = vpop.xlane.xlu1 %3731  ;;  %v4026_v63 = vand.u32 2147483648, %v8507_v30  ;;  %v3994_v30 = vand.u32 2147483647, %v8502_v61 }
 0x76f   : > { %v3908_v56 = vsel %vm3905_vm6, %v3907_v46, %v3903_v41  ;;  %5607 = vrcp.f32 %v8561_v26  ;;  %4582 = vrot.lane.b32.xlu1 %v9136_v17, %s5730_s21  ;;  %v3993_v61 = vsel %vm8592_vm14, %v8527_v60, %v3989_v15  ;;  %vm4036_vm3 = vweird.f32 %v8553_v50 }
 0x770   : > { %v3909_v53 = vmul.f32 %v8329_v34, %v3908_v56  ;;  %v4032_v9 = vsub.f32 1.0, %v4031_v58  ;;  %v4027_v1 = vor.u32 1.1754944e-38, %v4026_v63  ;;  %vm3995_vm2 = vcmp.eq.f32.partialorder %v3994_v30, 8.507059e+37 }
 0x771   : > { %v3998_v11 = vsel %vm3995_vm2, %v3997_v25, %v3993_v61  ;;  %v3981_v60 = vand.u32 2147483648, %v8561_v26  ;;  %v3979_v58 = vand.u32 2147483647, %v8561_v26  ;;  %vm4035_vm6 = vweird.f32 %v8543_v5 }
 0x772   : > { %v4277_v17 = vpack.c.bf16 %v3909_v53, %v3909_v53  ;;  %v4028_v16 = vsel %vm4025_vm15, %v4027_v1, %v4023_v55  ;;  %v4033_v57 = vmul.f32 %v8553_v50, %v4032_v9  ;;  %v3999_v56 = vmul.f32 %v8305_v22, %v3998_v11  ;;  %vm8614_vm12 = vmor %vm4035_vm6, %vm4036_vm3 }
 0x773   : > { %v4029_v31 = vmul.f32 %v8319_v36, %v4028_v16  ;;  %vm3975_vm5 = vweird.f32 %v8561_v26  ;;  %v3982_v28 = vor.u32 1.1754944e-38, %v3981_v60  ;;  %vm3980_vm8 = vcmp.eq.f32.partialorder %v3979_v58, 8.507059e+37 }
 0x774   : > { %v4380_v47 = vunpack.c.l.b16 %v4277_v17  ;;  %v4034_v45 = vadd.f32 %v8553_v50, %v4033_v57  ;;  %v4284_v9 = vpack.c.bf16 %v4014_v37, %v4014_v37  ;;  %v4283_v34 = vpack.c.bf16 %v3999_v56, %v3999_v56 }
 0x775   : > { %v5608_v13 = vpop.eup %5607  ;;  %v4285_v15 = vpack.c.bf16 %v4029_v31, %v4029_v31  ;;  %v4042_v32 = vor.u32 1.1754944e-38, %v4041_v6 }
 0x776   : > { %v4381_v4 = vpack.c.b16 %v4380_v47, %v4379_v49  ;;  %v3971_v3 = vmul.f32 %v5608_v13, %v8561_v26  ;;  %v3747_v40 = vpop.xlane.xlu1 %3746  ;;  %vm3976_vm4 = vweird.f32 %v5608_v13  ;;  %v4038_v8 = vsel %vm8614_vm12, %v8553_v50, %v4034_v45 }
 0x777   : > { %5609 = vrcp.f32 %v3747_v40  ;;  %vm3977_vm7 = vmor %vm3975_vm5, %vm3976_vm4  ;;  %v4480_v55 = vunpack.c.l.b16 %v4285_v15  ;;  %v4043_v48 = vsel %vm4040_vm9, %v4042_v32, %v4038_v8  ;;  %v4056_v21 = vand.u32 2147483648, %v3747_v40 }
 0x778   : > { %v3972_v46 = vsub.f32 1.0, %v3971_v3  ;;  %5248 = vmatmul.msk.bf16.vlgmr.msra.gmra.mxu3 %vm1348_vm11, %v4381_v4  ;;  %v4054_v50 = vand.u32 2147483647, %v3747_v40  ;;  %v4479_v47 = vunpack.c.l.b16 %v4284_v9  ;;  %v4044_v27 = vmul.f32 %v8342_v43, %v4043_v48 }
 0x779   : > { %vm4050_vm13 = vweird.f32 %v3747_v40  ;;  %v4057_v16 = vor.u32 1.1754944e-38, %v4056_v21 }
 0x77a   : > { %v3973_v41 = vmul.f32 %v5608_v13, %v3972_v46  ;;  %v4481_v4 = vpack.c.b16 %v4480_v55, %v4479_v47  ;;  %vm4055_vm15 = vcmp.eq.f32.partialorder %v4054_v50, 8.507059e+37  ;;  %v4286_v11 = vpack.c.bf16 %v4044_v27, %v4044_v27 }
 0x77c   : > { %v3974_v63 = vadd.f32 %v5608_v13, %v3973_v41  ;;  %v4504_v43 = vunpack.c.l.b16 %v4286_v11 }
 0x77d   : > { %v5610_v53 = vpop.eup %5609 }
 0x77e   : > { %v3978_v22 = vsel %vm3977_vm7, %v5608_v13, %v3974_v63  ;;  %v4046_v35 = vmul.f32 %v5610_v53, %v3747_v40  ;;  %v8623_v17 = vpop.xlane.xlu2 %3755  ;;  %vm4051_vm10 = vweird.f32 %v5610_v53  ;;  %v4455_v13 = vunpack.c.l.b16 %v4283_v34 }
 0x77f   : > { %v3983_v5 = vsel %vm3980_vm8, %v3982_v28, %v3978_v22  ;;  %vm4052_vm14 = vmor %vm4050_vm13, %vm4051_vm10  ;;  %v4101_v55 = vand.u32 2147483648, %v8623_v17  ;;  %vm4095_vm6 = vweird.f32 %v8623_v17  ;;  %v4099_v48 = vand.u32 2147483647, %v8623_v17 }
 0x780   : > { %v3984_v26 = vmul.f32 %v8354_v23, %v3983_v5  ;;  %v4047_v30 = vsub.f32 1.0, %v4046_v35 }
 0x781   : > { %vm4100_vm7 = vcmp.eq.f32.partialorder %v4099_v48, 8.507059e+37 }
 0x782   : > { %v4282_v49 = vpack.c.bf16 %v3984_v26, %v3984_v26  ;;  %v4048_v1 = vmul.f32 %v5610_v53, %v4047_v30 }
 0x784   : > { %v4454_v61 = vunpack.c.l.b16 %v4282_v49  ;;  %v4049_v25 = vadd.f32 %v5610_v53, %v4048_v1 }
 0x786   : > { %v4456_v57 = vpack.c.b16 %v4455_v13, %v4454_v61  ;;  %v4053_v23 = vsel %vm4052_vm14, %v5610_v53, %v4049_v25  ;;  %v3759_v3 = vpop.xlane.xlu2 %3758  ;;  %v4102_v13 = vor.u32 1.1754944e-38, %v4101_v55 }
 0x787   : > { %v4058_v2 = vsel %vm4055_vm15, %v4057_v16, %v4053_v23  ;;  %5611 = vrcp.f32 %v3759_v3  ;;  %v4116_v5 = vand.u32 2147483648, %v3759_v3  ;;  %vm4110_vm3 = vweird.f32 %v3759_v3 }
 0x788   : > { %v4059_v46 = vmul.f32 %v8357_v62, %v4058_v2  ;;  %5251 = vmatmul.msk.bf16.vlgmr.msra.gmra.mxu2 %vm1348_vm11, %v4456_v57  ;;  %5252 = vmatmul.msk.bf16.vlgmr.msrb.gmra.mxu3 %vm1348_vm11, %v4481_v4  ;;  %5613 = vrcp.f32 %v8623_v17  ;;  %v4114_v30 = vand.u32 2147483647, %v3759_v3 }
 0x789   : > { %v4117_v1 = vor.u32 1.1754944e-38, %v4116_v5  ;;  %v5308_v5 = vld [vmem:[%s8998_s5 + $0x8] sm:$0xff] }
 0x78a   : > { %v4287_v31 = vpack.c.bf16 %v4059_v46, %v4059_v46  ;;  %vm4115_vm5 = vcmp.eq.f32.partialorder %v4114_v30, 8.507059e+37 }
 0x78c   : > { %v4505_v60 = vunpack.c.l.b16 %v4287_v31 }
 0x78d   : > { %v5612_v62 = vpop.eup %5611 }
 0x78e   : > { %v3582_v40 = vpop.xlane.xlu2 %3581  ;;  %v4608_v45 = vpop.permute.xlu1 %4607  ;;  %v4506_v41 = vpack.c.b16 %v4505_v60, %v4504_v43  ;;  %v4106_v6 = vmul.f32 %v5612_v62, %v3759_v3  ;;  %vm4111_vm1 = vweird.f32 %v5612_v62 }
 0x78f   : > { %v3624_v58 = vsub.f32 %v8432_v54, %v3582_v40  ;;  %4620 = vmatpush.bf16.msra.mxu0 %v4608_v45  ;;  %v5614_v56 = vpop.eup %5613  ;;  %vm4112_vm4 = vmor %vm4110_vm3, %vm4111_vm1 }
 0x790   : > { %5253 = vmatmul.msk.bf16.vlgmr.msrb.gmra.mxu0 %vm1348_vm11, %v4506_v41  ;;  %v4091_v63 = vmul.f32 %v5614_v56, %v8623_v17  ;;  %v4107_v28 = vsub.f32 1.0, %v4106_v6  ;;  %vm4096_vm2 = vweird.f32 %v5614_v56 }
 0x791   : > { %v3682_v37 = vmul.f32 1.442695, %v3624_v58  ;;  %vm4097_vm12 = vmor %vm4095_vm6, %vm4096_vm2 }
 0x792   : > { %v4092_v8 = vsub.f32 1.0, %v4091_v63  ;;  %v4108_v22 = vmul.f32 %v5612_v62, %v4107_v28 }
 0x793   : > { %5615 = vpow2.f32 %v3682_v37  ;;  %4779 = vmatpush.bf16.msrb.mxu0 %v5308_v5 }
 0x794   : > { %v4093_v9 = vmul.f32 %v5614_v56, %v4092_v8  ;;  %v4109_v32 = vadd.f32 %v5612_v62, %v4108_v22 }
 0x796   : > { %v3585_v36 = vpop.xlane.xlu2 %3584  ;;  %v4094_v26 = vadd.f32 %v5614_v56, %v4093_v9  ;;  %v4113_v21 = vsel %vm4112_vm4, %v5612_v62, %v4109_v32 }
 0x797   : > { %v3625_v7 = vsub.f32 %v8446_v20, %v3585_v36  ;;  %v4118_v27 = vsel %vm4115_vm5, %v4117_v1, %v4113_v21 }
 0x798   : > { %v4098_v47 = vsel %vm4097_vm12, %v5614_v56, %v4094_v26  ;;  %v4119_v16 = vmul.f32 %v8409_v10, %v4118_v27 }
 0x799   : > { %v8635_v53 = vpop.eup %5615  ;;  %v3684_v15 = vmul.f32 1.442695, %v3625_v7  ;;  %v4103_v25 = vsel %vm4100_vm7, %v4102_v13, %v4098_v47 }
 0x79a   : > { %v3772_v54 = vsel %vm1348_vm11, %v8635_v53, 0.0  ;;  %v4104_v17 = vmul.f32 %v8394_v33, %v4103_v25  ;;  %v4291_v23 = vpack.c.bf16 %v4119_v16, %v4119_v16 }
 0x79b   : > { %5617 = vpow2.f32 %v3684_v15  ;;  %3773 = vadd.xlane.f32.xlu0 %v3772_v54 }
 0x79c   : > { %v4555_v46 = vunpack.c.l.b16 %v4291_v23 }
 0x79e   : > { %v8639_v35 = vpop.xlane.xlu2 %3770 }
 0x79f   : > { %5619 = vrcp.f32 %v8639_v35  ;;  %v4176_v41 = vand.u32 2147483648, %v8639_v35  ;;  %vm4170_vm9 = vweird.f32 %v8639_v35  ;;  %v4174_v37 = vand.u32 2147483647, %v8639_v35 }
 0x7a1   : > { %v8641_v34 = vpop.eup %5617  ;;  %v4177_v36 = vor.u32 1.1754944e-38, %v4176_v41  ;;  %vm4175_vm13 = vcmp.eq.f32.partialorder %v4174_v37, 8.507059e+37 }
 0x7a2   : > { %v3775_v20 = vsel %vm1348_vm11, %v8641_v34, 0.0 }
 0x7a3   : > { %3776 = vadd.xlane.f32.xlu1 %v3775_v20 }
 0x7a5   : > { %v5620_v4 = vpop.eup %5619 }
 0x7a6   : > { %v3588_v49 = vpop.xlane.xlu2 %3587  ;;  %v4166_v3 = vmul.f32 %v5620_v4, %v8639_v35  ;;  %vm4171_vm8 = vweird.f32 %v5620_v4 }
 0x7a7   : > { %v3626_v50 = vsub.f32 %v8460_v0, %v3588_v49  ;;  %v4290_v0 = vpack.c.bf16 %v4104_v17, %v4104_v17  ;;  %vm4172_vm10 = vmor %vm4170_vm9, %vm4171_vm8 }
 0x7a8   : > { %v4167_v31 = vsub.f32 1.0, %v4166_v3 }
 0x7a9   : > { %v3686_v61 = vmul.f32 1.442695, %v3626_v50  ;;  %v4554_v43 = vunpack.c.l.b16 %v4290_v0 }
 0x7aa   : > { %v4168_v40 = vmul.f32 %v5620_v4, %v4167_v31 }
 0x7ab   : > { %5621 = vpow2.f32 %v3686_v61  ;;  %v4556_v10 = vpack.c.b16 %v4555_v46, %v4554_v43 }
 0x7ac   : > { %v4169_v45 = vadd.f32 %v5620_v4, %v4168_v40 }
 0x7ae   : > { %v8652_v57 = vpop.xlane.xlu2 %3761  ;;  %v4173_v6 = vsel %vm4172_vm10, %v5620_v4, %v4169_v45 }
 0x7af   : > { %5623 = vrcp.f32 %v8652_v57  ;;  %v4178_v28 = vsel %vm4175_vm13, %v4177_v36, %v4173_v6  ;;  %v4131_v6 = vand.u32 2147483648, %v8652_v57  ;;  %vm4125_vm13 = vweird.f32 %v8652_v57 }
 0x7b0   : > { %v4179_v26 = vmul.f32 %v8451_v59, %v4178_v28 }
 0x7b1   : > { %v8655_v2 = vpop.eup %5621 }
 0x7b2   : > { %v3778_v11 = vsel %vm1348_vm11, %v8655_v2, 0.0  ;;  %v4295_v59 = vpack.c.bf16 %v4179_v26, %v4179_v26 }
 0x7b3   : > { %3779 = vadd.xlane.f32.xlu2 %v3778_v11 }
 0x7b5   : > { %v8664_v62 = vpop.eup %5623 }
 0x7b6   : > { %v4558_v60 = vpop.permute.xlu2 %4557  ;;  %v4121_v15 = vmul.f32 %v8664_v62, %v8652_v57  ;;  %vm4126_vm8 = vweird.f32 %v8664_v62 }
 0x7b7   : > { %4570 = vmatpush.bf16.msrb.mxu2 %v4558_v60 }
 0x7b8   : > { %v4122_v30 = vsub.f32 1.0, %v4121_v15 }
 0x7b9   : > { %v3768_v33 = vpop.xlane.xlu1 %3767 }
 0x7ba   : > { %5625 = vrcp.f32 %v3768_v33  ;;  %5255 = vmatmul.msk.bf16.vlgmr.msrb.gmra.mxu2 %vm1348_vm11, %v4556_v10  ;;  %v4159_v8 = vand.u32 2147483647, %v3768_v33  ;;  %v4161_v35 = vand.u32 2147483648, %v3768_v33  ;;  %vm4155_vm15 = vweird.f32 %v3768_v33 }
 0x7bb   : > { %v4123_v16 = vmul.f32 %v8664_v62, %v4122_v30 }
 0x7bc   : > { %vm4160_vm1 = vcmp.eq.f32.partialorder %v4159_v8, 8.507059e+37  ;;  %v4162_v1 = vor.u32 1.1754944e-38, %v4161_v35 }
 0x7bd   : > { %v3750_v58 = vpop.xlane.xlu0 %3749  ;;  %v4124_v45 = vadd.f32 %v8664_v62, %v4123_v16 }
 0x7be   : > { %5627 = vrcp.f32 %v3750_v58  ;;  %v4069_v50 = vand.u32 2147483647, %v3750_v58  ;;  %v4071_v47 = vand.u32 2147483648, %v3750_v58  ;;  %vm4065_vm4 = vweird.f32 %v3750_v58 }
 0x7c0   : > { %v5626_v56 = vpop.eup %5625  ;;  %vm4070_vm12 = vcmp.eq.f32.partialorder %v4069_v50, 8.507059e+37  ;;  %v4072_v3 = vor.u32 1.1754944e-38, %v4071_v47 }
 0x7c1   : > { %v4151_v7 = vmul.f32 %v5626_v56, %v3768_v33  ;;  %v8666_v63 = vpop.xlane.xlu1 %3752  ;;  %vm4156_vm14 = vweird.f32 %v5626_v56 }
 0x7c2   : > { %5629 = vrcp.f32 %v8666_v63  ;;  %vm4157_vm2 = vmor %vm4155_vm15, %vm4156_vm14  ;;  %v4084_v0 = vand.u32 2147483647, %v8666_v63  ;;  %v4086_v11 = vand.u32 2147483648, %v8666_v63  ;;  %vm4080_vm7 = vweird.f32 %v8666_v63 }
 0x7c3   : > { %v4152_v54 = vsub.f32 1.0, %v4151_v7  ;;  %vm4127_vm14 = vmor %vm4125_vm13, %vm4126_vm8 }
 0x7c4   : > { %v5628_v22 = vpop.eup %5627  ;;  %v4087_v41 = vor.u32 1.1754944e-38, %v4086_v11  ;;  %vm4085_vm10 = vcmp.eq.f32.partialorder %v4084_v0, 8.507059e+37 }
 0x7c5   : > { %v4153_v9 = vmul.f32 %v5626_v56, %v4152_v54  ;;  %v4061_v32 = vmul.f32 %v5628_v22, %v3750_v58  ;;  %v3591_v20 = vpop.xlane.xlu0 %3590  ;;  %vm4066_vm3 = vweird.f32 %v5628_v22  ;;  %v4128_v54 = vsel %vm4127_vm14, %v8664_v62, %v4124_v45 }
 0x7c6   : > { %v3627_v55 = vsub.f32 %v8490_v29, %v3591_v20  ;;  %vm4067_vm6 = vmor %vm4065_vm4, %vm4066_vm3 }
 0x7c7   : > { %v4154_v48 = vadd.f32 %v5626_v56, %v4153_v9  ;;  %v4062_v21 = vsub.f32 1.0, %v4061_v32  ;;  %v4132_v32 = vor.u32 1.1754944e-38, %v4131_v6 }
 0x7c8   : > { %v5630_v49 = vpop.eup %5629  ;;  %v3688_v13 = vmul.f32 1.442695, %v3627_v55 }
 0x7c9   : > { %v4158_v27 = vsel %vm4157_vm2, %v5626_v56, %v4154_v48  ;;  %v4063_v61 = vmul.f32 %v5628_v22, %v4062_v21  ;;  %v4076_v25 = vmul.f32 %v5630_v49, %v8666_v63  ;;  %vm4081_vm5 = vweird.f32 %v5630_v49 }
 0x7ca   : > { %v4163_v29 = vsel %vm4160_vm1, %v4162_v1, %v4158_v27  ;;  %5631 = vpow2.f32 %v3688_v13  ;;  %vm4082_vm9 = vmor %vm4080_vm7, %vm4081_vm5  ;;  %v4129_v63 = vand.u32 2147483647, %v8652_v57 }
 0x7cb   : > { %v4164_v4 = vmul.f32 %v8475_v12, %v4163_v29  ;;  %v4064_v17 = vadd.f32 %v5628_v22, %v4063_v61  ;;  %v4077_v23 = vsub.f32 1.0, %v4076_v25  ;;  %4657 = vrot.lane.b32.xlu2 %v6762_v52, %s5730_s21  ;;  %v4605_v52 = vunpack.c.l.b16 %v4295_v59 }
 0x7cc   : > { %vm4130_vm15 = vcmp.eq.f32.partialorder %v4129_v63, 8.507059e+37 }
 0x7cd   : > { %v4294_v46 = vpack.c.bf16 %v4164_v4, %v4164_v4  ;;  %v4068_v31 = vsel %vm4067_vm6, %v5628_v22, %v4064_v17  ;;  %v4078_v43 = vmul.f32 %v5630_v49, %v4077_v23  ;;  %v3765_v60 = vpop.xlane.xlu0 %3764  ;;  %v4133_v57 = vsel %vm4130_vm15, %v4132_v32, %v4128_v54 }
 0x7ce   : > { %v4073_v10 = vsel %vm4070_vm12, %v4072_v3, %v4068_v31  ;;  %5633 = vrcp.f32 %v3765_v60  ;;  %v4146_v26 = vand.u32 2147483648, %v3765_v60  ;;  %v4144_v55 = vand.u32 2147483647, %v3765_v60  ;;  %v4347_v3 = vpop.f32.mrf.mxu1  ;;  %v4372_v31 = vpop.f32.mrf.mxu2 }
 0x7cf   : > { %v4604_v12 = vunpack.c.l.b16 %v4294_v46  ;;  %v4079_v40 = vadd.f32 %v5630_v49, %v4078_v43  ;;  %v4074_v58 = vmul.f32 %v8479_v18, %v4073_v10  ;;  %v4322_v18 = vpop.f32.mrf.mxu0  ;;  %v4134_v21 = vmul.f32 %v8466_v44, %v4133_v57 }
 0x7d0   : > { %v8684_v33 = vpop.eup %5631  ;;  %vm4140_vm2 = vweird.f32 %v3765_v60  ;;  %v4147_v1 = vor.u32 1.1754944e-38, %v4146_v26  ;;  %vm4145_vm4 = vcmp.eq.f32.partialorder %v4144_v55, 8.507059e+37 }
 0x7d1   : > { %v4083_v37 = vsel %vm4082_vm9, %v5630_v49, %v4079_v40  ;;  %v3781_v56 = vsel %vm1348_vm11, %v8684_v33, 0.0  ;;  %v4606_v7 = vpack.c.b16 %v4605_v52, %v4604_v12  ;;  %v4288_v8 = vpack.c.bf16 %v4074_v58, %v4074_v58 }
 0x7d2   : > { %v4088_v36 = vsel %vm4085_vm10, %v4087_v41, %v4083_v37  ;;  %3782 = vadd.xlane.f32.xlu0 %v3781_v56  ;;  %v4292_v25 = vpack.c.bf16 %v4134_v21, %v4134_v21 }
 0x7d3   : > { %v4089_v15 = vmul.f32 %v8485_v24, %v4088_v36  ;;  %5257 = vmatmul.msk.bf16.vlgmr.msra.gmra.mxu0 %vm1348_vm11, %v4606_v7  ;;  %v4529_v24 = vunpack.c.l.b16 %v4288_v8 }
 0x7d4   : > { %v5634_v28 = vpop.eup %5633  ;;  %v4579_v17 = vunpack.c.l.b16 %v4292_v25 }
 0x7d5   : > { %v4289_v22 = vpack.c.bf16 %v4089_v15, %v4089_v15  ;;  %v4136_v35 = vmul.f32 %v5634_v28, %v3765_v60  ;;  %v3594_v9 = vpop.xlane.xlu0 %3593  ;;  %vm4141_vm1 = vweird.f32 %v5634_v28 }
 0x7d6   : > { %vm4142_vm3 = vmor %vm4140_vm2, %vm4141_vm1  ;;  %v4349_v11 = vpop.f32.mrf.mxu1  ;;  %v3628_v43 = vsub.f32 %v8518_v51, %v3594_v9  ;;  %v4374_v60 = vpop.f32.mrf.mxu2 }
 0x7d7   : > { %v4530_v20 = vunpack.c.l.b16 %v4289_v22  ;;  %v4137_v5 = vsub.f32 1.0, %v4136_v35  ;;  %v4324_v61 = vpop.f32.mrf.mxu0  ;;  %v4703_v46 = vpack.c.bf16 %v4349_v11, %v4347_v3  ;;  %v4704_v10 = vpack.c.bf16 %v4374_v60, %v4372_v31 }
 0x7d8   : > { %v4702_v4 = vpack.c.bf16 %v4324_v61, %v4322_v18  ;;  %v3690_v12 = vmul.f32 1.442695, %v3628_v43 }
 0x7d9   : > { %v4138_v30 = vmul.f32 %v5634_v28, %v4137_v5  ;;  %v4533_v48 = vpop.permute.xlu1 %4532  ;;  %v4531_v49 = vpack.c.b16 %v4530_v20, %v4529_v24 }
 0x7da   : > { %4545 = vmatpush.bf16.msra.mxu1 %v4533_v48 }
 0x7db   : > { %v4139_v62 = vadd.f32 %v5634_v28, %v4138_v30 }
 0x7dd   : > { %v4143_v50 = vsel %vm4142_vm3, %v5634_v28, %v4139_v62  ;;  %v3597_v47 = vpop.xlane.xlu0 %3596  ;;  %5254 = vmatmul.msk.bf16.vlgmr.msra.gmra.mxu1 %vm1348_vm11, %v4531_v49 }
 0x7de   : > { %v4148_v13 = vsel %vm4145_vm4, %v4147_v1, %v4143_v50  ;;  %v3629_v27 = vsub.f32 %v8541_v38, %v3597_v47 }
 0x7df   : > { %v4149_v59 = vmul.f32 %v8504_v39, %v4148_v13  ;;  %v4422_v51 = vpop.f32.mrf.mxu0 }
 0x7e0   : > { %v3692_v16 = vmul.f32 1.442695, %v3629_v27 }
 0x7e1   : > { %v4293_v29 = vpack.c.bf16 %v4149_v59, %v4149_v59  ;;  %v4583_v44 = vpop.permute.xlu1 %4582 }
 0x7e2   : > { %5635 = vpow2.f32 %v3692_v16  ;;  %4595 = vmatpush.bf16.msra.mxu3 %v4583_v44 }
 0x7e3   : > { %v4580_v23 = vunpack.c.l.b16 %v4293_v29  ;;  %5265 = vmatmul.msk.bf16.vlgmr.msrb.gmra.mxu0 %vm1348_vm11, %v4702_v4  ;;  %5637 = vpow2.f32 %v3690_v12 }
 0x7e5   : > { %v4581_v0 = vpack.c.b16 %v4580_v23, %v4579_v17 }
 0x7e6   : > { %4632 = vrot.lane.b32.xlu0 %v9137_v19, %s5730_s21 }
 0x7e7   : > { %5256 = vmatmul.msk.bf16.vlgmr.msra.gmra.mxu3 %vm1348_vm11, %v4581_v0  ;;  %v4424_v58 = vpop.f32.mrf.mxu0 }
 0x7e8   : > { %v8707_v38 = vpop.eup %5635  ;;  %v4706_v37 = vpack.c.bf16 %v4424_v58, %v4422_v51 }
 0x7e9   : > { %v3787_v39 = vsel %vm1348_vm11, %v8707_v38, 0.0  ;;  %v8716_v40 = vpop.eup %5637 }
 0x7ea   : > { %3788 = vadd.xlane.f32.xlu1 %v3787_v39  ;;  %v3784_v45 = vsel %vm1348_vm11, %v8716_v40, 0.0 }
 0x7f3   : > { %5266 = vmatmul.msk.bf16.gmra.mxu0 %vm1348_vm11, %v4703_v46 }
 0x7fb   : > { %v4397_v19 = vpop.f32.mrf.mxu3 }
 0x803   : > { %4682 = vrot.lane.b32.xlu1 %v6774_v42, %s5730_s21  ;;  %5267 = vmatmul.msk.bf16.gmra.mxu0 %vm1348_vm11, %v4704_v10  ;;  %v4399_v52 = vpop.f32.mrf.mxu3  ;;  %v4447_v42 = vpop.f32.mrf.mxu1 }
 0x804   : > { %v4705_v41 = vpack.c.bf16 %v4399_v52, %v4397_v19 }
 0x80b   : > { %v4449_v63 = vpop.f32.mrf.mxu1  ;;  %v4472_v18 = vpop.f32.mrf.mxu2 }
 0x80c   : > { %v4707_v15 = vpack.c.bf16 %v4449_v63, %v4447_v42  ;;  %v4497_v48 = vpop.f32.mrf.mxu3 }
 0x80d   : > { %v4522_v52 = vpop.f32.mrf.mxu0 }
 0x80e   : > { %v3774_v36 = vpop.xlane.xlu0 %3773 }
 0x80f   : > { %v4191_v47 = vand.u32 2147483648, %v3774_v36  ;;  %vm4185_vm8 = vweird.f32 %v3774_v36  ;;  %v4189_v13 = vand.u32 2147483647, %v3774_v36 }
 0x810   : > { %3785 = vadd.xlane.f32.xlu0 %v3784_v45 }
 0x811   : > { %v4192_v29 = vor.u32 1.1754944e-38, %v4191_v47  ;;  %vm4190_vm15 = vcmp.eq.f32.partialorder %v4189_v13, 8.507059e+37 }
 0x813   : > { %5268 = vmatmul.msk.bf16.gmra.mxu0 %vm1348_vm11, %v4705_v41  ;;  %v4474_v5 = vpop.f32.mrf.mxu2 }
 0x814   : > { %v4708_v30 = vpack.c.bf16 %v4474_v5, %v4472_v18  ;;  %v4499_v46 = vpop.f32.mrf.mxu3 }
 0x815   : > { %v4709_v45 = vpack.c.bf16 %v4499_v46, %v4497_v48 }
 0x816   : > { %v3777_v6 = vpop.xlane.xlu1 %3776 }
 0x817   : > { %5639 = vrcp.f32 %v3777_v6  ;;  %v4206_v21 = vand.u32 2147483648, %v3777_v6  ;;  %vm4200_vm5 = vweird.f32 %v3777_v6  ;;  %v4204_v50 = vand.u32 2147483647, %v3777_v6 }
 0x818   : > { %5641 = vrcp.f32 %v3774_v36 }
 0x819   : > { %v4207_v61 = vor.u32 1.1754944e-38, %v4206_v21  ;;  %vm4205_vm13 = vcmp.eq.f32.partialorder %v4204_v50, 8.507059e+37 }
 0x81d   : > { %v5640_v28 = vpop.eup %5639 }
 0x81e   : > { %v5642_v54 = vpop.eup %5641  ;;  %v4196_v8 = vmul.f32 %v5640_v28, %v3777_v6  ;;  %vm4201_vm6 = vweird.f32 %v5640_v28  ;;  %v5307_v6 = vld [vmem:[%s8998_s5] sm:$0xff] }
 0x81f   : > { %v4181_v35 = vmul.f32 %v5642_v54, %v3774_v36  ;;  %vm4186_vm12 = vweird.f32 %v5642_v54  ;;  %vm4202_vm7 = vmor %vm4200_vm5, %vm4201_vm6 }
 0x820   : > { %v4197_v9 = vsub.f32 1.0, %v4196_v8  ;;  %vm4187_vm9 = vmor %vm4185_vm8, %vm4186_vm12  ;;  %v4524_v8 = vpop.f32.mrf.mxu0 }
 0x821   : > { %v4182_v20 = vsub.f32 1.0, %v4181_v35  ;;  %v4710_v35 = vpack.c.bf16 %v4524_v8, %v4522_v52 }
 0x822   : > { %v4198_v57 = vmul.f32 %v5640_v28, %v4197_v9 }
 0x823   : > { %5269 = vmatmul.msk.bf16.gmra.mxu0 %vm1348_vm11, %v4706_v37  ;;  %v4183_v24 = vmul.f32 %v5642_v54, %v4182_v20 }
 0x824   : > { %v4199_v55 = vadd.f32 %v5640_v28, %v4198_v57 }
 0x825   : > { %v4184_v1 = vadd.f32 %v5642_v54, %v4183_v24 }
 0x826   : > { %v3780_v56 = vpop.xlane.xlu2 %3779  ;;  %v4203_v27 = vsel %vm4202_vm7, %v5640_v28, %v4199_v55 }
 0x827   : > { %5643 = vrcp.f32 %v3780_v56  ;;  %v4188_v59 = vsel %vm4187_vm9, %v5642_v54, %v4184_v1  ;;  %v4221_v16 = vand.u32 2147483648, %v3780_v56  ;;  %v4208_v44 = vsel %vm4205_vm13, %v4207_v61, %v4203_v27 }
 0x828   : > { %vm4215_vm14 = vweird.f32 %v3780_v56  ;;  %v4219_v4 = vand.u32 2147483647, %v3780_v56  ;;  %v4193_v23 = vsel %vm4190_vm15, %v4192_v29, %v4188_v59  ;;  %v4209_v39 = vmul.f32 %v8641_v34, %v4208_v44 }
 0x829   : > { %v4222_v11 = vor.u32 1.1754944e-38, %v4221_v16  ;;  %v4194_v43 = vmul.f32 %v8635_v53, %v4193_v23  ;;  %v9206_v23 = vld [vmem:[#allocation11_spill] sm:$0xff] }
 0x82a   : > { %vm4220_vm2 = vcmp.eq.f32.partialorder %v4219_v4, 8.507059e+37  ;;  %v4297_v41 = vpack.c.bf16 %v4209_v39, %v4209_v39 }
 0x82b   : > { %v4296_v37 = vpack.c.bf16 %v4194_v43, %v4194_v43 }
 0x82c   : > { %v4630_v53 = vunpack.c.l.b16 %v4297_v41 }
 0x82d   : > { %v5644_v22 = vpop.eup %5643  ;;  %v4629_v63 = vunpack.c.l.b16 %v4296_v37 }
 0x82e   : > { %v4658_v7 = vpop.permute.xlu2 %4657  ;;  %v4211_v32 = vmul.f32 %v5644_v22, %v3780_v56  ;;  %vm4216_vm10 = vweird.f32 %v5644_v22 }
 0x82f   : > { %4670 = vmatpush.bf16.msra.mxu2 %v4658_v7  ;;  %vm4217_vm1 = vmor %vm4215_vm14, %vm4216_vm10  ;;  %v4631_v28 = vpack.c.b16 %v4630_v53, %v4629_v63 }
 0x830   : > { %v4212_v26 = vsub.f32 1.0, %v4211_v32  ;;  %v9202_v32 = vld [vmem:[#allocation14_spill] sm:$0xff] }
 0x831   : > { %v3038_v20 = vpack.c.bf16 %v9202_v32, %v7880_v14 }
 0x832   : > { %v4213_v49 = vmul.f32 %v5644_v22, %v4212_v26 }
 0x833   : > { %5270 = vmatmul.msk.bf16.gmra.mxu0 %vm1348_vm11, %v4707_v15 }
 0x834   : > { %v4214_v25 = vadd.f32 %v5644_v22, %v4213_v49  ;;  %v9203_v49 = vld [vmem:[#allocation20_spill] sm:$0xff] }
 0x836   : > { %v4218_v3 = vsel %vm4217_vm1, %v5644_v22, %v4214_v25 }
 0x837   : > { %v4223_v60 = vsel %vm4220_vm2, %v4222_v11, %v4218_v3 }
 0x838   : > { %v4224_v51 = vmul.f32 %v8655_v2, %v4223_v60 }
 0x83a   : > { %v4298_v36 = vpack.c.bf16 %v4224_v51, %v4224_v51 }
 0x83c   : > { %v4654_v18 = vunpack.c.l.b16 %v4298_v36 }
 0x843   : > { %5271 = vmatmul.msk.bf16.gmra.mxu0 %vm1348_vm11, %v4708_v30  ;;  %v4572_v30 = vpop.f32.mrf.mxu2 }
 0x845   : > { %v3783_v62 = vpop.xlane.xlu0 %3782 }
 0x846   : > { %5645 = vrcp.f32 %v3783_v62  ;;  %v4236_v10 = vand.u32 2147483648, %v3783_v62  ;;  %v4234_v19 = vand.u32 2147483647, %v3783_v62  ;;  %vm4230_vm4 = vweird.f32 %v3783_v62 }
 0x848   : > { %v4237_v34 = vor.u32 1.1754944e-38, %v4236_v10  ;;  %vm4235_vm12 = vcmp.eq.f32.partialorder %v4234_v19, 8.507059e+37 }
 0x84b   : > { %v4574_v50 = vpop.f32.mrf.mxu2 }
 0x84c   : > { %v5646_v17 = vpop.eup %5645  ;;  %v4712_v13 = vpack.c.bf16 %v4574_v50, %v4572_v30 }
 0x84d   : > { %v4226_v0 = vmul.f32 %v5646_v17, %v3783_v62  ;;  %vm4231_vm3 = vweird.f32 %v5646_v17  ;;  %v9204_v62 = vld [vmem:[#allocation17_spill] sm:$0xff] }
 0x84e   : > { %vm4232_vm6 = vmor %vm4230_vm4, %vm4231_vm3  ;;  %v3039_v14 = vpack.c.bf16 %v9204_v62, %v9203_v49  ;;  %v9219_v49 = vld [vmem:[#allocation16_spill] sm:$0xff] }
 0x84f   : > { %v4227_v31 = vsub.f32 1.0, %v4226_v0 }
 0x850   : > { %v8734_v9 = vpop.f32.mrf.mxu0 }
 0x851   : > { %v4228_v12 = vmul.f32 %v5646_v17, %v4227_v31 }
 0x853   : > { %v4229_v58 = vadd.f32 %v5646_v17, %v4228_v12  ;;  %5272 = vmatmul.msk.bf16.gmra.mxu0 %vm1348_vm11, %v4709_v45 }
 0x855   : > { %v4233_v42 = vsel %vm4232_vm6, %v5646_v17, %v4229_v58  ;;  %v9205_v17 = vld [vmem:[#allocation5_spill] sm:$0xff] }
 0x856   : > { %v4238_v56 = vsel %vm4235_vm12, %v4237_v34, %v4233_v42  ;;  %v3040_v3 = vpack.c.bf16 %v9206_v23, %v9205_v17 }
 0x857   : > { %v4239_v7 = vmul.f32 %v8684_v33, %v4238_v56 }
 0x858   : > { %v4633_v2 = vpop.permute.xlu0 %4632  ;;  %v8740_v57 = vpop.f32.mrf.mxu0 }
 0x859   : > { %v4299_v15 = vpack.c.bf16 %v4239_v7, %v4239_v7  ;;  %4645 = vmatpush.bf16.msrb.mxu1 %v4633_v2  ;;  %v9207_v7 = vld [vmem:[#allocation15_spill] sm:$0xff] }
 0x85a   : > { %v4547_v33 = vpop.f32.mrf.mxu1 }
 0x85b   : > { %v4655_v54 = vunpack.c.l.b16 %v4299_v15 }
 0x85c   : > { %5258 = vmatmul.msk.bf16.vlgmr.msrb.gmra.mxu1 %vm1348_vm11, %v4631_v28  ;;  %v4714_v28 = vpack.c.bf16 %v8740_v57, %v8734_v9  ;;  %v9215_v9 = vld [vmem:[#allocation7_spill] sm:$0xff]  ;;  %v9216_v57 = vld [vmem:[#allocation13_spill] sm:$0xff] }
 0x85d   : > { %4922 = vmatpush.bf16.msra.mxu1 %v5307_v6  ;;  %v4656_v22 = vpack.c.b16 %v4655_v54, %v4654_v18  ;;  %v3789_v5 = vpop.xlane.xlu1 %3788  ;;  %v9210_v18 = vld [vmem:[#allocation24_spill] sm:$0xff] }
 0x85e   : > { %5647 = vrcp.f32 %v3789_v5  ;;  %v4266_v29 = vand.u32 2147483648, %v3789_v5  ;;  %vm4260_vm7 = vweird.f32 %v3789_v5  ;;  %v4264_v44 = vand.u32 2147483647, %v3789_v5 }
 0x85f   : > { %5259 = vmatmul.msk.bf16.vlgmr.msra.gmra.mxu2 %vm1348_vm11, %v4656_v22  ;;  %v9211_v22 = vld [vmem:[#allocation10_spill] sm:$0xff] }
 0x860   : > { %v8743_v21 = vpop.f32.mrf.mxu0  ;;  %v4267_v11 = vor.u32 1.1754944e-38, %v4266_v29  ;;  %vm4265_vm9 = vcmp.eq.f32.partialorder %v4264_v44, 8.507059e+37  ;;  %v9225_v29 = vld [vmem:[#allocation6_spill] sm:$0xff] }
 0x862   : > { %v4549_v26 = vpop.f32.mrf.mxu1 }
 0x863   : > { %5273 = vmatmul.msk.bf16.gmra.mxu0 %vm1348_vm11, %v4710_v35  ;;  %v4711_v24 = vpack.c.bf16 %v4549_v26, %v4547_v33  ;;  %v9212_v35 = vld [vmem:[#allocation3_spill] sm:$0xff] }
 0x864   : > { %v5648_v48 = vpop.eup %5647  ;;  %v3046_v33 = vpack.c.bf16 %v9212_v35, %v9211_v22  ;;  %v5688_v22 = vld [vmem:[%s5787_s30 + $0x18] sm:$0xff] }
 0x865   : > { %v4256_v1 = vmul.f32 %v5648_v48, %v3789_v5  ;;  %vm4261_vm5 = vweird.f32 %v5648_v48  ;;  %v9214_v5 = vld [vmem:[#allocation9_spill] sm:$0xff] }
 0x866   : > { %vm4262_vm8 = vmor %vm4260_vm7, %vm4261_vm5 }
 0x867   : > { %v4257_v47 = vsub.f32 1.0, %v4256_v1  ;;  %v9221_v1 = vld [vmem:[#allocation28_spill] sm:$0xff] }
 0x868   : > { %v8748_v27 = vpop.f32.mrf.mxu0 }
 0x869   : > { %v4258_v61 = vmul.f32 %v5648_v48, %v4257_v47 }
 0x86a   : > { %v4597_v59 = vpop.f32.mrf.mxu3 }
 0x86b   : > { %v4259_v16 = vadd.f32 %v5648_v48, %v4258_v61  ;;  %v9222_v61 = vld [vmem:[#allocation25_spill] sm:$0xff] }
 0x86c   : > { %5285 = vmatmul.msk.bf16.vlgmr.msra.gmra.mxu1 %vm1348_vm11, %v3038_v20  ;;  %v9213_v20 = vld [vmem:[#allocation4_spill] sm:$0xff] }
 0x86d   : > { %v4263_v0 = vsel %vm4262_vm8, %v5648_v48, %v4259_v16  ;;  %v3043_v26 = vpack.c.bf16 %v9214_v5, %v9213_v20  ;;  %v9218_v48 = vld [vmem:[#allocation8_spill] sm:$0xff]  ;;  %v9224_v16 = vld [vmem:[#allocation19_spill] sm:$0xff]  ;;  %v9231_v5 = vld [vmem:[#allocation2_spill] sm:$0xff] }
 0x86e   : > { %v4268_v43 = vsel %vm4265_vm9, %v4267_v11, %v4263_v0  ;;  %v3044_v62 = vpack.c.bf16 %v9219_v49, %v9218_v48  ;;  %v3049_v44 = vpack.c.bf16 %v9225_v29, %v9224_v16  ;;  %v9234_v16 = vld [vmem:[#allocation29_spill] sm:$0xff] }
 0x86f   : > { %v4269_v52 = vmul.f32 %v8707_v38, %v4268_v43  ;;  %v9208_v38 = vld [vmem:[#allocation12_spill] sm:$0xff] }
 0x870   : > { %v8753_v46 = vpop.f32.mrf.mxu0  ;;  %v3041_v63 = vpack.c.bf16 %v9208_v38, %v9207_v7  ;;  %v9229_v7 = vld [vmem:[#allocation30_spill] sm:$0xff]  ;;  %v9230_v38 = vld [vmem:[#allocation32_spill] sm:$0xff] }
 0x871   : > { %v4301_v34 = vpack.c.bf16 %v4269_v52, %v4269_v52 }
 0x872   : > { %v4599_v10 = vpop.f32.mrf.mxu3 }
 0x873   : > { %5274 = vmatmul.msk.bf16.gmra.mxu0 %vm1348_vm11, %v4711_v24  ;;  %v4713_v41 = vpack.c.bf16 %v4599_v10, %v4597_v59  ;;  %v9217_v24 = vpack.c.bf16 %v9215_v9, %v9216_v57  ;;  %v9227_v10 = vld [vmem:[#allocation18_spill] sm:$0xff] }
 0x875   : > { %v4683_v55 = vpop.permute.xlu1 %4682 }
 0x876   : > { %4695 = vmatpush.bf16.msrb.mxu3 %v4683_v55 }
 0x878   : > { %v8759_v53 = vpop.f32.mrf.mxu0 }
 0x87a   : > { %5311 = vmatpush.bf16.msra.mxu3 %v5307_v6  ;;  %v4680_v6 = vunpack.c.l.b16 %v4301_v34  ;;  %v5686_v34 = vld [vmem:[%s5787_s30 + $0x8] sm:$0xff] }
 0x87c   : > { %5286 = vmatmul.msk.bf16.gmra.mxu1 %vm1348_vm11, %v3039_v14  ;;  %v9220_v14 = vld [vmem:[#allocation27_spill] sm:$0xff] }
 0x87d   : > { %v3048_v50 = vpack.c.bf16 %v9221_v1, %v9220_v14  ;;  %v5690_v14 = vld [vmem:[%s5787_s30 + $0x28] sm:$0xff] }
 0x880   : > { %v8765_v15 = vpop.f32.mrf.mxu0 }
 0x883   : > { %v3786_v25 = vpop.xlane.xlu0 %3785  ;;  %5275 = vmatmul.msk.bf16.gmra.mxu0 %vm1348_vm11, %v4712_v13 }
 0x884   : > { %5649 = vrcp.f32 %v3786_v25  ;;  %v4251_v60 = vand.u32 2147483648, %v3786_v25  ;;  %v4249_v19 = vand.u32 2147483647, %v3786_v25  ;;  %vm4245_vm13 = vweird.f32 %v3786_v25 }
 0x886   : > { %v4252_v51 = vor.u32 1.1754944e-38, %v4251_v60  ;;  %vm4250_vm15 = vcmp.eq.f32.partialorder %v4249_v19, 8.507059e+37  ;;  %v9226_v60 = vld [vmem:[#allocation22_spill] sm:$0xff] }
 0x887   : > { %v5685_v19 = vld [vmem:[%s5787_s30] sm:$0xff] }
 0x888   : > { %v8772_v8 = vpop.f32.mrf.mxu0 }
 0x88a   : > { %v5650_v4 = vpop.eup %5649 }
 0x88b   : > { %v4241_v39 = vmul.f32 %v5650_v4, %v3786_v25  ;;  %vm4246_vm10 = vweird.f32 %v5650_v4  ;;  %v9223_v25 = vld [vmem:[#allocation26_spill] sm:$0xff] }
 0x88c   : > { %5287 = vmatmul.msk.bf16.gmra.mxu1 %vm1348_vm11, %v3040_v3  ;;  %vm4247_vm14 = vmor %vm4245_vm13, %vm4246_vm10  ;;  %v3045_v59 = vpack.c.bf16 %v9223_v25, %v9222_v61 }
 0x88d   : > { %v4242_v31 = vsub.f32 1.0, %v4241_v39  ;;  %v8813_v39 = vld [vmem:[%s8999_s6] ss:$0 sm:$0xff] }
 0x88f   : > { %v4243_v12 = vmul.f32 %v5650_v4, %v4242_v31 }
 0x890   : > { %v8778_v32 = vpop.f32.mrf.mxu0 }
 0x891   : > { %v4244_v45 = vadd.f32 %v5650_v4, %v4243_v12  ;;  %v9228_v12 = vpack.c.bf16 %v9226_v60, %v9227_v10 }
 0x893   : > { %v4248_v58 = vsel %vm4247_vm14, %v5650_v4, %v4244_v45  ;;  %5276 = vmatmul.msk.bf16.gmra.mxu0 %vm1348_vm11, %v4713_v41 }
 0x894   : > { %v4253_v37 = vsel %vm4250_vm15, %v4252_v51, %v4248_v58 }
 0x895   : > { %v4254_v42 = vmul.f32 %v8716_v40, %v4253_v37  ;;  %v9209_v40 = vld [vmem:[#allocation23_spill] sm:$0xff] }
 0x896   : > { %v3042_v54 = vpack.c.bf16 %v9210_v18, %v9209_v40 }
 0x897   : > { %v4300_v56 = vpack.c.bf16 %v4254_v42, %v4254_v42 }
 0x898   : > { %v8787_v30 = vpop.f32.mrf.mxu0 }
 0x899   : > { %v4679_v36 = vunpack.c.l.b16 %v4300_v56 }
 0x89b   : > { %v4681_v2 = vpack.c.b16 %v4680_v6, %v4679_v36 }
 0x89c   : > { %5288 = vmatmul.msk.bf16.gmra.mxu1 %vm1348_vm11, %v3041_v63  ;;  %v3051_v63 = vpack.c.bf16 %v9230_v38, %v9229_v7  ;;  %v5695_v38 = vld [vmem:[%s5787_s30 + $0x48] sm:$0xff] }
 0x89d   : > { %5260 = vmatmul.msk.bf16.vlgmr.msrb.gmra.mxu3 %vm1348_vm11, %v4681_v2  ;;  %v5687_v2 = vld [vmem:[%s5787_s30 + $0x10] sm:$0xff] }
 0x8a0   : > { %v8789_v55 = vpop.f32.mrf.mxu0 }
 0x8a3   : > { %5277 = vmatmul.msk.bf16.gmra.mxu0 %vm1348_vm11, %v4714_v28 }
 0x8a8   : > { %v8797_v47 = vpop.f32.mrf.mxu0 }
 0x8ac   : > { %5289 = vmatmul.msk.bf16.gmra.mxu1 %vm1348_vm11, %v3042_v54 }
 0x8ad   : > { %5293 = vmatmul.msk.bf16.vlgmr.msra.gmra.mxu3 %vm1348_vm11, %v3046_v33 }
 0x8b0   : > { %v8803_v4 = vpop.f32.mrf.mxu0 }
 0x8b8   : > { %v8808_v0 = vpop.f32.mrf.mxu0 }
 0x8bc   : > { %5290 = vmatmul.msk.bf16.gmra.mxu1 %vm1348_vm11, %v3043_v26  ;;  %v9232_v26 = vld [vmem:[#allocation21_spill] sm:$0xff] }
 0x8bd   : > { %5294 = vmatmul.msk.bf16.gmra.mxu3 %vm1348_vm11, %v9217_v24  ;;  %v3052_v9 = vpack.c.bf16 %v9232_v26, %v9231_v5  ;;  %v5689_v24 = vld [vmem:[%s5787_s30 + $0x20] sm:$0xff] }
 0x8c0   : > { %v8829_v41 = vpop.f32.mrf.mxu0 }
 0x8c8   : > { %v8839_v6 = vpop.f32.mrf.mxu0 }
 0x8cc   : > { %5291 = vmatmul.msk.bf16.gmra.mxu1 %vm1348_vm11, %v3044_v62 }
 0x8cd   : > { %5295 = vmatmul.msk.bf16.gmra.mxu3 %vm1348_vm11, %v3048_v50 }
 0x8d0   : > { %v8850_v54 = vpop.f32.mrf.mxu0 }
 0x8d9   : > { %v4647_v13 = vpop.f32.mrf.mxu1 }
 0x8dc   : > { %5292 = vmatmul.msk.bf16.gmra.mxu1 %vm1348_vm11, %v3045_v59  ;;  %v9233_v59 = vld [vmem:[#allocation31_spill] sm:$0xff] }
 0x8dd   : > { %5296 = vmatmul.msk.bf16.gmra.mxu3 %vm1348_vm11, %v3049_v44  ;;  %v9235_v29 = vpack.c.bf16 %v9233_v59, %v9234_v16  ;;  %v5700_v59 = vld [vmem:[%s5787_s30 + $0x98] sm:$0xff] }
 0x8e1   : > { %v4649_v17 = vpop.f32.mrf.mxu1 }
 0x8e2   : > { %v4715_v23 = vpack.c.bf16 %v4649_v17, %v4647_v13  ;;  %v4672_v3 = vpop.f32.mrf.mxu2 }
 0x8e4   : > { %5278 = vmatmul.msk.bf16.gmra.mxu0 %vm1348_vm11, %v4715_v23 }
 0x8e9   : > { %v4924_v11 = vpop.f32.mrf.mxu1 }
 0x8ea   : > { %v4925_v31 = vadd.f32 %v4924_v11, %v8743_v21  ;;  %v4674_v45 = vpop.f32.mrf.mxu2 }
 0x8eb   : > { %v4716_v51 = vpack.c.bf16 %v4674_v45, %v4672_v3 }
 0x8ec   : > { %v5008_v43 = vadd.f32 %v8813_v39, %v4925_v31  ;;  %v5692_v31 = vld [vmem:[%s5787_s30 + $0x38] sm:$0xff] }
 0x8ed   : > { %5297 = vmatmul.msk.bf16.gmra.mxu3 %vm1348_vm11, %v9228_v12 }
 0x8ee   : > { %v5040_v52 = vadd.f32 %v5685_v19, %v5008_v43 }
 0x8f0   : > { %5072 = vst.msk [vmem:[%s8822_s14] sm:$0xff] %vm320_vm0, %v5040_v52 }
 0x8f1   : > { %v4926_v21 = vpop.f32.mrf.mxu1 }
 0x8f2   : > { %v4927_v58 = vadd.f32 %v4926_v21, %v8748_v27 }
 0x8f4   : > { %v5009_v37 = vadd.f32 %v8813_v39, %v4927_v58  ;;  %5279 = vmatmul.msk.bf16.gmra.mxu0 %vm1348_vm11, %v4716_v51 }
 0x8f6   : > { %v5041_v42 = vadd.f32 %v5686_v34, %v5009_v37 }
 0x8f8   : > { %5073 = vst.msk [vmem:[%s8822_s14 + $0x8] sm:$0xff] %vm320_vm0, %v5041_v42 }
 0x8f9   : > { %v4929_v56 = vpop.f32.mrf.mxu1 }
 0x8fa   : > { %v4930_v36 = vadd.f32 %v4929_v56, %v8753_v46  ;;  %v5694_v56 = vld [vmem:[%s5787_s30 + $0x80] sm:$0xff] }
 0x8fc   : > { %v5010_v27 = vadd.f32 %v8813_v39, %v4930_v36 }
 0x8fd   : > { %5298 = vmatmul.msk.bf16.gmra.mxu3 %vm1348_vm11, %v3051_v63 }
 0x8fe   : > { %v5042_v28 = vadd.f32 %v5687_v2, %v5010_v27 }
 0x900   : > { %5074 = vst.msk [vmem:[%s8822_s14 + $0x10] sm:$0xff] %vm320_vm0, %v5042_v28 }
 0x901   : > { %v4931_v40 = vpop.f32.mrf.mxu1 }
 0x902   : > { %v4932_v18 = vadd.f32 %v4931_v40, %v8759_v53  ;;  %v8861_v53 = vpop.f32.mrf.mxu0 }
 0x904   : > { %v5011_v46 = vadd.f32 %v8813_v39, %v4932_v18 }
 0x906   : > { %v5043_v35 = vadd.f32 %v5688_v22, %v5011_v46  ;;  %v5696_v46 = vld [vmem:[%s5787_s30 + $0x88] sm:$0xff] }
 0x908   : > { %5075 = vst.msk [vmem:[%s8822_s14 + $0x18] sm:$0xff] %vm320_vm0, %v5043_v35  ;;  %v5697_v35 = vld [vmem:[%s5787_s30 + $0x50] sm:$0xff] }
 0x909   : > { %v4934_v33 = vpop.f32.mrf.mxu1 }
 0x90a   : > { %v4935_v20 = vadd.f32 %v4934_v33, %v8765_v15  ;;  %v4821_v50 = vpop.f32.mrf.mxu0 }
 0x90c   : > { %v5012_v57 = vadd.f32 %v8813_v39, %v4935_v20 }
 0x90d   : > { %5299 = vmatmul.msk.bf16.gmra.mxu3 %vm1348_vm11, %v3052_v9 }
 0x90e   : > { %v5044_v48 = vadd.f32 %v5689_v24, %v5012_v57 }
 0x910   : > { %5076 = vst.msk [vmem:[%s8822_s14 + $0x20] sm:$0xff] %vm320_vm0, %v5044_v48  ;;  %v5698_v48 = vld [vmem:[%s5787_s30 + $0x90] sm:$0xff] }
 0x911   : > { %v4936_v49 = vpop.f32.mrf.mxu1 }
 0x912   : > { %v4937_v62 = vadd.f32 %v4936_v49, %v8772_v8  ;;  %v5691_v8 = vld [vmem:[%s5787_s30 + $0x30] sm:$0xff]  ;;  %v4823_v3 = vpop.f32.mrf.mxu0 }
 0x914   : > { %v5013_v15 = vadd.f32 %v8813_v39, %v4937_v62  ;;  %v5699_v62 = vld [vmem:[%s5787_s30 + $0x58] sm:$0xff] }
 0x916   : > { %v5045_v1 = vadd.f32 %v5690_v14, %v5013_v15 }
 0x918   : > { %5077 = vst.msk [vmem:[%s8822_s14 + $0x28] sm:$0xff] %vm320_vm0, %v5045_v1 }
 0x919   : > { %v4939_v13 = vpop.f32.mrf.mxu1 }
 0x91a   : > { %v4940_v61 = vadd.f32 %v4939_v13, %v8778_v32  ;;  %v4826_v52 = vpop.f32.mrf.mxu0 }
 0x91c   : > { %v5014_v25 = vadd.f32 %v8813_v39, %v4940_v61 }
 0x91d   : > { %5300 = vmatmul.msk.bf16.gmra.mxu3 %vm1348_vm11, %v9235_v29  ;;  %v5701_v29 = vld [vmem:[%s5787_s30 + $0x60] sm:$0xff] }
 0x91e   : > { %v5046_v44 = vadd.f32 %v5691_v8, %v5014_v25 }
 0x920   : > { %5078 = vst.msk [vmem:[%s8822_s14 + $0x30] sm:$0xff] %vm320_vm0, %v5046_v44  ;;  %v4697_v17 = vpop.f32.mrf.mxu3 }
 0x921   : > { %v4941_v23 = vpop.f32.mrf.mxu1 }
 0x922   : > { %v4942_v11 = vadd.f32 %v4941_v23, %v8787_v30  ;;  %v5693_v30 = vld [vmem:[%s5787_s30 + $0x40] sm:$0xff]  ;;  %v4828_v7 = vpop.f32.mrf.mxu0 }
 0x924   : > { %v5015_v32 = vadd.f32 %v8813_v39, %v4942_v11 }
 0x926   : > { %v5047_v43 = vadd.f32 %v5692_v31, %v5015_v32  ;;  %v5702_v31 = vld [vmem:[%s5787_s30 + $0xa0] sm:$0xff] }
 0x928   : > { %5079 = vst.msk [vmem:[%s8822_s14 + $0x38] sm:$0xff] %vm320_vm0, %v5047_v43  ;;  %v4699_v60 = vpop.f32.mrf.mxu3 }
 0x929   : > { %v4717_v10 = vpack.c.bf16 %v4699_v60, %v4697_v17  ;;  %v4944_v12 = vpop.f32.mrf.mxu1  ;;  %v5703_v60 = vld [vmem:[%s5787_s30 + $0x68] sm:$0xff] }
 0x92a   : > { %v4945_v19 = vadd.f32 %v4944_v12, %v8789_v55  ;;  %v4831_v20 = vpop.f32.mrf.mxu0 }
 0x92b   : > { %5280 = vmatmul.msk.bf16.gmra.mxu0 %vm1348_vm11, %v4717_v10 }
 0x92c   : > { %v5016_v45 = vadd.f32 %v8813_v39, %v4945_v19 }
 0x92e   : > { %v5048_v21 = vadd.f32 %v5693_v30, %v5016_v45 }
 0x930   : > { %5080 = vst.msk [vmem:[%s8822_s14 + $0x40] sm:$0xff] %vm320_vm0, %v5048_v21  ;;  %v4964_v51 = vpop.f32.mrf.mxu3  ;;  %v5704_v21 = vld [vmem:[%s5787_s30 + $0xa8] sm:$0xff] }
 0x931   : > { %v4965_v58 = vadd.f32 %v4964_v51, %v4821_v50  ;;  %v4946_v37 = vpop.f32.mrf.mxu1 }
 0x932   : > { %v4947_v34 = vadd.f32 %v4946_v37, %v8797_v47  ;;  %v5705_v37 = vld [vmem:[%s5787_s30 + $0x70] sm:$0xff] }
 0x933   : > { %v5024_v55 = vadd.f32 %v8813_v39, %v4965_v58 }
 0x934   : > { %v5017_v42 = vadd.f32 %v8813_v39, %v4947_v34 }
 0x935   : > { %v5056_v36 = vadd.f32 %v5694_v56, %v5024_v55 }
 0x936   : > { %v5049_v63 = vadd.f32 %v5695_v38, %v5017_v42  ;;  %v5706_v38 = vld [vmem:[%s5787_s30 + $0xb0] sm:$0xff] }
 0x937   : > { %5088 = vst.msk [vmem:[%s8822_s14 + $0x80] sm:$0xff] %vm320_vm0, %v5056_v36 }
 0x938   : > { %5081 = vst.msk [vmem:[%s8822_s14 + $0x48] sm:$0xff] %vm320_vm0, %v5049_v63  ;;  %v4966_v27 = vpop.f32.mrf.mxu3 }
 0x939   : > { %v4967_v2 = vadd.f32 %v4966_v27, %v4823_v3  ;;  %v4949_v47 = vpop.f32.mrf.mxu1  ;;  %v5707_v27 = vld [vmem:[%s5787_s30 + $0x78] sm:$0xff] }
 0x93a   : > { %v4950_v28 = vadd.f32 %v4949_v47, %v8803_v4 }
 0x93b   : > { %v5025_v40 = vadd.f32 %v8813_v39, %v4967_v2 }
 0x93c   : > { %v5018_v18 = vadd.f32 %v8813_v39, %v4950_v28 }
 0x93d   : > { %v5057_v22 = vadd.f32 %v5696_v46, %v5025_v40 }
 0x93e   : > { %v5050_v33 = vadd.f32 %v5697_v35, %v5018_v18  ;;  %v5708_v18 = vld [vmem:[%s5787_s30 + $0xb8] sm:$0xff] }
 0x93f   : > { %5089 = vst.msk [vmem:[%s8822_s14 + $0x88] sm:$0xff] %vm320_vm0, %v5057_v22 }
 0x940   : > { %5082 = vst.msk [vmem:[%s8822_s14 + $0x50] sm:$0xff] %vm320_vm0, %v5050_v33  ;;  %v4969_v5 = vpop.f32.mrf.mxu3 }
 0x941   : > { %v4970_v26 = vadd.f32 %v4969_v5, %v4826_v52  ;;  %v4951_v4 = vpop.f32.mrf.mxu1  ;;  %v5709_v5 = vld [vmem:[%s5787_s30 + $0xc0] sm:$0xff] }
 0x942   : > { %v4952_v9 = vadd.f32 %v4951_v4, %v8808_v0  ;;  %v4833_v0 = vpop.f32.mrf.mxu0 }
 0x943   : > { %v5026_v57 = vadd.f32 %v8813_v39, %v4970_v26 }
 0x944   : > { %v5019_v24 = vadd.f32 %v8813_v39, %v4952_v9 }
 0x945   : > { %v5058_v49 = vadd.f32 %v5698_v48, %v5026_v57  ;;  %v5710_v48 = vld [vmem:[%s5787_s30 + $0xc8] sm:$0xff] }
 0x946   : > { %v5051_v15 = vadd.f32 %v5699_v62, %v5019_v24 }
 0x947   : > { %5090 = vst.msk [vmem:[%s8822_s14 + $0x90] sm:$0xff] %vm320_vm0, %v5058_v49 }
 0x948   : > { %5083 = vst.msk [vmem:[%s8822_s14 + $0x58] sm:$0xff] %vm320_vm0, %v5051_v15  ;;  %v4971_v14 = vpop.f32.mrf.mxu3 }
 0x949   : > { %v4972_v1 = vadd.f32 %v4971_v14, %v4828_v7  ;;  %v4954_v50 = vpop.f32.mrf.mxu1 }
 0x94a   : > { %v4955_v13 = vadd.f32 %v4954_v50, %v8829_v41  ;;  %v4836_v11 = vpop.f32.mrf.mxu0  ;;  %v5711_v50 = vld [vmem:[%s5787_s30 + $0xd0] sm:$0xff] }
 0x94b   : > { %v5027_v61 = vadd.f32 %v8813_v39, %v4972_v1 }
 0x94c   : > { %v5020_v25 = vadd.f32 %v8813_v39, %v4955_v13 }
 0x94d   : > { %v5059_v16 = vadd.f32 %v5700_v59, %v5027_v61  ;;  %v5712_v59 = vld [vmem:[%s5787_s30 + $0xd8] sm:$0xff] }
 0x94e   : > { %v5052_v8 = vadd.f32 %v5701_v29, %v5020_v25 }
 0x94f   : > { %5091 = vst.msk [vmem:[%s8822_s14 + $0x98] sm:$0xff] %vm320_vm0, %v5059_v16 }
 0x950   : > { %5084 = vst.msk [vmem:[%s8822_s14 + $0x60] sm:$0xff] %vm320_vm0, %v5052_v8  ;;  %v4974_v44 = vpop.f32.mrf.mxu3 }
 0x951   : > { %v4975_v17 = vadd.f32 %v4974_v44, %v4831_v20  ;;  %v4956_v23 = vpop.f32.mrf.mxu1 }
 0x952   : > { %v4957_v41 = vadd.f32 %v4956_v23, %v8839_v6  ;;  %v4838_v58 = vpop.f32.mrf.mxu0  ;;  %v5713_v23 = vld [vmem:[%s5787_s30 + $0xe0] sm:$0xff] }
 0x953   : > { %v5028_v3 = vadd.f32 %v8813_v39, %v4975_v17 }
 0x954   : > { %v5021_v32 = vadd.f32 %v8813_v39, %v4957_v41 }
 0x955   : > { %v5060_v43 = vadd.f32 %v5702_v31, %v5028_v3 }
 0x956   : > { %v5053_v10 = vadd.f32 %v5703_v60, %v5021_v32 }
 0x957   : > { %5092 = vst.msk [vmem:[%s8822_s14 + $0xa0] sm:$0xff] %vm320_vm0, %v5060_v43  ;;  %v5714_v43 = vld [vmem:[%s5787_s30 + $0xe8] sm:$0xff] }
 0x958   : > { %5085 = vst.msk [vmem:[%s8822_s14 + $0x68] sm:$0xff] %vm320_vm0, %v5053_v10  ;;  %v4976_v12 = vpop.f32.mrf.mxu3 }
 0x959   : > { %v4977_v19 = vadd.f32 %v4976_v12, %v4833_v0  ;;  %v4959_v6 = vpop.f32.mrf.mxu1 }
 0x95a   : > { %v4960_v52 = vadd.f32 %v4959_v6, %v8850_v54  ;;  %v4841_v47 = vpop.f32.mrf.mxu0 }
 0x95b   : > { %v5029_v45 = vadd.f32 %v8813_v39, %v4977_v19 }
 0x95c   : > { %v5022_v30 = vadd.f32 %v8813_v39, %v4960_v52  ;;  %v5715_v52 = vld [vmem:[%s5787_s30 + $0xf0] sm:$0xff] }
 0x95d   : > { %v5061_v51 = vadd.f32 %v5704_v21, %v5029_v45 }
 0x95e   : > { %v5054_v34 = vadd.f32 %v5705_v37, %v5022_v30  ;;  %v5716_v37 = vld [vmem:[%s5787_s30 + $0xf8] sm:$0xff] }
 0x95f   : > { %5093 = vst.msk [vmem:[%s8822_s14 + $0xa8] sm:$0xff] %vm320_vm0, %v5061_v51 }
 0x960   : > { %5086 = vst.msk [vmem:[%s8822_s14 + $0x70] sm:$0xff] %vm320_vm0, %v5054_v34  ;;  %v4979_v55 = vpop.f32.mrf.mxu3 }
 0x961   : > { %v4980_v54 = vadd.f32 %v4979_v55, %v4836_v11  ;;  %v4961_v42 = vpop.f32.mrf.mxu1 }
 0x962   : > { %v4962_v56 = vadd.f32 %v4961_v42, %v8861_v53  ;;  %v4843_v33 = vpop.f32.mrf.mxu0 }
 0x963   : > { %v5030_v36 = vadd.f32 %v8813_v39, %v4980_v54 }
 0x964   : > { %v5023_v7 = vadd.f32 %v8813_v39, %v4962_v56 }
 0x965   : > { %v5062_v63 = vadd.f32 %v5706_v38, %v5030_v36 }
 0x966   : > { %v5055_v2 = vadd.f32 %v5707_v27, %v5023_v7 }
 0x967   : > { %5094 = vst.msk [vmem:[%s8822_s14 + $0xb0] sm:$0xff] %vm320_vm0, %v5062_v63 }
 0x968   : > { %5087 = vst.msk [vmem:[%s8822_s14 + $0x78] sm:$0xff] %vm320_vm0, %v5055_v2  ;;  %v4981_v28 = vpop.f32.mrf.mxu3 }
 0x969   : > { %v4982_v40 = vadd.f32 %v4981_v28, %v4838_v58 }
 0x96a   : > { %v4846_v57 = vpop.f32.mrf.mxu0 }
 0x96b   : > { %v5031_v53 = vadd.f32 %v8813_v39, %v4982_v40 }
 0x96d   : > { %v5063_v46 = vadd.f32 %v5708_v18, %v5031_v53 }
 0x96f   : > { %5095 = vst.msk [vmem:[%s8822_s14 + $0xb8] sm:$0xff] %vm320_vm0, %v5063_v46 }
 0x970   : > { %v4984_v22 = vpop.f32.mrf.mxu3 }
 0x971   : > { %v4985_v35 = vadd.f32 %v4984_v22, %v4841_v47 }
 0x972   : > { %v4848_v1 = vpop.f32.mrf.mxu0 }
 0x973   : > { %v5032_v20 = vadd.f32 %v8813_v39, %v4985_v35 }
 0x975   : > { %v5064_v26 = vadd.f32 %v5709_v5, %v5032_v20 }
 0x977   : > { %5096 = vst.msk [vmem:[%s8822_s14 + $0xc0] sm:$0xff] %vm320_vm0, %v5064_v26 }
 0x978   : > { %v4986_v4 = vpop.f32.mrf.mxu3 }
 0x979   : > { %v4987_v9 = vadd.f32 %v4986_v4, %v4843_v33 }
 0x97a   : > { %v4851_v29 = vpop.f32.mrf.mxu0 }
 0x97b   : > { %v5033_v24 = vadd.f32 %v8813_v39, %v4987_v9 }
 0x97d   : > { %v5065_v49 = vadd.f32 %v5710_v48, %v5033_v24 }
 0x97f   : > { %5097 = vst.msk [vmem:[%s8822_s14 + $0xc8] sm:$0xff] %vm320_vm0, %v5065_v49 }
 0x980   : > { %v4989_v62 = vpop.f32.mrf.mxu3 }
 0x981   : > { %v4990_v15 = vadd.f32 %v4989_v62, %v4846_v57 }
 0x982   : > { %v4853_v3 = vpop.f32.mrf.mxu0 }
 0x983   : > { %v5034_v14 = vadd.f32 %v8813_v39, %v4990_v15 }
 0x985   : > { %v5066_v0 = vadd.f32 %v5711_v50, %v5034_v14 }
 0x987   : > { %5098 = vst.msk [vmem:[%s8822_s14 + $0xd0] sm:$0xff] %vm320_vm0, %v5066_v0 }
 0x988   : > { %v4991_v13 = vpop.f32.mrf.mxu3 }
 0x989   : > { %v4992_v61 = vadd.f32 %v4991_v13, %v4848_v1 }
 0x98b   : > { %v5035_v25 = vadd.f32 %v8813_v39, %v4992_v61 }
 0x98d   : > { %v5067_v16 = vadd.f32 %v5712_v59, %v5035_v25 }
 0x98f   : > { %5099 = vst.msk [vmem:[%s8822_s14 + $0xd8] sm:$0xff] %vm320_vm0, %v5067_v16 }
 0x990   : > { %v4994_v8 = vpop.f32.mrf.mxu3 }
 0x991   : > { %v4995_v44 = vadd.f32 %v4994_v8, %v4851_v29 }
 0x993   : > { %v5036_v17 = vadd.f32 %v8813_v39, %v4995_v44 }
 0x995   : > { %v5068_v41 = vadd.f32 %v5713_v23, %v5036_v17 }
 0x997   : > { %5100 = vst.msk [vmem:[%s8822_s14 + $0xe0] sm:$0xff] %vm320_vm0, %v5068_v41 }
 0x998   : > { %v4996_v11 = vpop.f32.mrf.mxu3 }
 0x999   : > { %v4997_v32 = vadd.f32 %v4996_v11, %v4853_v3 }
 0x99b   : > { %v5037_v31 = vadd.f32 %v8813_v39, %v4997_v32 }
 0x99d   : > { %v5069_v60 = vadd.f32 %v5714_v43, %v5037_v31 }
 0x99f   : > { %5101 = vst.msk [vmem:[%s8822_s14 + $0xe8] sm:$0xff] %vm320_vm0, %v5069_v60 }
 0x9a0   : > { %v4999_v10 = vpop.f32.mrf.mxu3 }
 0x9a8   : > { %v4856_v12 = vpop.f32.mrf.mxu0  ;;  %v5001_v30 = vpop.f32.mrf.mxu3 }
 0x9a9   : > { %v5000_v19 = vadd.f32 %v4999_v10, %v4856_v12 }
 0x9ab   : > { %v5038_v6 = vadd.f32 %v8813_v39, %v5000_v19 }
 0x9ad   : > { %v5070_v45 = vadd.f32 %v5715_v52, %v5038_v6 }
 0x9af   : > { %5102 = vst.msk [vmem:[%s8822_s14 + $0xf0] sm:$0xff] %vm320_vm0, %v5070_v45 }
 0x9b0   : > { %v4858_v21 = vpop.f32.mrf.mxu0 }
 0x9b1   : > { %v5002_v51 = vadd.f32 %v5001_v30, %v4858_v21 }
 0x9b3   : > { %v5039_v58 = vadd.f32 %v8813_v39, %v5002_v51 }
 0x9b5   : > { %v5071_v34 = vadd.f32 %v5716_v37, %v5039_v58 }
 0x9b7   : > { %5103 = vst.msk [vmem:[%s8822_s14 + $0xf8] sm:$0xff] %vm320_vm0, %v5071_v34 }
 0x9b8 PF: > { %s17_s24 = sadd.s32 1, %s5723_s24  }
 0x9b9   : > { %p14_p4 = scmp.ge.s32.totalorder %s17_s24, 4  }
 0x9bb   :  { %16 = sbr.rel (!%p14_p4) target bundleno = 1 (0x1), region = 78 }

</bundles_post_ra>
